<compile_context>
chip_gen: v7x
topology: tpu7x:2x2x1
jax: 0.10.0
libtpu: 0.0.40
codegen_flags: <defaults>
</compile_context>

<pallas_src>
import jax
import jax.numpy as jnp
from jax.experimental import pallas as pl
from jax.experimental.pallas import tpu as pltpu

D_LAYERS = 8            # NeRF depth D
W_HIDDEN = 256          # NeRF width W
NUM_FREQS = 10
NUM_FREQS_VIEWS = 4
PTS_EMB = 3 + 3 * 2 * NUM_FREQS          # 63
VIEWS_EMB = 3 + 3 * 2 * NUM_FREQS_VIEWS  # 27
SKIP = 4                                 # skips = [4]


# ---------------------------------------------------------------------------
# Embedder (elementwise sin/cos glue, plain JAX)
# ---------------------------------------------------------------------------
def embed(x, num_freqs):
    # freq_bands = 2 ** linspace(0, num_freqs-1, num_freqs) == 2 ** arange
    freqs = 2.0 ** jnp.arange(num_freqs, dtype=jnp.float32)
    outs = [x]
    for k in range(num_freqs):
        outs.append(jnp.sin(x * freqs[k]))
        outs.append(jnp.cos(x * freqs[k]))
    return jnp.concatenate(outs, axis=-1)


# ---------------------------------------------------------------------------
# Pallas kernel: full MLP for one tile of rows (no lane concats, bf16 matmuls)
# ---------------------------------------------------------------------------
def nerf_mlp_kernel(
    ep_ref, ev_ref,
    w0, b0, w1, b1, w2, b2, w3, b3, w4, b4,
    w5e, w5h, b5,
    w6, b6, w7, b7,
    wf, bft,
    wvf, wvv, bv,
    wa4, wr4, brgba,
    out_ref,
):
    def mm(x, w_ref):
        # bf16 x bf16 -> f32 accumulation on the MXU
        return jnp.dot(x, w_ref[...], preferred_element_type=jnp.float32)

    def relu_cast(acc_f32, b_ref):
        # bias add + ReLU in f32, activations carried in bf16
        return jnp.maximum(acc_f32 + b_ref[...], 0.0).astype(jnp.bfloat16)

    ep = ep_ref[...]   # (TM, 63)  bf16
    ev = ev_ref[...]   # (TM, 27)  bf16

    # pts_linears; skip connection after layer 4 realized as a split matmul
    h = relu_cast(mm(ep, w0), b0)
    h = relu_cast(mm(h, w1), b1)
    h = relu_cast(mm(h, w2), b2)
    h = relu_cast(mm(h, w3), b3)
    h = relu_cast(mm(h, w4), b4)
    h = relu_cast(mm(ep, w5e) + mm(h, w5h), b5)   # == cat([ep, h]) @ W5
    h = relu_cast(mm(h, w6), b6)
    h = relu_cast(mm(h, w7), b7)

    # feature_linear (no ReLU)
    feature = (mm(h, wf) + bft[...]).astype(jnp.bfloat16)          # (TM, 256)

    # views_linears[0]: cat([feature, ev]) @ Wv  ==  feature @ Wvf + ev @ Wvv
    h2 = relu_cast(mm(feature, wvf) + mm(ev, wvv), bv)             # (TM, 128)

    # rgba = cat([rgb, alpha]) built directly from zero-padded head weights:
    #   rgb  = h2 @ wr + br  -> columns 0..2
    #   alpha = h @ wa + ba  -> column  3
    out_ref[...] = mm(h2, wr4) + mm(h, wa4) + brgba[...]           # (TM, 4) f32


# ---------------------------------------------------------------------------
# Parameter flattening / recast for the kernel
# ---------------------------------------------------------------------------
def _prep_params(params):
    """params: list of 12 (w, b) pairs in [in, out] layout:
       0..7 pts_linears, 8 feature, 9 alpha, 10 views_linears[0], 11 rgb.
    Returns flat list: [w0,b0,...,w4,b4, w5e,w5h,b5, w6,b6,w7,b7,
                        wf,bf, wvf,wvv,bv, wa4,wr4,b_rgba]
    Weights bf16, biases f32 shaped (1, out)."""
    def w16(w):
        return jnp.asarray(w, jnp.float32).astype(jnp.bfloat16)

    def b32(b):
        return jnp.asarray(b, jnp.float32).reshape(1, -1)

    flat = []
    for i in range(D_LAYERS):
        w, b = params[i]
        if i == SKIP + 1:
            # skip layer: rows 0..62 multiply ep, rows 63.. multiply h
            flat += [w16(w[:PTS_EMB]), w16(w[PTS_EMB:]), b32(b)]
        else:
            flat += [w16(w), b32(b)]

    wf, bf_ = params[D_LAYERS]
    wa, ba = params[D_LAYERS + 1]
    wv, bv_ = params[D_LAYERS + 2]
    wr, br = params[D_LAYERS + 3]

    flat += [w16(wf), b32(bf_)]
    # views head split: rows 0..255 -> feature, rows 256.. -> view embedding
    flat += [w16(wv[:W_HIDDEN]), w16(wv[W_HIDDEN:]), b32(bv_)]

    wa = jnp.asarray(wa, jnp.float32)   # (256, 1)
    wr = jnp.asarray(wr, jnp.float32)   # (128, 3)
    wa4 = jnp.concatenate([jnp.zeros((W_HIDDEN, 3), jnp.float32), wa], axis=1)       # (256, 4)
    wr4 = jnp.concatenate([wr, jnp.zeros((W_HIDDEN // 2, 1), jnp.float32)], axis=1)  # (128, 4)
    b_rgba = jnp.concatenate(
        [jnp.asarray(br, jnp.float32), jnp.asarray(ba, jnp.float32)], axis=0
    ).reshape(1, 4)
    flat += [w16(wa4), w16(wr4), b_rgba]
    return flat


# ---------------------------------------------------------------------------
# Wrapper
# ---------------------------------------------------------------------------
def nerf_forward(input_pts, input_views, params, *, tile_rows=512,
                 vmem_limit_bytes=None):
    n_rays, n_samples, _ = input_pts.shape

    ep = embed(input_pts, NUM_FREQS)                          # (rays, samples, 63)
    ev = embed(input_views, NUM_FREQS_VIEWS)                  # (rays, 27)
    ev = jnp.broadcast_to(ev[:, None, :], (n_rays, n_samples, VIEWS_EMB))
    ep = ep.reshape(-1, PTS_EMB).astype(jnp.bfloat16)
    ev = ev.reshape(-1, VIEWS_EMB).astype(jnp.bfloat16)

    # Pad row count up to a tile multiple (padded rows are sliced off below).
    n = ep.shape[0]
    n_pad = ((n + tile_rows - 1) // tile_rows) * tile_rows
    if n_pad != n:
        ep = jnp.pad(ep, ((0, n_pad - n), (0, 0)))
        ev = jnp.pad(ev, ((0, n_pad - n), (0, 0)))

    flat_params = _prep_params(params)

    in_specs = [
        pl.BlockSpec((tile_rows, PTS_EMB), lambda i: (i, 0)),
        pl.BlockSpec((tile_rows, VIEWS_EMB), lambda i: (i, 0)),
    ]
    for p in flat_params:
        # whole weight / bias resident in VMEM; constant index_map -> DMA'd once
        in_specs.append(pl.BlockSpec(p.shape, lambda i: (0, 0)))

    cp_kwargs = dict(dimension_semantics=("parallel",))
    if vmem_limit_bytes is not None:
        cp_kwargs["vmem_limit_bytes"] = vmem_limit_bytes

    out = pl.pallas_call(
        nerf_mlp_kernel,
        out_shape=jax.ShapeDtypeStruct((n_pad, 4), jnp.float32),
        grid_spec=pltpu.PrefetchScalarGridSpec(
            num_scalar_prefetch=0,
            grid=(n_pad // tile_rows,),
            in_specs=in_specs,
            out_specs=pl.BlockSpec((tile_rows, 4), lambda i: (i, 0)),
        ),
        compiler_params=pltpu.CompilerParams(**cp_kwargs),
    )(ep, ev, *flat_params)

    return out[:n].reshape(n_rays, n_samples, 4)


# ---------------------------------------------------------------------------
# Deterministic parameter init (shapes from NeRF.__init__)
# ---------------------------------------------------------------------------
def init_params(key):
    layer_dims = []
    for j in range(D_LAYERS):                    # pts_linears
        if j == 0:
            layer_dims.append((PTS_EMB, W_HIDDEN))
        elif j == SKIP + 1:
            layer_dims.append((W_HIDDEN + PTS_EMB, W_HIDDEN))
        else:
            layer_dims.append((W_HIDDEN, W_HIDDEN))
    layer_dims.append((W_HIDDEN, W_HIDDEN))                     # feature_linear
    layer_dims.append((W_HIDDEN, 1))                            # alpha_linear
    layer_dims.append((W_HIDDEN + VIEWS_EMB, W_HIDDEN // 2))    # views_linears[0]
    layer_dims.append((W_HIDDEN // 2, 3))                       # rgb_linear

    keys = jax.random.split(key, 2 * len(layer_dims))
    params = []
    for idx, (fan_in, fan_out) in enumerate(layer_dims):
        bound = 1.0 / float(fan_in) ** 0.5
        w = jax.random.uniform(keys[2 * idx], (fan_in, fan_out),
                               jnp.float32, -bound, bound)
        b = jax.random.uniform(keys[2 * idx + 1], (fan_out,),
                               jnp.float32, -bound, bound)
        params.append((w, b))
    return params


# ---------------------------------------------------------------------------
# Pure-JAX f32 reference (semantics of the PyTorch forward)
# ---------------------------------------------------------------------------
def nerf_ref(input_pts, input_views, params):
    ep = embed(input_pts, NUM_FREQS)
    ev = embed(input_views, NUM_FREQS_VIEWS)
    ev = jnp.broadcast_to(ev[:, None, :], ep.shape[:-1] + (VIEWS_EMB,))
    ep = ep.reshape(-1, PTS_EMB)
    ev = ev.reshape(-1, VIEWS_EMB)
    h = ep
    for i in range(D_LAYERS):
        w, b = params[i]
        h = jnp.maximum(h @ w + b, 0.0)
        if i == SKIP:
            h = jnp.concatenate([ep, h], -1)
    wf, bf = params[D_LAYERS]
    wa, ba = params[D_LAYERS + 1]
    wv, bv = params[D_LAYERS + 2]
    wr, br = params[D_LAYERS + 3]
    feature = h @ wf + bf
    alpha = h @ wa + ba
    h2 = jnp.maximum(jnp.concatenate([feature, ev], -1) @ wv + bv, 0.0)
    rgb = h2 @ wr + br
    rgba = jnp.concatenate([rgb, alpha], -1)
    return rgba.reshape(input_pts.shape[:-1] + (4,))


if __name__ == "__main__":
    key = jax.random.PRNGKey(0)
    k_params, k_pts, k_views = jax.random.split(key, 3)

    params = init_params(k_params)

    # 480 points total -> padded to 512; tile_rows=256 exercises a 2-step grid
    # plus the row-padding path.
    n_rays, n_samples = 10, 48
    input_pts = jax.random.normal(k_pts, (n_rays, n_samples, 3), jnp.float32)
    input_views = jax.random.normal(k_views, (n_rays, 3), jnp.float32)

    rgba = nerf_forward(input_pts, input_views, params, tile_rows=256)
    rgba = jax.block_until_ready(rgba)

    assert rgba.shape == (n_rays, n_samples, 4)
    ref = nerf_ref(input_pts, input_views, params)
    # bf16 weights/activations (f32 accumulation) => loosen tolerance vs f32 ref.
    max_err = float(jnp.max(jnp.abs(rgba - ref)))
    if not bool(jnp.allclose(rgba, ref, atol=3e-2, rtol=3e-2)):
        raise AssertionError(
            f"Pallas kernel output mismatch vs JAX reference (max abs err {max_err})")

    print("KERNEL_OK")
</pallas_src>

<mosaic_0001>
module attributes {stable_mosaic.version = 11 : i64} {
  func.func @nerf_mlp_kernel(%arg0: i32, %arg1: memref<256x63xbf16, #tpu.memory_space<vmem>>, %arg2: memref<256x27xbf16, #tpu.memory_space<vmem>>, %arg3: memref<63x256xbf16, #tpu.memory_space<vmem>>, %arg4: memref<1x256xf32, #tpu.memory_space<vmem>>, %arg5: memref<256x256xbf16, #tpu.memory_space<vmem>>, %arg6: memref<1x256xf32, #tpu.memory_space<vmem>>, %arg7: memref<256x256xbf16, #tpu.memory_space<vmem>>, %arg8: memref<1x256xf32, #tpu.memory_space<vmem>>, %arg9: memref<256x256xbf16, #tpu.memory_space<vmem>>, %arg10: memref<1x256xf32, #tpu.memory_space<vmem>>, %arg11: memref<256x256xbf16, #tpu.memory_space<vmem>>, %arg12: memref<1x256xf32, #tpu.memory_space<vmem>>, %arg13: memref<63x256xbf16, #tpu.memory_space<vmem>>, %arg14: memref<256x256xbf16, #tpu.memory_space<vmem>>, %arg15: memref<1x256xf32, #tpu.memory_space<vmem>>, %arg16: memref<256x256xbf16, #tpu.memory_space<vmem>>, %arg17: memref<1x256xf32, #tpu.memory_space<vmem>>, %arg18: memref<256x256xbf16, #tpu.memory_space<vmem>>, %arg19: memref<1x256xf32, #tpu.memory_space<vmem>>, %arg20: memref<256x256xbf16, #tpu.memory_space<vmem>>, %arg21: memref<1x256xf32, #tpu.memory_space<vmem>>, %arg22: memref<256x128xbf16, #tpu.memory_space<vmem>>, %arg23: memref<27x128xbf16, #tpu.memory_space<vmem>>, %arg24: memref<1x128xf32, #tpu.memory_space<vmem>>, %arg25: memref<256x4xbf16, #tpu.memory_space<vmem>>, %arg26: memref<128x4xbf16, #tpu.memory_space<vmem>>, %arg27: memref<1x4xf32, #tpu.memory_space<vmem>>, %arg28: memref<256x4xf32, #tpu.memory_space<vmem>>) attributes {dimension_semantics = [#tpu.dimension_semantics<parallel>], iteration_bounds = array<i64: 2>, scalar_prefetch = 0 : i64, scratch_operands = 0 : i64, tpu.core_type = #tpu.core_type<tc>, window_params = [{transform_indices = @transform_0, window_bounds = array<i64: 256, 63>}, {transform_indices = @transform_1, window_bounds = array<i64: 256, 27>}, {pipeline_mode = #tpu.pipeline_mode<synchronous>, transform_indices = @transform_2, window_bounds = array<i64: 63, 256>}, {pipeline_mode = #tpu.pipeline_mode<synchronous>, transform_indices = @transform_3, window_bounds = array<i64: 1, 256>}, {pipeline_mode = #tpu.pipeline_mode<synchronous>, transform_indices = @transform_4, window_bounds = array<i64: 256, 256>}, {pipeline_mode = #tpu.pipeline_mode<synchronous>, transform_indices = @transform_5, window_bounds = array<i64: 1, 256>}, {pipeline_mode = #tpu.pipeline_mode<synchronous>, transform_indices = @transform_6, window_bounds = array<i64: 256, 256>}, {pipeline_mode = #tpu.pipeline_mode<synchronous>, transform_indices = @transform_7, window_bounds = array<i64: 1, 256>}, {pipeline_mode = #tpu.pipeline_mode<synchronous>, transform_indices = @transform_8, window_bounds = array<i64: 256, 256>}, {pipeline_mode = #tpu.pipeline_mode<synchronous>, transform_indices = @transform_9, window_bounds = array<i64: 1, 256>}, {pipeline_mode = #tpu.pipeline_mode<synchronous>, transform_indices = @transform_10, window_bounds = array<i64: 256, 256>}, {pipeline_mode = #tpu.pipeline_mode<synchronous>, transform_indices = @transform_11, window_bounds = array<i64: 1, 256>}, {pipeline_mode = #tpu.pipeline_mode<synchronous>, transform_indices = @transform_12, window_bounds = array<i64: 63, 256>}, {pipeline_mode = #tpu.pipeline_mode<synchronous>, transform_indices = @transform_13, window_bounds = array<i64: 256, 256>}, {pipeline_mode = #tpu.pipeline_mode<synchronous>, transform_indices = @transform_14, window_bounds = array<i64: 1, 256>}, {pipeline_mode = #tpu.pipeline_mode<synchronous>, transform_indices = @transform_15, window_bounds = array<i64: 256, 256>}, {pipeline_mode = #tpu.pipeline_mode<synchronous>, transform_indices = @transform_16, window_bounds = array<i64: 1, 256>}, {pipeline_mode = #tpu.pipeline_mode<synchronous>, transform_indices = @transform_17, window_bounds = array<i64: 256, 256>}, {pipeline_mode = #tpu.pipeline_mode<synchronous>, transform_indices = @transform_18, window_bounds = array<i64: 1, 256>}, {pipeline_mode = #tpu.pipeline_mode<synchronous>, transform_indices = @transform_19, window_bounds = array<i64: 256, 256>}, {pipeline_mode = #tpu.pipeline_mode<synchronous>, transform_indices = @transform_20, window_bounds = array<i64: 1, 256>}, {pipeline_mode = #tpu.pipeline_mode<synchronous>, transform_indices = @transform_21, window_bounds = array<i64: 256, 128>}, {pipeline_mode = #tpu.pipeline_mode<synchronous>, transform_indices = @transform_22, window_bounds = array<i64: 27, 128>}, {pipeline_mode = #tpu.pipeline_mode<synchronous>, transform_indices = @transform_23, window_bounds = array<i64: 1, 128>}, {pipeline_mode = #tpu.pipeline_mode<synchronous>, transform_indices = @transform_24, window_bounds = array<i64: 256, 4>}, {pipeline_mode = #tpu.pipeline_mode<synchronous>, transform_indices = @transform_25, window_bounds = array<i64: 128, 4>}, {pipeline_mode = #tpu.pipeline_mode<synchronous>, transform_indices = @transform_26, window_bounds = array<i64: 1, 4>}, {transform_indices = @transform_27, window_bounds = array<i64: 256, 4>}]} {
    %c0 = arith.constant 0 : index
    %c0_0 = arith.constant 0 : index
    %0 = vector.load %arg1[%c0, %c0_0] : memref<256x63xbf16, #tpu.memory_space<vmem>>, vector<256x63xbf16>
    %c0_1 = arith.constant 0 : index
    %c0_2 = arith.constant 0 : index
    %1 = vector.load %arg2[%c0_1, %c0_2] : memref<256x27xbf16, #tpu.memory_space<vmem>>, vector<256x27xbf16>
    %c0_3 = arith.constant 0 : index
    %c0_4 = arith.constant 0 : index
    %2 = vector.load %arg3[%c0_3, %c0_4] : memref<63x256xbf16, #tpu.memory_space<vmem>>, vector<63x256xbf16>
    %cst = arith.constant dense<0.000000e+00> : vector<256x256xf32>
    %3 = tpu.matmul %0, %2, %cst {dimension_numbers = #tpu.dot_dimension_numbers<[1], [0], [0], [1], [0, 0, 1, 1], [], []>} : vector<256x63xbf16>, vector<63x256xbf16>, vector<256x256xf32> -> vector<256x256xf32>
    %c0_5 = arith.constant 0 : index
    %c0_6 = arith.constant 0 : index
    %4 = vector.load %arg4[%c0_5, %c0_6] : memref<1x256xf32, #tpu.memory_space<vmem>>, vector<1x256xf32>
    %5 = vector.broadcast %4 : vector<1x256xf32> to vector<256x256xf32>
    %6 = arith.addf %3, %5 : vector<256x256xf32>
    %cst_7 = arith.constant 0.000000e+00 : f32
    %7 = vector.broadcast %cst_7 : f32 to vector<256x256xf32>
    %8 = arith.maximumf %6, %7 : vector<256x256xf32>
    %9 = arith.truncf %8 : vector<256x256xf32> to vector<256x256xbf16>
    %c0_8 = arith.constant 0 : index
    %c0_9 = arith.constant 0 : index
    %10 = vector.load %arg5[%c0_8, %c0_9] : memref<256x256xbf16, #tpu.memory_space<vmem>>, vector<256x256xbf16>
    %cst_10 = arith.constant dense<0.000000e+00> : vector<256x256xf32>
    %11 = tpu.matmul %9, %10, %cst_10 {dimension_numbers = #tpu.dot_dimension_numbers<[1], [0], [0], [1], [0, 0, 1, 1], [], []>} : vector<256x256xbf16>, vector<256x256xbf16>, vector<256x256xf32> -> vector<256x256xf32>
    %c0_11 = arith.constant 0 : index
    %c0_12 = arith.constant 0 : index
    %12 = vector.load %arg6[%c0_11, %c0_12] : memref<1x256xf32, #tpu.memory_space<vmem>>, vector<1x256xf32>
    %13 = vector.broadcast %12 : vector<1x256xf32> to vector<256x256xf32>
    %14 = arith.addf %11, %13 : vector<256x256xf32>
    %cst_13 = arith.constant 0.000000e+00 : f32
    %15 = vector.broadcast %cst_13 : f32 to vector<256x256xf32>
    %16 = arith.maximumf %14, %15 : vector<256x256xf32>
    %17 = arith.truncf %16 : vector<256x256xf32> to vector<256x256xbf16>
    %c0_14 = arith.constant 0 : index
    %c0_15 = arith.constant 0 : index
    %18 = vector.load %arg7[%c0_14, %c0_15] : memref<256x256xbf16, #tpu.memory_space<vmem>>, vector<256x256xbf16>
    %cst_16 = arith.constant dense<0.000000e+00> : vector<256x256xf32>
    %19 = tpu.matmul %17, %18, %cst_16 {dimension_numbers = #tpu.dot_dimension_numbers<[1], [0], [0], [1], [0, 0, 1, 1], [], []>} : vector<256x256xbf16>, vector<256x256xbf16>, vector<256x256xf32> -> vector<256x256xf32>
    %c0_17 = arith.constant 0 : index
    %c0_18 = arith.constant 0 : index
    %20 = vector.load %arg8[%c0_17, %c0_18] : memref<1x256xf32, #tpu.memory_space<vmem>>, vector<1x256xf32>
    %21 = vector.broadcast %20 : vector<1x256xf32> to vector<256x256xf32>
    %22 = arith.addf %19, %21 : vector<256x256xf32>
    %cst_19 = arith.constant 0.000000e+00 : f32
    %23 = vector.broadcast %cst_19 : f32 to vector<256x256xf32>
    %24 = arith.maximumf %22, %23 : vector<256x256xf32>
    %25 = arith.truncf %24 : vector<256x256xf32> to vector<256x256xbf16>
    %c0_20 = arith.constant 0 : index
    %c0_21 = arith.constant 0 : index
    %26 = vector.load %arg9[%c0_20, %c0_21] : memref<256x256xbf16, #tpu.memory_space<vmem>>, vector<256x256xbf16>
    %cst_22 = arith.constant dense<0.000000e+00> : vector<256x256xf32>
    %27 = tpu.matmul %25, %26, %cst_22 {dimension_numbers = #tpu.dot_dimension_numbers<[1], [0], [0], [1], [0, 0, 1, 1], [], []>} : vector<256x256xbf16>, vector<256x256xbf16>, vector<256x256xf32> -> vector<256x256xf32>
    %c0_23 = arith.constant 0 : index
    %c0_24 = arith.constant 0 : index
    %28 = vector.load %arg10[%c0_23, %c0_24] : memref<1x256xf32, #tpu.memory_space<vmem>>, vector<1x256xf32>
    %29 = vector.broadcast %28 : vector<1x256xf32> to vector<256x256xf32>
    %30 = arith.addf %27, %29 : vector<256x256xf32>
    %cst_25 = arith.constant 0.000000e+00 : f32
    %31 = vector.broadcast %cst_25 : f32 to vector<256x256xf32>
    %32 = arith.maximumf %30, %31 : vector<256x256xf32>
    %33 = arith.truncf %32 : vector<256x256xf32> to vector<256x256xbf16>
    %c0_26 = arith.constant 0 : index
    %c0_27 = arith.constant 0 : index
    %34 = vector.load %arg11[%c0_26, %c0_27] : memref<256x256xbf16, #tpu.memory_space<vmem>>, vector<256x256xbf16>
    %cst_28 = arith.constant dense<0.000000e+00> : vector<256x256xf32>
    %35 = tpu.matmul %33, %34, %cst_28 {dimension_numbers = #tpu.dot_dimension_numbers<[1], [0], [0], [1], [0, 0, 1, 1], [], []>} : vector<256x256xbf16>, vector<256x256xbf16>, vector<256x256xf32> -> vector<256x256xf32>
    %c0_29 = arith.constant 0 : index
    %c0_30 = arith.constant 0 : index
    %36 = vector.load %arg12[%c0_29, %c0_30] : memref<1x256xf32, #tpu.memory_space<vmem>>, vector<1x256xf32>
    %37 = vector.broadcast %36 : vector<1x256xf32> to vector<256x256xf32>
    %38 = arith.addf %35, %37 : vector<256x256xf32>
    %cst_31 = arith.constant 0.000000e+00 : f32
    %39 = vector.broadcast %cst_31 : f32 to vector<256x256xf32>
    %40 = arith.maximumf %38, %39 : vector<256x256xf32>
    %41 = arith.truncf %40 : vector<256x256xf32> to vector<256x256xbf16>
    %c0_32 = arith.constant 0 : index
    %c0_33 = arith.constant 0 : index
    %42 = vector.load %arg13[%c0_32, %c0_33] : memref<63x256xbf16, #tpu.memory_space<vmem>>, vector<63x256xbf16>
    %cst_34 = arith.constant dense<0.000000e+00> : vector<256x256xf32>
    %43 = tpu.matmul %0, %42, %cst_34 {dimension_numbers = #tpu.dot_dimension_numbers<[1], [0], [0], [1], [0, 0, 1, 1], [], []>} : vector<256x63xbf16>, vector<63x256xbf16>, vector<256x256xf32> -> vector<256x256xf32>
    %c0_35 = arith.constant 0 : index
    %c0_36 = arith.constant 0 : index
    %44 = vector.load %arg14[%c0_35, %c0_36] : memref<256x256xbf16, #tpu.memory_space<vmem>>, vector<256x256xbf16>
    %cst_37 = arith.constant dense<0.000000e+00> : vector<256x256xf32>
    %45 = tpu.matmul %41, %44, %cst_37 {dimension_numbers = #tpu.dot_dimension_numbers<[1], [0], [0], [1], [0, 0, 1, 1], [], []>} : vector<256x256xbf16>, vector<256x256xbf16>, vector<256x256xf32> -> vector<256x256xf32>
    %46 = arith.addf %43, %45 : vector<256x256xf32>
    %c0_38 = arith.constant 0 : index
    %c0_39 = arith.constant 0 : index
    %47 = vector.load %arg15[%c0_38, %c0_39] : memref<1x256xf32, #tpu.memory_space<vmem>>, vector<1x256xf32>
    %48 = vector.broadcast %47 : vector<1x256xf32> to vector<256x256xf32>
    %49 = arith.addf %46, %48 : vector<256x256xf32>
    %cst_40 = arith.constant 0.000000e+00 : f32
    %50 = vector.broadcast %cst_40 : f32 to vector<256x256xf32>
    %51 = arith.maximumf %49, %50 : vector<256x256xf32>
    %52 = arith.truncf %51 : vector<256x256xf32> to vector<256x256xbf16>
    %c0_41 = arith.constant 0 : index
    %c0_42 = arith.constant 0 : index
    %53 = vector.load %arg16[%c0_41, %c0_42] : memref<256x256xbf16, #tpu.memory_space<vmem>>, vector<256x256xbf16>
    %cst_43 = arith.constant dense<0.000000e+00> : vector<256x256xf32>
    %54 = tpu.matmul %52, %53, %cst_43 {dimension_numbers = #tpu.dot_dimension_numbers<[1], [0], [0], [1], [0, 0, 1, 1], [], []>} : vector<256x256xbf16>, vector<256x256xbf16>, vector<256x256xf32> -> vector<256x256xf32>
    %c0_44 = arith.constant 0 : index
    %c0_45 = arith.constant 0 : index
    %55 = vector.load %arg17[%c0_44, %c0_45] : memref<1x256xf32, #tpu.memory_space<vmem>>, vector<1x256xf32>
    %56 = vector.broadcast %55 : vector<1x256xf32> to vector<256x256xf32>
    %57 = arith.addf %54, %56 : vector<256x256xf32>
    %cst_46 = arith.constant 0.000000e+00 : f32
    %58 = vector.broadcast %cst_46 : f32 to vector<256x256xf32>
    %59 = arith.maximumf %57, %58 : vector<256x256xf32>
    %60 = arith.truncf %59 : vector<256x256xf32> to vector<256x256xbf16>
    %c0_47 = arith.constant 0 : index
    %c0_48 = arith.constant 0 : index
    %61 = vector.load %arg18[%c0_47, %c0_48] : memref<256x256xbf16, #tpu.memory_space<vmem>>, vector<256x256xbf16>
    %cst_49 = arith.constant dense<0.000000e+00> : vector<256x256xf32>
    %62 = tpu.matmul %60, %61, %cst_49 {dimension_numbers = #tpu.dot_dimension_numbers<[1], [0], [0], [1], [0, 0, 1, 1], [], []>} : vector<256x256xbf16>, vector<256x256xbf16>, vector<256x256xf32> -> vector<256x256xf32>
    %c0_50 = arith.constant 0 : index
    %c0_51 = arith.constant 0 : index
    %63 = vector.load %arg19[%c0_50, %c0_51] : memref<1x256xf32, #tpu.memory_space<vmem>>, vector<1x256xf32>
    %64 = vector.broadcast %63 : vector<1x256xf32> to vector<256x256xf32>
    %65 = arith.addf %62, %64 : vector<256x256xf32>
    %cst_52 = arith.constant 0.000000e+00 : f32
    %66 = vector.broadcast %cst_52 : f32 to vector<256x256xf32>
    %67 = arith.maximumf %65, %66 : vector<256x256xf32>
    %68 = arith.truncf %67 : vector<256x256xf32> to vector<256x256xbf16>
    %c0_53 = arith.constant 0 : index
    %c0_54 = arith.constant 0 : index
    %69 = vector.load %arg20[%c0_53, %c0_54] : memref<256x256xbf16, #tpu.memory_space<vmem>>, vector<256x256xbf16>
    %cst_55 = arith.constant dense<0.000000e+00> : vector<256x256xf32>
    %70 = tpu.matmul %68, %69, %cst_55 {dimension_numbers = #tpu.dot_dimension_numbers<[1], [0], [0], [1], [0, 0, 1, 1], [], []>} : vector<256x256xbf16>, vector<256x256xbf16>, vector<256x256xf32> -> vector<256x256xf32>
    %c0_56 = arith.constant 0 : index
    %c0_57 = arith.constant 0 : index
    %71 = vector.load %arg21[%c0_56, %c0_57] : memref<1x256xf32, #tpu.memory_space<vmem>>, vector<1x256xf32>
    %72 = vector.broadcast %71 : vector<1x256xf32> to vector<256x256xf32>
    %73 = arith.addf %70, %72 : vector<256x256xf32>
    %74 = arith.truncf %73 : vector<256x256xf32> to vector<256x256xbf16>
    %c0_58 = arith.constant 0 : index
    %c0_59 = arith.constant 0 : index
    %75 = vector.load %arg22[%c0_58, %c0_59] : memref<256x128xbf16, #tpu.memory_space<vmem>>, vector<256x128xbf16>
    %cst_60 = arith.constant dense<0.000000e+00> : vector<256x128xf32>
    %76 = tpu.matmul %74, %75, %cst_60 {dimension_numbers = #tpu.dot_dimension_numbers<[1], [0], [0], [1], [0, 0, 1, 1], [], []>} : vector<256x256xbf16>, vector<256x128xbf16>, vector<256x128xf32> -> vector<256x128xf32>
    %c0_61 = arith.constant 0 : index
    %c0_62 = arith.constant 0 : index
    %77 = vector.load %arg23[%c0_61, %c0_62] : memref<27x128xbf16, #tpu.memory_space<vmem>>, vector<27x128xbf16>
    %cst_63 = arith.constant dense<0.000000e+00> : vector<256x128xf32>
    %78 = tpu.matmul %1, %77, %cst_63 {dimension_numbers = #tpu.dot_dimension_numbers<[1], [0], [0], [1], [0, 0, 1, 1], [], []>} : vector<256x27xbf16>, vector<27x128xbf16>, vector<256x128xf32> -> vector<256x128xf32>
    %79 = arith.addf %76, %78 : vector<256x128xf32>
    %c0_64 = arith.constant 0 : index
    %c0_65 = arith.constant 0 : index
    %80 = vector.load %arg24[%c0_64, %c0_65] : memref<1x128xf32, #tpu.memory_space<vmem>>, vector<1x128xf32>
    %81 = vector.broadcast %80 : vector<1x128xf32> to vector<256x128xf32>
    %82 = arith.addf %79, %81 : vector<256x128xf32>
    %cst_66 = arith.constant 0.000000e+00 : f32
    %83 = vector.broadcast %cst_66 : f32 to vector<256x128xf32>
    %84 = arith.maximumf %82, %83 : vector<256x128xf32>
    %85 = arith.truncf %84 : vector<256x128xf32> to vector<256x128xbf16>
    %c0_67 = arith.constant 0 : index
    %c0_68 = arith.constant 0 : index
    %86 = vector.load %arg26[%c0_67, %c0_68] : memref<128x4xbf16, #tpu.memory_space<vmem>>, vector<128x4xbf16>
    %cst_69 = arith.constant dense<0.000000e+00> : vector<256x4xf32>
    %87 = tpu.matmul %85, %86, %cst_69 {dimension_numbers = #tpu.dot_dimension_numbers<[1], [0], [0], [1], [0, 0, 1, 1], [], []>} : vector<256x128xbf16>, vector<128x4xbf16>, vector<256x4xf32> -> vector<256x4xf32>
    %c0_70 = arith.constant 0 : index
    %c0_71 = arith.constant 0 : index
    %88 = vector.load %arg25[%c0_70, %c0_71] : memref<256x4xbf16, #tpu.memory_space<vmem>>, vector<256x4xbf16>
    %cst_72 = arith.constant dense<0.000000e+00> : vector<256x4xf32>
    %89 = tpu.matmul %68, %88, %cst_72 {dimension_numbers = #tpu.dot_dimension_numbers<[1], [0], [0], [1], [0, 0, 1, 1], [], []>} : vector<256x256xbf16>, vector<256x4xbf16>, vector<256x4xf32> -> vector<256x4xf32>
    %90 = arith.addf %87, %89 : vector<256x4xf32>
    %c0_73 = arith.constant 0 : index
    %c0_74 = arith.constant 0 : index
    %91 = vector.load %arg27[%c0_73, %c0_74] : memref<1x4xf32, #tpu.memory_space<vmem>>, vector<1x4xf32>
    %92 = vector.broadcast %91 : vector<1x4xf32> to vector<256x4xf32>
    %93 = arith.addf %90, %92 : vector<256x4xf32>
    %c0_75 = arith.constant 0 : index
    %c0_76 = arith.constant 0 : index
    %94 = vector.load %arg28[%c0_75, %c0_76] : memref<256x4xf32, #tpu.memory_space<vmem>>, vector<256x4xf32>
    tpu.vector_store %arg28[%c0_75, %c0_76], %93 {strides = array<i32>} : memref<256x4xf32, #tpu.memory_space<vmem>>, vector<256x4xf32>,
    return
  }
  func.func @transform_0(%arg0: i32) -> (i32, i32) {
    %c0_i32 = arith.constant 0 : i32
    %c0_i32_0 = arith.constant 0 : i32
    return %arg0, %c0_i32 : i32, i32
  }
  func.func @transform_1(%arg0: i32) -> (i32, i32) {
    %c0_i32 = arith.constant 0 : i32
    %c0_i32_0 = arith.constant 0 : i32
    return %arg0, %c0_i32 : i32, i32
  }
  func.func @transform_2(%arg0: i32) -> (i32, i32) {
    %c0_i32 = arith.constant 0 : i32
    %c0_i32_0 = arith.constant 0 : i32
    %c0_i32_1 = arith.constant 0 : i32
    return %c0_i32, %c0_i32_0 : i32, i32
  }
  func.func @transform_3(%arg0: i32) -> (i32, i32) {
    %c0_i32 = arith.constant 0 : i32
    %c0_i32_0 = arith.constant 0 : i32
    %c0_i32_1 = arith.constant 0 : i32
    return %c0_i32, %c0_i32_0 : i32, i32
  }
  func.func @transform_4(%arg0: i32) -> (i32, i32) {
    %c0_i32 = arith.constant 0 : i32
    %c0_i32_0 = arith.constant 0 : i32
    %c0_i32_1 = arith.constant 0 : i32
    return %c0_i32, %c0_i32_0 : i32, i32
  }
  func.func @transform_5(%arg0: i32) -> (i32, i32) {
    %c0_i32 = arith.constant 0 : i32
    %c0_i32_0 = arith.constant 0 : i32
    %c0_i32_1 = arith.constant 0 : i32
    return %c0_i32, %c0_i32_0 : i32, i32
  }
  func.func @transform_6(%arg0: i32) -> (i32, i32) {
    %c0_i32 = arith.constant 0 : i32
    %c0_i32_0 = arith.constant 0 : i32
    %c0_i32_1 = arith.constant 0 : i32
    return %c0_i32, %c0_i32_0 : i32, i32
  }
  func.func @transform_7(%arg0: i32) -> (i32, i32) {
    %c0_i32 = arith.constant 0 : i32
    %c0_i32_0 = arith.constant 0 : i32
    %c0_i32_1 = arith.constant 0 : i32
    return %c0_i32, %c0_i32_0 : i32, i32
  }
  func.func @transform_8(%arg0: i32) -> (i32, i32) {
    %c0_i32 = arith.constant 0 : i32
    %c0_i32_0 = arith.constant 0 : i32
    %c0_i32_1 = arith.constant 0 : i32
    return %c0_i32, %c0_i32_0 : i32, i32
  }
  func.func @transform_9(%arg0: i32) -> (i32, i32) {
    %c0_i32 = arith.constant 0 : i32
    %c0_i32_0 = arith.constant 0 : i32
    %c0_i32_1 = arith.constant 0 : i32
    return %c0_i32, %c0_i32_0 : i32, i32
  }
  func.func @transform_10(%arg0: i32) -> (i32, i32) {
    %c0_i32 = arith.constant 0 : i32
    %c0_i32_0 = arith.constant 0 : i32
    %c0_i32_1 = arith.constant 0 : i32
    return %c0_i32, %c0_i32_0 : i32, i32
  }
  func.func @transform_11(%arg0: i32) -> (i32, i32) {
    %c0_i32 = arith.constant 0 : i32
    %c0_i32_0 = arith.constant 0 : i32
    %c0_i32_1 = arith.constant 0 : i32
    return %c0_i32, %c0_i32_0 : i32, i32
  }
  func.func @transform_12(%arg0: i32) -> (i32, i32) {
    %c0_i32 = arith.constant 0 : i32
    %c0_i32_0 = arith.constant 0 : i32
    %c0_i32_1 = arith.constant 0 : i32
    return %c0_i32, %c0_i32_0 : i32, i32
  }
  func.func @transform_13(%arg0: i32) -> (i32, i32) {
    %c0_i32 = arith.constant 0 : i32
    %c0_i32_0 = arith.constant 0 : i32
    %c0_i32_1 = arith.constant 0 : i32
    return %c0_i32, %c0_i32_0 : i32, i32
  }
  func.func @transform_14(%arg0: i32) -> (i32, i32) {
    %c0_i32 = arith.constant 0 : i32
    %c0_i32_0 = arith.constant 0 : i32
    %c0_i32_1 = arith.constant 0 : i32
    return %c0_i32, %c0_i32_0 : i32, i32
  }
  func.func @transform_15(%arg0: i32) -> (i32, i32) {
    %c0_i32 = arith.constant 0 : i32
    %c0_i32_0 = arith.constant 0 : i32
    %c0_i32_1 = arith.constant 0 : i32
    return %c0_i32, %c0_i32_0 : i32, i32
  }
  func.func @transform_16(%arg0: i32) -> (i32, i32) {
    %c0_i32 = arith.constant 0 : i32
    %c0_i32_0 = arith.constant 0 : i32
    %c0_i32_1 = arith.constant 0 : i32
    return %c0_i32, %c0_i32_0 : i32, i32
  }
  func.func @transform_17(%arg0: i32) -> (i32, i32) {
    %c0_i32 = arith.constant 0 : i32
    %c0_i32_0 = arith.constant 0 : i32
    %c0_i32_1 = arith.constant 0 : i32
    return %c0_i32, %c0_i32_0 : i32, i32
  }
  func.func @transform_18(%arg0: i32) -> (i32, i32) {
    %c0_i32 = arith.constant 0 : i32
    %c0_i32_0 = arith.constant 0 : i32
    %c0_i32_1 = arith.constant 0 : i32
    return %c0_i32, %c0_i32_0 : i32, i32
  }
  func.func @transform_19(%arg0: i32) -> (i32, i32) {
    %c0_i32 = arith.constant 0 : i32
    %c0_i32_0 = arith.constant 0 : i32
    %c0_i32_1 = arith.constant 0 : i32
    return %c0_i32, %c0_i32_0 : i32, i32
  }
  func.func @transform_20(%arg0: i32) -> (i32, i32) {
    %c0_i32 = arith.constant 0 : i32
    %c0_i32_0 = arith.constant 0 : i32
    %c0_i32_1 = arith.constant 0 : i32
    return %c0_i32, %c0_i32_0 : i32, i32
  }
  func.func @transform_21(%arg0: i32) -> (i32, i32) {
    %c0_i32 = arith.constant 0 : i32
    %c0_i32_0 = arith.constant 0 : i32
    %c0_i32_1 = arith.constant 0 : i32
    return %c0_i32, %c0_i32_0 : i32, i32
  }
  func.func @transform_22(%arg0: i32) -> (i32, i32) {
    %c0_i32 = arith.constant 0 : i32
    %c0_i32_0 = arith.constant 0 : i32
    %c0_i32_1 = arith.constant 0 : i32
    return %c0_i32, %c0_i32_0 : i32, i32
  }
  func.func @transform_23(%arg0: i32) -> (i32, i32) {
    %c0_i32 = arith.constant 0 : i32
    %c0_i32_0 = arith.constant 0 : i32
    %c0_i32_1 = arith.constant 0 : i32
    return %c0_i32, %c0_i32_0 : i32, i32
  }
  func.func @transform_24(%arg0: i32) -> (i32, i32) {
    %c0_i32 = arith.constant 0 : i32
    %c0_i32_0 = arith.constant 0 : i32
    %c0_i32_1 = arith.constant 0 : i32
    return %c0_i32, %c0_i32_0 : i32, i32
  }
  func.func @transform_25(%arg0: i32) -> (i32, i32) {
    %c0_i32 = arith.constant 0 : i32
    %c0_i32_0 = arith.constant 0 : i32
    %c0_i32_1 = arith.constant 0 : i32
    return %c0_i32, %c0_i32_0 : i32, i32
  }
  func.func @transform_26(%arg0: i32) -> (i32, i32) {
    %c0_i32 = arith.constant 0 : i32
    %c0_i32_0 = arith.constant 0 : i32
    %c0_i32_1 = arith.constant 0 : i32
    return %c0_i32, %c0_i32_0 : i32, i32
  }
  func.func @transform_27(%arg0: i32) -> (i32, i32) {
    %c0_i32 = arith.constant 0 : i32
    %c0_i32_0 = arith.constant 0 : i32
    return %arg0, %c0_i32 : i32, i32
  }
}

</mosaic_0001>

<bundles_post_ra>
// kernel: tpu_custom_call.1
= control target key start
LH: loop header
LB: loop body
LE: loop exit
PB: predicated region body
PF: predicated region fallthrough
CT: control target
= control target key end

     0   :  { %s11112_s0 = inlined_call_operand.vmem [shape: bf16[512,63], index: 0, kind: input, shape index: {}]   ;;  %s11113_s1 = inlined_call_operand.vmem [shape: bf16[512,27], index: 1, kind: input, shape index: {}]   ;;  %s11114_s2 = inlined_call_operand.hbm [shape: bf16[63,256], index: 2, kind: input, shape index: {}]   ;;  %s11115_s3 = inlined_call_operand.hbm [shape: f32[1,256], index: 3, kind: input, shape index: {}]   ;;  %s11116_s4 = inlined_call_operand.vmem [shape: bf16[256,256], index: 4, kind: input, shape index: {}]   ;;  %s11117_s5 = inlined_call_operand.hbm [shape: f32[1,256], index: 5, kind: input, shape index: {}]   ;;  %s11118_s6 = inlined_call_operand.vmem [shape: bf16[256,256], index: 6, kind: input, shape index: {}]   ;;  %s11119_s7 = inlined_call_operand.vmem [shape: f32[1,256], index: 7, kind: input, shape index: {}]   ;;  %s11120_s8 = inlined_call_operand.vmem [shape: bf16[256,256], index: 8, kind: input, shape index: {}]   ;;  %s11121_s9 = inlined_call_operand.vmem [shape: f32[1,256], index: 9, kind: input, shape index: {}]   ;;  %s11122_s10 = inlined_call_operand.hbm [shape: bf16[256,256], index: 10, kind: input, shape index: {}]   ;;  %s11123_s11 = inlined_call_operand.vmem [shape: f32[1,256], index: 11, kind: input, shape index: {}]   ;;  %s11124_s12 = inlined_call_operand.hbm [shape: bf16[63,256], index: 12, kind: input, shape index: {}]   ;;  %s11125_s13 = inlined_call_operand.hbm [shape: bf16[256,256], index: 13, kind: input, shape index: {}]   ;;  %s11126_s14 = inlined_call_operand.vmem [shape: f32[1,256], index: 14, kind: input, shape index: {}]   ;;  %s11127_s15 = inlined_call_operand.hbm [shape: bf16[256,256], index: 15, kind: input, shape index: {}]   ;;  %s11128_s16 = inlined_call_operand.vmem [shape: f32[1,256], index: 16, kind: input, shape index: {}]   ;;  %s11129_s17 = inlined_call_operand.hbm [shape: bf16[256,256], index: 17, kind: input, shape index: {}]   ;;  %s11130_s18 = inlined_call_operand.vmem [shape: f32[1,256], index: 18, kind: input, shape index: {}]   ;;  %s11131_s19 = inlined_call_operand.hbm [shape: bf16[256,256], index: 19, kind: input, shape index: {}]   ;;  %s11132_s20 = inlined_call_operand.vmem [shape: f32[1,256], index: 20, kind: input, shape index: {}]   ;;  %s11133_s21 = inlined_call_operand.hbm [shape: bf16[256,128], index: 21, kind: input, shape index: {}]   ;;  %s11134_s22 = inlined_call_operand.vmem [shape: bf16[27,128], index: 22, kind: input, shape index: {}]   ;;  %s11135_s23 = inlined_call_operand.vmem [shape: f32[1,128], index: 23, kind: input, shape index: {}]   ;;  %s11136_s24 = inlined_call_operand.vmem [shape: bf16[256,4], index: 24, kind: input, shape index: {}]   ;;  %s11137_s25 = inlined_call_operand.vmem [shape: bf16[128,4], index: 25, kind: input, shape index: {}]   ;;  %s11138_s26 = inlined_call_operand.vmem [shape: f32[1,4], index: 26, kind: input, shape index: {}]   ;;  %s11139_s27 = inlined_call_operand.vmem [shape: f32[512,4], index: 27, kind: output, shape index: {}]  }
   0x1   :  { %11157 = sst [smem:[#allocation43_spill]] %s11112_s0 }
   0x2   :  { %11158 = sst [smem:[#allocation44_spill]] %s11113_s1 }
   0x3   :  { %11159 = sst [smem:[#allocation45_spill]] %s11114_s2 }
   0x4   :  { %11160 = sst [smem:[#allocation46_spill]] %s11115_s3 }
   0x5   :  { %11161 = sst [smem:[#allocation47_spill]] %s11116_s4 }
   0x6   :  { %11162 = sst [smem:[#allocation48_spill]] %s11117_s5 }
   0x7   :  { %11163 = sst [smem:[#allocation49_spill]] %s11118_s6 }
   0x8   :  { %11164 = sst [smem:[#allocation50_spill]] %s11119_s7 }
   0x9   :  { %11165 = sst [smem:[#allocation51_spill]] %s11120_s8 }
   0xa   :  { %11166 = sst [smem:[#allocation52_spill]] %s11121_s9 }
   0xb   :  { %11167 = sst [smem:[#allocation53_spill]] %s11122_s10 }
   0xc   :  { %11168 = sst [smem:[#allocation54_spill]] %s11123_s11 }
   0xd   :  { %11169 = sst [smem:[#allocation55_spill]] %s11125_s13 }
   0xe   :  { %11170 = sst [smem:[#allocation56_spill]] %s11132_s20 }
   0xf   :  { %11171 = sst [smem:[#allocation57_spill]] %s11135_s23 }
  0x10   :  { %11172 = sst [smem:[#allocation58_spill]] %s11137_s25 }
  0x11   :  { %11173 = sst [smem:[#allocation59_spill]] %s11138_s26 }
  0x12   :  { %11174 = sst [smem:[#allocation60_spill]] %s11139_s27 }
  0x13   :  { %32 = vsyncpa [#allocation3], 0 }
  0x14   :  { %33 = vsyncpa [#allocation5], 0 }
  0x15   :  { %34 = vsyncpa [#allocation8], 0 }
  0x16   :  { %35 = vsyncpa [#allocation11], 0 }
  0x17   :  { %36 = vsyncpa [#allocation14], 0 }
  0x18   :  { %37 = vsyncpa [#allocation17], 0  ;;  %s9122_s7 = smov 0  }
  0x19 LB: > { %s8966_s4 = smov [#allocation4]   ;;  %s11147_s30 = sadd.s32 4294967295, %s8964_s7   ;;  %s8964_s7 = sphi %s9122_s7, %s43_s7  }
  0x1a   : > { %s677_s8 = sshll.u32 %s8966_s4, 4  ;;  %p7168_p0 = scmp.ge.s32.totalorder %s8964_s7, 1  ;;  %s9136_s8 = int_to_ptr.vmem [resolvable:$true] %s677_s8 }
  0x1b   : > { %p651_p1 = scmp.lt.s32.totalorder %s8964_s7, 3  ;;  %p9132_p2 = scmp.eq.s32.totalorder %s11147_s30, 0 }
  0x1c   : > { %s8967_s28 = smov [#allocation7]   ;;  %s8968_s29 = smov [#allocation10]  }
  0x1d   : > { %s11175_s9 = scalar_select %p9132_p2, 1, 0 }
  0x1e   : > { %p9138_p3 = pnand %p7168_p0, %p651_p1  ;;  %s713_s0 = sshll.u32 %s8967_s28, 4  ;;  %s9144_s0 = int_to_ptr.vmem [resolvable:$true] %s713_s0 }
  0x1f   : > { %s742_s1 = sshll.u32 %s8968_s29, 4  ;;  %s8969_s6 = smov [#allocation13]   ;;  %s9152_s1 = int_to_ptr.vmem [resolvable:$true] %s742_s1 }
  0x20   : > { %s11176_s5 = scalar_select %p9138_p3, 1, 0 }
  0x21   : > { %p8081_p4 = pneg %p9138_p3  ;;  %s9154_s11 = sshll.u32 %s8969_s6, 4  ;;  %s775_s11 = int_to_ptr.vmem [resolvable:$true] %s9154_s11 }
  0x22   : > { %s11178_s4 = sld [smem:[#allocation46_spill]] }
  0x23   : > { %p9148_p5 = pnand %p9132_p2, %p8081_p4 }
  0x25   : > { %p9164_p7 = pneg %p9148_p5 }
  0x28   : > { %s8654_s30 = scalar_lea.hbm %s11178_s4, 32 }
  0x29   : > { %p8655_p6 = scmp.ne.s32.totalorder %s11178_s4, %s8654_s30  ;;  %p8661_p10 = scmp.lt.u32.totalorder %s8654_s30, %s11178_s4 }
  0x2b   : > { %p8657_p8 = pnand %p9164_p7, %p8655_p6 }
  0x2d   : > { %p8658_p9 = pneg %p8657_p8 }
  0x2f   : > { %p8663_p11 = pnand %p8661_p10, %p8658_p9 }
  0x31   : > { %8666 = shalt.err (!%p8663_p11)
}
  0x32   : > { %s8667_s27 = scalar_lea.vmem %s9136_s8, 32  ;;  %p8675_p1 = scmp.lt.s32.totalorder %s9136_s8, %s9136_s8 }
  0x33   : > { %p8668_p12 = scmp.ne.s32.totalorder %s9136_s8, %s8667_s27  ;;  %p8676_p4 = scmp.lt.s32.totalorder %s8667_s27, %s8667_s27 }
  0x35   : > { %p8670_p13 = pnand %p8668_p12, %p9164_p7  ;;  %p8677_p6 = por %p8676_p4, %p8675_p1 }
  0x37   : > { %p8671_p0 = pneg %p8670_p13 }
  0x39   : > { %p8678_p8 = pnand %p8677_p6, %p8671_p0 }
  0x3b   : > { %8681 = shalt.err (!%p8678_p8)
}
  0x3c   : > { %8087 = dma.hbm_to_vmem [thread:$0]  (!%p9148_p5), %s11178_s4, 32, %s9136_s8, [#allocation5]  }
  0x3d   : > { %s11180_s29 = sld [smem:[#allocation53_spill]] }
  0x43   : > { %s8682_s6 = scalar_lea.hbm %s11180_s29, 4096 }
  0x44   : > { %p8683_p9 = scmp.ne.s32.totalorder %s11180_s29, %s8682_s6  ;;  %p8689_p12 = scmp.lt.u32.totalorder %s8682_s6, %s11180_s29 }
  0x46   : > { %p8685_p10 = pnand %p8683_p9, %p9164_p7 }
  0x48   : > { %p8686_p11 = pneg %p8685_p10 }
  0x4a   : > { %p8691_p13 = pnand %p8689_p12, %p8686_p11 }
  0x4c   : > { %8694 = shalt.err (!%p8691_p13)
}
  0x4d   : > { %s8695_s8 = scalar_lea.vmem %s9144_s0, 4096  ;;  %p8703_p6 = scmp.lt.s32.totalorder %s9144_s0, %s9144_s0 }
  0x4e   : > { %p8696_p0 = scmp.ne.s32.totalorder %s9144_s0, %s8695_s8  ;;  %p8704_p8 = scmp.lt.s32.totalorder %s8695_s8, %s8695_s8 }
  0x50   : > { %p8698_p1 = pnand %p8696_p0, %p9164_p7  ;;  %p8705_p9 = por %p8704_p8, %p8703_p6 }
  0x52   : > { %p8699_p4 = pneg %p8698_p1 }
  0x54   : > { %p8706_p10 = pnand %p8705_p9, %p8699_p4 }
  0x56   : > { %8709 = shalt.err (!%p8706_p10)
}
  0x57   : > { %s11154_s23 = smov 128   ;;  %s8971_s20 = smov 8  }
  0x58   : > { %8093 = dma.hbm_to_vmem [thread:$0]  (!%p9148_p5), %s11180_s29, 4096, %s9144_s0, [#allocation8], %s11154_s23, %s11154_s23, %s8971_s20  }
  0x59   : > { %s11181_s13 = sld [smem:[#allocation55_spill]] }
  0x5f   : > { %s8710_s28 = scalar_lea.hbm %s11181_s13, 4096 }
  0x60   : > { %p8711_p11 = scmp.ne.s32.totalorder %s11181_s13, %s8710_s28  ;;  %p8717_p0 = scmp.lt.u32.totalorder %s8710_s28, %s11181_s13 }
  0x62   : > { %p8713_p12 = pnand %p8711_p11, %p9164_p7 }
  0x64   : > { %p8714_p13 = pneg %p8713_p12 }
  0x66   : > { %p8719_p1 = pnand %p8717_p0, %p8714_p13 }
  0x68   : > { %8722 = shalt.err (!%p8719_p1)
}
  0x69   : > { %s8723_s0 = scalar_lea.vmem %s9152_s1, 4096  ;;  %p8731_p9 = scmp.lt.s32.totalorder %s9152_s1, %s9152_s1 }
  0x6a   : > { %p8724_p4 = scmp.ne.s32.totalorder %s9152_s1, %s8723_s0  ;;  %p8732_p10 = scmp.lt.s32.totalorder %s8723_s0, %s8723_s0 }
  0x6c   : > { %p8726_p6 = pnand %p8724_p4, %p9164_p7  ;;  %p8733_p11 = por %p8732_p10, %p8731_p9 }
  0x6e   : > { %p8727_p8 = pneg %p8726_p6 }
  0x70   : > { %p8734_p12 = pnand %p8733_p11, %p8727_p8 }
  0x72   : > { %8737 = shalt.err (!%p8734_p12)
}
  0x73   : > { %8099 = dma.hbm_to_vmem [thread:$0]  (!%p9148_p5), %s11181_s13, 4096, %s9152_s1, [#allocation11], %s11154_s23, %s11154_s23, %s8971_s20  }
  0x74   : > { %s8738_s3 = scalar_lea.hbm %s11129_s17, 4096 }
  0x75   : > { %p8739_p13 = scmp.ne.s32.totalorder %s11129_s17, %s8738_s3  ;;  %p8745_p4 = scmp.lt.u32.totalorder %s8738_s3, %s11129_s17 }
  0x77   : > { %p8741_p0 = pnand %p8739_p13, %p9164_p7 }
  0x79   : > { %p8742_p1 = pneg %p8741_p0 }
  0x7b   : > { %p8747_p6 = pnand %p8745_p4, %p8742_p1 }
  0x7d   : > { %8750 = shalt.err (!%p8747_p6)
}
  0x7e   : > { %s8751_s0 = scalar_lea.vmem %s775_s11, 4096  ;;  %p8759_p11 = scmp.lt.s32.totalorder %s775_s11, %s775_s11 }
  0x7f   : > { %p8752_p8 = scmp.ne.s32.totalorder %s775_s11, %s8751_s0  ;;  %p8760_p12 = scmp.lt.s32.totalorder %s8751_s0, %s8751_s0 }
  0x81   : > { %p8754_p9 = pnand %p8752_p8, %p9164_p7  ;;  %p8761_p2 = por %p8760_p12, %p8759_p11 }
  0x83   : > { %p8755_p10 = pneg %p8754_p9 }
  0x85   : > { %p8762_p3 = pnand %p8761_p2, %p8755_p10 }
  0x87   : > { %8765 = shalt.err (!%p8762_p3)
}
  0x88   : > { %8105 = dma.hbm_to_vmem [thread:$0]  (!%p9148_p5), %s11129_s17, 4096, %s775_s11, [#allocation14], %s11154_s23, %s11154_s23, %s8971_s20  }
  0x89   : > { %s8972_s25 = smov [#allocation2]   ;;  %s8973_s2 = smov [#allocation6]  }
  0x8a   : > { %s663_s30 = sshll.u32 %s8972_s25, 4  ;;  %s691_s3 = sshll.u32 %s8973_s2, 4  ;;  %s664_s30 = int_to_ptr.vmem [resolvable:$true] %s663_s30  ;;  %s692_s3 = int_to_ptr.vmem [resolvable:$true] %s691_s3 }
  0x8b   : > { %s11182_s27 = sld [smem:[#allocation45_spill]] }
  0x91   : > { %s8766_s8 = scalar_lea.hbm %s11182_s27, 1024 }
  0x92   : > { %p8767_p2 = scmp.ne.s32.totalorder %s11182_s27, %s8766_s8  ;;  %p8773_p0 = scmp.lt.u32.totalorder %s8766_s8, %s11182_s27 }
  0x94   : > { %p8769_p3 = pnand %p8767_p2, %p9164_p7 }
  0x96   : > { %p8770_p13 = pneg %p8769_p3 }
  0x98   : > { %p8775_p1 = pnand %p8773_p0, %p8770_p13 }
  0x9a   : > { %8778 = shalt.err (!%p8775_p1)
}
  0x9b   : > { %s8779_s11 = scalar_lea.vmem %s664_s30, 1024  ;;  %p8787_p9 = scmp.lt.s32.totalorder %s664_s30, %s664_s30 }
  0x9c   : > { %p8780_p4 = scmp.ne.s32.totalorder %s664_s30, %s8779_s11  ;;  %p8788_p10 = scmp.lt.s32.totalorder %s8779_s11, %s8779_s11 }
  0x9e   : > { %p8782_p6 = pnand %p8780_p4, %p9164_p7  ;;  %p8789_p11 = por %p8788_p10, %p8787_p9 }
  0xa0   : > { %p8783_p8 = pneg %p8782_p6 }
  0xa2   : > { %p8790_p12 = pnand %p8789_p11, %p8783_p8 }
  0xa4   : > { %8793 = shalt.err (!%p8790_p12)
}
  0xa5   : > { %8084 = dma.hbm_to_vmem [thread:$0]  (!%p9148_p5), %s11182_s27, 1024, %s664_s30, [#allocation3], %s11154_s23, %s11154_s23, %s8971_s20  }
  0xa6   : > { %s11183_s2 = sld [smem:[#allocation48_spill]] }
  0xac   : > { %s8794_s28 = scalar_lea.hbm %s11183_s2, 32 }
  0xad   : > { %p8795_p2 = scmp.ne.s32.totalorder %s11183_s2, %s8794_s28  ;;  %p8801_p0 = scmp.lt.u32.totalorder %s8794_s28, %s11183_s2 }
  0xaf   : > { %p8797_p3 = pnand %p8795_p2, %p9164_p7 }
  0xb1   : > { %p8798_p13 = pneg %p8797_p3 }
  0xb3   : > { %p8803_p1 = pnand %p8801_p0, %p8798_p13 }
  0xb5   : > { %8806 = shalt.err (!%p8803_p1)
}
  0xb6   : > { %s8807_s11 = scalar_lea.vmem %s692_s3, 32  ;;  %p8815_p9 = scmp.lt.s32.totalorder %s692_s3, %s692_s3 }
  0xb7   : > { %p8808_p4 = scmp.ne.s32.totalorder %s692_s3, %s8807_s11  ;;  %p8816_p10 = scmp.lt.s32.totalorder %s8807_s11, %s8807_s11 }
  0xb9   : > { %p8810_p6 = pnand %p8808_p4, %p9164_p7  ;;  %p8817_p11 = por %p8816_p10, %p8815_p9 }
  0xbb   : > { %p8811_p8 = pneg %p8810_p6 }
  0xbd   : > { %p8818_p12 = pnand %p8817_p11, %p8811_p8 }
  0xbf   : > { %8821 = shalt.err (!%p8818_p12)
}
  0xc0   : > { %8090 = dma.hbm_to_vmem [thread:$0]  (!%p9148_p5), %s11183_s2, 32, %s692_s3, [#allocation5]  }
  0xc1   : > { %s8974_s29 = smov [#allocation9]   ;;  %s8975_s25 = smov [#allocation12]  }
  0xc2   : > { %s729_s4 = sshll.u32 %s8974_s29, 4  ;;  %s758_s28 = sshll.u32 %s8975_s25, 4  ;;  %s730_s4 = int_to_ptr.vmem [resolvable:$true] %s729_s4  ;;  %s759_s28 = int_to_ptr.vmem [resolvable:$true] %s758_s28 }
  0xc3   : > { %s8822_s0 = scalar_lea.hbm %s11124_s12, 1024 }
  0xc4   : > { %p8823_p2 = scmp.ne.s32.totalorder %s11124_s12, %s8822_s0  ;;  %p8829_p0 = scmp.lt.u32.totalorder %s8822_s0, %s11124_s12 }
  0xc6   : > { %p8825_p3 = pnand %p8823_p2, %p9164_p7 }
  0xc8   : > { %p8826_p13 = pneg %p8825_p3 }
  0xca   : > { %p8831_p1 = pnand %p8829_p0, %p8826_p13 }
  0xcc   : > { %8834 = shalt.err (!%p8831_p1)
}
  0xcd   : > { %s8835_s3 = scalar_lea.vmem %s730_s4, 1024  ;;  %p8843_p9 = scmp.lt.s32.totalorder %s730_s4, %s730_s4 }
  0xce   : > { %p8836_p4 = scmp.ne.s32.totalorder %s730_s4, %s8835_s3  ;;  %p8844_p10 = scmp.lt.s32.totalorder %s8835_s3, %s8835_s3 }
  0xd0   : > { %p8838_p6 = pnand %p8836_p4, %p9164_p7  ;;  %p8845_p11 = por %p8844_p10, %p8843_p9 }
  0xd2   : > { %p8839_p8 = pneg %p8838_p6 }
  0xd4   : > { %p8846_p12 = pnand %p8845_p11, %p8839_p8 }
  0xd6   : > { %8849 = shalt.err (!%p8846_p12)
}
  0xd7   : > { %s11184_s13 = smov 128   ;;  %s8850_s8 = scalar_lea.hbm %s11127_s15, 4096 }
  0xd8   : > { %8096 = dma.hbm_to_vmem [thread:$0]  (!%p9148_p5), %s11124_s12, 1024, %s730_s4, [#allocation8], %s11184_s13, %s11184_s13, %s8971_s20  }
  0xd9   : > { %p8851_p2 = scmp.ne.s32.totalorder %s11127_s15, %s8850_s8  ;;  %p8857_p0 = scmp.lt.u32.totalorder %s8850_s8, %s11127_s15 }
  0xdb   : > { %p8853_p3 = pnand %p8851_p2, %p9164_p7 }
  0xdd   : > { %p8854_p13 = pneg %p8853_p3 }
  0xdf   : > { %p8859_p1 = pnand %p8857_p0, %p8854_p13 }
  0xe1   : > { %8862 = shalt.err (!%p8859_p1)
}
  0xe2   : > { %s8863_s3 = scalar_lea.vmem %s759_s28, 4096  ;;  %p8871_p9 = scmp.lt.s32.totalorder %s759_s28, %s759_s28 }
  0xe3   : > { %p8864_p4 = scmp.ne.s32.totalorder %s759_s28, %s8863_s3  ;;  %p8872_p10 = scmp.lt.s32.totalorder %s8863_s3, %s8863_s3 }
  0xe5   : > { %p8866_p6 = pnand %p8864_p4, %p9164_p7  ;;  %p8873_p11 = por %p8872_p10, %p8871_p9 }
  0xe7   : > { %p8867_p8 = pneg %p8866_p6 }
  0xe9   : > { %p8874_p12 = pnand %p8873_p11, %p8867_p8 }
  0xeb   : > { %8877 = shalt.err (!%p8874_p12)
}
  0xec   : > { %8102 = dma.hbm_to_vmem [thread:$0]  (!%p9148_p5), %s11127_s15, 4096, %s759_s28, [#allocation11], %s11184_s13, %s11184_s13, %s8971_s20  }
  0xed   : > { %s8976_s29 = smov [#allocation15]   ;;  %s8977_s6 = smov [#allocation16]  }
  0xee   : > { %s790_s25 = sshll.u32 %s8976_s29, 4  ;;  %s806_s8 = sshll.u32 %s8977_s6, 4  ;;  %s791_s25 = int_to_ptr.vmem [resolvable:$true] %s790_s25  ;;  %s807_s8 = int_to_ptr.vmem [resolvable:$true] %s806_s8 }
  0xef   : > { %s8878_s11 = scalar_lea.hbm %s11131_s19, 4096 }
  0xf0   : > { %p8879_p2 = scmp.ne.s32.totalorder %s11131_s19, %s8878_s11  ;;  %p8885_p0 = scmp.lt.u32.totalorder %s8878_s11, %s11131_s19 }
  0xf2   : > { %p8881_p3 = pnand %p8879_p2, %p9164_p7 }
  0xf4   : > { %p8882_p13 = pneg %p8881_p3 }
  0xf6   : > { %p8887_p1 = pnand %p8885_p0, %p8882_p13 }
  0xf8   : > { %8890 = shalt.err (!%p8887_p1)
}
  0xf9   : > { %s8891_s28 = scalar_lea.vmem %s791_s25, 4096  ;;  %p8899_p9 = scmp.lt.s32.totalorder %s791_s25, %s791_s25 }
  0xfa   : > { %p8892_p4 = scmp.ne.s32.totalorder %s791_s25, %s8891_s28  ;;  %p8900_p10 = scmp.lt.s32.totalorder %s8891_s28, %s8891_s28 }
  0xfc   : > { %p8894_p6 = pnand %p8892_p4, %p9164_p7  ;;  %p8901_p11 = por %p8900_p10, %p8899_p9 }
  0xfe   : > { %p8895_p8 = pneg %p8894_p6 }
 0x100   : > { %p8902_p12 = pnand %p8901_p11, %p8895_p8 }
 0x102   : > { %8905 = shalt.err (!%p8902_p12)
}
 0x103   : > { %8108 = dma.hbm_to_vmem [thread:$0]  (!%p9148_p5), %s11131_s19, 4096, %s791_s25, [#allocation14], %s11184_s13, %s11184_s13, %s8971_s20  }
 0x104   : > { %s8906_s0 = scalar_lea.hbm %s11133_s21, 2048 }
 0x105   : > { %p8907_p2 = scmp.ne.s32.totalorder %s11133_s21, %s8906_s0  ;;  %p8913_p0 = scmp.lt.u32.totalorder %s8906_s0, %s11133_s21 }
 0x107   : > { %p8909_p3 = pnand %p8907_p2, %p9164_p7 }
 0x109   : > { %p8910_p13 = pneg %p8909_p3 }
 0x10b   : > { %p8915_p1 = pnand %p8913_p0, %p8910_p13 }
 0x10d   : > { %8918 = shalt.err (!%p8915_p1)
}
 0x10e   : > { %s8919_s4 = scalar_lea.vmem %s807_s8, 2048  ;;  %p8927_p9 = scmp.lt.s32.totalorder %s807_s8, %s807_s8 }
 0x10f   : > { %p8920_p4 = scmp.ne.s32.totalorder %s807_s8, %s8919_s4  ;;  %p8928_p10 = scmp.lt.s32.totalorder %s8919_s4, %s8919_s4 }
 0x111   : > { %p8922_p6 = pnand %p8920_p4, %p9164_p7  ;;  %p8929_p11 = por %p8928_p10, %p8927_p9 }
 0x113   : > { %p8923_p8 = pneg %p8922_p6 }
 0x115   : > { %p8930_p12 = pnand %p8929_p11, %p8923_p8 }
 0x117   : > { %8933 = shalt.err (!%p8930_p12)
}
 0x118   : > { %s8978_s20 = smov 64   ;;  %s8979_s13 = smov 4  }
 0x119   : > { %8111 = dma.hbm_to_vmem [thread:$0]  (!%p9148_p5), %s11133_s21, 2048, %s807_s8, [#allocation17], %s8978_s20, %s8978_s20, %s8979_s13  }
 0x11a   : > { %p11185_p2 = scmp.ne.s32.totalorder %s11176_s5, 0 }
 0x11c   : > { %855 = sbr.rel (%p11185_p2) target bundleno = 3011 (0xbc3), region = 128 }
 0x123   : > { %p11186_p3 = scmp.ne.s32.totalorder %s11175_s9, 0 }
 0x125   : > { %8939 = dma.done.wait (%p11186_p3), [#allocation3], 1024  }
 0x126   : > { %8941 = vsyncadd (%p11186_p3), [#allocation3], 4294966272 }
 0x127   : > { %8943 = dma.done.wait (%p11186_p3), [#allocation5], 64  }
 0x128   : > { %8945 = vsyncadd (%p11186_p3), [#allocation5], 4294967232 }
 0x129   : > { %8947 = dma.done.wait (%p11186_p3), [#allocation8], 5120  }
 0x12a   : > { %8949 = vsyncadd (%p11186_p3), [#allocation8], 4294962176 }
 0x12b   : > { %8951 = dma.done.wait (%p11186_p3), [#allocation11], 8192  }
 0x12c   : > { %8953 = vsyncadd (%p11186_p3), [#allocation11], 4294959104 }
 0x12d   : > { %8955 = dma.done.wait (%p11186_p3), [#allocation14], 8192  }
 0x12e   : > { %8957 = vsyncadd (%p11186_p3), [#allocation14], 4294959104 }
 0x12f   : > { %8959 = dma.done.wait (%p11186_p3), [#allocation17], 2048  }
 0x130   : > { %8961 = vsyncadd (%p11186_p3), [#allocation17], 4294965248  ;;  %v8980_v0 = vmov 0   ;;  %s11187_s26 = sadd.s32 4294967295, %s8964_s7   ;;  %vm1238_vm0 = vcmask 1046528   ;;  %vm1239_vm1 = vcmask 1047552  }
 0x131   : > { %1280 = vmatprep.mubr.bf16.mxu0 %v8980_v0  ;;  %s7191_s5 = sshll.u32 %s11187_s26, 5  ;;  %v8156_v1 = vld [vmem:[#allocation2 + $0x4] ss:$8 sps:$4 sm:$0xff]   ;;  %v8158_v2 = vld [vmem:[#allocation2] ss:$8 sps:$4 sm:$0xff]   ;;  %v8981_v4 = vmov 65535  }
 0x132   : > { %p969_p5 = scmp.lt.s32.totalorder %s7191_s5, 63  ;;  %1248 = vmatprep.subr.bf16.mxu0 %v8156_v1  ;;  %v8159_v3 = vld [vmem:[#allocation2 + $0x14] ss:$8 sps:$4 sm:$0xff]   ;;  %v1240_v5 = vsel %vm1238_vm0, 4294967295, %v8981_v4  ;;  %v8161_v6 = vld [vmem:[#allocation2 + $0x10] ss:$8 sps:$4 sm:$0xff]   ;;  %v1061_v1 = vlaneseq }
 0x133   : > { %1249 = vmatpush1.bf16.msra.mxu0 %v8158_v2  ;;  %v8162_v7 = vld [vmem:[#allocation2 + $0x24] ss:$8 sps:$4 sm:$0xff]   ;;  %v8165_v8 = vld [vmem:[#allocation2 + $0x34] ss:$8 sps:$4 sm:$0xff]   ;;  %s11188_s2 = sld [smem:[#allocation43_spill]]  ;;  %v9419_v9 = vsel %vm1239_vm1, %v1240_v5, 0 }
 0x134   : > { %s11240_s5 = smov (!%p969_p5, %s7191_s5), 63  ;;  %1250 = vmatprep.subr.bf16.mxu0 %v8159_v3  ;;  %v8164_v10 = vld [vmem:[#allocation2 + $0x20] ss:$8 sps:$4 sm:$0xff]   ;;  %v8167_v11 = vld [vmem:[#allocation2 + $0x30] ss:$8 sps:$4 sm:$0xff]   ;;  %v1246_v12 = vand.u32 %v8165_v8, %v9419_v9  ;;  %vm1189_vm2 = vcmask 515072  }
 0x135   : > { %s7192_s10 = sshll.u32 %s11240_s5, 2  ;;  %v1243_v13 = vand.u32 %v8167_v11, %v9419_v9  ;;  %s11189_s0 = sld [smem:[#allocation47_spill]]  ;;  %v1062_v5 = vshrl.u32 %v1061_v1, 7  ;;  %vm5902_vm3 = vcmask 1044480   ;;  %vm5903_vm4 = vcmask 1045504  }
 0x136   : > { %s11190_s4 = sld [smem:[#allocation49_spill]]  ;;  %s11191_s29 = sld [smem:[#allocation51_spill]]  ;;  %vm5853_vm5 = vcmask 220160   ;;  %vm6967_vm6 = vcmask 31744  }
 0x137   : > { %1251 = vmatpush1.bf16.msra.mxu0 %v8161_v6  ;;  %v9578_v6 = vsub.s32 0, %v1062_v5  ;;  %v9580_v8 = vsub.s32 1, %v1062_v5  ;;  %s11193_s11 = sld [smem:[#allocation52_spill]]  ;;  %s11194_s20 = sld [smem:[#allocation54_spill]] }
 0x138   : > { %1252 = vmatprep.subr.bf16.mxu0 %v8162_v7  ;;  %v1059_v7 = vld [vmem:[#allocation4] sm:$0x3]  ;;  %s11195_s6 = sld [smem:[#allocation44_spill]]  ;;  %s11196_s26 = sld [smem:[#allocation56_spill]] }
 0x139   : > { %s9417_s23 = scalar_lea.vmem %s11188_s2, %s7192_s10  ;;  %s11192_s2 = sld [smem:[#allocation50_spill]] }
 0x13a   : > { %v8168_v14 = vld [vmem:[%s9417_s23] sm:$0xff]   ;;  %v8169_v15 = vld [vmem:[%s9417_s23 + $0x8] sm:$0xff]   ;;  %v8170_v22 = vld [vmem:[%s9417_s23 + $0x10] sm:$0xff]   ;;  %s11217_s30 = sld [smem:[#allocation57_spill]]  ;;  %s11218_s13 = sld [smem:[#allocation59_spill]] }
 0x13b   : > { %1253 = vmatpush1.bf16.msra.mxu0 %v8164_v10  ;;  %v8184_v16 = vld [vmem:[%s11189_s0 + $0x4] ss:$8 sps:$4 sm:$0xff]   ;;  %v8186_v17 = vld [vmem:[%s11189_s0] ss:$8 sps:$4 sm:$0xff]   ;;  %v8187_v18 = vld [vmem:[%s11189_s0 + $0x14] ss:$8 sps:$4 sm:$0xff]  }
 0x13c   : > { %1254 = vmatprep.subr.bf16.mxu0 %v1246_v12  ;;  %1741 = vmatprep.subr.bf16.mxu1 %v8184_v16  ;;  %v8189_v19 = vld [vmem:[%s11189_s0 + $0x10] ss:$8 sps:$4 sm:$0xff]   ;;  %v8190_v20 = vld [vmem:[%s11189_s0 + $0x24] ss:$8 sps:$4 sm:$0xff]   ;;  %v8192_v21 = vld [vmem:[%s11189_s0 + $0x20] ss:$8 sps:$4 sm:$0xff]   ;;  %v9589_v12 = vrot.slane %v1059_v7, %v9578_v6 }
 0x13d   : > { %1742 = vmatpush1.bf16.msra.mxu1 %v8186_v17  ;;  %v8193_v23 = vld [vmem:[%s11189_s0 + $0x34] ss:$8 sps:$4 sm:$0xff]   ;;  %v8195_v24 = vld [vmem:[%s11189_s0 + $0x30] ss:$8 sps:$4 sm:$0xff]   ;;  %v8196_v25 = vld [vmem:[%s11189_s0 + $0x44] ss:$8 sps:$4 sm:$0xff]  }
 0x13e   : > { %1743 = vmatprep.subr.bf16.mxu1 %v8187_v18  ;;  %v8198_v26 = vld [vmem:[%s11189_s0 + $0x40] ss:$8 sps:$4 sm:$0xff]   ;;  %v8171_v27 = vld [vmem:[%s9417_s23 + $0x18] sm:$0xff]   ;;  %v8202_v30 = vld [vmem:[%s11189_s0 + $0x64] ss:$8 sps:$4 sm:$0xff]   ;;  %s10413_s1 = scalar_lea.vmem %s11195_s6, %s7192_s10  ;;  %s7196_s10 = sshll.u32 %s11240_s5, 3 }
 0x13f   : > { %1255 = vmatpush1.bf16.msra.mxu0 %v1243_v13  ;;  %v8199_v28 = vld [vmem:[%s11189_s0 + $0x54] ss:$8 sps:$4 sm:$0xff]   ;;  %v8201_v29 = vld [vmem:[%s11189_s0 + $0x50] ss:$8 sps:$4 sm:$0xff]   ;;  %v8204_v31 = vld [vmem:[%s11189_s0 + $0x60] ss:$8 sps:$4 sm:$0xff]   ;;  %v9592_v13 = vrot.slane %v1059_v7, %v9580_v8 }
 0x140   : > { %v8172_v32 = vld [vmem:[%s9417_s23 + $0x20] sm:$0xff]   ;;  %v8205_v33 = vld [vmem:[%s11189_s0 + $0x74] ss:$8 sps:$4 sm:$0xff]   ;;  %v8207_v34 = vld [vmem:[%s11189_s0 + $0x70] ss:$8 sps:$4 sm:$0xff]  }
 0x141   : > { %1744 = vmatpush1.bf16.msra.mxu1 %v8189_v19  ;;  %v8208_v35 = vld [vmem:[%s11189_s0 + $0x84] ss:$8 sps:$4 sm:$0xff]   ;;  %v8210_v36 = vld [vmem:[%s11189_s0 + $0x80] ss:$8 sps:$4 sm:$0xff]   ;;  %v8211_v38 = vld [vmem:[%s11189_s0 + $0x94] ss:$8 sps:$4 sm:$0xff]  }
 0x142   : > { %7221 = vmatmul.mubr.msk.bf16.vlgmr.msra.gmra.mrb[0].mxu0 %vm1189_vm2, %v8168_v14  ;;  %1745 = vmatprep.subr.bf16.mxu1 %v8190_v20  ;;  %v8173_v37 = vld [vmem:[%s9417_s23 + $0x28] sm:$0xff]   ;;  %v8213_v39 = vld [vmem:[%s11189_s0 + $0x90] ss:$8 sps:$4 sm:$0xff]   ;;  %v8217_v43 = vld [vmem:[%s11189_s0 + $0xb4] ss:$8 sps:$4 sm:$0xff]  }
 0x143   : > { %1290 = vmatprep.mubr.bf16.mxu0 %v8980_v0  ;;  %v8214_v40 = vld [vmem:[%s11189_s0 + $0xa4] ss:$8 sps:$4 sm:$0xff]   ;;  %v8216_v41 = vld [vmem:[%s11189_s0 + $0xa0] ss:$8 sps:$4 sm:$0xff]   ;;  %v8174_v42 = vld [vmem:[%s9417_s23 + $0x30] sm:$0xff]  }
 0x144   : > { %v8219_v44 = vld [vmem:[%s11189_s0 + $0xb0] ss:$8 sps:$4 sm:$0xff]   ;;  %v8220_v45 = vld [vmem:[%s11189_s0 + $0xc4] ss:$8 sps:$4 sm:$0xff]   ;;  %v8222_v46 = vld [vmem:[%s11189_s0 + $0xc0] ss:$8 sps:$4 sm:$0xff]  }
 0x145   : > { %1746 = vmatpush1.bf16.msra.mxu1 %v8192_v21  ;;  %v8175_v47 = vld [vmem:[%s9417_s23 + $0x38] sm:$0xff]   ;;  %v8176_v49 = vld [vmem:[%s9417_s23 + $0x40] sm:$0xff]   ;;  %v8177_v50 = vld [vmem:[%s9417_s23 + $0x48] sm:$0xff]  }
 0x146   : > { %1747 = vmatprep.subr.bf16.mxu1 %v8193_v23  ;;  %v8223_v48 = vld [vmem:[%s11189_s0 + $0xd4] ss:$8 sps:$4 sm:$0xff]   ;;  %v8225_v52 = vld [vmem:[%s11189_s0 + $0xd0] ss:$8 sps:$4 sm:$0xff]   ;;  %v8226_v54 = vld [vmem:[%s11189_s0 + $0xe4] ss:$8 sps:$4 sm:$0xff]  }
 0x147   : > { %v8178_v51 = vld [vmem:[%s9417_s23 + $0x50] sm:$0xff]   ;;  %v8179_v53 = vld [vmem:[%s9417_s23 + $0x58] sm:$0xff]   ;;  %v8228_v55 = vld [vmem:[%s11189_s0 + $0xe0] ss:$8 sps:$4 sm:$0xff]  }
 0x148   : > { %v8229_v56 = vld [vmem:[%s11189_s0 + $0xf4] ss:$8 sps:$4 sm:$0xff]   ;;  %v8231_v57 = vld [vmem:[%s11189_s0 + $0xf0] ss:$8 sps:$4 sm:$0xff]   ;;  %v8180_v58 = vld [vmem:[%s9417_s23 + $0x60] sm:$0xff]  }
 0x149   : > { %1748 = vmatpush1.bf16.msra.mxu1 %v8195_v24  ;;  %v8181_v59 = vld [vmem:[%s9417_s23 + $0x68] sm:$0xff]   ;;  %v8182_v60 = vld [vmem:[%s9417_s23 + $0x70] sm:$0xff]   ;;  %v8183_v61 = vld [vmem:[%s9417_s23 + $0x78] sm:$0xff]  }
 0x14a   : > { %7222 = vmatmul.mubr.msk.bf16.gmra.mrb[4].mxu0 %vm1189_vm2, %v8169_v15  ;;  %1749 = vmatprep.subr.bf16.mxu1 %v8196_v25  ;;  %v8232_v62 = vld [vmem:[%s11190_s4] ss:$8 sps:$4 sm:$0xff]   ;;  %v8234_v63 = vld [vmem:[%s11190_s4 + $0x4] ss:$8 sps:$4 sm:$0xff]   ;;  %v8235_v2 = vld [vmem:[%s11190_s4 + $0x10] ss:$8 sps:$4 sm:$0xff]  }
 0x14b   : > { %1300 = vmatprep.mubr.bf16.mxu0 %v8980_v0  ;;  %2234 = vmatprep.subr.bf16.mxu0 %v8234_v63  ;;  %v8237_v3 = vld [vmem:[%s11190_s4 + $0x14] ss:$8 sps:$4 sm:$0xff]   ;;  %v8238_v10 = vld [vmem:[%s11190_s4 + $0x20] ss:$8 sps:$4 sm:$0xff]   ;;  %v8240_v11 = vld [vmem:[%s11190_s4 + $0x24] ss:$8 sps:$4 sm:$0xff]  }
 0x14c   : > { %2235 = vmatpush1.bf16.msra.mxu0 %v8232_v62  ;;  %v8241_v14 = vld [vmem:[%s11190_s4 + $0x30] ss:$8 sps:$4 sm:$0xff]   ;;  %v8243_v15 = vld [vmem:[%s11190_s4 + $0x34] ss:$8 sps:$4 sm:$0xff]   ;;  %v8244_v23 = vld [vmem:[%s11190_s4 + $0x40] ss:$8 sps:$4 sm:$0xff]  }
 0x14d   : > { %1750 = vmatpush1.bf16.msra.mxu1 %v8198_v26  ;;  %2236 = vmatprep.subr.bf16.mxu0 %v8237_v3  ;;  %v8246_v24 = vld [vmem:[%s11190_s4 + $0x44] ss:$8 sps:$4 sm:$0xff]   ;;  %v8249_v26 = vld [vmem:[%s11190_s4 + $0x54] ss:$8 sps:$4 sm:$0xff]   ;;  %v8259_v5 = vld [vmem:[%s11190_s4 + $0x90] ss:$8 sps:$4 sm:$0xff]  }
 0x14e   : > { %1751 = vmatprep.subr.bf16.mxu1 %v8199_v28 }
 0x150   : > { %2237 = vmatpush1.bf16.msra.mxu0 %v8235_v2 }
 0x151   : > { %1752 = vmatpush1.bf16.msra.mxu1 %v8201_v29  ;;  %2238 = vmatprep.subr.bf16.mxu0 %v8240_v11 }
 0x152   : > { %7223 = vmatmul.mubr.msk.bf16.gmra.mrb[8].mxu0 %vm1189_vm2, %v8170_v22  ;;  %1753 = vmatprep.subr.bf16.mxu1 %v8202_v30 }
 0x153   : > { %1310 = vmatprep.mubr.bf16.mxu0 %v8980_v0 }
 0x154   : > { %2239 = vmatpush1.bf16.msra.mxu0 %v8238_v10  ;;  %v8264_v10 = vld [vmem:[%s11190_s4 + $0xa4] ss:$8 sps:$4 sm:$0xff]  }
 0x155   : > { %1754 = vmatpush1.bf16.msra.mxu1 %v8204_v31  ;;  %2240 = vmatprep.subr.bf16.mxu0 %v8243_v15  ;;  %v8247_v31 = vld [vmem:[%s11190_s4 + $0x50] ss:$8 sps:$4 sm:$0xff]  }
 0x156   : > { %1755 = vmatprep.subr.bf16.mxu1 %v8205_v33  ;;  %v8252_v33 = vld [vmem:[%s11190_s4 + $0x64] ss:$8 sps:$4 sm:$0xff]  }
 0x158   : > { %2241 = vmatpush1.bf16.msra.mxu0 %v8241_v14 }
 0x159   : > { %1756 = vmatpush1.bf16.msra.mxu1 %v8207_v34  ;;  %2242 = vmatprep.subr.bf16.mxu0 %v8246_v24 }
 0x15a   : > { %7224 = vmatmul.mubr.msk.bf16.gmra.mrb[12].mxu0 %vm1189_vm2, %v8171_v27  ;;  %1757 = vmatprep.subr.bf16.mxu1 %v8208_v35 }
 0x15b   : > { %1320 = vmatprep.mubr.bf16.mxu0 %v8980_v0 }
 0x15c   : > { %2243 = vmatpush1.bf16.msra.mxu0 %v8244_v23 }
 0x15d   : > { %1758 = vmatpush1.bf16.msra.mxu1 %v8210_v36  ;;  %2244 = vmatprep.subr.bf16.mxu0 %v8249_v26 }
 0x15e   : > { %1759 = vmatprep.subr.bf16.mxu1 %v8211_v38 }
 0x160   : > { %2245 = vmatpush1.bf16.msra.mxu0 %v8247_v31 }
 0x161   : > { %1760 = vmatpush1.bf16.msra.mxu1 %v8213_v39  ;;  %2246 = vmatprep.subr.bf16.mxu0 %v8252_v33 }
 0x162   : > { %7225 = vmatmul.mubr.msk.bf16.gmra.mrb[16].mxu0 %vm1189_vm2, %v8172_v32  ;;  %1761 = vmatprep.subr.bf16.mxu1 %v8214_v40  ;;  %v8250_v40 = vld [vmem:[%s11190_s4 + $0x60] ss:$8 sps:$4 sm:$0xff]  }
 0x163   : > { %1330 = vmatprep.mubr.bf16.mxu0 %v8980_v0 }
 0x164   : > { %2247 = vmatpush1.bf16.msra.mxu0 %v8250_v40  ;;  %v8273_v40 = vld [vmem:[%s11190_s4 + $0xd4] ss:$8 sps:$4 sm:$0xff]  }
 0x165   : > { %1762 = vmatpush1.bf16.msra.mxu1 %v8216_v41 }
 0x166   : > { %1763 = vmatprep.subr.bf16.mxu1 %v8217_v43  ;;  %v8255_v43 = vld [vmem:[%s11190_s4 + $0x74] ss:$8 sps:$4 sm:$0xff]  }
 0x167   : > { %2248 = vmatprep.subr.bf16.mxu0 %v8255_v43 }
 0x169   : > { %1764 = vmatpush1.bf16.msra.mxu1 %v8219_v44 }
 0x16a   : > { %7226 = vmatmul.mubr.msk.bf16.gmra.mrb[20].mxu0 %vm1189_vm2, %v8173_v37  ;;  %1765 = vmatprep.subr.bf16.mxu1 %v8220_v45 }
 0x16b   : > { %1340 = vmatprep.mubr.bf16.mxu0 %v8980_v0 }
 0x16d   : > { %1766 = vmatpush1.bf16.msra.mxu1 %v8222_v46 }
 0x16e   : > { %1767 = vmatprep.subr.bf16.mxu1 %v8223_v48 }
 0x171   : > { %1768 = vmatpush1.bf16.msra.mxu1 %v8225_v52 }
 0x172   : > { %7227 = vmatmul.mubr.msk.bf16.gmra.mrb[24].mxu0 %vm1189_vm2, %v8174_v42  ;;  %1769 = vmatprep.subr.bf16.mxu1 %v8226_v54 }
 0x173   : > { %1350 = vmatprep.mubr.bf16.mxu0 %v8980_v0 }
 0x175   : > { %1770 = vmatpush1.bf16.msra.mxu1 %v8228_v55 }
 0x176   : > { %1771 = vmatprep.subr.bf16.mxu1 %v8229_v56 }
 0x179   : > { %1772 = vmatpush1.bf16.msra.mxu1 %v8231_v57 }
 0x17a   : > { %7228 = vmatmul.mubr.msk.bf16.gmra.mrb[28].mxu0 %vm1189_vm2, %v8175_v47 }
 0x17b   : > { %1360 = vmatprep.mubr.bf16.mxu0 %v8980_v0 }
 0x182   : > { %7229 = vmatmul.mubr.msk.bf16.gmra.mrb[32].mxu0 %vm1189_vm2, %v8176_v49  ;;  %v8253_v49 = vld [vmem:[%s11190_s4 + $0x70] ss:$8 sps:$4 sm:$0xff]  }
 0x183   : > { %1370 = vmatprep.mubr.bf16.mxu0 %v8980_v0  ;;  %2249 = vmatpush1.bf16.msra.mxu0 %v8253_v49 }
 0x18a   : > { %7230 = vmatmul.mubr.msk.bf16.gmra.mrb[36].mxu0 %vm1189_vm2, %v8177_v50 }
 0x18b   : > { %1380 = vmatprep.mubr.bf16.mxu0 %v8980_v0 }
 0x192   : > { %7231 = vmatmul.mubr.msk.bf16.gmra.mrb[40].mxu0 %vm1189_vm2, %v8178_v51  ;;  %v8258_v51 = vld [vmem:[%s11190_s4 + $0x84] ss:$8 sps:$4 sm:$0xff]  }
 0x193   : > { %1390 = vmatprep.mubr.bf16.mxu0 %v8980_v0  ;;  %2250 = vmatprep.subr.bf16.mxu0 %v8258_v51 }
 0x19a   : > { %7232 = vmatmul.mubr.msk.bf16.gmra.mrb[44].mxu0 %vm1189_vm2, %v8179_v53 }
 0x19b   : > { %1400 = vmatprep.mubr.bf16.mxu0 %v8980_v0 }
 0x1a2   : > { %7233 = vmatmul.mubr.msk.bf16.gmra.mrb[48].mxu0 %vm1189_vm2, %v8180_v58  ;;  %v8256_v58 = vld [vmem:[%s11190_s4 + $0x80] ss:$8 sps:$4 sm:$0xff]  }
 0x1a3   : > { %1410 = vmatprep.mubr.bf16.mxu0 %v8980_v0  ;;  %2251 = vmatpush1.bf16.msra.mxu0 %v8256_v58 }
 0x1aa   : > { %7234 = vmatmul.mubr.msk.bf16.gmra.mrb[52].mxu0 %vm1189_vm2, %v8181_v59 }
 0x1ab   : > { %1420 = vmatprep.mubr.bf16.mxu0 %v8980_v0 }
 0x1b2   : > { %7235 = vmatmul.mubr.msk.bf16.gmra.mrb[56].mxu0 %vm1189_vm2, %v8182_v60 }
 0x1b3   : > { %1430 = vmatprep.mubr.bf16.mxu0 %v8980_v0 }
 0x1ba   : > { %7236 = vmatmul.mubr.msk.bf16.gmra.mrb[60].mxu0 %vm1189_vm2, %v8183_v61  ;;  %v8261_v61 = vld [vmem:[%s11190_s4 + $0x94] ss:$8 sps:$4 sm:$0xff]  }
 0x1bb   : > { %2252 = vmatprep.subr.bf16.mxu0 %v8261_v61 }
 0x1bc   : > { %2253 = vmatpush1.bf16.msra.mxu0 %v8259_v5 }
 0x1bd   : > { %2254 = vmatprep.subr.bf16.mxu0 %v8264_v10 }
 0x215   : > { %v1282_v16 = vpop.f32.mrb[0].mxu0 }
 0x216   : > { %v1283_v17 = vadd.f32 %v1282_v16, %v9589_v12  ;;  %v1284_v18 = vpop.f32.mrb[1].mxu0 }
 0x217   : > { %v1286_v19 = vpop.f32.mrb[2].mxu0  ;;  %v1285_v20 = vadd.f32 %v1284_v18, %v9592_v13 }
 0x218   : > { %v1287_v21 = vadd.f32 %v1286_v19, %v9589_v12  ;;  %v1288_v22 = vpop.f32.mrb[3].mxu0  ;;  %v1441_v27 = vmax.f32 %v1283_v17, 0.0  ;;  %v8262_v19 = vld [vmem:[%s11190_s4 + $0xa0] ss:$8 sps:$4 sm:$0xff]  }
 0x219   : > { %v1289_v25 = vadd.f32 %v1288_v22, %v9592_v13  ;;  %v1442_v29 = vmax.f32 %v1285_v20, 0.0  ;;  %v8267_v22 = vld [vmem:[%s11190_s4 + $0xb4] ss:$8 sps:$4 sm:$0xff]   ;;  %2255 = vmatpush1.bf16.msra.mxu0 %v8262_v19 }
 0x21a   : > { %v1443_v28 = vmax.f32 %v1287_v21, 0.0  ;;  %2256 = vmatprep.subr.bf16.mxu0 %v8267_v22 }
 0x21b   : > { %v1444_v30 = vmax.f32 %v1289_v25, 0.0 }
 0x21c   : > { %v1505_v32 = vpack.c.bf16 %v1443_v28, %v1441_v27  ;;  %v8265_v28 = vld [vmem:[%s11190_s4 + $0xb0] ss:$8 sps:$4 sm:$0xff]  }
 0x21d   : > { %v1292_v34 = vpop.f32.mrb[4].mxu0  ;;  %v1506_v35 = vpack.c.bf16 %v1444_v30, %v1442_v29  ;;  %v8270_v30 = vld [vmem:[%s11190_s4 + $0xc4] ss:$8 sps:$4 sm:$0xff]   ;;  %2257 = vmatpush1.bf16.msra.mxu0 %v8265_v28 }
 0x21e   : > { %v1293_v36 = vadd.f32 %v1292_v34, %v9589_v12  ;;  %v1294_v37 = vpop.f32.mrb[5].mxu0  ;;  %2258 = vmatprep.subr.bf16.mxu0 %v8270_v30 }
 0x21f   : > { %v1295_v38 = vadd.f32 %v1294_v37, %v9592_v13  ;;  %v1296_v39 = vpop.f32.mrb[6].mxu0  ;;  %1773 = vmatprep.mubr.bf16.mxu1 %v1506_v35  ;;  %v8268_v37 = vld [vmem:[%s11190_s4 + $0xc0] ss:$8 sps:$4 sm:$0xff]  }
 0x220   : > { %v1297_v41 = vadd.f32 %v1296_v39, %v9589_v12  ;;  %v1298_v42 = vpop.f32.mrb[7].mxu0  ;;  %1774 = vmatmul.mubr.bf16.vlgmr.msra.gmra.mrb[0].mxu1 %v1505_v32  ;;  %v1445_v45 = vmax.f32 %v1293_v36, 0.0 }
 0x221   : > { %v1299_v44 = vadd.f32 %v1298_v42, %v9592_v13  ;;  %v1446_v47 = vmax.f32 %v1295_v38, 0.0  ;;  %2259 = vmatpush1.bf16.msra.mxu0 %v8268_v37 }
 0x222   : > { %v1447_v46 = vmax.f32 %v1297_v41, 0.0  ;;  %2260 = vmatprep.subr.bf16.mxu0 %v8273_v40 }
 0x223   : > { %v1448_v48 = vmax.f32 %v1299_v44, 0.0 }
 0x224   : > { %v1507_v50 = vpack.c.bf16 %v1447_v46, %v1445_v45  ;;  %v8271_v46 = vld [vmem:[%s11190_s4 + $0xd0] ss:$8 sps:$4 sm:$0xff]  }
 0x225   : > { %v1302_v52 = vpop.f32.mrb[8].mxu0  ;;  %v1508_v53 = vpack.c.bf16 %v1448_v48, %v1446_v47  ;;  %v8276_v48 = vld [vmem:[%s11190_s4 + $0xe4] ss:$8 sps:$4 sm:$0xff]   ;;  %2261 = vmatpush1.bf16.msra.mxu0 %v8271_v46 }
 0x226   : > { %v1303_v54 = vadd.f32 %v1302_v52, %v9589_v12  ;;  %v1304_v55 = vpop.f32.mrb[9].mxu0  ;;  %2262 = vmatprep.subr.bf16.mxu0 %v8276_v48 }
 0x227   : > { %v1305_v56 = vadd.f32 %v1304_v55, %v9592_v13  ;;  %v1306_v57 = vpop.f32.mrb[10].mxu0  ;;  %1783 = vmatprep.mubr.bf16.mxu1 %v1508_v53  ;;  %v8274_v55 = vld [vmem:[%s11190_s4 + $0xe0] ss:$8 sps:$4 sm:$0xff]  }
 0x228   : > { %v1307_v59 = vadd.f32 %v1306_v57, %v9589_v12  ;;  %v1308_v60 = vpop.f32.mrb[11].mxu0  ;;  %1784 = vmatmul.mubr.bf16.gmra.mrb[4].mxu1 %v1507_v50  ;;  %v1449_v63 = vmax.f32 %v1303_v54, 0.0 }
 0x229   : > { %v1309_v62 = vadd.f32 %v1308_v60, %v9592_v13  ;;  %v1450_v2 = vmax.f32 %v1305_v56, 0.0  ;;  %2263 = vmatpush1.bf16.msra.mxu0 %v8274_v55 }
 0x22a   : > { %v1451_v1 = vmax.f32 %v1307_v59, 0.0 }
 0x22b   : > { %v1452_v3 = vmax.f32 %v1309_v62, 0.0 }
 0x22c   : > { %v1509_v7 = vpack.c.bf16 %v1451_v1, %v1449_v63 }
 0x22d   : > { %v1312_v11 = vpop.f32.mrb[12].mxu0  ;;  %v1510_v14 = vpack.c.bf16 %v1452_v3, %v1450_v2 }
 0x22e   : > { %v1313_v15 = vadd.f32 %v1312_v11, %v9589_v12  ;;  %v1314_v16 = vpop.f32.mrb[13].mxu0 }
 0x22f   : > { %v1315_v17 = vadd.f32 %v1314_v16, %v9592_v13  ;;  %v1316_v18 = vpop.f32.mrb[14].mxu0  ;;  %1793 = vmatprep.mubr.bf16.mxu1 %v1510_v14 }
 0x230   : > { %v1317_v20 = vadd.f32 %v1316_v18, %v9589_v12  ;;  %v1318_v21 = vpop.f32.mrb[15].mxu0  ;;  %1794 = vmatmul.mubr.bf16.gmra.mrb[8].mxu1 %v1509_v7  ;;  %v1453_v24 = vmax.f32 %v1313_v15, 0.0 }
 0x231   : > { %v1319_v23 = vadd.f32 %v1318_v21, %v9592_v13  ;;  %v1454_v26 = vmax.f32 %v1315_v17, 0.0 }
 0x232   : > { %v1455_v25 = vmax.f32 %v1317_v20, 0.0 }
 0x233   : > { %v1456_v27 = vmax.f32 %v1319_v23, 0.0 }
 0x234   : > { %v1511_v29 = vpack.c.bf16 %v1455_v25, %v1453_v24 }
 0x235   : > { %v1322_v31 = vpop.f32.mrb[16].mxu0  ;;  %v1512_v32 = vpack.c.bf16 %v1456_v27, %v1454_v26 }
 0x236   : > { %v1323_v33 = vadd.f32 %v1322_v31, %v9589_v12  ;;  %v1324_v34 = vpop.f32.mrb[17].mxu0 }
 0x237   : > { %v1325_v35 = vadd.f32 %v1324_v34, %v9592_v13  ;;  %v1326_v36 = vpop.f32.mrb[18].mxu0  ;;  %1803 = vmatprep.mubr.bf16.mxu1 %v1512_v32 }
 0x238   : > { %v1327_v38 = vadd.f32 %v1326_v36, %v9589_v12  ;;  %v1328_v39 = vpop.f32.mrb[19].mxu0  ;;  %1804 = vmatmul.mubr.bf16.gmra.mrb[12].mxu1 %v1511_v29  ;;  %v1457_v42 = vmax.f32 %v1323_v33, 0.0 }
 0x239   : > { %v1329_v41 = vadd.f32 %v1328_v39, %v9592_v13  ;;  %v1458_v44 = vmax.f32 %v1325_v35, 0.0 }
 0x23a   : > { %v1459_v43 = vmax.f32 %v1327_v38, 0.0 }
 0x23b   : > { %v1460_v45 = vmax.f32 %v1329_v41, 0.0 }
 0x23c   : > { %v1513_v47 = vpack.c.bf16 %v1459_v43, %v1457_v42 }
 0x23d   : > { %v1332_v49 = vpop.f32.mrb[20].mxu0  ;;  %v1514_v50 = vpack.c.bf16 %v1460_v45, %v1458_v44 }
 0x23e   : > { %v1333_v51 = vadd.f32 %v1332_v49, %v9589_v12  ;;  %v1334_v52 = vpop.f32.mrb[21].mxu0 }
 0x23f   : > { %v1335_v53 = vadd.f32 %v1334_v52, %v9592_v13  ;;  %v1336_v54 = vpop.f32.mrb[22].mxu0  ;;  %1813 = vmatprep.mubr.bf16.mxu1 %v1514_v50 }
 0x240   : > { %v1337_v56 = vadd.f32 %v1336_v54, %v9589_v12  ;;  %v1338_v57 = vpop.f32.mrb[23].mxu0  ;;  %1814 = vmatmul.mubr.bf16.gmra.mrb[16].mxu1 %v1513_v47  ;;  %v1461_v59 = vmax.f32 %v1333_v51, 0.0 }
 0x241   : > { %v1339_v58 = vadd.f32 %v1338_v57, %v9592_v13  ;;  %v1462_v61 = vmax.f32 %v1335_v53, 0.0 }
 0x242   : > { %v1463_v60 = vmax.f32 %v1337_v56, 0.0 }
 0x243   : > { %v1464_v62 = vmax.f32 %v1339_v58, 0.0 }
 0x244   : > { %v1515_v63 = vpack.c.bf16 %v1463_v60, %v1461_v59 }
 0x245   : > { %v1342_v1 = vpop.f32.mrb[24].mxu0  ;;  %v1516_v2 = vpack.c.bf16 %v1464_v62, %v1462_v61 }
 0x246   : > { %v1343_v3 = vadd.f32 %v1342_v1, %v9589_v12  ;;  %v1344_v5 = vpop.f32.mrb[25].mxu0 }
 0x247   : > { %v1345_v7 = vadd.f32 %v1344_v5, %v9592_v13  ;;  %v1346_v10 = vpop.f32.mrb[26].mxu0  ;;  %1823 = vmatprep.mubr.bf16.mxu1 %v1516_v2 }
 0x248   : > { %v1347_v11 = vadd.f32 %v1346_v10, %v9589_v12  ;;  %v1348_v14 = vpop.f32.mrb[27].mxu0  ;;  %1824 = vmatmul.mubr.bf16.gmra.mrb[20].mxu1 %v1515_v63  ;;  %v1465_v16 = vmax.f32 %v1343_v3, 0.0 }
 0x249   : > { %v1349_v15 = vadd.f32 %v1348_v14, %v9592_v13  ;;  %v1466_v18 = vmax.f32 %v1345_v7, 0.0 }
 0x24a   : > { %v1467_v17 = vmax.f32 %v1347_v11, 0.0 }
 0x24b   : > { %v1468_v19 = vmax.f32 %v1349_v15, 0.0 }
 0x24c   : > { %v1517_v20 = vpack.c.bf16 %v1467_v17, %v1465_v16 }
 0x24d   : > { %v1352_v21 = vpop.f32.mrb[28].mxu0  ;;  %v1518_v22 = vpack.c.bf16 %v1468_v19, %v1466_v18 }
 0x24e   : > { %v1353_v23 = vadd.f32 %v1352_v21, %v9589_v12  ;;  %v1354_v24 = vpop.f32.mrb[29].mxu0 }
 0x24f   : > { %v1355_v25 = vadd.f32 %v1354_v24, %v9592_v13  ;;  %v1356_v26 = vpop.f32.mrb[30].mxu0  ;;  %1833 = vmatprep.mubr.bf16.mxu1 %v1518_v22 }
 0x250   : > { %v1357_v27 = vadd.f32 %v1356_v26, %v9589_v12  ;;  %v1358_v28 = vpop.f32.mrb[31].mxu0  ;;  %1834 = vmatmul.mubr.bf16.gmra.mrb[24].mxu1 %v1517_v20  ;;  %v1469_v30 = vmax.f32 %v1353_v23, 0.0 }
 0x251   : > { %v1359_v29 = vadd.f32 %v1358_v28, %v9592_v13  ;;  %v1470_v32 = vmax.f32 %v1355_v25, 0.0 }
 0x252   : > { %v1471_v31 = vmax.f32 %v1357_v27, 0.0 }
 0x253   : > { %v1472_v33 = vmax.f32 %v1359_v29, 0.0 }
 0x254   : > { %v1519_v34 = vpack.c.bf16 %v1471_v31, %v1469_v30 }
 0x255   : > { %v1362_v35 = vpop.f32.mrb[32].mxu0  ;;  %v1520_v36 = vpack.c.bf16 %v1472_v33, %v1470_v32 }
 0x256   : > { %v1363_v37 = vadd.f32 %v1362_v35, %v9589_v12  ;;  %v1364_v38 = vpop.f32.mrb[33].mxu0 }
 0x257   : > { %v1365_v39 = vadd.f32 %v1364_v38, %v9592_v13  ;;  %v1366_v40 = vpop.f32.mrb[34].mxu0  ;;  %1843 = vmatprep.mubr.bf16.mxu1 %v1520_v36 }
 0x258   : > { %v1367_v41 = vadd.f32 %v1366_v40, %v9589_v12  ;;  %v1368_v42 = vpop.f32.mrb[35].mxu0  ;;  %1844 = vmatmul.mubr.bf16.gmra.mrb[28].mxu1 %v1519_v34  ;;  %v1473_v44 = vmax.f32 %v1363_v37, 0.0 }
 0x259   : > { %v1369_v43 = vadd.f32 %v1368_v42, %v9592_v13  ;;  %v1474_v46 = vmax.f32 %v1365_v39, 0.0  ;;  %v8279_v42 = vld [vmem:[%s11190_s4 + $0xf4] ss:$8 sps:$4 sm:$0xff]  }
 0x25a   : > { %v1475_v45 = vmax.f32 %v1367_v41, 0.0  ;;  %2264 = vmatprep.subr.bf16.mxu0 %v8279_v42 }
 0x25b   : > { %v1476_v47 = vmax.f32 %v1369_v43, 0.0 }
 0x25c   : > { %v1521_v48 = vpack.c.bf16 %v1475_v45, %v1473_v44  ;;  %v8277_v44 = vld [vmem:[%s11190_s4 + $0xf0] ss:$8 sps:$4 sm:$0xff]  }
 0x25d   : > { %v1372_v49 = vpop.f32.mrb[36].mxu0  ;;  %v1522_v50 = vpack.c.bf16 %v1476_v47, %v1474_v46  ;;  %2265 = vmatpush1.bf16.msra.mxu0 %v8277_v44  ;;  %v8291_v44 = vld [vmem:[%s11191_s29 + $0x34] ss:$8 sps:$4 sm:$0xff]  }
 0x25e   : > { %v1373_v51 = vadd.f32 %v1372_v49, %v9589_v12  ;;  %v1374_v52 = vpop.f32.mrb[37].mxu0 }
 0x25f   : > { %v1375_v53 = vadd.f32 %v1374_v52, %v9592_v13  ;;  %v1376_v54 = vpop.f32.mrb[38].mxu0  ;;  %1853 = vmatprep.mubr.bf16.mxu1 %v1522_v50 }
 0x260   : > { %v1377_v55 = vadd.f32 %v1376_v54, %v9589_v12  ;;  %v1378_v56 = vpop.f32.mrb[39].mxu0  ;;  %1854 = vmatmul.mubr.bf16.gmra.mrb[32].mxu1 %v1521_v48  ;;  %v1477_v58 = vmax.f32 %v1373_v51, 0.0 }
 0x261   : > { %v1379_v57 = vadd.f32 %v1378_v56, %v9592_v13  ;;  %v1478_v60 = vmax.f32 %v1375_v53, 0.0 }
 0x262   : > { %v1479_v59 = vmax.f32 %v1377_v55, 0.0 }
 0x263   : > { %v1480_v61 = vmax.f32 %v1379_v57, 0.0 }
 0x264   : > { %v1523_v62 = vpack.c.bf16 %v1479_v59, %v1477_v58 }
 0x265   : > { %v1382_v63 = vpop.f32.mrb[40].mxu0  ;;  %v1524_v1 = vpack.c.bf16 %v1480_v61, %v1478_v60 }
 0x266   : > { %v1383_v2 = vadd.f32 %v1382_v63, %v9589_v12  ;;  %v1384_v3 = vpop.f32.mrb[41].mxu0 }
 0x267   : > { %v1385_v5 = vadd.f32 %v1384_v3, %v9592_v13  ;;  %v1386_v7 = vpop.f32.mrb[42].mxu0  ;;  %1863 = vmatprep.mubr.bf16.mxu1 %v1524_v1 }
 0x268   : > { %v1387_v10 = vadd.f32 %v1386_v7, %v9589_v12  ;;  %v1388_v11 = vpop.f32.mrb[43].mxu0  ;;  %1864 = vmatmul.mubr.bf16.gmra.mrb[36].mxu1 %v1523_v62  ;;  %v1481_v15 = vmax.f32 %v1383_v2, 0.0 }
 0x269   : > { %v1389_v14 = vadd.f32 %v1388_v11, %v9592_v13  ;;  %v1482_v17 = vmax.f32 %v1385_v5, 0.0 }
 0x26a   : > { %v1483_v16 = vmax.f32 %v1387_v10, 0.0 }
 0x26b   : > { %v1484_v18 = vmax.f32 %v1389_v14, 0.0 }
 0x26c   : > { %v1525_v19 = vpack.c.bf16 %v1483_v16, %v1481_v15 }
 0x26d   : > { %v1392_v20 = vpop.f32.mrb[44].mxu0  ;;  %v1526_v21 = vpack.c.bf16 %v1484_v18, %v1482_v17 }
 0x26e   : > { %v1393_v22 = vadd.f32 %v1392_v20, %v9589_v12  ;;  %v1394_v23 = vpop.f32.mrb[45].mxu0 }
 0x26f   : > { %v1395_v24 = vadd.f32 %v1394_v23, %v9592_v13  ;;  %v1396_v25 = vpop.f32.mrb[46].mxu0  ;;  %1873 = vmatprep.mubr.bf16.mxu1 %v1526_v21 }
 0x270   : > { %v1397_v26 = vadd.f32 %v1396_v25, %v9589_v12  ;;  %v1398_v27 = vpop.f32.mrb[47].mxu0  ;;  %1874 = vmatmul.mubr.bf16.gmra.mrb[40].mxu1 %v1525_v19  ;;  %v1485_v29 = vmax.f32 %v1393_v22, 0.0 }
 0x271   : > { %v1399_v28 = vadd.f32 %v1398_v27, %v9592_v13  ;;  %v1486_v31 = vmax.f32 %v1395_v24, 0.0 }
 0x272   : > { %v1487_v30 = vmax.f32 %v1397_v26, 0.0 }
 0x273   : > { %v1488_v32 = vmax.f32 %v1399_v28, 0.0 }
 0x274   : > { %v1527_v33 = vpack.c.bf16 %v1487_v30, %v1485_v29 }
 0x275   : > { %v1402_v34 = vpop.f32.mrb[48].mxu0  ;;  %v1528_v35 = vpack.c.bf16 %v1488_v32, %v1486_v31 }
 0x276   : > { %v1403_v36 = vadd.f32 %v1402_v34, %v9589_v12  ;;  %v1404_v37 = vpop.f32.mrb[49].mxu0 }
 0x277   : > { %v1405_v38 = vadd.f32 %v1404_v37, %v9592_v13  ;;  %v1406_v39 = vpop.f32.mrb[50].mxu0  ;;  %1883 = vmatprep.mubr.bf16.mxu1 %v1528_v35  ;;  %v8285_v37 = vld [vmem:[%s11191_s29 + $0x14] ss:$8 sps:$4 sm:$0xff]  }
 0x278   : > { %v1407_v40 = vadd.f32 %v1406_v39, %v9589_v12  ;;  %v1408_v41 = vpop.f32.mrb[51].mxu0  ;;  %1884 = vmatmul.mubr.bf16.gmra.mrb[44].mxu1 %v1527_v33  ;;  %v1489_v45 = vmax.f32 %v1403_v36, 0.0  ;;  %v8280_v36 = vld [vmem:[%s11191_s29] ss:$8 sps:$4 sm:$0xff]  }
 0x279   : > { %v1409_v43 = vadd.f32 %v1408_v41, %v9592_v13  ;;  %v1490_v47 = vmax.f32 %v1405_v38, 0.0  ;;  %v1569_v38 = vld [vmem:[#allocation6] sm:$0x3] }
 0x27a   : > { %v1491_v46 = vmax.f32 %v1407_v40, 0.0  ;;  %v8286_v39 = vld [vmem:[%s11191_s29 + $0x20] ss:$8 sps:$4 sm:$0xff]   ;;  %v8288_v40 = vld [vmem:[%s11191_s29 + $0x24] ss:$8 sps:$4 sm:$0xff]   ;;  %v9755_v41 = vrot.slane %v1569_v38, %v9578_v6  ;;  %v9758_v42 = vrot.slane %v1569_v38, %v9580_v8 }
 0x27b   : > { %v1492_v48 = vmax.f32 %v1409_v43, 0.0  ;;  %v8289_v43 = vld [vmem:[%s11191_s29 + $0x30] ss:$8 sps:$4 sm:$0xff]  }
 0x27c   : > { %v1529_v49 = vpack.c.bf16 %v1491_v46, %v1489_v45 }
 0x27d   : > { %v1412_v50 = vpop.f32.mrb[52].mxu0  ;;  %v1530_v51 = vpack.c.bf16 %v1492_v48, %v1490_v47 }
 0x27e   : > { %v1413_v52 = vadd.f32 %v1412_v50, %v9589_v12  ;;  %v1414_v53 = vpop.f32.mrb[53].mxu0 }
 0x27f   : > { %v1415_v54 = vadd.f32 %v1414_v53, %v9592_v13  ;;  %v1416_v55 = vpop.f32.mrb[54].mxu0  ;;  %1893 = vmatprep.mubr.bf16.mxu1 %v1530_v51  ;;  %v8294_v53 = vld [vmem:[%s11191_s29 + $0x44] ss:$8 sps:$4 sm:$0xff]  }
 0x280   : > { %v1417_v56 = vadd.f32 %v1416_v55, %v9589_v12  ;;  %v1418_v57 = vpop.f32.mrb[55].mxu0  ;;  %1894 = vmatmul.mubr.bf16.gmra.mrb[48].mxu1 %v1529_v49  ;;  %v1493_v59 = vmax.f32 %v1413_v52, 0.0  ;;  %v8292_v52 = vld [vmem:[%s11191_s29 + $0x40] ss:$8 sps:$4 sm:$0xff]   ;;  %v8297_v55 = vld [vmem:[%s11191_s29 + $0x54] ss:$8 sps:$4 sm:$0xff]  }
 0x281   : > { %v1419_v58 = vadd.f32 %v1418_v57, %v9592_v13  ;;  %v1494_v61 = vmax.f32 %v1415_v54, 0.0 }
 0x282   : > { %v1495_v60 = vmax.f32 %v1417_v56, 0.0 }
 0x283   : > { %v1496_v62 = vmax.f32 %v1419_v58, 0.0 }
 0x284   : > { %v1531_v63 = vpack.c.bf16 %v1495_v60, %v1493_v59  ;;  %v8295_v60 = vld [vmem:[%s11191_s29 + $0x50] ss:$8 sps:$4 sm:$0xff]  }
 0x285   : > { %v1422_v1 = vpop.f32.mrb[56].mxu0  ;;  %v1532_v2 = vpack.c.bf16 %v1496_v62, %v1494_v61  ;;  %v8300_v62 = vld [vmem:[%s11191_s29 + $0x64] ss:$8 sps:$4 sm:$0xff]  }
 0x286   : > { %v1423_v3 = vadd.f32 %v1422_v1, %v9589_v12  ;;  %v1424_v5 = vpop.f32.mrb[57].mxu0 }
 0x287   : > { %v1425_v7 = vadd.f32 %v1424_v5, %v9592_v13  ;;  %v1426_v10 = vpop.f32.mrb[58].mxu0  ;;  %1903 = vmatprep.mubr.bf16.mxu1 %v1532_v2 }
 0x288   : > { %v1427_v11 = vadd.f32 %v1426_v10, %v9589_v12  ;;  %v1428_v14 = vpop.f32.mrb[59].mxu0  ;;  %1904 = vmatmul.mubr.bf16.gmra.mrb[52].mxu1 %v1531_v63  ;;  %v1497_v16 = vmax.f32 %v1423_v3, 0.0  ;;  %v8298_v10 = vld [vmem:[%s11191_s29 + $0x60] ss:$8 sps:$4 sm:$0xff]  }
 0x289   : > { %v1429_v15 = vadd.f32 %v1428_v14, %v9592_v13  ;;  %v1498_v18 = vmax.f32 %v1425_v7, 0.0 }
 0x28a   : > { %v1499_v17 = vmax.f32 %v1427_v11, 0.0 }
 0x28b   : > { %v1500_v19 = vmax.f32 %v1429_v15, 0.0  ;;  %v8303_v15 = vld [vmem:[%s11191_s29 + $0x74] ss:$8 sps:$4 sm:$0xff]  }
 0x28c   : > { %v1533_v20 = vpack.c.bf16 %v1499_v17, %v1497_v16 }
 0x28d   : > { %v1432_v21 = vpop.f32.mrb[60].mxu0  ;;  %v1534_v22 = vpack.c.bf16 %v1500_v19, %v1498_v18 }
 0x28e   : > { %v1433_v23 = vadd.f32 %v1432_v21, %v9589_v12  ;;  %v1434_v24 = vpop.f32.mrb[61].mxu0  ;;  %v8301_v21 = vld [vmem:[%s11191_s29 + $0x70] ss:$8 sps:$4 sm:$0xff]  }
 0x28f   : > { %v1435_v25 = vadd.f32 %v1434_v24, %v9592_v13  ;;  %v1436_v26 = vpop.f32.mrb[62].mxu0  ;;  %1913 = vmatprep.mubr.bf16.mxu1 %v1534_v22 }
 0x290   : > { %v1437_v27 = vadd.f32 %v1436_v26, %v9589_v12  ;;  %v1438_v28 = vpop.f32.mrb[63].mxu0  ;;  %1914 = vmatmul.mubr.bf16.gmra.mrb[56].mxu1 %v1533_v20  ;;  %v1501_v30 = vmax.f32 %v1433_v23, 0.0  ;;  %v8282_v12 = vld [vmem:[%s11191_s29 + $0x4] ss:$8 sps:$4 sm:$0xff]  }
 0x291   : > { %v1439_v29 = vadd.f32 %v1438_v28, %v9592_v13  ;;  %v1502_v32 = vmax.f32 %v1435_v25, 0.0  ;;  %2727 = vmatprep.subr.bf16.mxu1 %v8282_v12  ;;  %v8283_v13 = vld [vmem:[%s11191_s29 + $0x10] ss:$8 sps:$4 sm:$0xff]   ;;  %v8306_v23 = vld [vmem:[%s11191_s29 + $0x84] ss:$8 sps:$4 sm:$0xff]  }
 0x292   : > { %v1503_v31 = vmax.f32 %v1437_v27, 0.0  ;;  %2728 = vmatpush1.bf16.msra.mxu1 %v8280_v36 }
 0x293   : > { %v1504_v33 = vmax.f32 %v1439_v29, 0.0  ;;  %2729 = vmatprep.subr.bf16.mxu1 %v8285_v37  ;;  %v8307_v37 = vld [vmem:[%s11191_s29 + $0x90] ss:$8 sps:$4 sm:$0xff]  }
 0x294   : > { %v1535_v34 = vpack.c.bf16 %v1503_v31, %v1501_v30  ;;  %v8304_v30 = vld [vmem:[%s11191_s29 + $0x80] ss:$8 sps:$4 sm:$0xff]  }
 0x295   : > { %v1536_v35 = vpack.c.bf16 %v1504_v33, %v1502_v32  ;;  %v8309_v33 = vld [vmem:[%s11191_s29 + $0x94] ss:$8 sps:$4 sm:$0xff]  }
 0x296   : > { %2730 = vmatpush1.bf16.msra.mxu1 %v8283_v13 }
 0x297   : > { %1923 = vmatprep.mubr.bf16.mxu1 %v1536_v35  ;;  %2731 = vmatprep.subr.bf16.mxu1 %v8288_v40 }
 0x298   : > { %1924 = vmatmul.mubr.bf16.gmra.mrb[60].mxu1 %v1535_v34 }
 0x29a   : > { %2732 = vmatpush1.bf16.msra.mxu1 %v8286_v39  ;;  %v8312_v39 = vld [vmem:[%s11191_s29 + $0xa4] ss:$8 sps:$4 sm:$0xff]  }
 0x29b   : > { %2733 = vmatprep.subr.bf16.mxu1 %v8291_v44 }
 0x29e   : > { %2734 = vmatpush1.bf16.msra.mxu1 %v8289_v43 }
 0x29f   : > { %2735 = vmatprep.subr.bf16.mxu1 %v8294_v53 }
 0x2a2   : > { %2736 = vmatpush1.bf16.msra.mxu1 %v8292_v52 }
 0x2a3   : > { %2737 = vmatprep.subr.bf16.mxu1 %v8297_v55 }
 0x2a6   : > { %2738 = vmatpush1.bf16.msra.mxu1 %v8295_v60 }
 0x2a7   : > { %2739 = vmatprep.subr.bf16.mxu1 %v8300_v62 }
 0x2aa   : > { %2740 = vmatpush1.bf16.msra.mxu1 %v8298_v10  ;;  %v8321_v10 = vld [vmem:[%s11191_s29 + $0xd4] ss:$8 sps:$4 sm:$0xff]  }
 0x2ab   : > { %2741 = vmatprep.subr.bf16.mxu1 %v8303_v15 }
 0x2ae   : > { %2742 = vmatpush1.bf16.msra.mxu1 %v8301_v21 }
 0x2af   : > { %2743 = vmatprep.subr.bf16.mxu1 %v8306_v23 }
 0x2b2   : > { %2744 = vmatpush1.bf16.msra.mxu1 %v8304_v30 }
 0x2b3   : > { %2745 = vmatprep.subr.bf16.mxu1 %v8309_v33 }
 0x2b6   : > { %2746 = vmatpush1.bf16.msra.mxu1 %v8307_v37 }
 0x2b7   : > { %2747 = vmatprep.subr.bf16.mxu1 %v8312_v39 }
 0x2f3   : > { %v1775_v45 = vpop.f32.mrb[0].mxu1 }
 0x2f4   : > { %v1776_v46 = vadd.f32 %v1775_v45, %v9755_v41  ;;  %v1777_v47 = vpop.f32.mrb[1].mxu1 }
 0x2f5   : > { %v1778_v48 = vadd.f32 %v1777_v47, %v9758_v42  ;;  %v1779_v49 = vpop.f32.mrb[2].mxu1 }
 0x2f6   : > { %v1780_v50 = vadd.f32 %v1779_v49, %v9755_v41  ;;  %v1781_v51 = vpop.f32.mrb[3].mxu1  ;;  %v1934_v56 = vmax.f32 %v1776_v46, 0.0 }
 0x2f7   : > { %v1782_v54 = vadd.f32 %v1781_v51, %v9758_v42  ;;  %v1935_v58 = vmax.f32 %v1778_v48, 0.0  ;;  %v8310_v48 = vld [vmem:[%s11191_s29 + $0xa0] ss:$8 sps:$4 sm:$0xff]   ;;  %v8315_v51 = vld [vmem:[%s11191_s29 + $0xb4] ss:$8 sps:$4 sm:$0xff]  }
 0x2f8   : > { %v1936_v57 = vmax.f32 %v1780_v50, 0.0  ;;  %2748 = vmatpush1.bf16.msra.mxu1 %v8310_v48 }
 0x2f9   : > { %v1937_v59 = vmax.f32 %v1782_v54, 0.0  ;;  %2749 = vmatprep.subr.bf16.mxu1 %v8315_v51 }
 0x2fa   : > { %v1998_v61 = vpack.c.bf16 %v1936_v57, %v1934_v56  ;;  %v8313_v57 = vld [vmem:[%s11191_s29 + $0xb0] ss:$8 sps:$4 sm:$0xff]  }
 0x2fb   : > { %v1785_v63 = vpop.f32.mrb[4].mxu1  ;;  %v1999_v1 = vpack.c.bf16 %v1937_v59, %v1935_v58  ;;  %v8318_v59 = vld [vmem:[%s11191_s29 + $0xc4] ss:$8 sps:$4 sm:$0xff]  }
 0x2fc   : > { %v1786_v2 = vadd.f32 %v1785_v63, %v9755_v41  ;;  %v1787_v3 = vpop.f32.mrb[5].mxu1  ;;  %2750 = vmatpush1.bf16.msra.mxu1 %v8313_v57 }
 0x2fd   : > { %v1788_v5 = vadd.f32 %v1787_v3, %v9758_v42  ;;  %v1789_v7 = vpop.f32.mrb[6].mxu1  ;;  %2266 = vmatprep.mubr.bf16.mxu0 %v1999_v1  ;;  %v8316_v3 = vld [vmem:[%s11191_s29 + $0xc0] ss:$8 sps:$4 sm:$0xff]   ;;  %2751 = vmatprep.subr.bf16.mxu1 %v8318_v59 }
 0x2fe   : > { %v1790_v11 = vadd.f32 %v1789_v7, %v9755_v41  ;;  %v1791_v14 = vpop.f32.mrb[7].mxu1  ;;  %2267 = vmatmul.mubr.bf16.vlgmr.msra.gmra.mrb[64].mxu0 %v1998_v61  ;;  %v1938_v17 = vmax.f32 %v1786_v2, 0.0 }
 0x2ff   : > { %v1792_v16 = vadd.f32 %v1791_v14, %v9758_v42  ;;  %v1939_v19 = vmax.f32 %v1788_v5, 0.0 }
 0x300   : > { %v1940_v18 = vmax.f32 %v1790_v11, 0.0  ;;  %2752 = vmatpush1.bf16.msra.mxu1 %v8316_v3 }
 0x301   : > { %v1941_v20 = vmax.f32 %v1792_v16, 0.0  ;;  %2753 = vmatprep.subr.bf16.mxu1 %v8321_v10 }
 0x302   : > { %v2000_v22 = vpack.c.bf16 %v1940_v18, %v1938_v17  ;;  %v8319_v18 = vld [vmem:[%s11191_s29 + $0xd0] ss:$8 sps:$4 sm:$0xff]  }
 0x303   : > { %v1795_v24 = vpop.f32.mrb[8].mxu1  ;;  %v2001_v25 = vpack.c.bf16 %v1941_v20, %v1939_v19  ;;  %v8324_v20 = vld [vmem:[%s11191_s29 + $0xe4] ss:$8 sps:$4 sm:$0xff]  }
 0x304   : > { %v1796_v26 = vadd.f32 %v1795_v24, %v9755_v41  ;;  %v1797_v27 = vpop.f32.mrb[9].mxu1  ;;  %2754 = vmatpush1.bf16.msra.mxu1 %v8319_v18 }
 0x305   : > { %v1798_v28 = vadd.f32 %v1797_v27, %v9758_v42  ;;  %v1799_v29 = vpop.f32.mrb[10].mxu1  ;;  %2276 = vmatprep.mubr.bf16.mxu0 %v2001_v25  ;;  %v8322_v27 = vld [vmem:[%s11191_s29 + $0xe0] ss:$8 sps:$4 sm:$0xff]   ;;  %2755 = vmatprep.subr.bf16.mxu1 %v8324_v20 }
 0x306   : > { %v1800_v31 = vadd.f32 %v1799_v29, %v9755_v41  ;;  %v1801_v32 = vpop.f32.mrb[11].mxu1  ;;  %2277 = vmatmul.mubr.bf16.gmra.mrb[68].mxu0 %v2000_v22  ;;  %v1942_v35 = vmax.f32 %v1796_v26, 0.0 }
 0x307   : > { %v1802_v34 = vadd.f32 %v1801_v32, %v9758_v42  ;;  %v1943_v12 = vmax.f32 %v1798_v28, 0.0 }
 0x308   : > { %v1944_v36 = vmax.f32 %v1800_v31, 0.0  ;;  %2756 = vmatpush1.bf16.msra.mxu1 %v8322_v27 }
 0x309   : > { %v1945_v13 = vmax.f32 %v1802_v34, 0.0 }
 0x30a   : > { %v2002_v38 = vpack.c.bf16 %v1944_v36, %v1942_v35 }
 0x30b   : > { %v1805_v40 = vpop.f32.mrb[12].mxu1  ;;  %v2003_v43 = vpack.c.bf16 %v1945_v13, %v1943_v12 }
 0x30c   : > { %v1806_v44 = vadd.f32 %v1805_v40, %v9755_v41  ;;  %v1807_v45 = vpop.f32.mrb[13].mxu1 }
 0x30d   : > { %v1808_v46 = vadd.f32 %v1807_v45, %v9758_v42  ;;  %v1809_v47 = vpop.f32.mrb[14].mxu1  ;;  %2286 = vmatprep.mubr.bf16.mxu0 %v2003_v43 }
 0x30e   : > { %v1810_v49 = vadd.f32 %v1809_v47, %v9755_v41  ;;  %v1811_v50 = vpop.f32.mrb[15].mxu1  ;;  %2287 = vmatmul.mubr.bf16.gmra.mrb[72].mxu0 %v2002_v38  ;;  %v1946_v53 = vmax.f32 %v1806_v44, 0.0 }
 0x30f   : > { %v1812_v52 = vadd.f32 %v1811_v50, %v9758_v42  ;;  %v1947_v55 = vmax.f32 %v1808_v46, 0.0 }
 0x310   : > { %v1948_v54 = vmax.f32 %v1810_v49, 0.0 }
 0x311   : > { %v1949_v56 = vmax.f32 %v1812_v52, 0.0 }
 0x312   : > { %v2004_v58 = vpack.c.bf16 %v1948_v54, %v1946_v53 }
 0x313   : > { %v1815_v60 = vpop.f32.mrb[16].mxu1  ;;  %v2005_v61 = vpack.c.bf16 %v1949_v56, %v1947_v55 }
 0x314   : > { %v1816_v62 = vadd.f32 %v1815_v60, %v9755_v41  ;;  %v1817_v63 = vpop.f32.mrb[17].mxu1 }
 0x315   : > { %v1818_v1 = vadd.f32 %v1817_v63, %v9758_v42  ;;  %v1819_v2 = vpop.f32.mrb[18].mxu1  ;;  %2296 = vmatprep.mubr.bf16.mxu0 %v2005_v61 }
 0x316   : > { %v1820_v5 = vadd.f32 %v1819_v2, %v9755_v41  ;;  %v1821_v7 = vpop.f32.mrb[19].mxu1  ;;  %2297 = vmatmul.mubr.bf16.gmra.mrb[76].mxu0 %v2004_v58  ;;  %v1950_v14 = vmax.f32 %v1816_v62, 0.0 }
 0x317   : > { %v1822_v11 = vadd.f32 %v1821_v7, %v9758_v42  ;;  %v1951_v16 = vmax.f32 %v1818_v1, 0.0 }
 0x318   : > { %v1952_v15 = vmax.f32 %v1820_v5, 0.0 }
 0x319   : > { %v1953_v17 = vmax.f32 %v1822_v11, 0.0 }
 0x31a   : > { %v2006_v19 = vpack.c.bf16 %v1952_v15, %v1950_v14 }
 0x31b   : > { %v1825_v21 = vpop.f32.mrb[20].mxu1  ;;  %v2007_v22 = vpack.c.bf16 %v1953_v17, %v1951_v16 }
 0x31c   : > { %v1826_v23 = vadd.f32 %v1825_v21, %v9755_v41  ;;  %v1827_v24 = vpop.f32.mrb[21].mxu1 }
 0x31d   : > { %v1828_v25 = vadd.f32 %v1827_v24, %v9758_v42  ;;  %v1829_v26 = vpop.f32.mrb[22].mxu1  ;;  %2306 = vmatprep.mubr.bf16.mxu0 %v2007_v22 }
 0x31e   : > { %v1830_v28 = vadd.f32 %v1829_v26, %v9755_v41  ;;  %v1831_v29 = vpop.f32.mrb[23].mxu1  ;;  %2307 = vmatmul.mubr.bf16.gmra.mrb[80].mxu0 %v2006_v19  ;;  %v1954_v31 = vmax.f32 %v1826_v23, 0.0 }
 0x31f   : > { %v1832_v30 = vadd.f32 %v1831_v29, %v9758_v42  ;;  %v1955_v33 = vmax.f32 %v1828_v25, 0.0 }
 0x320   : > { %v1956_v32 = vmax.f32 %v1830_v28, 0.0 }
 0x321   : > { %v1957_v34 = vmax.f32 %v1832_v30, 0.0 }
 0x322   : > { %v2008_v35 = vpack.c.bf16 %v1956_v32, %v1954_v31 }
 0x323   : > { %v1835_v36 = vpop.f32.mrb[24].mxu1  ;;  %v2009_v12 = vpack.c.bf16 %v1957_v34, %v1955_v33 }
 0x324   : > { %v1836_v13 = vadd.f32 %v1835_v36, %v9755_v41  ;;  %v1837_v37 = vpop.f32.mrb[25].mxu1 }
 0x325   : > { %v1838_v38 = vadd.f32 %v1837_v37, %v9758_v42  ;;  %v1839_v39 = vpop.f32.mrb[26].mxu1  ;;  %2316 = vmatprep.mubr.bf16.mxu0 %v2009_v12 }
 0x326   : > { %v1840_v40 = vadd.f32 %v1839_v39, %v9755_v41  ;;  %v1841_v43 = vpop.f32.mrb[27].mxu1  ;;  %2317 = vmatmul.mubr.bf16.gmra.mrb[84].mxu0 %v2008_v35  ;;  %v1958_v45 = vmax.f32 %v1836_v13, 0.0 }
 0x327   : > { %v1842_v44 = vadd.f32 %v1841_v43, %v9758_v42  ;;  %v1959_v47 = vmax.f32 %v1838_v38, 0.0 }
 0x328   : > { %v1960_v46 = vmax.f32 %v1840_v40, 0.0 }
 0x329   : > { %v1961_v48 = vmax.f32 %v1842_v44, 0.0 }
 0x32a   : > { %v2010_v49 = vpack.c.bf16 %v1960_v46, %v1958_v45 }
 0x32b   : > { %v1845_v50 = vpop.f32.mrb[28].mxu1  ;;  %v2011_v51 = vpack.c.bf16 %v1961_v48, %v1959_v47 }
 0x32c   : > { %v1846_v52 = vadd.f32 %v1845_v50, %v9755_v41  ;;  %v1847_v53 = vpop.f32.mrb[29].mxu1 }
 0x32d   : > { %v1848_v54 = vadd.f32 %v1847_v53, %v9758_v42  ;;  %v1849_v55 = vpop.f32.mrb[30].mxu1  ;;  %2326 = vmatprep.mubr.bf16.mxu0 %v2011_v51 }
 0x32e   : > { %v1850_v56 = vadd.f32 %v1849_v55, %v9755_v41  ;;  %v1851_v57 = vpop.f32.mrb[31].mxu1  ;;  %2327 = vmatmul.mubr.bf16.gmra.mrb[88].mxu0 %v2010_v49  ;;  %v1962_v59 = vmax.f32 %v1846_v52, 0.0 }
 0x32f   : > { %v1852_v58 = vadd.f32 %v1851_v57, %v9758_v42  ;;  %v1963_v61 = vmax.f32 %v1848_v54, 0.0 }
 0x330   : > { %v1964_v60 = vmax.f32 %v1850_v56, 0.0 }
 0x331   : > { %v1965_v62 = vmax.f32 %v1852_v58, 0.0 }
 0x332   : > { %v2012_v63 = vpack.c.bf16 %v1964_v60, %v1962_v59 }
 0x333   : > { %v1855_v1 = vpop.f32.mrb[32].mxu1  ;;  %v2013_v2 = vpack.c.bf16 %v1965_v62, %v1963_v61 }
 0x334   : > { %v1856_v3 = vadd.f32 %v1855_v1, %v9755_v41  ;;  %v1857_v5 = vpop.f32.mrb[33].mxu1 }
 0x335   : > { %v1858_v7 = vadd.f32 %v1857_v5, %v9758_v42  ;;  %v1859_v10 = vpop.f32.mrb[34].mxu1  ;;  %2336 = vmatprep.mubr.bf16.mxu0 %v2013_v2 }
 0x336   : > { %v1860_v11 = vadd.f32 %v1859_v10, %v9755_v41  ;;  %v1861_v14 = vpop.f32.mrb[35].mxu1  ;;  %2337 = vmatmul.mubr.bf16.gmra.mrb[92].mxu0 %v2012_v63  ;;  %v1966_v16 = vmax.f32 %v1856_v3, 0.0 }
 0x337   : > { %v1862_v15 = vadd.f32 %v1861_v14, %v9758_v42  ;;  %v1967_v18 = vmax.f32 %v1858_v7, 0.0  ;;  %v8327_v14 = vld [vmem:[%s11191_s29 + $0xf4] ss:$8 sps:$4 sm:$0xff]  }
 0x338   : > { %v1968_v17 = vmax.f32 %v1860_v11, 0.0  ;;  %2757 = vmatprep.subr.bf16.mxu1 %v8327_v14 }
 0x339   : > { %v1969_v19 = vmax.f32 %v1862_v15, 0.0 }
 0x33a   : > { %v2014_v20 = vpack.c.bf16 %v1968_v17, %v1966_v16  ;;  %v8325_v16 = vld [vmem:[%s11191_s29 + $0xf0] ss:$8 sps:$4 sm:$0xff]  }
 0x33b   : > { %v1865_v21 = vpop.f32.mrb[36].mxu1  ;;  %v2015_v22 = vpack.c.bf16 %v1969_v19, %v1967_v18  ;;  %2758 = vmatpush1.bf16.msra.mxu1 %v8325_v16  ;;  %v8339_v16 = vld [vmem:[#allocation7 + $0x34] ss:$8 sps:$4 sm:$0xff]  }
 0x33c   : > { %v1866_v23 = vadd.f32 %v1865_v21, %v9755_v41  ;;  %v1867_v24 = vpop.f32.mrb[37].mxu1 }
 0x33d   : > { %v1868_v25 = vadd.f32 %v1867_v24, %v9758_v42  ;;  %v1869_v26 = vpop.f32.mrb[38].mxu1  ;;  %2346 = vmatprep.mubr.bf16.mxu0 %v2015_v22 }
 0x33e   : > { %v1870_v27 = vadd.f32 %v1869_v26, %v9755_v41  ;;  %v1871_v28 = vpop.f32.mrb[39].mxu1  ;;  %2347 = vmatmul.mubr.bf16.gmra.mrb[96].mxu0 %v2014_v20  ;;  %v1970_v30 = vmax.f32 %v1866_v23, 0.0 }
 0x33f   : > { %v1872_v29 = vadd.f32 %v1871_v28, %v9758_v42  ;;  %v1971_v32 = vmax.f32 %v1868_v25, 0.0 }
 0x340   : > { %v1972_v31 = vmax.f32 %v1870_v27, 0.0 }
 0x341   : > { %v1973_v33 = vmax.f32 %v1872_v29, 0.0 }
 0x342   : > { %v2016_v34 = vpack.c.bf16 %v1972_v31, %v1970_v30 }
 0x343   : > { %v1875_v35 = vpop.f32.mrb[40].mxu1  ;;  %v2017_v36 = vpack.c.bf16 %v1973_v33, %v1971_v32 }
 0x344   : > { %v1876_v12 = vadd.f32 %v1875_v35, %v9755_v41  ;;  %v1877_v13 = vpop.f32.mrb[41].mxu1 }
 0x345   : > { %v1878_v37 = vadd.f32 %v1877_v13, %v9758_v42  ;;  %v1879_v38 = vpop.f32.mrb[42].mxu1  ;;  %2356 = vmatprep.mubr.bf16.mxu0 %v2017_v36 }
 0x346   : > { %v1880_v39 = vadd.f32 %v1879_v38, %v9755_v41  ;;  %v1881_v40 = vpop.f32.mrb[43].mxu1  ;;  %2357 = vmatmul.mubr.bf16.gmra.mrb[100].mxu0 %v2016_v34  ;;  %v1974_v44 = vmax.f32 %v1876_v12, 0.0 }
 0x347   : > { %v1882_v43 = vadd.f32 %v1881_v40, %v9758_v42  ;;  %v1975_v46 = vmax.f32 %v1878_v37, 0.0 }
 0x348   : > { %v1976_v45 = vmax.f32 %v1880_v39, 0.0 }
 0x349   : > { %v1977_v47 = vmax.f32 %v1882_v43, 0.0 }
 0x34a   : > { %v2018_v48 = vpack.c.bf16 %v1976_v45, %v1974_v44 }
 0x34b   : > { %v1885_v49 = vpop.f32.mrb[44].mxu1  ;;  %v2019_v50 = vpack.c.bf16 %v1977_v47, %v1975_v46 }
 0x34c   : > { %v1886_v51 = vadd.f32 %v1885_v49, %v9755_v41  ;;  %v1887_v52 = vpop.f32.mrb[45].mxu1 }
 0x34d   : > { %v1888_v53 = vadd.f32 %v1887_v52, %v9758_v42  ;;  %v1889_v54 = vpop.f32.mrb[46].mxu1  ;;  %2366 = vmatprep.mubr.bf16.mxu0 %v2019_v50 }
 0x34e   : > { %v1890_v55 = vadd.f32 %v1889_v54, %v9755_v41  ;;  %v1891_v56 = vpop.f32.mrb[47].mxu1  ;;  %2367 = vmatmul.mubr.bf16.gmra.mrb[104].mxu0 %v2018_v48  ;;  %v1978_v58 = vmax.f32 %v1886_v51, 0.0 }
 0x34f   : > { %v1892_v57 = vadd.f32 %v1891_v56, %v9758_v42  ;;  %v1979_v60 = vmax.f32 %v1888_v53, 0.0 }
 0x350   : > { %v1980_v59 = vmax.f32 %v1890_v55, 0.0 }
 0x351   : > { %v1981_v61 = vmax.f32 %v1892_v57, 0.0 }
 0x352   : > { %v2020_v62 = vpack.c.bf16 %v1980_v59, %v1978_v58 }
 0x353   : > { %v1895_v63 = vpop.f32.mrb[48].mxu1  ;;  %v2021_v1 = vpack.c.bf16 %v1981_v61, %v1979_v60 }
 0x354   : > { %v1896_v2 = vadd.f32 %v1895_v63, %v9755_v41  ;;  %v1897_v3 = vpop.f32.mrb[49].mxu1 }
 0x355   : > { %v1898_v5 = vadd.f32 %v1897_v3, %v9758_v42  ;;  %v1899_v7 = vpop.f32.mrb[50].mxu1  ;;  %2376 = vmatprep.mubr.bf16.mxu0 %v2021_v1  ;;  %v8330_v3 = vld [vmem:[#allocation7 + $0x4] ss:$8 sps:$4 sm:$0xff]  }
 0x356   : > { %v1900_v10 = vadd.f32 %v1899_v7, %v9755_v41  ;;  %v1901_v11 = vpop.f32.mrb[51].mxu1  ;;  %2377 = vmatmul.mubr.bf16.gmra.mrb[108].mxu0 %v2020_v62  ;;  %v1982_v17 = vmax.f32 %v1896_v2, 0.0  ;;  %v8328_v2 = vld [vmem:[#allocation7] ss:$8 sps:$4 sm:$0xff]   ;;  %3220 = vmatprep.subr.bf16.mxu0 %v8330_v3  ;;  %v8333_v7 = vld [vmem:[#allocation7 + $0x14] ss:$8 sps:$4 sm:$0xff]  }
 0x357   : > { %v1902_v15 = vadd.f32 %v1901_v11, %v9758_v42  ;;  %v1983_v19 = vmax.f32 %v1898_v5, 0.0  ;;  %3221 = vmatpush1.bf16.msra.mxu0 %v8328_v2  ;;  %v8331_v5 = vld [vmem:[#allocation7 + $0x10] ss:$8 sps:$4 sm:$0xff]  }
 0x358   : > { %v1984_v18 = vmax.f32 %v1900_v10, 0.0  ;;  %3222 = vmatprep.subr.bf16.mxu0 %v8333_v7  ;;  %v8336_v10 = vld [vmem:[#allocation7 + $0x24] ss:$8 sps:$4 sm:$0xff]   ;;  %v8355_v7 = vld [vmem:[#allocation7 + $0x90] ss:$8 sps:$4 sm:$0xff]  }
 0x359   : > { %v1985_v20 = vmax.f32 %v1902_v15, 0.0  ;;  %v8337_v15 = vld [vmem:[#allocation7 + $0x30] ss:$8 sps:$4 sm:$0xff]  }
 0x35a   : > { %v2022_v21 = vpack.c.bf16 %v1984_v18, %v1982_v17 }
 0x35b   : > { %v1905_v22 = vpop.f32.mrb[52].mxu1  ;;  %v2023_v23 = vpack.c.bf16 %v1985_v20, %v1983_v19  ;;  %3223 = vmatpush1.bf16.msra.mxu0 %v8331_v5 }
 0x35c   : > { %v1906_v24 = vadd.f32 %v1905_v22, %v9755_v41  ;;  %v1907_v25 = vpop.f32.mrb[53].mxu1  ;;  %3224 = vmatprep.subr.bf16.mxu0 %v8336_v10 }
 0x35d   : > { %v1908_v26 = vadd.f32 %v1907_v25, %v9758_v42  ;;  %v1909_v27 = vpop.f32.mrb[54].mxu1  ;;  %2386 = vmatprep.mubr.bf16.mxu0 %v2023_v23  ;;  %v8342_v25 = vld [vmem:[#allocation7 + $0x44] ss:$8 sps:$4 sm:$0xff]  }
 0x35e   : > { %v1910_v28 = vadd.f32 %v1909_v27, %v9755_v41  ;;  %v1911_v29 = vpop.f32.mrb[55].mxu1  ;;  %2387 = vmatmul.mubr.bf16.gmra.mrb[112].mxu0 %v2022_v21  ;;  %v1986_v31 = vmax.f32 %v1906_v24, 0.0  ;;  %v8340_v24 = vld [vmem:[#allocation7 + $0x40] ss:$8 sps:$4 sm:$0xff]   ;;  %v8345_v27 = vld [vmem:[#allocation7 + $0x54] ss:$8 sps:$4 sm:$0xff]  }
 0x35f   : > { %v1912_v30 = vadd.f32 %v1911_v29, %v9758_v42  ;;  %v1987_v33 = vmax.f32 %v1908_v26, 0.0 }
 0x360   : > { %v1988_v32 = vmax.f32 %v1910_v28, 0.0 }
 0x361   : > { %v1989_v34 = vmax.f32 %v1912_v30, 0.0 }
 0x362   : > { %v2024_v35 = vpack.c.bf16 %v1988_v32, %v1986_v31  ;;  %v8343_v32 = vld [vmem:[#allocation7 + $0x50] ss:$8 sps:$4 sm:$0xff]  }
 0x363   : > { %v1915_v36 = vpop.f32.mrb[56].mxu1  ;;  %v2025_v12 = vpack.c.bf16 %v1989_v34, %v1987_v33  ;;  %v8348_v34 = vld [vmem:[#allocation7 + $0x64] ss:$8 sps:$4 sm:$0xff]  }
 0x364   : > { %v1916_v13 = vadd.f32 %v1915_v36, %v9755_v41  ;;  %v1917_v37 = vpop.f32.mrb[57].mxu1 }
 0x365   : > { %v1918_v38 = vadd.f32 %v1917_v37, %v9758_v42  ;;  %v1919_v39 = vpop.f32.mrb[58].mxu1  ;;  %2396 = vmatprep.mubr.bf16.mxu0 %v2025_v12 }
 0x366   : > { %v1920_v40 = vadd.f32 %v1919_v39, %v9755_v41  ;;  %v1921_v43 = vpop.f32.mrb[59].mxu1  ;;  %2397 = vmatmul.mubr.bf16.gmra.mrb[116].mxu0 %v2024_v35  ;;  %v1990_v45 = vmax.f32 %v1916_v13, 0.0  ;;  %v8346_v39 = vld [vmem:[#allocation7 + $0x60] ss:$8 sps:$4 sm:$0xff]  }
 0x367   : > { %v1922_v44 = vadd.f32 %v1921_v43, %v9758_v42  ;;  %v1991_v47 = vmax.f32 %v1918_v38, 0.0 }
 0x368   : > { %v1992_v46 = vmax.f32 %v1920_v40, 0.0 }
 0x369   : > { %v1993_v48 = vmax.f32 %v1922_v44, 0.0  ;;  %v8351_v44 = vld [vmem:[#allocation7 + $0x74] ss:$8 sps:$4 sm:$0xff]  }
 0x36a   : > { %v2026_v49 = vpack.c.bf16 %v1992_v46, %v1990_v45 }
 0x36b   : > { %v1925_v50 = vpop.f32.mrb[60].mxu1  ;;  %v2027_v51 = vpack.c.bf16 %v1993_v48, %v1991_v47 }
 0x36c   : > { %v1926_v52 = vadd.f32 %v1925_v50, %v9755_v41  ;;  %v1927_v53 = vpop.f32.mrb[61].mxu1  ;;  %v8349_v50 = vld [vmem:[#allocation7 + $0x70] ss:$8 sps:$4 sm:$0xff]  }
 0x36d   : > { %v1928_v54 = vadd.f32 %v1927_v53, %v9758_v42  ;;  %v1929_v55 = vpop.f32.mrb[62].mxu1  ;;  %2406 = vmatprep.mubr.bf16.mxu0 %v2027_v51 }
 0x36e   : > { %v1930_v56 = vadd.f32 %v1929_v55, %v9755_v41  ;;  %v1931_v57 = vpop.f32.mrb[63].mxu1  ;;  %2407 = vmatmul.mubr.bf16.gmra.mrb[120].mxu0 %v2026_v49  ;;  %v1994_v59 = vmax.f32 %v1926_v52, 0.0  ;;  %v2062_v41 = vld [vmem:[%s11192_s2] sm:$0x3]  ;;  %v8354_v52 = vld [vmem:[#allocation7 + $0x84] ss:$8 sps:$4 sm:$0xff]  }
 0x36f   : > { %v1932_v58 = vadd.f32 %v1931_v57, %v9758_v42  ;;  %v1995_v61 = vmax.f32 %v1928_v54, 0.0  ;;  %v8334_v42 = vld [vmem:[#allocation7 + $0x20] ss:$8 sps:$4 sm:$0xff]   ;;  %v9906_v11 = vrot.slane %v2062_v41, %v9578_v6  ;;  %v9909_v14 = vrot.slane %v2062_v41, %v9580_v8  ;;  %s11197_s2 = sld [smem:[#allocation58_spill]] }
 0x370   : > { %v1996_v60 = vmax.f32 %v1930_v56, 0.0  ;;  %3225 = vmatpush1.bf16.msra.mxu0 %v8334_v42  ;;  %v8360_v42 = vld [vmem:[#allocation7 + $0xa4] ss:$8 sps:$4 sm:$0xff]  }
 0x371   : > { %v1997_v62 = vmax.f32 %v1932_v58, 0.0  ;;  %3226 = vmatprep.subr.bf16.mxu0 %v8339_v16 }
 0x372   : > { %v2028_v63 = vpack.c.bf16 %v1996_v60, %v1994_v59  ;;  %v8352_v59 = vld [vmem:[#allocation7 + $0x80] ss:$8 sps:$4 sm:$0xff]  }
 0x373   : > { %v2029_v1 = vpack.c.bf16 %v1997_v62, %v1995_v61  ;;  %v8357_v62 = vld [vmem:[#allocation7 + $0x94] ss:$8 sps:$4 sm:$0xff]  }
 0x374   : > { %3227 = vmatpush1.bf16.msra.mxu0 %v8337_v15 }
 0x375   : > { %2416 = vmatprep.mubr.bf16.mxu0 %v2029_v1  ;;  %3228 = vmatprep.subr.bf16.mxu0 %v8342_v25 }
 0x376   : > { %2417 = vmatmul.mubr.bf16.gmra.mrb[124].mxu0 %v2028_v63 }
 0x378   : > { %3229 = vmatpush1.bf16.msra.mxu0 %v8340_v24 }
 0x379   : > { %3230 = vmatprep.subr.bf16.mxu0 %v8345_v27 }
 0x37c   : > { %3231 = vmatpush1.bf16.msra.mxu0 %v8343_v32 }
 0x37d   : > { %3232 = vmatprep.subr.bf16.mxu0 %v8348_v34 }
 0x380   : > { %3233 = vmatpush1.bf16.msra.mxu0 %v8346_v39  ;;  %v8369_v39 = vld [vmem:[#allocation7 + $0xd4] ss:$8 sps:$4 sm:$0xff]  }
 0x381   : > { %3234 = vmatprep.subr.bf16.mxu0 %v8351_v44 }
 0x384   : > { %3235 = vmatpush1.bf16.msra.mxu0 %v8349_v50 }
 0x385   : > { %3236 = vmatprep.subr.bf16.mxu0 %v8354_v52 }
 0x388   : > { %3237 = vmatpush1.bf16.msra.mxu0 %v8352_v59 }
 0x389   : > { %3238 = vmatprep.subr.bf16.mxu0 %v8357_v62 }
 0x38c   : > { %3239 = vmatpush1.bf16.msra.mxu0 %v8355_v7 }
 0x38d   : > { %3240 = vmatprep.subr.bf16.mxu0 %v8360_v42 }
 0x3d1   : > { %v2268_v17 = vpop.f32.mrb[64].mxu0 }
 0x3d2   : > { %v2269_v18 = vadd.f32 %v2268_v17, %v9906_v11  ;;  %v2270_v19 = vpop.f32.mrb[65].mxu0 }
 0x3d3   : > { %v2271_v20 = vadd.f32 %v2270_v19, %v9909_v14  ;;  %v2272_v21 = vpop.f32.mrb[66].mxu0 }
 0x3d4   : > { %v2273_v22 = vadd.f32 %v2272_v21, %v9906_v11  ;;  %v2274_v23 = vpop.f32.mrb[67].mxu0  ;;  %v2427_v28 = vmax.f32 %v2269_v18, 0.0 }
 0x3d5   : > { %v2275_v26 = vadd.f32 %v2274_v23, %v9909_v14  ;;  %v2428_v30 = vmax.f32 %v2271_v20, 0.0  ;;  %v8358_v20 = vld [vmem:[#allocation7 + $0xa0] ss:$8 sps:$4 sm:$0xff]   ;;  %v8363_v23 = vld [vmem:[#allocation7 + $0xb4] ss:$8 sps:$4 sm:$0xff]  }
 0x3d6   : > { %v2429_v29 = vmax.f32 %v2273_v22, 0.0  ;;  %3241 = vmatpush1.bf16.msra.mxu0 %v8358_v20 }
 0x3d7   : > { %v2430_v31 = vmax.f32 %v2275_v26, 0.0  ;;  %3242 = vmatprep.subr.bf16.mxu0 %v8363_v23 }
 0x3d8   : > { %v2491_v33 = vpack.c.bf16 %v2429_v29, %v2427_v28  ;;  %v8361_v29 = vld [vmem:[#allocation7 + $0xb0] ss:$8 sps:$4 sm:$0xff]  }
 0x3d9   : > { %v2278_v35 = vpop.f32.mrb[68].mxu0  ;;  %v2492_v36 = vpack.c.bf16 %v2430_v31, %v2428_v30  ;;  %v8366_v31 = vld [vmem:[#allocation7 + $0xc4] ss:$8 sps:$4 sm:$0xff]  }
 0x3da   : > { %v2279_v12 = vadd.f32 %v2278_v35, %v9906_v11  ;;  %v2280_v13 = vpop.f32.mrb[69].mxu0  ;;  %3243 = vmatpush1.bf16.msra.mxu0 %v8361_v29 }
 0x3db   : > { %v2281_v37 = vadd.f32 %v2280_v13, %v9909_v14  ;;  %v2282_v38 = vpop.f32.mrb[70].mxu0  ;;  %2759 = vmatprep.mubr.bf16.mxu1 %v2492_v36  ;;  %v8364_v13 = vld [vmem:[#allocation7 + $0xc0] ss:$8 sps:$4 sm:$0xff]   ;;  %3244 = vmatprep.subr.bf16.mxu0 %v8366_v31 }
 0x3dc   : > { %v2283_v40 = vadd.f32 %v2282_v38, %v9906_v11  ;;  %v2284_v43 = vpop.f32.mrb[71].mxu0  ;;  %2760 = vmatmul.mubr.bf16.vlgmr.msra.gmra.mrb[64].mxu1 %v2491_v33  ;;  %v2431_v46 = vmax.f32 %v2279_v12, 0.0 }
 0x3dd   : > { %v2285_v45 = vadd.f32 %v2284_v43, %v9909_v14  ;;  %v2432_v48 = vmax.f32 %v2281_v37, 0.0 }
 0x3de   : > { %v2433_v47 = vmax.f32 %v2283_v40, 0.0  ;;  %3245 = vmatpush1.bf16.msra.mxu0 %v8364_v13 }
 0x3df   : > { %v2434_v49 = vmax.f32 %v2285_v45, 0.0  ;;  %3246 = vmatprep.subr.bf16.mxu0 %v8369_v39 }
 0x3e0   : > { %v2493_v51 = vpack.c.bf16 %v2433_v47, %v2431_v46  ;;  %v8367_v47 = vld [vmem:[#allocation7 + $0xd0] ss:$8 sps:$4 sm:$0xff]  }
 0x3e1   : > { %v2288_v53 = vpop.f32.mrb[72].mxu0  ;;  %v2494_v54 = vpack.c.bf16 %v2434_v49, %v2432_v48  ;;  %v8372_v49 = vld [vmem:[#allocation7 + $0xe4] ss:$8 sps:$4 sm:$0xff]  }
 0x3e2   : > { %v2289_v55 = vadd.f32 %v2288_v53, %v9906_v11  ;;  %v2290_v56 = vpop.f32.mrb[73].mxu0  ;;  %3247 = vmatpush1.bf16.msra.mxu0 %v8367_v47 }
 0x3e3   : > { %v2291_v57 = vadd.f32 %v2290_v56, %v9909_v14  ;;  %v2292_v58 = vpop.f32.mrb[74].mxu0  ;;  %2769 = vmatprep.mubr.bf16.mxu1 %v2494_v54  ;;  %v8370_v56 = vld [vmem:[#allocation7 + $0xe0] ss:$8 sps:$4 sm:$0xff]   ;;  %3248 = vmatprep.subr.bf16.mxu0 %v8372_v49 }
 0x3e4   : > { %v2293_v60 = vadd.f32 %v2292_v58, %v9906_v11  ;;  %v2294_v61 = vpop.f32.mrb[75].mxu0  ;;  %2770 = vmatmul.mubr.bf16.gmra.mrb[68].mxu1 %v2493_v51  ;;  %v2435_v1 = vmax.f32 %v2289_v55, 0.0 }
 0x3e5   : > { %v2295_v63 = vadd.f32 %v2294_v61, %v9909_v14  ;;  %v2436_v3 = vmax.f32 %v2291_v57, 0.0 }
 0x3e6   : > { %v2437_v2 = vmax.f32 %v2293_v60, 0.0  ;;  %3249 = vmatpush1.bf16.msra.mxu0 %v8370_v56 }
 0x3e7   : > { %v2438_v5 = vmax.f32 %v2295_v63, 0.0 }
 0x3e8   : > { %v2495_v41 = vpack.c.bf16 %v2437_v2, %v2435_v1 }
 0x3e9   : > { %v2298_v10 = vpop.f32.mrb[76].mxu0  ;;  %v2496_v15 = vpack.c.bf16 %v2438_v5, %v2436_v3 }
 0x3ea   : > { %v2299_v16 = vadd.f32 %v2298_v10, %v9906_v11  ;;  %v2300_v17 = vpop.f32.mrb[77].mxu0 }
 0x3eb   : > { %v2301_v18 = vadd.f32 %v2300_v17, %v9909_v14  ;;  %v2302_v19 = vpop.f32.mrb[78].mxu0  ;;  %2779 = vmatprep.mubr.bf16.mxu1 %v2496_v15 }
 0x3ec   : > { %v2303_v21 = vadd.f32 %v2302_v19, %v9906_v11  ;;  %v2304_v22 = vpop.f32.mrb[79].mxu0  ;;  %2780 = vmatmul.mubr.bf16.gmra.mrb[72].mxu1 %v2495_v41  ;;  %v2439_v25 = vmax.f32 %v2299_v16, 0.0 }
 0x3ed   : > { %v2305_v24 = vadd.f32 %v2304_v22, %v9909_v14  ;;  %v2440_v27 = vmax.f32 %v2301_v18, 0.0 }
 0x3ee   : > { %v2441_v26 = vmax.f32 %v2303_v21, 0.0 }
 0x3ef   : > { %v2442_v28 = vmax.f32 %v2305_v24, 0.0 }
 0x3f0   : > { %v2497_v30 = vpack.c.bf16 %v2441_v26, %v2439_v25 }
 0x3f1   : > { %v2308_v32 = vpop.f32.mrb[80].mxu0  ;;  %v2498_v33 = vpack.c.bf16 %v2442_v28, %v2440_v27 }
 0x3f2   : > { %v2309_v34 = vadd.f32 %v2308_v32, %v9906_v11  ;;  %v2310_v35 = vpop.f32.mrb[81].mxu0 }
 0x3f3   : > { %v2311_v36 = vadd.f32 %v2310_v35, %v9909_v14  ;;  %v2312_v12 = vpop.f32.mrb[82].mxu0  ;;  %2789 = vmatprep.mubr.bf16.mxu1 %v2498_v33 }
 0x3f4   : > { %v2313_v37 = vadd.f32 %v2312_v12, %v9906_v11  ;;  %v2314_v38 = vpop.f32.mrb[83].mxu0  ;;  %2790 = vmatmul.mubr.bf16.gmra.mrb[76].mxu1 %v2497_v30  ;;  %v2443_v43 = vmax.f32 %v2309_v34, 0.0 }
 0x3f5   : > { %v2315_v40 = vadd.f32 %v2314_v38, %v9909_v14  ;;  %v2444_v45 = vmax.f32 %v2311_v36, 0.0 }
 0x3f6   : > { %v2445_v44 = vmax.f32 %v2313_v37, 0.0 }
 0x3f7   : > { %v2446_v46 = vmax.f32 %v2315_v40, 0.0 }
 0x3f8   : > { %v2499_v48 = vpack.c.bf16 %v2445_v44, %v2443_v43 }
 0x3f9   : > { %v2318_v50 = vpop.f32.mrb[84].mxu0  ;;  %v2500_v51 = vpack.c.bf16 %v2446_v46, %v2444_v45 }
 0x3fa   : > { %v2319_v52 = vadd.f32 %v2318_v50, %v9906_v11  ;;  %v2320_v53 = vpop.f32.mrb[85].mxu0 }
 0x3fb   : > { %v2321_v54 = vadd.f32 %v2320_v53, %v9909_v14  ;;  %v2322_v55 = vpop.f32.mrb[86].mxu0  ;;  %2799 = vmatprep.mubr.bf16.mxu1 %v2500_v51 }
 0x3fc   : > { %v2323_v57 = vadd.f32 %v2322_v55, %v9906_v11  ;;  %v2324_v58 = vpop.f32.mrb[87].mxu0  ;;  %2800 = vmatmul.mubr.bf16.gmra.mrb[80].mxu1 %v2499_v48  ;;  %v2447_v60 = vmax.f32 %v2319_v52, 0.0 }
 0x3fd   : > { %v2325_v59 = vadd.f32 %v2324_v58, %v9909_v14  ;;  %v2448_v62 = vmax.f32 %v2321_v54, 0.0 }
 0x3fe   : > { %v2449_v61 = vmax.f32 %v2323_v57, 0.0 }
 0x3ff   : > { %v2450_v63 = vmax.f32 %v2325_v59, 0.0 }
 0x400   : > { %v2501_v1 = vpack.c.bf16 %v2449_v61, %v2447_v60 }
 0x401   : > { %v2328_v2 = vpop.f32.mrb[88].mxu0  ;;  %v2502_v3 = vpack.c.bf16 %v2450_v63, %v2448_v62 }
 0x402   : > { %v2329_v5 = vadd.f32 %v2328_v2, %v9906_v11  ;;  %v2330_v7 = vpop.f32.mrb[89].mxu0 }
 0x403   : > { %v2331_v41 = vadd.f32 %v2330_v7, %v9909_v14  ;;  %v2332_v42 = vpop.f32.mrb[90].mxu0  ;;  %2809 = vmatprep.mubr.bf16.mxu1 %v2502_v3 }
 0x404   : > { %v2333_v10 = vadd.f32 %v2332_v42, %v9906_v11  ;;  %v2334_v15 = vpop.f32.mrb[91].mxu0  ;;  %2810 = vmatmul.mubr.bf16.gmra.mrb[84].mxu1 %v2501_v1  ;;  %v2451_v17 = vmax.f32 %v2329_v5, 0.0 }
 0x405   : > { %v2335_v16 = vadd.f32 %v2334_v15, %v9909_v14  ;;  %v2452_v19 = vmax.f32 %v2331_v41, 0.0 }
 0x406   : > { %v2453_v18 = vmax.f32 %v2333_v10, 0.0 }
 0x407   : > { %v2454_v20 = vmax.f32 %v2335_v16, 0.0 }
 0x408   : > { %v2503_v21 = vpack.c.bf16 %v2453_v18, %v2451_v17 }
 0x409   : > { %v2338_v22 = vpop.f32.mrb[92].mxu0  ;;  %v2504_v23 = vpack.c.bf16 %v2454_v20, %v2452_v19 }
 0x40a   : > { %v2339_v24 = vadd.f32 %v2338_v22, %v9906_v11  ;;  %v2340_v25 = vpop.f32.mrb[93].mxu0 }
 0x40b   : > { %v2341_v26 = vadd.f32 %v2340_v25, %v9909_v14  ;;  %v2342_v27 = vpop.f32.mrb[94].mxu0  ;;  %2819 = vmatprep.mubr.bf16.mxu1 %v2504_v23 }
 0x40c   : > { %v2343_v28 = vadd.f32 %v2342_v27, %v9906_v11  ;;  %v2344_v29 = vpop.f32.mrb[95].mxu0  ;;  %2820 = vmatmul.mubr.bf16.gmra.mrb[88].mxu1 %v2503_v21  ;;  %v2455_v31 = vmax.f32 %v2339_v24, 0.0 }
 0x40d   : > { %v2345_v30 = vadd.f32 %v2344_v29, %v9909_v14  ;;  %v2456_v33 = vmax.f32 %v2341_v26, 0.0 }
 0x40e   : > { %v2457_v32 = vmax.f32 %v2343_v28, 0.0 }
 0x40f   : > { %v2458_v34 = vmax.f32 %v2345_v30, 0.0 }
 0x410   : > { %v2505_v35 = vpack.c.bf16 %v2457_v32, %v2455_v31 }
 0x411   : > { %v2348_v36 = vpop.f32.mrb[96].mxu0  ;;  %v2506_v12 = vpack.c.bf16 %v2458_v34, %v2456_v33 }
 0x412   : > { %v2349_v13 = vadd.f32 %v2348_v36, %v9906_v11  ;;  %v2350_v37 = vpop.f32.mrb[97].mxu0 }
 0x413   : > { %v2351_v38 = vadd.f32 %v2350_v37, %v9909_v14  ;;  %v2352_v39 = vpop.f32.mrb[98].mxu0  ;;  %2829 = vmatprep.mubr.bf16.mxu1 %v2506_v12 }
 0x414   : > { %v2353_v40 = vadd.f32 %v2352_v39, %v9906_v11  ;;  %v2354_v43 = vpop.f32.mrb[99].mxu0  ;;  %2830 = vmatmul.mubr.bf16.gmra.mrb[92].mxu1 %v2505_v35  ;;  %v2459_v45 = vmax.f32 %v2349_v13, 0.0 }
 0x415   : > { %v2355_v44 = vadd.f32 %v2354_v43, %v9909_v14  ;;  %v2460_v47 = vmax.f32 %v2351_v38, 0.0  ;;  %v8375_v43 = vld [vmem:[#allocation7 + $0xf4] ss:$8 sps:$4 sm:$0xff]  }
 0x416   : > { %v2461_v46 = vmax.f32 %v2353_v40, 0.0  ;;  %3250 = vmatprep.subr.bf16.mxu0 %v8375_v43 }
 0x417   : > { %v2462_v48 = vmax.f32 %v2355_v44, 0.0 }
 0x418   : > { %v2507_v49 = vpack.c.bf16 %v2461_v46, %v2459_v45  ;;  %v8373_v45 = vld [vmem:[#allocation7 + $0xf0] ss:$8 sps:$4 sm:$0xff]  }
 0x419   : > { %v2358_v50 = vpop.f32.mrb[100].mxu0  ;;  %v2508_v51 = vpack.c.bf16 %v2462_v48, %v2460_v47  ;;  %3251 = vmatpush1.bf16.msra.mxu0 %v8373_v45  ;;  %v8385_v45 = vld [vmem:[#allocation10 + $0x30] ss:$8 sps:$4 sm:$0xff]  }
 0x41a   : > { %v2359_v52 = vadd.f32 %v2358_v50, %v9906_v11  ;;  %v2360_v53 = vpop.f32.mrb[101].mxu0 }
 0x41b   : > { %v2361_v54 = vadd.f32 %v2360_v53, %v9909_v14  ;;  %v2362_v55 = vpop.f32.mrb[102].mxu0  ;;  %2839 = vmatprep.mubr.bf16.mxu1 %v2508_v51 }
 0x41c   : > { %v2363_v56 = vadd.f32 %v2362_v55, %v9906_v11  ;;  %v2364_v57 = vpop.f32.mrb[103].mxu0  ;;  %2840 = vmatmul.mubr.bf16.gmra.mrb[96].mxu1 %v2507_v49  ;;  %v2463_v59 = vmax.f32 %v2359_v52, 0.0 }
 0x41d   : > { %v2365_v58 = vadd.f32 %v2364_v57, %v9909_v14  ;;  %v2464_v61 = vmax.f32 %v2361_v54, 0.0 }
 0x41e   : > { %v2465_v60 = vmax.f32 %v2363_v56, 0.0 }
 0x41f   : > { %v2466_v62 = vmax.f32 %v2365_v58, 0.0 }
 0x420   : > { %v2509_v63 = vpack.c.bf16 %v2465_v60, %v2463_v59 }
 0x421   : > { %v2368_v1 = vpop.f32.mrb[104].mxu0  ;;  %v2510_v2 = vpack.c.bf16 %v2466_v62, %v2464_v61 }
 0x422   : > { %v2369_v3 = vadd.f32 %v2368_v1, %v9906_v11  ;;  %v2370_v5 = vpop.f32.mrb[105].mxu0 }
 0x423   : > { %v2371_v7 = vadd.f32 %v2370_v5, %v9909_v14  ;;  %v2372_v41 = vpop.f32.mrb[106].mxu0  ;;  %2849 = vmatprep.mubr.bf16.mxu1 %v2510_v2 }
 0x424   : > { %v2373_v42 = vadd.f32 %v2372_v41, %v9906_v11  ;;  %v2374_v10 = vpop.f32.mrb[107].mxu0  ;;  %2850 = vmatmul.mubr.bf16.gmra.mrb[100].mxu1 %v2509_v63  ;;  %v2467_v16 = vmax.f32 %v2369_v3, 0.0 }
 0x425   : > { %v2375_v15 = vadd.f32 %v2374_v10, %v9909_v14  ;;  %v2468_v18 = vmax.f32 %v2371_v7, 0.0 }
 0x426   : > { %v2469_v17 = vmax.f32 %v2373_v42, 0.0 }
 0x427   : > { %v2470_v19 = vmax.f32 %v2375_v15, 0.0 }
 0x428   : > { %v2511_v20 = vpack.c.bf16 %v2469_v17, %v2467_v16 }
 0x429   : > { %v2378_v21 = vpop.f32.mrb[108].mxu0  ;;  %v2512_v22 = vpack.c.bf16 %v2470_v19, %v2468_v18 }
 0x42a   : > { %v2379_v23 = vadd.f32 %v2378_v21, %v9906_v11  ;;  %v2380_v24 = vpop.f32.mrb[109].mxu0 }
 0x42b   : > { %v2381_v25 = vadd.f32 %v2380_v24, %v9909_v14  ;;  %v2382_v26 = vpop.f32.mrb[110].mxu0  ;;  %2859 = vmatprep.mubr.bf16.mxu1 %v2512_v22 }
 0x42c   : > { %v2383_v27 = vadd.f32 %v2382_v26, %v9906_v11  ;;  %v2384_v28 = vpop.f32.mrb[111].mxu0  ;;  %2860 = vmatmul.mubr.bf16.gmra.mrb[104].mxu1 %v2511_v20  ;;  %v2471_v30 = vmax.f32 %v2379_v23, 0.0 }
 0x42d   : > { %v2385_v29 = vadd.f32 %v2384_v28, %v9909_v14  ;;  %v2472_v32 = vmax.f32 %v2381_v25, 0.0 }
 0x42e   : > { %v2473_v31 = vmax.f32 %v2383_v27, 0.0 }
 0x42f   : > { %v2474_v33 = vmax.f32 %v2385_v29, 0.0 }
 0x430   : > { %v2513_v34 = vpack.c.bf16 %v2473_v31, %v2471_v30 }
 0x431   : > { %v2388_v35 = vpop.f32.mrb[112].mxu0  ;;  %v2514_v36 = vpack.c.bf16 %v2474_v33, %v2472_v32 }
 0x432   : > { %v2389_v12 = vadd.f32 %v2388_v35, %v9906_v11  ;;  %v2390_v13 = vpop.f32.mrb[113].mxu0 }
 0x433   : > { %v2391_v37 = vadd.f32 %v2390_v13, %v9909_v14  ;;  %v2392_v38 = vpop.f32.mrb[114].mxu0  ;;  %2869 = vmatprep.mubr.bf16.mxu1 %v2514_v36  ;;  %v8378_v13 = vld [vmem:[#allocation10 + $0x4] ss:$8 sps:$4 sm:$0xff]  }
 0x434   : > { %v2393_v39 = vadd.f32 %v2392_v38, %v9906_v11  ;;  %v2394_v40 = vpop.f32.mrb[115].mxu0  ;;  %2870 = vmatmul.mubr.bf16.gmra.mrb[108].mxu1 %v2513_v34  ;;  %v2475_v46 = vmax.f32 %v2389_v12, 0.0  ;;  %v8376_v12 = vld [vmem:[#allocation10] ss:$8 sps:$4 sm:$0xff]   ;;  %3709 = vmatprep.subr.bf16.mxu1 %v8378_v13  ;;  %v8381_v38 = vld [vmem:[#allocation10 + $0x14] ss:$8 sps:$4 sm:$0xff]  }
 0x435   : > { %v2395_v44 = vadd.f32 %v2394_v40, %v9909_v14  ;;  %v2476_v48 = vmax.f32 %v2391_v37, 0.0  ;;  %3710 = vmatpush1.bf16.msra.mxu1 %v8376_v12  ;;  %v8379_v37 = vld [vmem:[#allocation10 + $0x10] ss:$8 sps:$4 sm:$0xff]  }
 0x436   : > { %v2477_v47 = vmax.f32 %v2393_v39, 0.0  ;;  %3711 = vmatprep.subr.bf16.mxu1 %v8381_v38  ;;  %v8384_v39 = vld [vmem:[#allocation10 + $0x24] ss:$8 sps:$4 sm:$0xff]  }
 0x437   : > { %v2478_v49 = vmax.f32 %v2395_v44, 0.0 }
 0x438   : > { %v2515_v50 = vpack.c.bf16 %v2477_v47, %v2475_v46  ;;  %v8387_v46 = vld [vmem:[#allocation10 + $0x34] ss:$8 sps:$4 sm:$0xff]  }
 0x439   : > { %v2398_v51 = vpop.f32.mrb[116].mxu0  ;;  %v2516_v52 = vpack.c.bf16 %v2478_v49, %v2476_v48  ;;  %3712 = vmatpush1.bf16.msra.mxu1 %v8379_v37 }
 0x43a   : > { %v2399_v53 = vadd.f32 %v2398_v51, %v9906_v11  ;;  %v2400_v54 = vpop.f32.mrb[117].mxu0  ;;  %3713 = vmatprep.subr.bf16.mxu1 %v8384_v39 }
 0x43b   : > { %v2401_v55 = vadd.f32 %v2400_v54, %v9909_v14  ;;  %v2402_v56 = vpop.f32.mrb[118].mxu0  ;;  %2879 = vmatprep.mubr.bf16.mxu1 %v2516_v52  ;;  %v8390_v54 = vld [vmem:[#allocation10 + $0x44] ss:$8 sps:$4 sm:$0xff]  }
 0x43c   : > { %v2403_v57 = vadd.f32 %v2402_v56, %v9906_v11  ;;  %v2404_v58 = vpop.f32.mrb[119].mxu0  ;;  %2880 = vmatmul.mubr.bf16.gmra.mrb[112].mxu1 %v2515_v50  ;;  %v2479_v60 = vmax.f32 %v2399_v53, 0.0  ;;  %v8388_v53 = vld [vmem:[#allocation10 + $0x40] ss:$8 sps:$4 sm:$0xff]   ;;  %v8393_v56 = vld [vmem:[#allocation10 + $0x54] ss:$8 sps:$4 sm:$0xff]  }
 0x43d   : > { %v2405_v59 = vadd.f32 %v2404_v58, %v9909_v14  ;;  %v2480_v62 = vmax.f32 %v2401_v55, 0.0 }
 0x43e   : > { %v2481_v61 = vmax.f32 %v2403_v57, 0.0 }
 0x43f   : > { %v2482_v63 = vmax.f32 %v2405_v59, 0.0 }
 0x440   : > { %v2517_v1 = vpack.c.bf16 %v2481_v61, %v2479_v60 }
 0x441   : > { %v2408_v2 = vpop.f32.mrb[120].mxu0  ;;  %v2518_v3 = vpack.c.bf16 %v2482_v63, %v2480_v62  ;;  %v8391_v62 = vld [vmem:[#allocation10 + $0x50] ss:$8 sps:$4 sm:$0xff]  }
 0x442   : > { %v2409_v5 = vadd.f32 %v2408_v2, %v9906_v11  ;;  %v2410_v7 = vpop.f32.mrb[121].mxu0  ;;  %v8396_v2 = vld [vmem:[#allocation10 + $0x64] ss:$8 sps:$4 sm:$0xff]  }
 0x443   : > { %v2411_v41 = vadd.f32 %v2410_v7, %v9909_v14  ;;  %v2412_v42 = vpop.f32.mrb[122].mxu0  ;;  %2889 = vmatprep.mubr.bf16.mxu1 %v2518_v3 }
 0x444   : > { %v2413_v10 = vadd.f32 %v2412_v42, %v9906_v11  ;;  %v2414_v15 = vpop.f32.mrb[123].mxu0  ;;  %2890 = vmatmul.mubr.bf16.gmra.mrb[116].mxu1 %v2517_v1  ;;  %v2483_v17 = vmax.f32 %v2409_v5, 0.0 }
 0x445   : > { %v2415_v16 = vadd.f32 %v2414_v15, %v9909_v14  ;;  %v2484_v19 = vmax.f32 %v2411_v41, 0.0  ;;  %v8394_v15 = vld [vmem:[#allocation10 + $0x60] ss:$8 sps:$4 sm:$0xff]  }
 0x446   : > { %v2485_v18 = vmax.f32 %v2413_v10, 0.0 }
 0x447   : > { %v2486_v20 = vmax.f32 %v2415_v16, 0.0 }
 0x448   : > { %v2519_v21 = vpack.c.bf16 %v2485_v18, %v2483_v17  ;;  %v8399_v17 = vld [vmem:[#allocation10 + $0x74] ss:$8 sps:$4 sm:$0xff]  }
 0x449   : > { %v2418_v22 = vpop.f32.mrb[124].mxu0  ;;  %v2520_v23 = vpack.c.bf16 %v2486_v20, %v2484_v19 }
 0x44a   : > { %v2419_v24 = vadd.f32 %v2418_v22, %v9906_v11  ;;  %v2420_v25 = vpop.f32.mrb[125].mxu0 }
 0x44b   : > { %v2421_v26 = vadd.f32 %v2420_v25, %v9909_v14  ;;  %v2422_v27 = vpop.f32.mrb[126].mxu0  ;;  %2899 = vmatprep.mubr.bf16.mxu1 %v2520_v23  ;;  %v8397_v23 = vld [vmem:[#allocation10 + $0x70] ss:$8 sps:$4 sm:$0xff]  }
 0x44c   : > { %v2423_v28 = vadd.f32 %v2422_v27, %v9906_v11  ;;  %v2424_v29 = vpop.f32.mrb[127].mxu0  ;;  %2900 = vmatmul.mubr.bf16.gmra.mrb[120].mxu1 %v2519_v21  ;;  %v2487_v31 = vmax.f32 %v2419_v24, 0.0  ;;  %v2555_v11 = vld [vmem:[%s11193_s11] sm:$0x3] }
 0x44d   : > { %v2425_v30 = vadd.f32 %v2424_v29, %v9909_v14  ;;  %v2488_v33 = vmax.f32 %v2421_v26, 0.0  ;;  %v8382_v14 = vld [vmem:[#allocation10 + $0x20] ss:$8 sps:$4 sm:$0xff]   ;;  %v9979_v40 = vrot.slane %v2555_v11, %v9578_v6  ;;  %v9982_v43 = vrot.slane %v2555_v11, %v9580_v8  ;;  %v8402_v26 = vld [vmem:[#allocation10 + $0x84] ss:$8 sps:$4 sm:$0xff]  }
 0x44e   : > { %v2489_v32 = vmax.f32 %v2423_v28, 0.0  ;;  %3714 = vmatpush1.bf16.msra.mxu1 %v8382_v14  ;;  %v8403_v11 = vld [vmem:[#allocation10 + $0x90] ss:$8 sps:$4 sm:$0xff]  }
 0x44f   : > { %v2490_v34 = vmax.f32 %v2425_v30, 0.0  ;;  %3715 = vmatprep.subr.bf16.mxu1 %v8387_v46 }
 0x450   : > { %v2521_v35 = vpack.c.bf16 %v2489_v32, %v2487_v31 }
 0x451   : > { %v2522_v36 = vpack.c.bf16 %v2490_v34, %v2488_v33  ;;  %v8400_v33 = vld [vmem:[#allocation10 + $0x80] ss:$8 sps:$4 sm:$0xff]  }
 0x452   : > { %3716 = vmatpush1.bf16.msra.mxu1 %v8385_v45 }
 0x453   : > { %2909 = vmatprep.mubr.bf16.mxu1 %v2522_v36  ;;  %3717 = vmatprep.subr.bf16.mxu1 %v8390_v54 }
 0x454   : > { %2910 = vmatmul.mubr.bf16.gmra.mrb[124].mxu1 %v2521_v35  ;;  %v8405_v35 = vld [vmem:[#allocation10 + $0x94] ss:$8 sps:$4 sm:$0xff]  }
 0x456   : > { %3718 = vmatpush1.bf16.msra.mxu1 %v8388_v53  ;;  %v8411_v53 = vld [vmem:[#allocation10 + $0xb4] ss:$8 sps:$4 sm:$0xff]  }
 0x457   : > { %3719 = vmatprep.subr.bf16.mxu1 %v8393_v56 }
 0x45a   : > { %3720 = vmatpush1.bf16.msra.mxu1 %v8391_v62  ;;  %v8414_v62 = vld [vmem:[#allocation10 + $0xc4] ss:$8 sps:$4 sm:$0xff]  }
 0x45b   : > { %3721 = vmatprep.subr.bf16.mxu1 %v8396_v2 }
 0x45e   : > { %3722 = vmatpush1.bf16.msra.mxu1 %v8394_v15 }
 0x45f   : > { %3723 = vmatprep.subr.bf16.mxu1 %v8399_v17 }
 0x462   : > { %3724 = vmatpush1.bf16.msra.mxu1 %v8397_v23  ;;  %v8420_v23 = vld [vmem:[#allocation10 + $0xe4] ss:$8 sps:$4 sm:$0xff]  }
 0x463   : > { %3725 = vmatprep.subr.bf16.mxu1 %v8402_v26 }
 0x466   : > { %3726 = vmatpush1.bf16.msra.mxu1 %v8400_v33 }
 0x467   : > { %3727 = vmatprep.subr.bf16.mxu1 %v8405_v35 }
 0x46a   : > { %3728 = vmatpush1.bf16.msra.mxu1 %v8403_v11 }
 0x4af   : > { %v2761_v44 = vpop.f32.mrb[64].mxu1 }
 0x4b0   : > { %v2762_v47 = vadd.f32 %v2761_v44, %v9979_v40  ;;  %v2763_v48 = vpop.f32.mrb[65].mxu1  ;;  %v8408_v44 = vld [vmem:[#allocation10 + $0xa4] ss:$8 sps:$4 sm:$0xff]  }
 0x4b1   : > { %v2764_v49 = vadd.f32 %v2763_v48, %v9982_v43  ;;  %v2765_v50 = vpop.f32.mrb[66].mxu1  ;;  %3729 = vmatprep.subr.bf16.mxu1 %v8408_v44 }
 0x4b2   : > { %v2766_v51 = vadd.f32 %v2765_v50, %v9979_v40  ;;  %v2767_v52 = vpop.f32.mrb[67].mxu1  ;;  %v2920_v57 = vmax.f32 %v2762_v47, 0.0 }
 0x4b3   : > { %v2768_v55 = vadd.f32 %v2767_v52, %v9982_v43  ;;  %v2921_v59 = vmax.f32 %v2764_v49, 0.0 }
 0x4b4   : > { %v2922_v58 = vmax.f32 %v2766_v51, 0.0  ;;  %v8406_v51 = vld [vmem:[#allocation10 + $0xa0] ss:$8 sps:$4 sm:$0xff]  }
 0x4b5   : > { %v2923_v60 = vmax.f32 %v2768_v55, 0.0  ;;  %3730 = vmatpush1.bf16.msra.mxu1 %v8406_v51 }
 0x4b6   : > { %v2984_v61 = vpack.c.bf16 %v2922_v58, %v2920_v57  ;;  %3731 = vmatprep.subr.bf16.mxu1 %v8411_v53 }
 0x4b7   : > { %v2771_v63 = vpop.f32.mrb[68].mxu1  ;;  %v2985_v1 = vpack.c.bf16 %v2923_v60, %v2921_v59  ;;  %v8409_v59 = vld [vmem:[#allocation10 + $0xb0] ss:$8 sps:$4 sm:$0xff]  }
 0x4b8   : > { %v2772_v3 = vadd.f32 %v2771_v63, %v9979_v40  ;;  %v2773_v5 = vpop.f32.mrb[69].mxu1 }
 0x4b9   : > { %v2774_v7 = vadd.f32 %v2773_v5, %v9982_v43  ;;  %v2775_v41 = vpop.f32.mrb[70].mxu1  ;;  %3252 = vmatprep.mubr.bf16.mxu0 %v2985_v1  ;;  %3732 = vmatpush1.bf16.msra.mxu1 %v8409_v59 }
 0x4ba   : > { %v2776_v42 = vadd.f32 %v2775_v41, %v9979_v40  ;;  %v2777_v10 = vpop.f32.mrb[71].mxu1  ;;  %3253 = vmatmul.mubr.bf16.vlgmr.msra.gmra.mrb[128].mxu0 %v2984_v61  ;;  %v2924_v18 = vmax.f32 %v2772_v3, 0.0  ;;  %v8412_v41 = vld [vmem:[#allocation10 + $0xc0] ss:$8 sps:$4 sm:$0xff]   ;;  %3733 = vmatprep.subr.bf16.mxu1 %v8414_v62 }
 0x4bb   : > { %v2778_v16 = vadd.f32 %v2777_v10, %v9982_v43  ;;  %v2925_v20 = vmax.f32 %v2774_v7, 0.0  ;;  %v8417_v10 = vld [vmem:[#allocation10 + $0xd4] ss:$8 sps:$4 sm:$0xff]  }
 0x4bc   : > { %v2926_v19 = vmax.f32 %v2776_v42, 0.0 }
 0x4bd   : > { %v2927_v21 = vmax.f32 %v2778_v16, 0.0  ;;  %3734 = vmatpush1.bf16.msra.mxu1 %v8412_v41 }
 0x4be   : > { %v2986_v22 = vpack.c.bf16 %v2926_v19, %v2924_v18  ;;  %3735 = vmatprep.subr.bf16.mxu1 %v8417_v10 }
 0x4bf   : > { %v2781_v24 = vpop.f32.mrb[72].mxu1  ;;  %v2987_v25 = vpack.c.bf16 %v2927_v21, %v2925_v20  ;;  %v8415_v20 = vld [vmem:[#allocation10 + $0xd0] ss:$8 sps:$4 sm:$0xff]  }
 0x4c0   : > { %v2782_v27 = vadd.f32 %v2781_v24, %v9979_v40  ;;  %v2783_v28 = vpop.f32.mrb[73].mxu1 }
 0x4c1   : > { %v2784_v29 = vadd.f32 %v2783_v28, %v9982_v43  ;;  %v2785_v30 = vpop.f32.mrb[74].mxu1  ;;  %3262 = vmatprep.mubr.bf16.mxu0 %v2987_v25  ;;  %3736 = vmatpush1.bf16.msra.mxu1 %v8415_v20 }
 0x4c2   : > { %v2786_v31 = vadd.f32 %v2785_v30, %v9979_v40  ;;  %v2787_v32 = vpop.f32.mrb[75].mxu1  ;;  %3263 = vmatmul.mubr.bf16.gmra.mrb[132].mxu0 %v2986_v22  ;;  %v2928_v36 = vmax.f32 %v2782_v27, 0.0  ;;  %v8418_v30 = vld [vmem:[#allocation10 + $0xe0] ss:$8 sps:$4 sm:$0xff]   ;;  %3737 = vmatprep.subr.bf16.mxu1 %v8420_v23 }
 0x4c3   : > { %v2788_v34 = vadd.f32 %v2787_v32, %v9982_v43  ;;  %v2929_v13 = vmax.f32 %v2784_v29, 0.0 }
 0x4c4   : > { %v2930_v12 = vmax.f32 %v2786_v31, 0.0 }
 0x4c5   : > { %v2931_v37 = vmax.f32 %v2788_v34, 0.0  ;;  %3738 = vmatpush1.bf16.msra.mxu1 %v8418_v30 }
 0x4c6   : > { %v2988_v38 = vpack.c.bf16 %v2930_v12, %v2928_v36 }
 0x4c7   : > { %v2791_v14 = vpop.f32.mrb[76].mxu1  ;;  %v2989_v39 = vpack.c.bf16 %v2931_v37, %v2929_v13 }
 0x4c8   : > { %v2792_v45 = vadd.f32 %v2791_v14, %v9979_v40  ;;  %v2793_v46 = vpop.f32.mrb[77].mxu1 }
 0x4c9   : > { %v2794_v47 = vadd.f32 %v2793_v46, %v9982_v43  ;;  %v2795_v48 = vpop.f32.mrb[78].mxu1  ;;  %3272 = vmatprep.mubr.bf16.mxu0 %v2989_v39 }
 0x4ca   : > { %v2796_v49 = vadd.f32 %v2795_v48, %v9979_v40  ;;  %v2797_v50 = vpop.f32.mrb[79].mxu1  ;;  %3273 = vmatmul.mubr.bf16.gmra.mrb[136].mxu0 %v2988_v38  ;;  %v2932_v54 = vmax.f32 %v2792_v45, 0.0 }
 0x4cb   : > { %v2798_v52 = vadd.f32 %v2797_v50, %v9982_v43  ;;  %v2933_v56 = vmax.f32 %v2794_v47, 0.0 }
 0x4cc   : > { %v2934_v55 = vmax.f32 %v2796_v49, 0.0 }
 0x4cd   : > { %v2935_v57 = vmax.f32 %v2798_v52, 0.0 }
 0x4ce   : > { %v2990_v58 = vpack.c.bf16 %v2934_v55, %v2932_v54 }
 0x4cf   : > { %v2801_v60 = vpop.f32.mrb[80].mxu1  ;;  %v2991_v61 = vpack.c.bf16 %v2935_v57, %v2933_v56 }
 0x4d0   : > { %v2802_v63 = vadd.f32 %v2801_v60, %v9979_v40  ;;  %v2803_v1 = vpop.f32.mrb[81].mxu1 }
 0x4d1   : > { %v2804_v2 = vadd.f32 %v2803_v1, %v9982_v43  ;;  %v2805_v3 = vpop.f32.mrb[82].mxu1  ;;  %3282 = vmatprep.mubr.bf16.mxu0 %v2991_v61 }
 0x4d2   : > { %v2806_v5 = vadd.f32 %v2805_v3, %v9979_v40  ;;  %v2807_v7 = vpop.f32.mrb[83].mxu1  ;;  %3283 = vmatmul.mubr.bf16.gmra.mrb[140].mxu0 %v2990_v58  ;;  %v2936_v15 = vmax.f32 %v2802_v63, 0.0 }
 0x4d3   : > { %v2808_v42 = vadd.f32 %v2807_v7, %v9982_v43  ;;  %v2937_v17 = vmax.f32 %v2804_v2, 0.0 }
 0x4d4   : > { %v2938_v16 = vmax.f32 %v2806_v5, 0.0 }
 0x4d5   : > { %v2939_v18 = vmax.f32 %v2808_v42, 0.0 }
 0x4d6   : > { %v2992_v19 = vpack.c.bf16 %v2938_v16, %v2936_v15 }
 0x4d7   : > { %v2811_v21 = vpop.f32.mrb[84].mxu1  ;;  %v2993_v22 = vpack.c.bf16 %v2939_v18, %v2937_v17 }
 0x4d8   : > { %v2812_v24 = vadd.f32 %v2811_v21, %v9979_v40  ;;  %v2813_v25 = vpop.f32.mrb[85].mxu1 }
 0x4d9   : > { %v2814_v26 = vadd.f32 %v2813_v25, %v9982_v43  ;;  %v2815_v27 = vpop.f32.mrb[86].mxu1  ;;  %3292 = vmatprep.mubr.bf16.mxu0 %v2993_v22 }
 0x4da   : > { %v2816_v28 = vadd.f32 %v2815_v27, %v9979_v40  ;;  %v2817_v29 = vpop.f32.mrb[87].mxu1  ;;  %3293 = vmatmul.mubr.bf16.gmra.mrb[144].mxu0 %v2992_v19  ;;  %v2940_v32 = vmax.f32 %v2812_v24, 0.0 }
 0x4db   : > { %v2818_v31 = vadd.f32 %v2817_v29, %v9982_v43  ;;  %v2941_v34 = vmax.f32 %v2814_v26, 0.0 }
 0x4dc   : > { %v2942_v33 = vmax.f32 %v2816_v28, 0.0 }
 0x4dd   : > { %v2943_v35 = vmax.f32 %v2818_v31, 0.0 }
 0x4de   : > { %v2994_v36 = vpack.c.bf16 %v2942_v33, %v2940_v32 }
 0x4df   : > { %v2995_v12 = vpack.c.bf16 %v2943_v35, %v2941_v34  ;;  %v2821_v13 = vpop.f32.mrb[88].mxu1 }
 0x4e0   : > { %v2822_v37 = vadd.f32 %v2821_v13, %v9979_v40  ;;  %v2823_v38 = vpop.f32.mrb[89].mxu1 }
 0x4e1   : > { %v2824_v11 = vadd.f32 %v2823_v38, %v9982_v43  ;;  %v2825_v14 = vpop.f32.mrb[90].mxu1  ;;  %3302 = vmatprep.mubr.bf16.mxu0 %v2995_v12 }
 0x4e2   : > { %v2826_v39 = vadd.f32 %v2825_v14, %v9979_v40  ;;  %v2827_v44 = vpop.f32.mrb[91].mxu1  ;;  %3303 = vmatmul.mubr.bf16.gmra.mrb[148].mxu0 %v2994_v36  ;;  %v2944_v46 = vmax.f32 %v2822_v37, 0.0 }
 0x4e3   : > { %v2828_v45 = vadd.f32 %v2827_v44, %v9982_v43  ;;  %v2945_v48 = vmax.f32 %v2824_v11, 0.0 }
 0x4e4   : > { %v2946_v47 = vmax.f32 %v2826_v39, 0.0 }
 0x4e5   : > { %v2947_v49 = vmax.f32 %v2828_v45, 0.0 }
 0x4e6   : > { %v2996_v50 = vpack.c.bf16 %v2946_v47, %v2944_v46 }
 0x4e7   : > { %v2997_v51 = vpack.c.bf16 %v2947_v49, %v2945_v48  ;;  %v2831_v52 = vpop.f32.mrb[92].mxu1 }
 0x4e8   : > { %v2832_v53 = vadd.f32 %v2831_v52, %v9979_v40  ;;  %v2833_v54 = vpop.f32.mrb[93].mxu1 }
 0x4e9   : > { %v2834_v55 = vadd.f32 %v2833_v54, %v9982_v43  ;;  %v2835_v56 = vpop.f32.mrb[94].mxu1  ;;  %3312 = vmatprep.mubr.bf16.mxu0 %v2997_v51 }
 0x4ea   : > { %v2836_v57 = vadd.f32 %v2835_v56, %v9979_v40  ;;  %v2837_v58 = vpop.f32.mrb[95].mxu1  ;;  %3313 = vmatmul.mubr.bf16.gmra.mrb[152].mxu0 %v2996_v50  ;;  %v2948_v60 = vmax.f32 %v2832_v53, 0.0 }
 0x4eb   : > { %v2838_v59 = vadd.f32 %v2837_v58, %v9982_v43  ;;  %v2949_v62 = vmax.f32 %v2834_v55, 0.0 }
 0x4ec   : > { %v2950_v61 = vmax.f32 %v2836_v57, 0.0 }
 0x4ed   : > { %v2951_v63 = vmax.f32 %v2838_v59, 0.0 }
 0x4ee   : > { %v2998_v1 = vpack.c.bf16 %v2950_v61, %v2948_v60 }
 0x4ef   : > { %v2999_v2 = vpack.c.bf16 %v2951_v63, %v2949_v62  ;;  %v2841_v3 = vpop.f32.mrb[96].mxu1 }
 0x4f0   : > { %v2842_v5 = vadd.f32 %v2841_v3, %v9979_v40  ;;  %v2843_v7 = vpop.f32.mrb[97].mxu1 }
 0x4f1   : > { %v2844_v41 = vadd.f32 %v2843_v7, %v9982_v43  ;;  %v2845_v42 = vpop.f32.mrb[98].mxu1  ;;  %3322 = vmatprep.mubr.bf16.mxu0 %v2999_v2 }
 0x4f2   : > { %v2846_v10 = vadd.f32 %v2845_v42, %v9979_v40  ;;  %v2847_v15 = vpop.f32.mrb[99].mxu1  ;;  %3323 = vmatmul.mubr.bf16.gmra.mrb[156].mxu0 %v2998_v1  ;;  %v2952_v17 = vmax.f32 %v2842_v5, 0.0 }
 0x4f3   : > { %v2848_v16 = vadd.f32 %v2847_v15, %v9982_v43  ;;  %v2953_v19 = vmax.f32 %v2844_v41, 0.0  ;;  %v8423_v15 = vld [vmem:[#allocation10 + $0xf4] ss:$8 sps:$4 sm:$0xff]  }
 0x4f4   : > { %v2954_v18 = vmax.f32 %v2846_v10, 0.0  ;;  %3739 = vmatprep.subr.bf16.mxu1 %v8423_v15 }
 0x4f5   : > { %v2955_v20 = vmax.f32 %v2848_v16, 0.0 }
 0x4f6   : > { %v3000_v21 = vpack.c.bf16 %v2954_v18, %v2952_v17  ;;  %v8421_v17 = vld [vmem:[#allocation10 + $0xf0] ss:$8 sps:$4 sm:$0xff]  }
 0x4f7   : > { %v3001_v22 = vpack.c.bf16 %v2955_v20, %v2953_v19  ;;  %v2851_v23 = vpop.f32.mrb[100].mxu1  ;;  %3740 = vmatpush1.bf16.msra.mxu1 %v8421_v17 }
 0x4f8   : > { %v2852_v24 = vadd.f32 %v2851_v23, %v9979_v40  ;;  %v2853_v25 = vpop.f32.mrb[101].mxu1 }
 0x4f9   : > { %v2854_v26 = vadd.f32 %v2853_v25, %v9982_v43  ;;  %v2855_v27 = vpop.f32.mrb[102].mxu1  ;;  %3332 = vmatprep.mubr.bf16.mxu0 %v3001_v22 }
 0x4fa   : > { %v2856_v28 = vadd.f32 %v2855_v27, %v9979_v40  ;;  %v2857_v29 = vpop.f32.mrb[103].mxu1  ;;  %3333 = vmatmul.mubr.bf16.gmra.mrb[160].mxu0 %v3000_v21  ;;  %v2956_v31 = vmax.f32 %v2852_v24, 0.0 }
 0x4fb   : > { %v2858_v30 = vadd.f32 %v2857_v29, %v9982_v43  ;;  %v2957_v33 = vmax.f32 %v2854_v26, 0.0 }
 0x4fc   : > { %v2958_v32 = vmax.f32 %v2856_v28, 0.0 }
 0x4fd   : > { %v2959_v34 = vmax.f32 %v2858_v30, 0.0 }
 0x4fe   : > { %v3002_v35 = vpack.c.bf16 %v2958_v32, %v2956_v31  ;;  %v8426_v31 = vld [vmem:[#allocation9 + $0x4] ss:$8 sps:$4 sm:$0xff]  }
 0x4ff   : > { %v3003_v36 = vpack.c.bf16 %v2959_v34, %v2957_v33  ;;  %v2861_v12 = vpop.f32.mrb[104].mxu1  ;;  %3946 = vmatprep.subr.bf16.mxu1 %v8426_v31 }
 0x500   : > { %v2862_v13 = vadd.f32 %v2861_v12, %v9979_v40  ;;  %v2863_v37 = vpop.f32.mrb[105].mxu1 }
 0x501   : > { %v2864_v38 = vadd.f32 %v2863_v37, %v9982_v43  ;;  %v2865_v11 = vpop.f32.mrb[106].mxu1  ;;  %3342 = vmatprep.mubr.bf16.mxu0 %v3003_v36 }
 0x502   : > { %v2866_v14 = vadd.f32 %v2865_v11, %v9979_v40  ;;  %v2867_v39 = vpop.f32.mrb[107].mxu1  ;;  %3343 = vmatmul.mubr.bf16.gmra.mrb[164].mxu0 %v3002_v35  ;;  %v2960_v45 = vmax.f32 %v2862_v13, 0.0 }
 0x503   : > { %v2868_v44 = vadd.f32 %v2867_v39, %v9982_v43  ;;  %v2961_v47 = vmax.f32 %v2864_v38, 0.0 }
 0x504   : > { %v2962_v46 = vmax.f32 %v2866_v14, 0.0 }
 0x505   : > { %v2963_v48 = vmax.f32 %v2868_v44, 0.0 }
 0x506   : > { %v3004_v49 = vpack.c.bf16 %v2962_v46, %v2960_v45 }
 0x507   : > { %v3005_v50 = vpack.c.bf16 %v2963_v48, %v2961_v47  ;;  %v2871_v51 = vpop.f32.mrb[108].mxu1 }
 0x508   : > { %v2872_v52 = vadd.f32 %v2871_v51, %v9979_v40  ;;  %v2873_v53 = vpop.f32.mrb[109].mxu1 }
 0x509   : > { %v2874_v54 = vadd.f32 %v2873_v53, %v9982_v43  ;;  %v2875_v55 = vpop.f32.mrb[110].mxu1  ;;  %3352 = vmatprep.mubr.bf16.mxu0 %v3005_v50 }
 0x50a   : > { %v2876_v56 = vadd.f32 %v2875_v55, %v9979_v40  ;;  %v2877_v57 = vpop.f32.mrb[111].mxu1  ;;  %3353 = vmatmul.mubr.bf16.gmra.mrb[168].mxu0 %v3004_v49  ;;  %v2964_v59 = vmax.f32 %v2872_v52, 0.0 }
 0x50b   : > { %v2878_v58 = vadd.f32 %v2877_v57, %v9982_v43  ;;  %v2965_v61 = vmax.f32 %v2874_v54, 0.0 }
 0x50c   : > { %v2966_v60 = vmax.f32 %v2876_v56, 0.0 }
 0x50d   : > { %v2967_v62 = vmax.f32 %v2878_v58, 0.0 }
 0x50e   : > { %v3006_v63 = vpack.c.bf16 %v2966_v60, %v2964_v59 }
 0x50f   : > { %v3007_v1 = vpack.c.bf16 %v2967_v62, %v2965_v61  ;;  %v2881_v2 = vpop.f32.mrb[112].mxu1 }
 0x510   : > { %v2882_v3 = vadd.f32 %v2881_v2, %v9979_v40  ;;  %v2883_v5 = vpop.f32.mrb[113].mxu1 }
 0x511   : > { %v2884_v7 = vadd.f32 %v2883_v5, %v9982_v43  ;;  %v2885_v41 = vpop.f32.mrb[114].mxu1  ;;  %3362 = vmatprep.mubr.bf16.mxu0 %v3007_v1  ;;  %v3048_v5 = vld [vmem:[%s11194_s20] sm:$0x3] }
 0x512   : > { %v2886_v42 = vadd.f32 %v2885_v41, %v9979_v40  ;;  %v2887_v10 = vpop.f32.mrb[115].mxu1  ;;  %3363 = vmatmul.mubr.bf16.gmra.mrb[172].mxu0 %v3006_v63  ;;  %v2968_v18 = vmax.f32 %v2882_v3, 0.0 }
 0x513   : > { %v2888_v16 = vadd.f32 %v2887_v10, %v9982_v43  ;;  %v2969_v20 = vmax.f32 %v2884_v7, 0.0  ;;  %v10052_v7 = vrot.slane %v3048_v5, %v9578_v6 }
 0x514   : > { %v2970_v19 = vmax.f32 %v2886_v42, 0.0 }
 0x515   : > { %v2971_v21 = vmax.f32 %v2888_v16, 0.0 }
 0x516   : > { %v3008_v22 = vpack.c.bf16 %v2970_v19, %v2968_v18 }
 0x517   : > { %v3009_v23 = vpack.c.bf16 %v2971_v21, %v2969_v20  ;;  %v2891_v24 = vpop.f32.mrb[116].mxu1 }
 0x518   : > { %v2892_v25 = vadd.f32 %v2891_v24, %v9979_v40  ;;  %v2893_v26 = vpop.f32.mrb[117].mxu1 }
 0x519   : > { %v2894_v27 = vadd.f32 %v2893_v26, %v9982_v43  ;;  %v2895_v28 = vpop.f32.mrb[118].mxu1  ;;  %3372 = vmatprep.mubr.bf16.mxu0 %v3009_v23  ;;  %v8424_v26 = vld [vmem:[#allocation9] ss:$8 sps:$4 sm:$0xff]  }
 0x51a   : > { %v2896_v29 = vadd.f32 %v2895_v28, %v9979_v40  ;;  %v2897_v30 = vpop.f32.mrb[119].mxu1  ;;  %3373 = vmatmul.mubr.bf16.gmra.mrb[176].mxu0 %v3008_v22  ;;  %v2972_v33 = vmax.f32 %v2892_v25, 0.0 }
 0x51b   : > { %v2898_v32 = vadd.f32 %v2897_v30, %v9982_v43  ;;  %v2973_v35 = vmax.f32 %v2894_v27, 0.0 }
 0x51c   : > { %v2974_v34 = vmax.f32 %v2896_v29, 0.0  ;;  %v8429_v29 = vld [vmem:[#allocation9 + $0x14] ss:$8 sps:$4 sm:$0xff]  }
 0x51d   : > { %v2975_v36 = vmax.f32 %v2898_v32, 0.0 }
 0x51e   : > { %v3010_v12 = vpack.c.bf16 %v2974_v34, %v2972_v33 }
 0x51f   : > { %v3011_v13 = vpack.c.bf16 %v2975_v36, %v2973_v35  ;;  %v2901_v37 = vpop.f32.mrb[120].mxu1  ;;  %v8427_v35 = vld [vmem:[#allocation9 + $0x10] ss:$8 sps:$4 sm:$0xff]  }
 0x520   : > { %v2902_v38 = vadd.f32 %v2901_v37, %v9979_v40  ;;  %v2903_v11 = vpop.f32.mrb[121].mxu1  ;;  %v8435_v37 = vld [vmem:[#allocation9 + $0x34] ss:$8 sps:$4 sm:$0xff]  }
 0x521   : > { %v2904_v14 = vadd.f32 %v2903_v11, %v9982_v43  ;;  %v2905_v39 = vpop.f32.mrb[122].mxu1  ;;  %3382 = vmatprep.mubr.bf16.mxu0 %v3011_v13  ;;  %v8432_v13 = vld [vmem:[#allocation9 + $0x24] ss:$8 sps:$4 sm:$0xff]  }
 0x522   : > { %v2906_v44 = vadd.f32 %v2905_v39, %v9979_v40  ;;  %v2907_v45 = vpop.f32.mrb[123].mxu1  ;;  %3383 = vmatmul.mubr.bf16.gmra.mrb[180].mxu0 %v3010_v12  ;;  %v2976_v47 = vmax.f32 %v2902_v38, 0.0 }
 0x523   : > { %v2908_v46 = vadd.f32 %v2907_v45, %v9982_v43  ;;  %v2977_v49 = vmax.f32 %v2904_v14, 0.0  ;;  %v8430_v45 = vld [vmem:[#allocation9 + $0x20] ss:$8 sps:$4 sm:$0xff]  }
 0x524   : > { %v2978_v48 = vmax.f32 %v2906_v44, 0.0 }
 0x525   : > { %v2979_v50 = vmax.f32 %v2908_v46, 0.0  ;;  %v8433_v46 = vld [vmem:[#allocation9 + $0x30] ss:$8 sps:$4 sm:$0xff]  }
 0x526   : > { %v3012_v51 = vpack.c.bf16 %v2978_v48, %v2976_v47 }
 0x527   : > { %v3013_v52 = vpack.c.bf16 %v2979_v50, %v2977_v49  ;;  %v2911_v53 = vpop.f32.mrb[124].mxu1  ;;  %v3944_v49 = vand.u32 %v8435_v37, %v9419_v9 }
 0x528   : > { %v2912_v54 = vadd.f32 %v2911_v53, %v9979_v40  ;;  %v2913_v55 = vpop.f32.mrb[125].mxu1 }
 0x529   : > { %v2914_v56 = vadd.f32 %v2913_v55, %v9982_v43  ;;  %v2915_v57 = vpop.f32.mrb[126].mxu1  ;;  %3392 = vmatprep.mubr.bf16.mxu0 %v3013_v52  ;;  %v3941_v55 = vand.u32 %v8433_v46, %v9419_v9 }
 0x52a   : > { %v2916_v58 = vadd.f32 %v2915_v57, %v9979_v40  ;;  %v2917_v59 = vpop.f32.mrb[127].mxu1  ;;  %3393 = vmatmul.mubr.bf16.gmra.mrb[184].mxu0 %v3012_v51  ;;  %v2980_v61 = vmax.f32 %v2912_v54, 0.0  ;;  %v10055_v40 = vrot.slane %v3048_v5, %v9580_v8 }
 0x52b   : > { %v2918_v60 = vadd.f32 %v2917_v59, %v9982_v43  ;;  %v2981_v63 = vmax.f32 %v2914_v56, 0.0 }
 0x52c   : > { %v2982_v62 = vmax.f32 %v2916_v58, 0.0 }
 0x52d   : > { %v2983_v1 = vmax.f32 %v2918_v60, 0.0 }
 0x52e   : > { %v3014_v2 = vpack.c.bf16 %v2982_v62, %v2980_v61 }
 0x52f   : > { %v3015_v3 = vpack.c.bf16 %v2983_v1, %v2981_v63 }
 0x531   : > { %3402 = vmatprep.mubr.bf16.mxu0 %v3015_v3 }
 0x532   : > { %3403 = vmatmul.mubr.bf16.gmra.mrb[188].mxu0 %v3014_v2 }
 0x58d   : > { %v3254_v41 = vpop.f32.mrb[128].mxu0 }
 0x58e   : > { %v3255_v43 = vadd.f32 %v3254_v41, %v10052_v7  ;;  %v3256_v42 = vpop.f32.mrb[129].mxu0 }
 0x58f   : > { %v3257_v10 = vadd.f32 %v3256_v42, %v10055_v40  ;;  %v3258_v15 = vpop.f32.mrb[130].mxu0 }
 0x590   : > { %v3259_v16 = vadd.f32 %v3258_v15, %v10052_v7  ;;  %v3260_v17 = vpop.f32.mrb[131].mxu0  ;;  %v3413_v19 = vmax.f32 %v3255_v43, 0.0 }
 0x591   : > { %v3261_v18 = vadd.f32 %v3260_v17, %v10055_v40  ;;  %v3414_v21 = vmax.f32 %v3257_v10, 0.0 }
 0x592   : > { %v3415_v20 = vmax.f32 %v3259_v16, 0.0 }
 0x593   : > { %v3416_v22 = vmax.f32 %v3261_v18, 0.0 }
 0x594   : > { %v3477_v23 = vpack.c.bf16 %v3415_v20, %v3413_v19 }
 0x595   : > { %v3264_v24 = vpop.f32.mrb[132].mxu0  ;;  %v3478_v25 = vpack.c.bf16 %v3416_v22, %v3414_v21 }
 0x596   : > { %v3265_v27 = vadd.f32 %v3264_v24, %v10052_v7  ;;  %v3266_v28 = vpop.f32.mrb[133].mxu0 }
 0x597   : > { %v3267_v30 = vadd.f32 %v3266_v28, %v10055_v40  ;;  %v3268_v31 = vpop.f32.mrb[134].mxu0  ;;  %3741 = vmatprep.mubr.bf16.mxu1 %v3478_v25 }
 0x598   : > { %v3269_v32 = vadd.f32 %v3268_v31, %v10052_v7  ;;  %v3270_v33 = vpop.f32.mrb[135].mxu0  ;;  %3742 = vmatmul.mubr.bf16.vlgmr.msra.gmra.mrb[128].mxu1 %v3477_v23  ;;  %v3417_v36 = vmax.f32 %v3265_v27, 0.0 }
 0x599   : > { %v3271_v34 = vadd.f32 %v3270_v33, %v10055_v40  ;;  %3947 = vmatpush1.bf16.msra.mxu1 %v8424_v26  ;;  %v3418_v38 = vmax.f32 %v3267_v30, 0.0 }
 0x59a   : > { %v3419_v12 = vmax.f32 %v3269_v32, 0.0  ;;  %3948 = vmatprep.subr.bf16.mxu1 %v8429_v29 }
 0x59b   : > { %v3420_v11 = vmax.f32 %v3271_v34, 0.0 }
 0x59c   : > { %v3479_v14 = vpack.c.bf16 %v3419_v12, %v3417_v36 }
 0x59d   : > { %v3274_v39 = vpop.f32.mrb[136].mxu0  ;;  %v3480_v44 = vpack.c.bf16 %v3420_v11, %v3418_v38  ;;  %3949 = vmatpush1.bf16.msra.mxu1 %v8427_v35 }
 0x59e   : > { %v3275_v47 = vadd.f32 %v3274_v39, %v10052_v7  ;;  %v3276_v48 = vpop.f32.mrb[137].mxu0  ;;  %3950 = vmatprep.subr.bf16.mxu1 %v8432_v13 }
 0x59f   : > { %v3277_v50 = vadd.f32 %v3276_v48, %v10055_v40  ;;  %v3278_v51 = vpop.f32.mrb[138].mxu0  ;;  %3751 = vmatprep.mubr.bf16.mxu1 %v3480_v44 }
 0x5a0   : > { %v3279_v52 = vadd.f32 %v3278_v51, %v10052_v7  ;;  %v3280_v53 = vpop.f32.mrb[139].mxu0  ;;  %3752 = vmatmul.mubr.bf16.gmra.mrb[132].mxu1 %v3479_v14  ;;  %v3421_v56 = vmax.f32 %v3275_v47, 0.0 }
 0x5a1   : > { %v3281_v54 = vadd.f32 %v3280_v53, %v10055_v40  ;;  %3951 = vmatpush1.bf16.msra.mxu1 %v8430_v45  ;;  %v3422_v58 = vmax.f32 %v3277_v50, 0.0 }
 0x5a2   : > { %v3423_v57 = vmax.f32 %v3279_v52, 0.0  ;;  %3952 = vmatprep.subr.bf16.mxu1 %v3944_v49 }
 0x5a3   : > { %v3424_v59 = vmax.f32 %v3281_v54, 0.0 }
 0x5a4   : > { %v3481_v60 = vpack.c.bf16 %v3423_v57, %v3421_v56 }
 0x5a5   : > { %v3284_v61 = vpop.f32.mrb[140].mxu0  ;;  %v3482_v62 = vpack.c.bf16 %v3424_v59, %v3422_v58  ;;  %3953 = vmatpush1.bf16.msra.mxu1 %v3941_v55 }
 0x5a6   : > { %v3285_v63 = vadd.f32 %v3284_v61, %v10052_v7  ;;  %v3286_v1 = vpop.f32.mrb[141].mxu0 }
 0x5a7   : > { %v3287_v2 = vadd.f32 %v3286_v1, %v10055_v40  ;;  %v3288_v3 = vpop.f32.mrb[142].mxu0  ;;  %3761 = vmatprep.mubr.bf16.mxu1 %v3482_v62 }
 0x5a8   : > { %v3289_v5 = vadd.f32 %v3288_v3, %v10052_v7  ;;  %v3290_v41 = vpop.f32.mrb[143].mxu0  ;;  %3762 = vmatmul.mubr.bf16.gmra.mrb[136].mxu1 %v3481_v60  ;;  %v3425_v43 = vmax.f32 %v3285_v63, 0.0 }
 0x5a9   : > { %v3291_v9 = vadd.f32 %v3290_v41, %v10055_v40  ;;  %v3426_v10 = vmax.f32 %v3287_v2, 0.0 }
 0x5aa   : > { %v3427_v42 = vmax.f32 %v3289_v5, 0.0 }
 0x5ab   : > { %v3428_v15 = vmax.f32 %v3291_v9, 0.0 }
 0x5ac   : > { %v3483_v16 = vpack.c.bf16 %v3427_v42, %v3425_v43 }
 0x5ad   : > { %v3294_v17 = vpop.f32.mrb[144].mxu0  ;;  %v3484_v18 = vpack.c.bf16 %v3428_v15, %v3426_v10 }
 0x5ae   : > { %v3295_v19 = vadd.f32 %v3294_v17, %v10052_v7  ;;  %v3296_v20 = vpop.f32.mrb[145].mxu0 }
 0x5af   : > { %v3297_v21 = vadd.f32 %v3296_v20, %v10055_v40  ;;  %v3298_v22 = vpop.f32.mrb[146].mxu0  ;;  %3771 = vmatprep.mubr.bf16.mxu1 %v3484_v18 }
 0x5b0   : > { %v3299_v23 = vadd.f32 %v3298_v22, %v10052_v7  ;;  %v3300_v24 = vpop.f32.mrb[147].mxu0  ;;  %3772 = vmatmul.mubr.bf16.gmra.mrb[140].mxu1 %v3483_v16  ;;  %v3429_v26 = vmax.f32 %v3295_v19, 0.0 }
 0x5b1   : > { %v3301_v25 = vadd.f32 %v3300_v24, %v10055_v40  ;;  %v3430_v28 = vmax.f32 %v3297_v21, 0.0 }
 0x5b2   : > { %v3431_v27 = vmax.f32 %v3299_v23, 0.0 }
 0x5b3   : > { %v3432_v29 = vmax.f32 %v3301_v25, 0.0 }
 0x5b4   : > { %v3485_v30 = vpack.c.bf16 %v3431_v27, %v3429_v26 }
 0x5b5   : > { %v3304_v31 = vpop.f32.mrb[148].mxu0  ;;  %v3486_v32 = vpack.c.bf16 %v3432_v29, %v3430_v28 }
 0x5b6   : > { %v3305_v33 = vadd.f32 %v3304_v31, %v10052_v7  ;;  %v3306_v34 = vpop.f32.mrb[149].mxu0 }
 0x5b7   : > { %v3307_v35 = vadd.f32 %v3306_v34, %v10055_v40  ;;  %v3308_v36 = vpop.f32.mrb[150].mxu0  ;;  %3781 = vmatprep.mubr.bf16.mxu1 %v3486_v32 }
 0x5b8   : > { %v3309_v12 = vadd.f32 %v3308_v36, %v10052_v7  ;;  %v3310_v13 = vpop.f32.mrb[151].mxu0  ;;  %3782 = vmatmul.mubr.bf16.gmra.mrb[144].mxu1 %v3485_v30  ;;  %v3433_v38 = vmax.f32 %v3305_v33, 0.0 }
 0x5b9   : > { %v3311_v37 = vadd.f32 %v3310_v13, %v10055_v40  ;;  %v3434_v14 = vmax.f32 %v3307_v35, 0.0 }
 0x5ba   : > { %v3435_v11 = vmax.f32 %v3309_v12, 0.0 }
 0x5bb   : > { %v3436_v39 = vmax.f32 %v3311_v37, 0.0 }
 0x5bc   : > { %v3487_v44 = vpack.c.bf16 %v3435_v11, %v3433_v38 }
 0x5bd   : > { %v3314_v45 = vpop.f32.mrb[152].mxu0  ;;  %v3488_v46 = vpack.c.bf16 %v3436_v39, %v3434_v14 }
 0x5be   : > { %v3315_v47 = vadd.f32 %v3314_v45, %v10052_v7  ;;  %v3316_v48 = vpop.f32.mrb[153].mxu0 }
 0x5bf   : > { %v3317_v49 = vadd.f32 %v3316_v48, %v10055_v40  ;;  %v3318_v50 = vpop.f32.mrb[154].mxu0  ;;  %3791 = vmatprep.mubr.bf16.mxu1 %v3488_v46 }
 0x5c0   : > { %v3319_v51 = vadd.f32 %v3318_v50, %v10052_v7  ;;  %v3320_v52 = vpop.f32.mrb[155].mxu0  ;;  %3792 = vmatmul.mubr.bf16.gmra.mrb[148].mxu1 %v3487_v44  ;;  %v3437_v54 = vmax.f32 %v3315_v47, 0.0 }
 0x5c1   : > { %v3321_v53 = vadd.f32 %v3320_v52, %v10055_v40  ;;  %v3438_v56 = vmax.f32 %v3317_v49, 0.0 }
 0x5c2   : > { %v3439_v55 = vmax.f32 %v3319_v51, 0.0 }
 0x5c3   : > { %v3440_v57 = vmax.f32 %v3321_v53, 0.0 }
 0x5c4   : > { %v3489_v58 = vpack.c.bf16 %v3439_v55, %v3437_v54 }
 0x5c5   : > { %v3324_v59 = vpop.f32.mrb[156].mxu0  ;;  %v3490_v60 = vpack.c.bf16 %v3440_v57, %v3438_v56 }
 0x5c6   : > { %v3325_v61 = vadd.f32 %v3324_v59, %v10052_v7  ;;  %v3326_v62 = vpop.f32.mrb[157].mxu0 }
 0x5c7   : > { %v3327_v63 = vadd.f32 %v3326_v62, %v10055_v40  ;;  %v3328_v1 = vpop.f32.mrb[158].mxu0  ;;  %3801 = vmatprep.mubr.bf16.mxu1 %v3490_v60 }
 0x5c8   : > { %v3329_v2 = vadd.f32 %v3328_v1, %v10052_v7  ;;  %v3330_v3 = vpop.f32.mrb[159].mxu0  ;;  %3802 = vmatmul.mubr.bf16.gmra.mrb[152].mxu1 %v3489_v58  ;;  %v3441_v41 = vmax.f32 %v3325_v61, 0.0 }
 0x5c9   : > { %v3331_v5 = vadd.f32 %v3330_v3, %v10055_v40  ;;  %v3442_v43 = vmax.f32 %v3327_v63, 0.0 }
 0x5ca   : > { %v3443_v9 = vmax.f32 %v3329_v2, 0.0 }
 0x5cb   : > { %v3444_v42 = vmax.f32 %v3331_v5, 0.0 }
 0x5cc   : > { %v3491_v10 = vpack.c.bf16 %v3443_v9, %v3441_v41 }
 0x5cd   : > { %v3334_v15 = vpop.f32.mrb[160].mxu0  ;;  %v3492_v16 = vpack.c.bf16 %v3444_v42, %v3442_v43 }
 0x5ce   : > { %v3335_v17 = vadd.f32 %v3334_v15, %v10052_v7  ;;  %v3336_v18 = vpop.f32.mrb[161].mxu0 }
 0x5cf   : > { %v3337_v19 = vadd.f32 %v3336_v18, %v10055_v40  ;;  %v3338_v20 = vpop.f32.mrb[162].mxu0  ;;  %3811 = vmatprep.mubr.bf16.mxu1 %v3492_v16 }
 0x5d0   : > { %v3339_v21 = vadd.f32 %v3338_v20, %v10052_v7  ;;  %v3340_v22 = vpop.f32.mrb[163].mxu0  ;;  %3812 = vmatmul.mubr.bf16.gmra.mrb[156].mxu1 %v3491_v10  ;;  %v3445_v24 = vmax.f32 %v3335_v17, 0.0 }
 0x5d1   : > { %v3341_v23 = vadd.f32 %v3340_v22, %v10055_v40  ;;  %v3446_v26 = vmax.f32 %v3337_v19, 0.0  ;;  %v8438_v22 = vld [vmem:[#allocation12 + $0x4] ss:$8 sps:$4 sm:$0xff]  }
 0x5d2   : > { %v3447_v25 = vmax.f32 %v3339_v21, 0.0  ;;  %v8436_v21 = vld [vmem:[#allocation12] ss:$8 sps:$4 sm:$0xff]   ;;  %4515 = vmatprep.subr.bf16.mxu0 %v8438_v22  ;;  %v8451_v22 = vld [vmem:[#allocation12 + $0x50] ss:$8 sps:$4 sm:$0xff]  }
 0x5d3   : > { %v3448_v27 = vmax.f32 %v3341_v23, 0.0  ;;  %4516 = vmatpush1.bf16.msra.mxu0 %v8436_v21  ;;  %v8450_v21 = vld [vmem:[#allocation12 + $0x44] ss:$8 sps:$4 sm:$0xff]  }
 0x5d4   : > { %v3493_v28 = vpack.c.bf16 %v3447_v25, %v3445_v24 }
 0x5d5   : > { %v3344_v29 = vpop.f32.mrb[164].mxu0  ;;  %v3494_v30 = vpack.c.bf16 %v3448_v27, %v3446_v26 }
 0x5d6   : > { %v3345_v31 = vadd.f32 %v3344_v29, %v10052_v7  ;;  %v3346_v32 = vpop.f32.mrb[165].mxu0 }
 0x5d7   : > { %v3347_v33 = vadd.f32 %v3346_v32, %v10055_v40  ;;  %v3348_v34 = vpop.f32.mrb[166].mxu0  ;;  %3821 = vmatprep.mubr.bf16.mxu1 %v3494_v30 }
 0x5d8   : > { %v3349_v35 = vadd.f32 %v3348_v34, %v10052_v7  ;;  %v3350_v36 = vpop.f32.mrb[167].mxu0  ;;  %3822 = vmatmul.mubr.bf16.gmra.mrb[160].mxu1 %v3493_v28  ;;  %v3449_v13 = vmax.f32 %v3345_v31, 0.0 }
 0x5d9   : > { %v3351_v12 = vadd.f32 %v3350_v36, %v10055_v40  ;;  %v3450_v38 = vmax.f32 %v3347_v33, 0.0 }
 0x5da   : > { %v3451_v37 = vmax.f32 %v3349_v35, 0.0 }
 0x5db   : > { %v3452_v11 = vmax.f32 %v3351_v12, 0.0  ;;  %v8439_v12 = vld [vmem:[#allocation12 + $0x10] ss:$8 sps:$4 sm:$0xff]  }
 0x5dc   : > { %v3495_v14 = vpack.c.bf16 %v3451_v37, %v3449_v13  ;;  %v8441_v13 = vld [vmem:[#allocation12 + $0x14] ss:$8 sps:$4 sm:$0xff]  }
 0x5dd   : > { %v3354_v39 = vpop.f32.mrb[168].mxu0  ;;  %v3496_v44 = vpack.c.bf16 %v3452_v11, %v3450_v38  ;;  %4517 = vmatprep.subr.bf16.mxu0 %v8441_v13  ;;  %v8472_v13 = vld [vmem:[#allocation12 + $0xc0] ss:$8 sps:$4 sm:$0xff]  }
 0x5de   : > { %v3355_v45 = vadd.f32 %v3354_v39, %v10052_v7  ;;  %v3356_v46 = vpop.f32.mrb[169].mxu0  ;;  %4518 = vmatpush1.bf16.msra.mxu0 %v8439_v12  ;;  %v8474_v12 = vld [vmem:[#allocation12 + $0xc4] ss:$8 sps:$4 sm:$0xff]  }
 0x5df   : > { %v3357_v47 = vadd.f32 %v3356_v46, %v10055_v40  ;;  %v3358_v48 = vpop.f32.mrb[170].mxu0  ;;  %3831 = vmatprep.mubr.bf16.mxu1 %v3496_v44 }
 0x5e0   : > { %v3359_v49 = vadd.f32 %v3358_v48, %v10052_v7  ;;  %v3360_v50 = vpop.f32.mrb[171].mxu0  ;;  %3832 = vmatmul.mubr.bf16.gmra.mrb[164].mxu1 %v3495_v14  ;;  %v3453_v52 = vmax.f32 %v3355_v45, 0.0 }
 0x5e1   : > { %v3361_v51 = vadd.f32 %v3360_v50, %v10055_v40  ;;  %v3454_v54 = vmax.f32 %v3357_v47, 0.0 }
 0x5e2   : > { %v3455_v53 = vmax.f32 %v3359_v49, 0.0 }
 0x5e3   : > { %v3456_v55 = vmax.f32 %v3361_v51, 0.0 }
 0x5e4   : > { %v3497_v56 = vpack.c.bf16 %v3455_v53, %v3453_v52  ;;  %v8442_v53 = vld [vmem:[#allocation12 + $0x20] ss:$8 sps:$4 sm:$0xff]  }
 0x5e5   : > { %v3364_v57 = vpop.f32.mrb[172].mxu0  ;;  %v3498_v58 = vpack.c.bf16 %v3456_v55, %v3454_v54  ;;  %v8444_v54 = vld [vmem:[#allocation12 + $0x24] ss:$8 sps:$4 sm:$0xff]  }
 0x5e6   : > { %v3365_v59 = vadd.f32 %v3364_v57, %v10052_v7  ;;  %v3366_v60 = vpop.f32.mrb[173].mxu0  ;;  %4519 = vmatprep.subr.bf16.mxu0 %v8444_v54  ;;  %v8650_v54 = vld [vmem:[%s9417_s23 + $0x60] sm:$0xff]  }
 0x5e7   : > { %v3367_v61 = vadd.f32 %v3366_v60, %v10055_v40  ;;  %v3368_v62 = vpop.f32.mrb[174].mxu0  ;;  %3841 = vmatprep.mubr.bf16.mxu1 %v3498_v58  ;;  %4520 = vmatpush1.bf16.msra.mxu0 %v8442_v53  ;;  %v8481_v53 = vld [vmem:[#allocation12 + $0xf0] ss:$8 sps:$4 sm:$0xff]  }
 0x5e8   : > { %v3369_v63 = vadd.f32 %v3368_v62, %v10052_v7  ;;  %v3370_v1 = vpop.f32.mrb[175].mxu0  ;;  %3842 = vmatmul.mubr.bf16.gmra.mrb[168].mxu1 %v3497_v56  ;;  %v3457_v3 = vmax.f32 %v3365_v59, 0.0 }
 0x5e9   : > { %v3371_v2 = vadd.f32 %v3370_v1, %v10055_v40  ;;  %v3458_v41 = vmax.f32 %v3367_v61, 0.0 }
 0x5ea   : > { %v3459_v5 = vmax.f32 %v3369_v63, 0.0 }
 0x5eb   : > { %v3460_v9 = vmax.f32 %v3371_v2, 0.0 }
 0x5ec   : > { %v3499_v43 = vpack.c.bf16 %v3459_v5, %v3457_v3 }
 0x5ed   : > { %v3500_v42 = vpack.c.bf16 %v3460_v9, %v3458_v41  ;;  %v3374_v10 = vpop.f32.mrb[176].mxu0  ;;  %v8445_v9 = vld [vmem:[#allocation12 + $0x30] ss:$8 sps:$4 sm:$0xff]  }
 0x5ee   : > { %v3375_v15 = vadd.f32 %v3374_v10, %v10052_v7  ;;  %v3376_v16 = vpop.f32.mrb[177].mxu0 }
 0x5ef   : > { %v3377_v17 = vadd.f32 %v3376_v16, %v10055_v40  ;;  %v3378_v18 = vpop.f32.mrb[178].mxu0  ;;  %3851 = vmatprep.mubr.bf16.mxu1 %v3500_v42 }
 0x5f0   : > { %v3379_v19 = vadd.f32 %v3378_v18, %v10052_v7  ;;  %v3380_v20 = vpop.f32.mrb[179].mxu0  ;;  %3852 = vmatmul.mubr.bf16.gmra.mrb[172].mxu1 %v3499_v43  ;;  %v3461_v24 = vmax.f32 %v3375_v15, 0.0  ;;  %v8447_v43 = vld [vmem:[#allocation12 + $0x34] ss:$8 sps:$4 sm:$0xff]  }
 0x5f1   : > { %v3381_v23 = vadd.f32 %v3380_v20, %v10055_v40  ;;  %v3462_v26 = vmax.f32 %v3377_v17, 0.0  ;;  %4521 = vmatprep.subr.bf16.mxu0 %v8447_v43  ;;  %v8448_v20 = vld [vmem:[#allocation12 + $0x40] ss:$8 sps:$4 sm:$0xff]  }
 0x5f2   : > { %v3463_v25 = vmax.f32 %v3379_v19, 0.0  ;;  %4522 = vmatpush1.bf16.msra.mxu0 %v8445_v9 }
 0x5f3   : > { %v3464_v27 = vmax.f32 %v3381_v23, 0.0  ;;  %4523 = vmatprep.subr.bf16.mxu0 %v8450_v21  ;;  %v8454_v23 = vld [vmem:[#allocation12 + $0x60] ss:$8 sps:$4 sm:$0xff]   ;;  %v8489_v21 = vld [vmem:[#allocation13 + $0x14] ss:$8 sps:$4 sm:$0xff]  }
 0x5f4   : > { %v3501_v28 = vpack.c.bf16 %v3463_v25, %v3461_v24  ;;  %v8638_v24 = vld [vmem:[%s9417_s23] sm:$0xff]  }
 0x5f5   : > { %v3502_v29 = vpack.c.bf16 %v3464_v27, %v3462_v26  ;;  %v3384_v30 = vpop.f32.mrb[180].mxu0  ;;  %v8459_v25 = vld [vmem:[#allocation12 + $0x74] ss:$8 sps:$4 sm:$0xff]   ;;  %v8457_v26 = vld [vmem:[#allocation12 + $0x70] ss:$8 sps:$4 sm:$0xff]  }
 0x5f6   : > { %v3385_v31 = vadd.f32 %v3384_v30, %v10052_v7  ;;  %v3386_v32 = vpop.f32.mrb[181].mxu0  ;;  %4524 = vmatpush1.bf16.msra.mxu0 %v8448_v20  ;;  %v8462_v27 = vld [vmem:[#allocation12 + $0x84] ss:$8 sps:$4 sm:$0xff]   ;;  %v8465_v30 = vld [vmem:[#allocation12 + $0x94] ss:$8 sps:$4 sm:$0xff]  }
 0x5f7   : > { %v3387_v33 = vadd.f32 %v3386_v32, %v10055_v40  ;;  %v3388_v34 = vpop.f32.mrb[182].mxu0  ;;  %3861 = vmatprep.mubr.bf16.mxu1 %v3502_v29  ;;  %v8639_v29 = vld [vmem:[%s9417_s23 + $0x8] sm:$0xff]  }
 0x5f8   : > { %v3389_v35 = vadd.f32 %v3388_v34, %v10052_v7  ;;  %v3390_v36 = vpop.f32.mrb[183].mxu0  ;;  %3862 = vmatmul.mubr.bf16.gmra.mrb[176].mxu1 %v3501_v28  ;;  %v3465_v38 = vmax.f32 %v3385_v31, 0.0  ;;  %v8460_v28 = vld [vmem:[#allocation12 + $0x80] ss:$8 sps:$4 sm:$0xff]   ;;  %v8463_v31 = vld [vmem:[#allocation12 + $0x90] ss:$8 sps:$4 sm:$0xff]  }
 0x5f9   : > { %v3391_v37 = vadd.f32 %v3390_v36, %v10055_v40  ;;  %v3466_v14 = vmax.f32 %v3387_v33, 0.0  ;;  %v8468_v32 = vld [vmem:[#allocation12 + $0xa4] ss:$8 sps:$4 sm:$0xff]   ;;  %v8466_v33 = vld [vmem:[#allocation12 + $0xa0] ss:$8 sps:$4 sm:$0xff]  }
 0x5fa   : > { %v3467_v11 = vmax.f32 %v3389_v35, 0.0  ;;  %v8640_v34 = vld [vmem:[%s9417_s23 + $0x10] sm:$0xff]   ;;  %v8471_v35 = vld [vmem:[#allocation12 + $0xb4] ss:$8 sps:$4 sm:$0xff]  }
 0x5fb   : > { %v3468_v39 = vmax.f32 %v3391_v37, 0.0  ;;  %v8469_v36 = vld [vmem:[#allocation12 + $0xb0] ss:$8 sps:$4 sm:$0xff]  }
 0x5fc   : > { %v3503_v44 = vpack.c.bf16 %v3467_v11, %v3465_v38  ;;  %v8641_v37 = vld [vmem:[%s9417_s23 + $0x18] sm:$0xff]  }
 0x5fd   : > { %v3504_v45 = vpack.c.bf16 %v3468_v39, %v3466_v14  ;;  %v3394_v46 = vpop.f32.mrb[184].mxu0  ;;  %v8477_v38 = vld [vmem:[#allocation12 + $0xd4] ss:$8 sps:$4 sm:$0xff]   ;;  %v8475_v11 = vld [vmem:[#allocation12 + $0xd0] ss:$8 sps:$4 sm:$0xff]  }
 0x5fe   : > { %v3395_v47 = vadd.f32 %v3394_v46, %v10052_v7  ;;  %v3396_v48 = vpop.f32.mrb[185].mxu0  ;;  %v8480_v14 = vld [vmem:[#allocation12 + $0xe4] ss:$8 sps:$4 sm:$0xff]   ;;  %v8478_v39 = vld [vmem:[#allocation12 + $0xe0] ss:$8 sps:$4 sm:$0xff]  }
 0x5ff   : > { %v3397_v49 = vadd.f32 %v3396_v48, %v10055_v40  ;;  %v3398_v50 = vpop.f32.mrb[186].mxu0  ;;  %3871 = vmatprep.mubr.bf16.mxu1 %v3504_v45  ;;  %v8643_v45 = vld [vmem:[%s9417_s23 + $0x28] sm:$0xff]   ;;  %v8644_v46 = vld [vmem:[%s9417_s23 + $0x30] sm:$0xff]   ;;  %v8646_v48 = vld [vmem:[%s9417_s23 + $0x40] sm:$0xff]  }
 0x600   : > { %v3399_v51 = vadd.f32 %v3398_v50, %v10052_v7  ;;  %v3400_v52 = vpop.f32.mrb[187].mxu0  ;;  %3872 = vmatmul.mubr.bf16.gmra.mrb[180].mxu1 %v3503_v44  ;;  %v3469_v56 = vmax.f32 %v3395_v47, 0.0  ;;  %v8642_v44 = vld [vmem:[%s9417_s23 + $0x20] sm:$0xff]   ;;  %v8645_v47 = vld [vmem:[%s9417_s23 + $0x38] sm:$0xff]   ;;  %v8648_v50 = vld [vmem:[%s9417_s23 + $0x50] sm:$0xff]  }
 0x601   : > { %v3401_v55 = vadd.f32 %v3400_v52, %v10055_v40  ;;  %v3470_v58 = vmax.f32 %v3397_v49, 0.0  ;;  %v8647_v49 = vld [vmem:[%s9417_s23 + $0x48] sm:$0xff]   ;;  %v8483_v52 = vld [vmem:[#allocation12 + $0xf4] ss:$8 sps:$4 sm:$0xff]  }
 0x602   : > { %v3471_v57 = vmax.f32 %v3399_v51, 0.0  ;;  %v8649_v51 = vld [vmem:[%s9417_s23 + $0x58] sm:$0xff]  }
 0x603   : > { %v3472_v59 = vmax.f32 %v3401_v55, 0.0  ;;  %v8651_v55 = vld [vmem:[%s9417_s23 + $0x68] sm:$0xff]  }
 0x604   : > { %v3505_v60 = vpack.c.bf16 %v3471_v57, %v3469_v56  ;;  %v8652_v56 = vld [vmem:[%s9417_s23 + $0x70] sm:$0xff]   ;;  %v8653_v57 = vld [vmem:[%s9417_s23 + $0x78] sm:$0xff]  }
 0x605   : > { %v3506_v61 = vpack.c.bf16 %v3472_v59, %v3470_v58  ;;  %v3404_v62 = vpop.f32.mrb[188].mxu0  ;;  %v8486_v58 = vld [vmem:[#allocation13 + $0x4] ss:$8 sps:$4 sm:$0xff]   ;;  %v4139_v59 = vld [vmem:[%s11126_s14] sm:$0x3] }
 0x606   : > { %v3405_v63 = vadd.f32 %v3404_v62, %v10052_v7  ;;  %v3406_v1 = vpop.f32.mrb[189].mxu0 }
 0x607   : > { %v3407_v2 = vadd.f32 %v3406_v1, %v10055_v40  ;;  %v3408_v3 = vpop.f32.mrb[190].mxu0  ;;  %3881 = vmatprep.mubr.bf16.mxu1 %v3506_v61  ;;  %v10178_v61 = vrot.slane %v4139_v59, %v9580_v8 }
 0x608   : > { %v3409_v5 = vadd.f32 %v3408_v3, %v10052_v7  ;;  %v3410_v41 = vpop.f32.mrb[191].mxu0  ;;  %3882 = vmatmul.mubr.bf16.gmra.mrb[184].mxu1 %v3505_v60  ;;  %v3473_v10 = vmax.f32 %v3405_v63, 0.0  ;;  %v8453_v7 = vld [vmem:[#allocation12 + $0x54] ss:$8 sps:$4 sm:$0xff]   ;;  %v10175_v60 = vrot.slane %v4139_v59, %v9578_v6 }
 0x609   : > { %v3411_v42 = vadd.f32 %v3410_v41, %v10055_v40  ;;  %v3474_v16 = vmax.f32 %v3407_v2, 0.0  ;;  %4525 = vmatprep.subr.bf16.mxu0 %v8453_v7  ;;  %v8456_v40 = vld [vmem:[#allocation12 + $0x64] ss:$8 sps:$4 sm:$0xff]  }
 0x60a   : > { %v3475_v15 = vmax.f32 %v3409_v5, 0.0  ;;  %4526 = vmatpush1.bf16.msra.mxu0 %v8451_v22 }
 0x60b   : > { %v3476_v17 = vmax.f32 %v3411_v42, 0.0  ;;  %4527 = vmatprep.subr.bf16.mxu0 %v8456_v40 }
 0x60c   : > { %v3507_v18 = vpack.c.bf16 %v3475_v15, %v3473_v10 }
 0x60d   : > { %v3508_v19 = vpack.c.bf16 %v3476_v17, %v3474_v16 }
 0x60e   : > { %4528 = vmatpush1.bf16.msra.mxu0 %v8454_v23 }
 0x60f   : > { %3891 = vmatprep.mubr.bf16.mxu1 %v3508_v19  ;;  %4529 = vmatprep.subr.bf16.mxu0 %v8459_v25  ;;  %v8487_v25 = vld [vmem:[#allocation13 + $0x10] ss:$8 sps:$4 sm:$0xff]  }
 0x610   : > { %3892 = vmatmul.mubr.bf16.gmra.mrb[188].mxu1 %v3507_v18  ;;  %v8484_v18 = vld [vmem:[#allocation13] ss:$8 sps:$4 sm:$0xff]  }
 0x611   : > { %3978 = vmatprep.mubr.bf16.mxu1 %v8980_v0 }
 0x612   : > { %4530 = vmatpush1.bf16.msra.mxu0 %v8457_v26 }
 0x613   : > { %4531 = vmatprep.subr.bf16.mxu0 %v8462_v27 }
 0x616   : > { %4532 = vmatpush1.bf16.msra.mxu0 %v8460_v28  ;;  %v8492_v28 = vld [vmem:[#allocation13 + $0x24] ss:$8 sps:$4 sm:$0xff]  }
 0x617   : > { %4533 = vmatprep.subr.bf16.mxu0 %v8465_v30 }
 0x618   : > { %7405 = vmatmul.mubr.msk.bf16.vlgmr.msra.gmra.mrb[128].mxu1 %vm1189_vm2, %v8638_v24 }
 0x619   : > { %3988 = vmatprep.mubr.bf16.mxu1 %v8980_v0 }
 0x61a   : > { %4534 = vmatpush1.bf16.msra.mxu0 %v8463_v31 }
 0x61b   : > { %4535 = vmatprep.subr.bf16.mxu0 %v8468_v32 }
 0x61e   : > { %4536 = vmatpush1.bf16.msra.mxu0 %v8466_v33 }
 0x61f   : > { %4537 = vmatprep.subr.bf16.mxu0 %v8471_v35 }
 0x620   : > { %7406 = vmatmul.mubr.msk.bf16.gmra.mrb[132].mxu1 %vm1189_vm2, %v8639_v29 }
 0x621   : > { %3998 = vmatprep.mubr.bf16.mxu1 %v8980_v0 }
 0x622   : > { %4538 = vmatpush1.bf16.msra.mxu0 %v8469_v36 }
 0x623   : > { %4539 = vmatprep.subr.bf16.mxu0 %v8474_v12  ;;  %v8495_v12 = vld [vmem:[#allocation13 + $0x34] ss:$8 sps:$4 sm:$0xff]  }
 0x626   : > { %4540 = vmatpush1.bf16.msra.mxu0 %v8472_v13 }
 0x627   : > { %4541 = vmatprep.subr.bf16.mxu0 %v8477_v38 }
 0x628   : > { %7407 = vmatmul.mubr.msk.bf16.gmra.mrb[136].mxu1 %vm1189_vm2, %v8640_v34  ;;  %v8490_v34 = vld [vmem:[#allocation13 + $0x20] ss:$8 sps:$4 sm:$0xff]  }
 0x629   : > { %4008 = vmatprep.mubr.bf16.mxu1 %v8980_v0 }
 0x62a   : > { %4542 = vmatpush1.bf16.msra.mxu0 %v8475_v11 }
 0x62b   : > { %4543 = vmatprep.subr.bf16.mxu0 %v8480_v14 }
 0x62e   : > { %4544 = vmatpush1.bf16.msra.mxu0 %v8478_v39  ;;  %v8493_v39 = vld [vmem:[#allocation13 + $0x30] ss:$8 sps:$4 sm:$0xff]  }
 0x62f   : > { %4545 = vmatprep.subr.bf16.mxu0 %v8483_v52  ;;  %v8496_v52 = vld [vmem:[#allocation13 + $0x40] ss:$8 sps:$4 sm:$0xff]  }
 0x630   : > { %7408 = vmatmul.mubr.msk.bf16.gmra.mrb[140].mxu1 %vm1189_vm2, %v8641_v37 }
 0x631   : > { %4018 = vmatprep.mubr.bf16.mxu1 %v8980_v0 }
 0x632   : > { %4546 = vmatpush1.bf16.msra.mxu0 %v8481_v53 }
 0x633   : > { %5008 = vmatprep.subr.bf16.mxu0 %v8486_v58 }
 0x638   : > { %7409 = vmatmul.mubr.msk.bf16.gmra.mrb[144].mxu1 %vm1189_vm2, %v8642_v44 }
 0x639   : > { %4028 = vmatprep.mubr.bf16.mxu1 %v8980_v0 }
 0x640   : > { %7410 = vmatmul.mubr.msk.bf16.gmra.mrb[148].mxu1 %vm1189_vm2, %v8643_v45 }
 0x641   : > { %4038 = vmatprep.mubr.bf16.mxu1 %v8980_v0 }
 0x648   : > { %7411 = vmatmul.mubr.msk.bf16.gmra.mrb[152].mxu1 %vm1189_vm2, %v8644_v46  ;;  %v8498_v46 = vld [vmem:[#allocation13 + $0x44] ss:$8 sps:$4 sm:$0xff]  }
 0x649   : > { %4048 = vmatprep.mubr.bf16.mxu1 %v8980_v0 }
 0x650   : > { %7412 = vmatmul.mubr.msk.bf16.gmra.mrb[156].mxu1 %vm1189_vm2, %v8645_v47 }
 0x651   : > { %4058 = vmatprep.mubr.bf16.mxu1 %v8980_v0 }
 0x658   : > { %7413 = vmatmul.mubr.msk.bf16.gmra.mrb[160].mxu1 %vm1189_vm2, %v8646_v48 }
 0x659   : > { %4068 = vmatprep.mubr.bf16.mxu1 %v8980_v0 }
 0x660   : > { %7414 = vmatmul.mubr.msk.bf16.gmra.mrb[164].mxu1 %vm1189_vm2, %v8647_v49 }
 0x661   : > { %4078 = vmatprep.mubr.bf16.mxu1 %v8980_v0 }
 0x668   : > { %7415 = vmatmul.mubr.msk.bf16.gmra.mrb[168].mxu1 %vm1189_vm2, %v8648_v50 }
 0x669   : > { %4088 = vmatprep.mubr.bf16.mxu1 %v8980_v0 }
 0x670   : > { %7416 = vmatmul.mubr.msk.bf16.gmra.mrb[172].mxu1 %vm1189_vm2, %v8649_v51 }
 0x671   : > { %4098 = vmatprep.mubr.bf16.mxu1 %v8980_v0 }
 0x678   : > { %7417 = vmatmul.mubr.msk.bf16.gmra.mrb[176].mxu1 %vm1189_vm2, %v8650_v54 }
 0x679   : > { %4108 = vmatprep.mubr.bf16.mxu1 %v8980_v0 }
 0x680   : > { %7418 = vmatmul.mubr.msk.bf16.gmra.mrb[180].mxu1 %vm1189_vm2, %v8651_v55  ;;  %v8501_v55 = vld [vmem:[#allocation13 + $0x54] ss:$8 sps:$4 sm:$0xff]  }
 0x681   : > { %4118 = vmatprep.mubr.bf16.mxu1 %v8980_v0 }
 0x688   : > { %7419 = vmatmul.mubr.msk.bf16.gmra.mrb[184].mxu1 %vm1189_vm2, %v8652_v56 }
 0x689   : > { %4128 = vmatprep.mubr.bf16.mxu1 %v8980_v0 }
 0x690   : > { %7420 = vmatmul.mubr.msk.bf16.gmra.mrb[188].mxu1 %vm1189_vm2, %v8653_v57 }
 0x6eb   : > { %v3980_v62 = vpop.f32.mrb[128].mxu1 }
 0x6ec   : > { %v4151_v63 = vadd.f32 %v10175_v60, %v3980_v62  ;;  %v3982_v1 = vpop.f32.mrb[129].mxu1 }
 0x6ed   : > { %v4152_v0 = vadd.f32 %v10178_v61, %v3982_v1  ;;  %v3984_v2 = vpop.f32.mrb[130].mxu1 }
 0x6ee   : > { %v4153_v3 = vadd.f32 %v10175_v60, %v3984_v2  ;;  %v3986_v5 = vpop.f32.mrb[131].mxu1  ;;  %v4215_v9 = vmax.f32 %v4151_v63, 0.0  ;;  %v8499_v63 = vld [vmem:[#allocation13 + $0x50] ss:$8 sps:$4 sm:$0xff]   ;;  %v8504_v2 = vld [vmem:[#allocation13 + $0x64] ss:$8 sps:$4 sm:$0xff]  }
 0x6ef   : > { %v4154_v41 = vadd.f32 %v10178_v61, %v3986_v5  ;;  %v4216_v42 = vmax.f32 %v4152_v0, 0.0 }
 0x6f0   : > { %v4217_v43 = vmax.f32 %v4153_v3, 0.0 }
 0x6f1   : > { %v4218_v10 = vmax.f32 %v4154_v41, 0.0 }
 0x6f2   : > { %v4279_v15 = vpack.c.bf16 %v4217_v43, %v4215_v9 }
 0x6f3   : > { %v4280_v16 = vpack.c.bf16 %v4218_v10, %v4216_v42  ;;  %v3990_v17 = vpop.f32.mrb[132].mxu1  ;;  %v8502_v42 = vld [vmem:[#allocation13 + $0x60] ss:$8 sps:$4 sm:$0xff]  }
 0x6f4   : > { %v4155_v19 = vadd.f32 %v10175_v60, %v3990_v17  ;;  %v3992_v20 = vpop.f32.mrb[133].mxu1 }
 0x6f5   : > { %v4156_v7 = vadd.f32 %v10178_v61, %v3992_v20  ;;  %v3994_v22 = vpop.f32.mrb[134].mxu1  ;;  %4547 = vmatprep.mubr.bf16.mxu0 %v4280_v16  ;;  %v8507_v16 = vld [vmem:[#allocation13 + $0x74] ss:$8 sps:$4 sm:$0xff]  }
 0x6f6   : > { %v4157_v40 = vadd.f32 %v10175_v60, %v3994_v22  ;;  %v3996_v23 = vpop.f32.mrb[135].mxu1  ;;  %4548 = vmatmul.mubr.bf16.vlgmr.msra.gmra.mrb[192].mxu0 %v4279_v15  ;;  %v4219_v26 = vmax.f32 %v4155_v19, 0.0 }
 0x6f7   : > { %v4158_v24 = vadd.f32 %v10178_v61, %v3996_v23  ;;  %5009 = vmatpush1.bf16.msra.mxu0 %v8484_v18  ;;  %v4220_v29 = vmax.f32 %v4156_v7, 0.0  ;;  %v8505_v7 = vld [vmem:[#allocation13 + $0x70] ss:$8 sps:$4 sm:$0xff]   ;;  %v8510_v23 = vld [vmem:[#allocation13 + $0x84] ss:$8 sps:$4 sm:$0xff]  }
 0x6f8   : > { %v4221_v27 = vmax.f32 %v4157_v40, 0.0  ;;  %5010 = vmatprep.subr.bf16.mxu0 %v8489_v21 }
 0x6f9   : > { %v4222_v30 = vmax.f32 %v4158_v24, 0.0 }
 0x6fa   : > { %v4281_v31 = vpack.c.bf16 %v4221_v27, %v4219_v26 }
 0x6fb   : > { %v4282_v32 = vpack.c.bf16 %v4222_v30, %v4220_v29  ;;  %v4000_v33 = vpop.f32.mrb[136].mxu1  ;;  %5011 = vmatpush1.bf16.msra.mxu0 %v8487_v25  ;;  %v8508_v29 = vld [vmem:[#allocation13 + $0x80] ss:$8 sps:$4 sm:$0xff]  }
 0x6fc   : > { %v4159_v35 = vadd.f32 %v10175_v60, %v4000_v33  ;;  %v4002_v36 = vpop.f32.mrb[137].mxu1  ;;  %5012 = vmatprep.subr.bf16.mxu0 %v8492_v28 }
 0x6fd   : > { %v4160_v13 = vadd.f32 %v10178_v61, %v4002_v36  ;;  %v4004_v37 = vpop.f32.mrb[138].mxu1  ;;  %4557 = vmatprep.mubr.bf16.mxu0 %v4282_v32  ;;  %v8513_v32 = vld [vmem:[#allocation13 + $0x94] ss:$8 sps:$4 sm:$0xff]  }
 0x6fe   : > { %v4161_v38 = vadd.f32 %v10175_v60, %v4004_v37  ;;  %v4006_v11 = vpop.f32.mrb[139].mxu1  ;;  %4558 = vmatmul.mubr.bf16.gmra.mrb[196].mxu0 %v4281_v31  ;;  %v4223_v44 = vmax.f32 %v4159_v35, 0.0 }
 0x6ff   : > { %v4162_v14 = vadd.f32 %v10178_v61, %v4006_v11  ;;  %5013 = vmatpush1.bf16.msra.mxu0 %v8490_v34  ;;  %v4224_v47 = vmax.f32 %v4160_v13, 0.0  ;;  %v8511_v13 = vld [vmem:[#allocation13 + $0x90] ss:$8 sps:$4 sm:$0xff]   ;;  %v8516_v11 = vld [vmem:[#allocation13 + $0xa4] ss:$8 sps:$4 sm:$0xff]  }
 0x700   : > { %v4225_v45 = vmax.f32 %v4161_v38, 0.0  ;;  %5014 = vmatprep.subr.bf16.mxu0 %v8495_v12 }
 0x701   : > { %v4226_v48 = vmax.f32 %v4162_v14, 0.0 }
 0x702   : > { %v4283_v49 = vpack.c.bf16 %v4225_v45, %v4223_v44 }
 0x703   : > { %v4284_v50 = vpack.c.bf16 %v4226_v48, %v4224_v47  ;;  %v4010_v51 = vpop.f32.mrb[140].mxu1  ;;  %5015 = vmatpush1.bf16.msra.mxu0 %v8493_v39  ;;  %v8514_v47 = vld [vmem:[#allocation13 + $0xa0] ss:$8 sps:$4 sm:$0xff]  }
 0x704   : > { %v4163_v53 = vadd.f32 %v10175_v60, %v4010_v51  ;;  %v4012_v54 = vpop.f32.mrb[141].mxu1  ;;  %5016 = vmatprep.subr.bf16.mxu0 %v8498_v46 }
 0x705   : > { %v4164_v56 = vadd.f32 %v10178_v61, %v4012_v54  ;;  %v4014_v57 = vpop.f32.mrb[142].mxu1  ;;  %4567 = vmatprep.mubr.bf16.mxu0 %v4284_v50  ;;  %v8519_v50 = vld [vmem:[#allocation13 + $0xb4] ss:$8 sps:$4 sm:$0xff]  }
 0x706   : > { %v4165_v58 = vadd.f32 %v10175_v60, %v4014_v57  ;;  %v4016_v59 = vpop.f32.mrb[143].mxu1  ;;  %4568 = vmatmul.mubr.bf16.gmra.mrb[200].mxu0 %v4283_v49  ;;  %v4227_v1 = vmax.f32 %v4163_v53, 0.0 }
 0x707   : > { %v4166_v62 = vadd.f32 %v10178_v61, %v4016_v59  ;;  %5017 = vmatpush1.bf16.msra.mxu0 %v8496_v52  ;;  %v4228_v3 = vmax.f32 %v4164_v56, 0.0  ;;  %v8517_v56 = vld [vmem:[#allocation13 + $0xb0] ss:$8 sps:$4 sm:$0xff]   ;;  %v8522_v59 = vld [vmem:[#allocation13 + $0xc4] ss:$8 sps:$4 sm:$0xff]  }
 0x708   : > { %v4229_v0 = vmax.f32 %v4165_v58, 0.0  ;;  %5018 = vmatprep.subr.bf16.mxu0 %v8501_v55 }
 0x709   : > { %v4230_v5 = vmax.f32 %v4166_v62, 0.0 }
 0x70a   : > { %v4285_v41 = vpack.c.bf16 %v4229_v0, %v4227_v1 }
 0x70b   : > { %v4286_v9 = vpack.c.bf16 %v4230_v5, %v4228_v3  ;;  %v4020_v43 = vpop.f32.mrb[144].mxu1  ;;  %5019 = vmatpush1.bf16.msra.mxu0 %v8499_v63  ;;  %v8520_v3 = vld [vmem:[#allocation13 + $0xc0] ss:$8 sps:$4 sm:$0xff]  }
 0x70c   : > { %v4167_v10 = vadd.f32 %v10175_v60, %v4020_v43  ;;  %v4022_v15 = vpop.f32.mrb[145].mxu1  ;;  %5020 = vmatprep.subr.bf16.mxu0 %v8504_v2 }
 0x70d   : > { %v4168_v17 = vadd.f32 %v10178_v61, %v4022_v15  ;;  %v4024_v18 = vpop.f32.mrb[146].mxu1  ;;  %4577 = vmatprep.mubr.bf16.mxu0 %v4286_v9  ;;  %v8525_v9 = vld [vmem:[#allocation13 + $0xd4] ss:$8 sps:$4 sm:$0xff]  }
 0x70e   : > { %v4169_v19 = vadd.f32 %v10175_v60, %v4024_v18  ;;  %v4026_v20 = vpop.f32.mrb[147].mxu1  ;;  %4578 = vmatmul.mubr.bf16.gmra.mrb[204].mxu0 %v4285_v41  ;;  %v4231_v22 = vmax.f32 %v4167_v10, 0.0 }
 0x70f   : > { %v4170_v21 = vadd.f32 %v10178_v61, %v4026_v20  ;;  %5021 = vmatpush1.bf16.msra.mxu0 %v8502_v42  ;;  %v4232_v24 = vmax.f32 %v4168_v17, 0.0  ;;  %v8523_v17 = vld [vmem:[#allocation13 + $0xd0] ss:$8 sps:$4 sm:$0xff]   ;;  %v8528_v20 = vld [vmem:[#allocation13 + $0xe4] ss:$8 sps:$4 sm:$0xff]  }
 0x710   : > { %v4233_v40 = vmax.f32 %v4169_v19, 0.0  ;;  %5022 = vmatprep.subr.bf16.mxu0 %v8507_v16 }
 0x711   : > { %v4234_v25 = vmax.f32 %v4170_v21, 0.0 }
 0x712   : > { %v4287_v26 = vpack.c.bf16 %v4233_v40, %v4231_v22 }
 0x713   : > { %v4288_v27 = vpack.c.bf16 %v4234_v25, %v4232_v24  ;;  %v4030_v28 = vpop.f32.mrb[148].mxu1  ;;  %5023 = vmatpush1.bf16.msra.mxu0 %v8505_v7  ;;  %v8526_v24 = vld [vmem:[#allocation13 + $0xe0] ss:$8 sps:$4 sm:$0xff]  }
 0x714   : > { %v4171_v30 = vadd.f32 %v10175_v60, %v4030_v28  ;;  %v4032_v31 = vpop.f32.mrb[149].mxu1  ;;  %5024 = vmatprep.subr.bf16.mxu0 %v8510_v23 }
 0x715   : > { %v4172_v33 = vadd.f32 %v10178_v61, %v4032_v31  ;;  %v4034_v34 = vpop.f32.mrb[150].mxu1  ;;  %4587 = vmatprep.mubr.bf16.mxu0 %v4288_v27 }
 0x716   : > { %v4173_v35 = vadd.f32 %v10175_v60, %v4034_v34  ;;  %v4036_v36 = vpop.f32.mrb[151].mxu1  ;;  %4588 = vmatmul.mubr.bf16.gmra.mrb[208].mxu0 %v4287_v26  ;;  %v4235_v37 = vmax.f32 %v4171_v30, 0.0 }
 0x717   : > { %v4174_v12 = vadd.f32 %v10178_v61, %v4036_v36  ;;  %5025 = vmatpush1.bf16.msra.mxu0 %v8508_v29  ;;  %v4236_v14 = vmax.f32 %v4172_v33, 0.0 }
 0x718   : > { %v4237_v38 = vmax.f32 %v4173_v35, 0.0  ;;  %5026 = vmatprep.subr.bf16.mxu0 %v8513_v32 }
 0x719   : > { %v4238_v39 = vmax.f32 %v4174_v12, 0.0 }
 0x71a   : > { %v4289_v44 = vpack.c.bf16 %v4237_v38, %v4235_v37 }
 0x71b   : > { %v4290_v45 = vpack.c.bf16 %v4238_v39, %v4236_v14  ;;  %v4040_v46 = vpop.f32.mrb[152].mxu1  ;;  %5027 = vmatpush1.bf16.msra.mxu0 %v8511_v13 }
 0x71c   : > { %v4175_v48 = vadd.f32 %v10175_v60, %v4040_v46  ;;  %v4042_v49 = vpop.f32.mrb[153].mxu1  ;;  %5028 = vmatprep.subr.bf16.mxu0 %v8516_v11 }
 0x71d   : > { %v4176_v51 = vadd.f32 %v10178_v61, %v4042_v49  ;;  %v4044_v52 = vpop.f32.mrb[154].mxu1  ;;  %4597 = vmatprep.mubr.bf16.mxu0 %v4290_v45 }
 0x71e   : > { %v4177_v53 = vadd.f32 %v10175_v60, %v4044_v52  ;;  %v4046_v54 = vpop.f32.mrb[155].mxu1  ;;  %4598 = vmatmul.mubr.bf16.gmra.mrb[212].mxu0 %v4289_v44  ;;  %v4239_v57 = vmax.f32 %v4175_v48, 0.0 }
 0x71f   : > { %v4178_v55 = vadd.f32 %v10178_v61, %v4046_v54  ;;  %5029 = vmatpush1.bf16.msra.mxu0 %v8514_v47  ;;  %v4240_v62 = vmax.f32 %v4176_v51, 0.0 }
 0x720   : > { %v4241_v58 = vmax.f32 %v4177_v53, 0.0  ;;  %5030 = vmatprep.subr.bf16.mxu0 %v8519_v50 }
 0x721   : > { %v4242_v63 = vmax.f32 %v4178_v55, 0.0 }
 0x722   : > { %v4291_v1 = vpack.c.bf16 %v4241_v58, %v4239_v57 }
 0x723   : > { %v4292_v0 = vpack.c.bf16 %v4242_v63, %v4240_v62  ;;  %v4050_v2 = vpop.f32.mrb[156].mxu1  ;;  %5031 = vmatpush1.bf16.msra.mxu0 %v8517_v56 }
 0x724   : > { %v4179_v5 = vadd.f32 %v10175_v60, %v4050_v2  ;;  %v4052_v41 = vpop.f32.mrb[157].mxu1  ;;  %5032 = vmatprep.subr.bf16.mxu0 %v8522_v59 }
 0x725   : > { %v4180_v43 = vadd.f32 %v10178_v61, %v4052_v41  ;;  %v4054_v42 = vpop.f32.mrb[158].mxu1  ;;  %4607 = vmatprep.mubr.bf16.mxu0 %v4292_v0 }
 0x726   : > { %v4181_v10 = vadd.f32 %v10175_v60, %v4054_v42  ;;  %v4056_v15 = vpop.f32.mrb[159].mxu1  ;;  %4608 = vmatmul.mubr.bf16.gmra.mrb[216].mxu0 %v4291_v1  ;;  %v4243_v18 = vmax.f32 %v4179_v5, 0.0 }
 0x727   : > { %v4182_v16 = vadd.f32 %v10178_v61, %v4056_v15  ;;  %5033 = vmatpush1.bf16.msra.mxu0 %v8520_v3  ;;  %v4244_v21 = vmax.f32 %v4180_v43, 0.0 }
 0x728   : > { %v4245_v19 = vmax.f32 %v4181_v10, 0.0  ;;  %5034 = vmatprep.subr.bf16.mxu0 %v8525_v9 }
 0x729   : > { %v4246_v7 = vmax.f32 %v4182_v16, 0.0 }
 0x72a   : > { %v4293_v22 = vpack.c.bf16 %v4245_v19, %v4243_v18 }
 0x72b   : > { %v4294_v40 = vpack.c.bf16 %v4246_v7, %v4244_v21  ;;  %v4060_v23 = vpop.f32.mrb[160].mxu1  ;;  %5035 = vmatpush1.bf16.msra.mxu0 %v8523_v17 }
 0x72c   : > { %v4183_v25 = vadd.f32 %v10175_v60, %v4060_v23  ;;  %v4062_v26 = vpop.f32.mrb[161].mxu1  ;;  %5036 = vmatprep.subr.bf16.mxu0 %v8528_v20 }
 0x72d   : > { %v4184_v27 = vadd.f32 %v10178_v61, %v4062_v26  ;;  %v4064_v28 = vpop.f32.mrb[162].mxu1  ;;  %4617 = vmatprep.mubr.bf16.mxu0 %v4294_v40 }
 0x72e   : > { %v4185_v29 = vadd.f32 %v10175_v60, %v4064_v28  ;;  %v4066_v30 = vpop.f32.mrb[163].mxu1  ;;  %4618 = vmatmul.mubr.bf16.gmra.mrb[220].mxu0 %v4293_v22  ;;  %v4247_v32 = vmax.f32 %v4183_v25, 0.0  ;;  %v8531_v28 = vld [vmem:[#allocation13 + $0xf4] ss:$8 sps:$4 sm:$0xff]  }
 0x72f   : > { %v4186_v31 = vadd.f32 %v10178_v61, %v4066_v30  ;;  %5037 = vmatpush1.bf16.msra.mxu0 %v8526_v24  ;;  %v4248_v34 = vmax.f32 %v4184_v27, 0.0  ;;  %v8529_v30 = vld [vmem:[#allocation13 + $0xf0] ss:$8 sps:$4 sm:$0xff]  }
 0x730   : > { %v4249_v33 = vmax.f32 %v4185_v29, 0.0  ;;  %5038 = vmatprep.subr.bf16.mxu0 %v8531_v28  ;;  %v10256_v28 = vld [vmem:[#allocation15 + $0x34] ss:$8 sps:$4 sm:$0xff]  }
 0x731   : > { %v4250_v35 = vmax.f32 %v4186_v31, 0.0 }
 0x732   : > { %v4295_v36 = vpack.c.bf16 %v4249_v33, %v4247_v32 }
 0x733   : > { %v4296_v12 = vpack.c.bf16 %v4250_v35, %v4248_v34  ;;  %v4070_v13 = vpop.f32.mrb[164].mxu1  ;;  %5039 = vmatpush1.bf16.msra.mxu0 %v8529_v30 }
 0x734   : > { %v4187_v37 = vadd.f32 %v10175_v60, %v4070_v13  ;;  %v4072_v38 = vpop.f32.mrb[165].mxu1 }
 0x735   : > { %v4188_v11 = vadd.f32 %v10178_v61, %v4072_v38  ;;  %v4074_v14 = vpop.f32.mrb[166].mxu1  ;;  %4627 = vmatprep.mubr.bf16.mxu0 %v4296_v12 }
 0x736   : > { %v4189_v39 = vadd.f32 %v10175_v60, %v4074_v14  ;;  %v4076_v44 = vpop.f32.mrb[167].mxu1  ;;  %4628 = vmatmul.mubr.bf16.gmra.mrb[224].mxu0 %v4295_v36  ;;  %v4251_v46 = vmax.f32 %v4187_v37, 0.0 }
 0x737   : > { %v4190_v45 = vadd.f32 %v10178_v61, %v4076_v44  ;;  %v4252_v48 = vmax.f32 %v4188_v11, 0.0 }
 0x738   : > { %v4253_v47 = vmax.f32 %v4189_v39, 0.0 }
 0x739   : > { %v4254_v49 = vmax.f32 %v4190_v45, 0.0 }
 0x73a   : > { %v4297_v50 = vpack.c.bf16 %v4253_v47, %v4251_v46 }
 0x73b   : > { %v4298_v51 = vpack.c.bf16 %v4254_v49, %v4252_v48  ;;  %v4080_v52 = vpop.f32.mrb[168].mxu1 }
 0x73c   : > { %v4191_v53 = vadd.f32 %v10175_v60, %v4080_v52  ;;  %v4082_v54 = vpop.f32.mrb[169].mxu1 }
 0x73d   : > { %v4192_v55 = vadd.f32 %v10178_v61, %v4082_v54  ;;  %v4084_v56 = vpop.f32.mrb[170].mxu1  ;;  %4637 = vmatprep.mubr.bf16.mxu0 %v4298_v51 }
 0x73e   : > { %v4193_v57 = vadd.f32 %v10175_v60, %v4084_v56  ;;  %v4086_v58 = vpop.f32.mrb[171].mxu1  ;;  %4638 = vmatmul.mubr.bf16.gmra.mrb[228].mxu0 %v4297_v50  ;;  %v4255_v62 = vmax.f32 %v4191_v53, 0.0 }
 0x73f   : > { %v4194_v59 = vadd.f32 %v10178_v61, %v4086_v58  ;;  %v4256_v1 = vmax.f32 %v4192_v55, 0.0 }
 0x740   : > { %v4257_v63 = vmax.f32 %v4193_v57, 0.0 }
 0x741   : > { %v4258_v0 = vmax.f32 %v4194_v59, 0.0 }
 0x742   : > { %v4299_v2 = vpack.c.bf16 %v4257_v63, %v4255_v62 }
 0x743   : > { %v4300_v3 = vpack.c.bf16 %v4258_v0, %v4256_v1  ;;  %v4090_v5 = vpop.f32.mrb[172].mxu1 }
 0x744   : > { %v4195_v41 = vadd.f32 %v10175_v60, %v4090_v5  ;;  %v4092_v9 = vpop.f32.mrb[173].mxu1 }
 0x745   : > { %v4196_v43 = vadd.f32 %v10178_v61, %v4092_v9  ;;  %v4094_v42 = vpop.f32.mrb[174].mxu1  ;;  %4647 = vmatprep.mubr.bf16.mxu0 %v4300_v3 }
 0x746   : > { %v4197_v10 = vadd.f32 %v10175_v60, %v4094_v42  ;;  %v4096_v15 = vpop.f32.mrb[175].mxu1  ;;  %4648 = vmatmul.mubr.bf16.gmra.mrb[232].mxu0 %v4299_v2  ;;  %v4259_v17 = vmax.f32 %v4195_v41, 0.0 }
 0x747   : > { %v4198_v16 = vadd.f32 %v10178_v61, %v4096_v15  ;;  %v4260_v19 = vmax.f32 %v4196_v43, 0.0 }
 0x748   : > { %v4261_v18 = vmax.f32 %v4197_v10, 0.0 }
 0x749   : > { %v4262_v20 = vmax.f32 %v4198_v16, 0.0 }
 0x74a   : > { %v4301_v21 = vpack.c.bf16 %v4261_v18, %v4259_v17 }
 0x74b   : > { %v4302_v7 = vpack.c.bf16 %v4262_v20, %v4260_v19  ;;  %v4100_v22 = vpop.f32.mrb[176].mxu1 }
 0x74c   : > { %v4199_v40 = vadd.f32 %v10175_v60, %v4100_v22  ;;  %v4102_v23 = vpop.f32.mrb[177].mxu1  ;;  %v8532_v22 = vld [vmem:[#allocation15] ss:$8 sps:$4 sm:$0xff]  }
 0x74d   : > { %v4200_v24 = vadd.f32 %v10178_v61, %v4102_v23  ;;  %v4104_v25 = vpop.f32.mrb[178].mxu1  ;;  %4657 = vmatprep.mubr.bf16.mxu0 %v4302_v7  ;;  %v8534_v7 = vld [vmem:[#allocation15 + $0x4] ss:$8 sps:$4 sm:$0xff]   ;;  %v8535_v23 = vld [vmem:[#allocation15 + $0x10] ss:$8 sps:$4 sm:$0xff]  }
 0x74e   : > { %v4201_v26 = vadd.f32 %v10175_v60, %v4104_v25  ;;  %v4106_v27 = vpop.f32.mrb[179].mxu1  ;;  %4658 = vmatmul.mubr.bf16.gmra.mrb[236].mxu0 %v4301_v21  ;;  %v4263_v31 = vmax.f32 %v4199_v40, 0.0  ;;  %5501 = vmatprep.subr.bf16.mxu0 %v8534_v7  ;;  %v8537_v40 = vld [vmem:[#allocation15 + $0x14] ss:$8 sps:$4 sm:$0xff]  }
 0x74f   : > { %v4202_v29 = vadd.f32 %v10178_v61, %v4106_v27  ;;  %v4264_v33 = vmax.f32 %v4200_v24, 0.0  ;;  %7945 = vmatprep.subr.bf16.mxu1 %v8534_v7  ;;  %v10247_v24 = vld [vmem:[#allocation15 + $0x20] ss:$8 sps:$4 sm:$0xff]   ;;  %v10305_v7 = vld [vmem:[#allocation15 + $0x94] ss:$8 sps:$4 sm:$0xff]  }
 0x750   : > { %v4265_v32 = vmax.f32 %v4201_v26, 0.0  ;;  %7961 = vmatpush1.bf16.msra.mxu1 %v8532_v22 }
 0x751   : > { %v4266_v34 = vmax.f32 %v4202_v29, 0.0  ;;  %7946 = vmatprep.subr.bf16.mxu1 %v8537_v40 }
 0x752   : > { %v4303_v35 = vpack.c.bf16 %v4265_v32, %v4263_v31  ;;  %v10259_v31 = vld [vmem:[#allocation15 + $0x30] ss:$8 sps:$4 sm:$0xff]  }
 0x753   : > { %v4304_v36 = vpack.c.bf16 %v4266_v34, %v4264_v33  ;;  %v4110_v12 = vpop.f32.mrb[180].mxu1 }
 0x754   : > { %v4203_v13 = vadd.f32 %v10175_v60, %v4110_v12  ;;  %v4112_v37 = vpop.f32.mrb[181].mxu1  ;;  %7962 = vmatpush1.bf16.msra.mxu1 %v8535_v23 }
 0x755   : > { %v4204_v38 = vadd.f32 %v10178_v61, %v4112_v37  ;;  %v4114_v11 = vpop.f32.mrb[182].mxu1  ;;  %4667 = vmatprep.mubr.bf16.mxu0 %v4304_v36  ;;  %v10264_v36 = vld [vmem:[#allocation15 + $0x44] ss:$8 sps:$4 sm:$0xff]  }
 0x756   : > { %v4205_v14 = vadd.f32 %v10175_v60, %v4114_v11  ;;  %v4116_v39 = vpop.f32.mrb[183].mxu1  ;;  %4668 = vmatmul.mubr.bf16.gmra.mrb[240].mxu0 %v4303_v35  ;;  %v4267_v45 = vmax.f32 %v4203_v13, 0.0 }
 0x757   : > { %v4206_v44 = vadd.f32 %v10178_v61, %v4116_v39  ;;  %v4268_v47 = vmax.f32 %v4204_v38, 0.0  ;;  %v10268_v38 = vld [vmem:[#allocation15 + $0x40] ss:$8 sps:$4 sm:$0xff]   ;;  %v10271_v39 = vld [vmem:[#allocation15 + $0x54] ss:$8 sps:$4 sm:$0xff]  }
 0x758   : > { %v4269_v46 = vmax.f32 %v4205_v14, 0.0 }
 0x759   : > { %v4270_v48 = vmax.f32 %v4206_v44, 0.0 }
 0x75a   : > { %v4305_v49 = vpack.c.bf16 %v4269_v46, %v4267_v45 }
 0x75b   : > { %v4306_v50 = vpack.c.bf16 %v4270_v48, %v4268_v47  ;;  %v4120_v51 = vpop.f32.mrb[184].mxu1 }
 0x75c   : > { %v4207_v52 = vadd.f32 %v10175_v60, %v4120_v51  ;;  %v4122_v53 = vpop.f32.mrb[185].mxu1 }
 0x75d   : > { %v4208_v54 = vadd.f32 %v10178_v61, %v4122_v53  ;;  %v4124_v55 = vpop.f32.mrb[186].mxu1  ;;  %4677 = vmatprep.mubr.bf16.mxu0 %v4306_v50 }
 0x75e   : > { %v4209_v56 = vadd.f32 %v10175_v60, %v4124_v55  ;;  %v4126_v57 = vpop.f32.mrb[187].mxu1  ;;  %4678 = vmatmul.mubr.bf16.gmra.mrb[244].mxu0 %v4305_v49  ;;  %v4271_v59 = vmax.f32 %v4207_v52, 0.0  ;;  %v10276_v49 = vld [vmem:[#allocation15 + $0x50] ss:$8 sps:$4 sm:$0xff]   ;;  %v10279_v52 = vld [vmem:[#allocation15 + $0x64] ss:$8 sps:$4 sm:$0xff]  }
 0x75f   : > { %v4210_v58 = vadd.f32 %v10178_v61, %v4126_v57  ;;  %v4272_v63 = vmax.f32 %v4208_v54, 0.0 }
 0x760   : > { %v4273_v62 = vmax.f32 %v4209_v56, 0.0 }
 0x761   : > { %v4274_v1 = vmax.f32 %v4210_v58, 0.0  ;;  %v10285_v58 = vld [vmem:[#allocation15 + $0x60] ss:$8 sps:$4 sm:$0xff]  }
 0x762   : > { %v4307_v0 = vpack.c.bf16 %v4273_v62, %v4271_v59 }
 0x763   : > { %v4308_v2 = vpack.c.bf16 %v4274_v1, %v4272_v63  ;;  %v4130_v3 = vpop.f32.mrb[188].mxu1  ;;  %v10287_v63 = vld [vmem:[#allocation15 + $0x74] ss:$8 sps:$4 sm:$0xff]  }
 0x764   : > { %v4211_v5 = vadd.f32 %v10175_v60, %v4130_v3  ;;  %v4132_v41 = vpop.f32.mrb[189].mxu1 }
 0x765   : > { %v4212_v9 = vadd.f32 %v10178_v61, %v4132_v41  ;;  %v4134_v43 = vpop.f32.mrb[190].mxu1  ;;  %4687 = vmatprep.mubr.bf16.mxu0 %v4308_v2  ;;  %v10292_v41 = vld [vmem:[#allocation15 + $0x70] ss:$8 sps:$4 sm:$0xff]  }
 0x766   : > { %v4213_v42 = vadd.f32 %v10175_v60, %v4134_v43  ;;  %v4136_v10 = vpop.f32.mrb[191].mxu1  ;;  %4688 = vmatmul.mubr.bf16.gmra.mrb[248].mxu0 %v4307_v0  ;;  %v4275_v16 = vmax.f32 %v4211_v5, 0.0  ;;  %v4343_v60 = vld [vmem:[%s11128_s16] sm:$0x3] }
 0x767   : > { %v4214_v15 = vadd.f32 %v10178_v61, %v4136_v10  ;;  %v4276_v18 = vmax.f32 %v4212_v9, 0.0  ;;  %v8540_v61 = vld [vmem:[#allocation15 + $0x24] ss:$8 sps:$4 sm:$0xff]   ;;  %v10250_v25 = vrot.slane %v4343_v60, %v9578_v6  ;;  %v10253_v26 = vrot.slane %v4343_v60, %v9580_v8 }
 0x768   : > { %v4277_v17 = vmax.f32 %v4213_v42, 0.0  ;;  %7947 = vmatprep.subr.bf16.mxu1 %v8540_v61  ;;  %v10295_v42 = vld [vmem:[#allocation15 + $0x84] ss:$8 sps:$4 sm:$0xff]  }
 0x769   : > { %v4278_v19 = vmax.f32 %v4214_v15, 0.0  ;;  %7963 = vmatpush1.bf16.msra.mxu1 %v10247_v24 }
 0x76a   : > { %v4309_v20 = vpack.c.bf16 %v4277_v17, %v4275_v16  ;;  %7948 = vmatprep.subr.bf16.mxu1 %v10256_v28 }
 0x76b   : > { %v4310_v21 = vpack.c.bf16 %v4278_v19, %v4276_v18  ;;  %v10303_v19 = vld [vmem:[#allocation15 + $0x80] ss:$8 sps:$4 sm:$0xff]  }
 0x76d   : > { %4697 = vmatprep.mubr.bf16.mxu0 %v4310_v21  ;;  %7964 = vmatpush1.bf16.msra.mxu1 %v10259_v31 }
 0x76e   : > { %4698 = vmatmul.mubr.bf16.gmra.mrb[252].mxu0 %v4309_v20  ;;  %7949 = vmatprep.subr.bf16.mxu1 %v10264_v36 }
 0x771   : > { %7965 = vmatpush1.bf16.msra.mxu1 %v10268_v38 }
 0x772   : > { %7950 = vmatprep.subr.bf16.mxu1 %v10271_v39 }
 0x775   : > { %7966 = vmatpush1.bf16.msra.mxu1 %v10276_v49 }
 0x776   : > { %7951 = vmatprep.subr.bf16.mxu1 %v10279_v52 }
 0x779   : > { %7967 = vmatpush1.bf16.msra.mxu1 %v10285_v58 }
 0x77a   : > { %7952 = vmatprep.subr.bf16.mxu1 %v10287_v63 }
 0x77d   : > { %7968 = vmatpush1.bf16.msra.mxu1 %v10292_v41 }
 0x77e   : > { %7953 = vmatprep.subr.bf16.mxu1 %v10295_v42 }
 0x781   : > { %7969 = vmatpush1.bf16.msra.mxu1 %v10303_v19 }
 0x782   : > { %7954 = vmatprep.subr.bf16.mxu1 %v10305_v7 }
 0x7c9   : > { %v4549_v27 = vpop.f32.mrb[192].mxu0 }
 0x7ca   : > { %v4550_v29 = vadd.f32 %v4549_v27, %v10250_v25  ;;  %v4551_v30 = vpop.f32.mrb[193].mxu0 }
 0x7cb   : > { %v4552_v32 = vadd.f32 %v4551_v30, %v10253_v26  ;;  %v4553_v33 = vpop.f32.mrb[194].mxu0 }
 0x7cc   : > { %v4554_v34 = vadd.f32 %v4553_v33, %v10250_v25  ;;  %v4555_v35 = vpop.f32.mrb[195].mxu0  ;;  %v4708_v13 = vmax.f32 %v4550_v29, 0.0  ;;  %v10315_v29 = vld [vmem:[#allocation15 + $0xa4] ss:$8 sps:$4 sm:$0xff]  }
 0x7cd   : > { %v4556_v12 = vadd.f32 %v4555_v35, %v10253_v26  ;;  %v4709_v11 = vmax.f32 %v4552_v32, 0.0  ;;  %v10323_v35 = vld [vmem:[#allocation15 + $0xa0] ss:$8 sps:$4 sm:$0xff]  }
 0x7ce   : > { %v4710_v37 = vmax.f32 %v4554_v34, 0.0 }
 0x7cf   : > { %v4711_v14 = vmax.f32 %v4556_v12, 0.0 }
 0x7d0   : > { %v4772_v44 = vpack.c.bf16 %v4710_v37, %v4708_v13  ;;  %v10325_v13 = vld [vmem:[#allocation15 + $0xb4] ss:$8 sps:$4 sm:$0xff]  }
 0x7d1   : > { %v4773_v45 = vpack.c.bf16 %v4711_v14, %v4709_v11  ;;  %v4559_v46 = vpop.f32.mrb[196].mxu0 }
 0x7d2   : > { %v4560_v47 = vadd.f32 %v4559_v46, %v10250_v25  ;;  %v4561_v48 = vpop.f32.mrb[197].mxu0 }
 0x7d3   : > { %v4562_v50 = vadd.f32 %v4561_v48, %v10253_v26  ;;  %v4563_v51 = vpop.f32.mrb[198].mxu0  ;;  %5040 = vmatprep.mubr.bf16.mxu0 %v4773_v45 }
 0x7d4   : > { %v4564_v53 = vadd.f32 %v4563_v51, %v10250_v25  ;;  %v4565_v54 = vpop.f32.mrb[199].mxu0  ;;  %5041 = vmatmul.mubr.bf16.vlgmr.msra.gmra.mrb[0].mxu0 %v4772_v44  ;;  %v4712_v56 = vmax.f32 %v4560_v47, 0.0  ;;  %v10335_v47 = vld [vmem:[#allocation15 + $0xc4] ss:$8 sps:$4 sm:$0xff]  }
 0x7d5   : > { %v4566_v55 = vadd.f32 %v4565_v54, %v10253_v26  ;;  %5502 = vmatpush1.bf16.msra.mxu0 %v8532_v22  ;;  %v4713_v59 = vmax.f32 %v4562_v50, 0.0 }
 0x7d6   : > { %v4714_v57 = vmax.f32 %v4564_v53, 0.0  ;;  %5503 = vmatprep.subr.bf16.mxu0 %v8537_v40  ;;  %v10343_v53 = vld [vmem:[#allocation15 + $0xc0] ss:$8 sps:$4 sm:$0xff]  }
 0x7d7   : > { %v4715_v62 = vmax.f32 %v4566_v55, 0.0 }
 0x7d8   : > { %v4774_v1 = vpack.c.bf16 %v4714_v57, %v4712_v56  ;;  %v10345_v56 = vld [vmem:[#allocation15 + $0xd4] ss:$8 sps:$4 sm:$0xff]  }
 0x7d9   : > { %v4775_v0 = vpack.c.bf16 %v4715_v62, %v4713_v59  ;;  %v4569_v2 = vpop.f32.mrb[200].mxu0  ;;  %5504 = vmatpush1.bf16.msra.mxu0 %v8535_v23 }
 0x7da   : > { %v4570_v3 = vadd.f32 %v4569_v2, %v10250_v25  ;;  %v4571_v5 = vpop.f32.mrb[201].mxu0  ;;  %5505 = vmatprep.subr.bf16.mxu0 %v8540_v61 }
 0x7db   : > { %v4572_v9 = vadd.f32 %v4571_v5, %v10253_v26  ;;  %v4573_v43 = vpop.f32.mrb[202].mxu0  ;;  %5050 = vmatprep.mubr.bf16.mxu0 %v4775_v0 }
 0x7dc   : > { %v4574_v10 = vadd.f32 %v4573_v43, %v10250_v25  ;;  %v4575_v15 = vpop.f32.mrb[203].mxu0  ;;  %5051 = vmatmul.mubr.bf16.gmra.mrb[4].mxu0 %v4774_v1  ;;  %v4716_v17 = vmax.f32 %v4570_v3, 0.0  ;;  %v8576_v3 = vld [vmem:[#allocation15 + $0xe4] ss:$8 sps:$4 sm:$0xff]  }
 0x7dd   : > { %v4576_v16 = vadd.f32 %v4575_v15, %v10253_v26  ;;  %5506 = vmatpush1.bf16.msra.mxu0 %v10247_v24  ;;  %v4717_v20 = vmax.f32 %v4572_v9, 0.0  ;;  %v10312_v24 = vld [vmem:[#allocation15 + $0x90] ss:$8 sps:$4 sm:$0xff]  }
 0x7de   : > { %v4718_v18 = vmax.f32 %v4574_v10, 0.0  ;;  %5507 = vmatprep.subr.bf16.mxu0 %v10256_v28  ;;  %7970 = vmatpush1.bf16.msra.mxu1 %v10312_v24 }
 0x7df   : > { %v4719_v21 = vmax.f32 %v4576_v16, 0.0  ;;  %7955 = vmatprep.subr.bf16.mxu1 %v10315_v29 }
 0x7e0   : > { %v4776_v22 = vpack.c.bf16 %v4718_v18, %v4716_v17 }
 0x7e1   : > { %v4777_v40 = vpack.c.bf16 %v4719_v21, %v4717_v20  ;;  %v4579_v23 = vpop.f32.mrb[204].mxu0  ;;  %5508 = vmatpush1.bf16.msra.mxu0 %v10259_v31 }
 0x7e2   : > { %v4580_v60 = vadd.f32 %v4579_v23, %v10250_v25  ;;  %v4581_v61 = vpop.f32.mrb[205].mxu0  ;;  %5509 = vmatprep.subr.bf16.mxu0 %v10264_v36  ;;  %7971 = vmatpush1.bf16.msra.mxu1 %v10323_v35 }
 0x7e3   : > { %v4582_v27 = vadd.f32 %v4581_v61, %v10253_v26  ;;  %v4583_v28 = vpop.f32.mrb[206].mxu0  ;;  %5060 = vmatprep.mubr.bf16.mxu0 %v4777_v40  ;;  %7956 = vmatprep.subr.bf16.mxu1 %v10325_v13 }
 0x7e4   : > { %v4584_v30 = vadd.f32 %v4583_v28, %v10250_v25  ;;  %v4585_v32 = vpop.f32.mrb[207].mxu0  ;;  %5061 = vmatmul.mubr.bf16.gmra.mrb[8].mxu0 %v4776_v22  ;;  %v4720_v33 = vmax.f32 %v4580_v60, 0.0 }
 0x7e5   : > { %v4586_v31 = vadd.f32 %v4585_v32, %v10253_v26  ;;  %5510 = vmatpush1.bf16.msra.mxu0 %v10268_v38  ;;  %v4721_v36 = vmax.f32 %v4582_v27, 0.0 }
 0x7e6   : > { %v4722_v34 = vmax.f32 %v4584_v30, 0.0  ;;  %5511 = vmatprep.subr.bf16.mxu0 %v10271_v39  ;;  %v10332_v39 = vld [vmem:[#allocation15 + $0xb0] ss:$8 sps:$4 sm:$0xff]  }
 0x7e7   : > { %v4723_v12 = vmax.f32 %v4586_v31, 0.0  ;;  %7972 = vmatpush1.bf16.msra.mxu1 %v10332_v39 }
 0x7e8   : > { %v4778_v37 = vpack.c.bf16 %v4722_v34, %v4720_v33  ;;  %7957 = vmatprep.subr.bf16.mxu1 %v10335_v47 }
 0x7e9   : > { %v4779_v11 = vpack.c.bf16 %v4723_v12, %v4721_v36  ;;  %v4589_v14 = vpop.f32.mrb[208].mxu0  ;;  %5512 = vmatpush1.bf16.msra.mxu0 %v10276_v49 }
 0x7ea   : > { %v4590_v38 = vadd.f32 %v4589_v14, %v10250_v25  ;;  %v4591_v44 = vpop.f32.mrb[209].mxu0  ;;  %5513 = vmatprep.subr.bf16.mxu0 %v10279_v52 }
 0x7eb   : > { %v4592_v45 = vadd.f32 %v4591_v44, %v10253_v26  ;;  %v4593_v46 = vpop.f32.mrb[210].mxu0  ;;  %5070 = vmatprep.mubr.bf16.mxu0 %v4779_v11  ;;  %7973 = vmatpush1.bf16.msra.mxu1 %v10343_v53 }
 0x7ec   : > { %v4594_v48 = vadd.f32 %v4593_v46, %v10250_v25  ;;  %v4595_v50 = vpop.f32.mrb[211].mxu0  ;;  %5071 = vmatmul.mubr.bf16.gmra.mrb[12].mxu0 %v4778_v37  ;;  %v4724_v51 = vmax.f32 %v4590_v38, 0.0  ;;  %7958 = vmatprep.subr.bf16.mxu1 %v10345_v56 }
 0x7ed   : > { %v4596_v49 = vadd.f32 %v4595_v50, %v10253_v26  ;;  %5514 = vmatpush1.bf16.msra.mxu0 %v10285_v58  ;;  %v4725_v54 = vmax.f32 %v4592_v45, 0.0 }
 0x7ee   : > { %v4726_v52 = vmax.f32 %v4594_v48, 0.0  ;;  %5515 = vmatprep.subr.bf16.mxu0 %v10287_v63  ;;  %v8571_v63 = vld [vmem:[#allocation15 + $0xd0] ss:$8 sps:$4 sm:$0xff]  }
 0x7ef   : > { %v4727_v55 = vmax.f32 %v4596_v49, 0.0  ;;  %7974 = vmatpush1.bf16.msra.mxu1 %v8571_v63 }
 0x7f0   : > { %v4780_v57 = vpack.c.bf16 %v4726_v52, %v4724_v51  ;;  %7959 = vmatprep.subr.bf16.mxu1 %v8576_v3 }
 0x7f1   : > { %v4781_v59 = vpack.c.bf16 %v4727_v55, %v4725_v54  ;;  %v4599_v62 = vpop.f32.mrb[212].mxu0  ;;  %5516 = vmatpush1.bf16.msra.mxu0 %v10292_v41 }
 0x7f2   : > { %v4600_v58 = vadd.f32 %v4599_v62, %v10250_v25  ;;  %v4601_v1 = vpop.f32.mrb[213].mxu0  ;;  %5517 = vmatprep.subr.bf16.mxu0 %v10295_v42  ;;  %v8574_v42 = vld [vmem:[#allocation15 + $0xe0] ss:$8 sps:$4 sm:$0xff]  }
 0x7f3   : > { %v4602_v0 = vadd.f32 %v4601_v1, %v10253_v26  ;;  %v4603_v2 = vpop.f32.mrb[214].mxu0  ;;  %5080 = vmatprep.mubr.bf16.mxu0 %v4781_v59  ;;  %7975 = vmatpush1.bf16.msra.mxu1 %v8574_v42 }
 0x7f4   : > { %v4604_v5 = vadd.f32 %v4603_v2, %v10250_v25  ;;  %v4605_v9 = vpop.f32.mrb[215].mxu0  ;;  %5081 = vmatmul.mubr.bf16.gmra.mrb[16].mxu0 %v4780_v57  ;;  %v4728_v43 = vmax.f32 %v4600_v58, 0.0 }
 0x7f5   : > { %v4606_v41 = vadd.f32 %v4605_v9, %v10253_v26  ;;  %5518 = vmatpush1.bf16.msra.mxu0 %v10303_v19  ;;  %v4729_v15 = vmax.f32 %v4602_v0, 0.0 }
 0x7f6   : > { %v4730_v10 = vmax.f32 %v4604_v5, 0.0  ;;  %5519 = vmatprep.subr.bf16.mxu0 %v10305_v7 }
 0x7f7   : > { %v4731_v16 = vmax.f32 %v4606_v41, 0.0 }
 0x7f8   : > { %v4782_v17 = vpack.c.bf16 %v4730_v10, %v4728_v43 }
 0x7f9   : > { %v4783_v18 = vpack.c.bf16 %v4731_v16, %v4729_v15  ;;  %v4609_v20 = vpop.f32.mrb[216].mxu0  ;;  %5520 = vmatpush1.bf16.msra.mxu0 %v10312_v24 }
 0x7fa   : > { %v4610_v21 = vadd.f32 %v4609_v20, %v10250_v25  ;;  %v4611_v22 = vpop.f32.mrb[217].mxu0  ;;  %5521 = vmatprep.subr.bf16.mxu0 %v10315_v29 }
 0x7fb   : > { %v4612_v19 = vadd.f32 %v4611_v22, %v10253_v26  ;;  %v4613_v40 = vpop.f32.mrb[218].mxu0  ;;  %5090 = vmatprep.mubr.bf16.mxu0 %v4783_v18 }
 0x7fc   : > { %v4614_v7 = vadd.f32 %v4613_v40, %v10250_v25  ;;  %v4615_v23 = vpop.f32.mrb[219].mxu0  ;;  %5091 = vmatmul.mubr.bf16.gmra.mrb[20].mxu0 %v4782_v17  ;;  %v4732_v61 = vmax.f32 %v4610_v21, 0.0 }
 0x7fd   : > { %v4616_v60 = vadd.f32 %v4615_v23, %v10253_v26  ;;  %5522 = vmatpush1.bf16.msra.mxu0 %v10323_v35  ;;  %v4733_v24 = vmax.f32 %v4612_v19, 0.0 }
 0x7fe   : > { %v4734_v27 = vmax.f32 %v4614_v7, 0.0  ;;  %5523 = vmatprep.subr.bf16.mxu0 %v10325_v13 }
 0x7ff   : > { %v4735_v28 = vmax.f32 %v4616_v60, 0.0 }
 0x800   : > { %v4784_v30 = vpack.c.bf16 %v4734_v27, %v4732_v61 }
 0x801   : > { %v4785_v29 = vpack.c.bf16 %v4735_v28, %v4733_v24  ;;  %v4619_v32 = vpop.f32.mrb[220].mxu0  ;;  %5524 = vmatpush1.bf16.msra.mxu0 %v10332_v39 }
 0x802   : > { %v4620_v31 = vadd.f32 %v4619_v32, %v10250_v25  ;;  %v4621_v33 = vpop.f32.mrb[221].mxu0  ;;  %5525 = vmatprep.subr.bf16.mxu0 %v10335_v47 }
 0x803   : > { %v4622_v34 = vadd.f32 %v4621_v33, %v10253_v26  ;;  %v4623_v36 = vpop.f32.mrb[222].mxu0  ;;  %5100 = vmatprep.mubr.bf16.mxu0 %v4785_v29 }
 0x804   : > { %v4624_v35 = vadd.f32 %v4623_v36, %v10250_v25  ;;  %v4625_v12 = vpop.f32.mrb[223].mxu0  ;;  %5101 = vmatmul.mubr.bf16.gmra.mrb[24].mxu0 %v4784_v30  ;;  %v4736_v37 = vmax.f32 %v4620_v31, 0.0 }
 0x805   : > { %v4626_v13 = vadd.f32 %v4625_v12, %v10253_v26  ;;  %5526 = vmatpush1.bf16.msra.mxu0 %v10343_v53  ;;  %v4737_v14 = vmax.f32 %v4622_v34, 0.0 }
 0x806   : > { %v4738_v11 = vmax.f32 %v4624_v35, 0.0  ;;  %5527 = vmatprep.subr.bf16.mxu0 %v10345_v56 }
 0x807   : > { %v4739_v38 = vmax.f32 %v4626_v13, 0.0 }
 0x808   : > { %v4786_v44 = vpack.c.bf16 %v4738_v11, %v4736_v37 }
 0x809   : > { %v4787_v39 = vpack.c.bf16 %v4739_v38, %v4737_v14  ;;  %v4629_v45 = vpop.f32.mrb[224].mxu0  ;;  %5528 = vmatpush1.bf16.msra.mxu0 %v8571_v63 }
 0x80a   : > { %v4630_v46 = vadd.f32 %v4629_v45, %v10250_v25  ;;  %v4631_v47 = vpop.f32.mrb[225].mxu0  ;;  %5529 = vmatprep.subr.bf16.mxu0 %v8576_v3 }
 0x80b   : > { %v4632_v48 = vadd.f32 %v4631_v47, %v10253_v26  ;;  %v4633_v50 = vpop.f32.mrb[226].mxu0  ;;  %5110 = vmatprep.mubr.bf16.mxu0 %v4787_v39 }
 0x80c   : > { %v4634_v49 = vadd.f32 %v4633_v50, %v10250_v25  ;;  %v4635_v51 = vpop.f32.mrb[227].mxu0  ;;  %5111 = vmatmul.mubr.bf16.gmra.mrb[28].mxu0 %v4786_v44  ;;  %v4740_v53 = vmax.f32 %v4630_v46, 0.0  ;;  %v8579_v50 = vld [vmem:[#allocation15 + $0xf4] ss:$8 sps:$4 sm:$0xff]  }
 0x80d   : > { %v4636_v52 = vadd.f32 %v4635_v51, %v10253_v26  ;;  %5530 = vmatpush1.bf16.msra.mxu0 %v8574_v42  ;;  %v4741_v55 = vmax.f32 %v4632_v48, 0.0  ;;  %v8577_v51 = vld [vmem:[#allocation15 + $0xf0] ss:$8 sps:$4 sm:$0xff]   ;;  %7960 = vmatprep.subr.bf16.mxu1 %v8579_v50 }
 0x80e   : > { %v4742_v54 = vmax.f32 %v4634_v49, 0.0  ;;  %5531 = vmatprep.subr.bf16.mxu0 %v8579_v50  ;;  %7976 = vmatpush1.bf16.msra.mxu1 %v8577_v51 }
 0x80f   : > { %v4743_v56 = vmax.f32 %v4636_v52, 0.0 }
 0x810   : > { %v4788_v57 = vpack.c.bf16 %v4742_v54, %v4740_v53 }
 0x811   : > { %v4789_v59 = vpack.c.bf16 %v4743_v56, %v4741_v55  ;;  %v4639_v62 = vpop.f32.mrb[228].mxu0  ;;  %5532 = vmatpush1.bf16.msra.mxu0 %v8577_v51  ;;  %v5904_v51 = vsel %vm5902_vm3, 4294967295, %v8981_v4 }
 0x812   : > { %v4640_v58 = vadd.f32 %v4639_v62, %v10250_v25  ;;  %v4641_v1 = vpop.f32.mrb[229].mxu0 }
 0x813   : > { %v4642_v63 = vadd.f32 %v4641_v1, %v10253_v26  ;;  %v4643_v0 = vpop.f32.mrb[230].mxu0  ;;  %5120 = vmatprep.mubr.bf16.mxu0 %v4789_v59 }
 0x814   : > { %v4644_v2 = vadd.f32 %v4643_v0, %v10250_v25  ;;  %v4645_v3 = vpop.f32.mrb[231].mxu0  ;;  %5121 = vmatmul.mubr.bf16.gmra.mrb[32].mxu0 %v4788_v57  ;;  %v4744_v9 = vmax.f32 %v4640_v58, 0.0 }
 0x815   : > { %v4646_v5 = vadd.f32 %v4645_v3, %v10253_v26  ;;  %v4745_v43 = vmax.f32 %v4642_v63, 0.0 }
 0x816   : > { %v4746_v41 = vmax.f32 %v4644_v2, 0.0 }
 0x817   : > { %v4747_v10 = vmax.f32 %v4646_v5, 0.0 }
 0x818   : > { %v4790_v42 = vpack.c.bf16 %v4746_v41, %v4744_v9 }
 0x819   : > { %v4791_v15 = vpack.c.bf16 %v4747_v10, %v4745_v43  ;;  %v4649_v16 = vpop.f32.mrb[232].mxu0 }
 0x81a   : > { %v4650_v17 = vadd.f32 %v4649_v16, %v10250_v25  ;;  %v4651_v18 = vpop.f32.mrb[233].mxu0 }
 0x81b   : > { %v4652_v20 = vadd.f32 %v4651_v18, %v10253_v26  ;;  %v4653_v21 = vpop.f32.mrb[234].mxu0  ;;  %5130 = vmatprep.mubr.bf16.mxu0 %v4791_v15 }
 0x81c   : > { %v4654_v22 = vadd.f32 %v4653_v21, %v10250_v25  ;;  %v4655_v19 = vpop.f32.mrb[235].mxu0  ;;  %5131 = vmatmul.mubr.bf16.gmra.mrb[36].mxu0 %v4790_v42  ;;  %v4748_v7 = vmax.f32 %v4650_v17, 0.0 }
 0x81d   : > { %v4656_v40 = vadd.f32 %v4655_v19, %v10253_v26  ;;  %v4749_v60 = vmax.f32 %v4652_v20, 0.0 }
 0x81e   : > { %v4750_v23 = vmax.f32 %v4654_v22, 0.0 }
 0x81f   : > { %v4751_v61 = vmax.f32 %v4656_v40, 0.0 }
 0x820   : > { %v4792_v27 = vpack.c.bf16 %v4750_v23, %v4748_v7 }
 0x821   : > { %v4793_v24 = vpack.c.bf16 %v4751_v61, %v4749_v60  ;;  %v4659_v28 = vpop.f32.mrb[236].mxu0 }
 0x822   : > { %v4660_v30 = vadd.f32 %v4659_v28, %v10250_v25  ;;  %v4661_v29 = vpop.f32.mrb[237].mxu0 }
 0x823   : > { %v4662_v32 = vadd.f32 %v4661_v29, %v10253_v26  ;;  %v4663_v31 = vpop.f32.mrb[238].mxu0  ;;  %5140 = vmatprep.mubr.bf16.mxu0 %v4793_v24 }
 0x824   : > { %v4664_v33 = vadd.f32 %v4663_v31, %v10250_v25  ;;  %v4665_v34 = vpop.f32.mrb[239].mxu0  ;;  %5141 = vmatmul.mubr.bf16.gmra.mrb[40].mxu0 %v4792_v27  ;;  %v4752_v35 = vmax.f32 %v4660_v30, 0.0  ;;  %v8580_v27 = vld [vmem:[%s11134_s22] sm:$0xff]  }
 0x825   : > { %v4666_v36 = vadd.f32 %v4665_v34, %v10253_v26  ;;  %v4753_v13 = vmax.f32 %v4662_v32, 0.0  ;;  %7861 = vmatprep.subr.bf16.mxu0 %v8580_v27 }
 0x826   : > { %v4754_v12 = vmax.f32 %v4664_v33, 0.0 }
 0x827   : > { %v4755_v37 = vmax.f32 %v4666_v36, 0.0 }
 0x828   : > { %v4794_v11 = vpack.c.bf16 %v4754_v12, %v4752_v35 }
 0x829   : > { %v4795_v14 = vpack.c.bf16 %v4755_v37, %v4753_v13  ;;  %v4669_v38 = vpop.f32.mrb[240].mxu0 }
 0x82a   : > { %v4670_v44 = vadd.f32 %v4669_v38, %v10250_v25  ;;  %v4671_v39 = vpop.f32.mrb[241].mxu0 }
 0x82b   : > { %v4672_v45 = vadd.f32 %v4671_v39, %v10253_v26  ;;  %v4673_v46 = vpop.f32.mrb[242].mxu0  ;;  %5150 = vmatprep.mubr.bf16.mxu0 %v4795_v14  ;;  %v8614_v39 = vld [vmem:[#allocation16 + $0x40] sm:$0xff]  }
 0x82c   : > { %v4674_v47 = vadd.f32 %v4673_v46, %v10250_v25  ;;  %v4675_v48 = vpop.f32.mrb[243].mxu0  ;;  %5151 = vmatmul.mubr.bf16.gmra.mrb[44].mxu0 %v4794_v11  ;;  %v4756_v52 = vmax.f32 %v4670_v44, 0.0  ;;  %7613 = vmatprep.subr.bf16.mxu1 %v8614_v39 }
 0x82d   : > { %v4676_v49 = vadd.f32 %v4675_v48, %v10253_v26  ;;  %v4757_v54 = vmax.f32 %v4672_v45, 0.0 }
 0x82e   : > { %v4758_v53 = vmax.f32 %v4674_v47, 0.0 }
 0x82f   : > { %v4759_v55 = vmax.f32 %v4676_v49, 0.0 }
 0x830   : > { %v4796_v56 = vpack.c.bf16 %v4758_v53, %v4756_v52 }
 0x831   : > { %v4797_v57 = vpack.c.bf16 %v4759_v55, %v4757_v54  ;;  %v4679_v59 = vpop.f32.mrb[244].mxu0  ;;  %v8581_v55 = vld [vmem:[%s11134_s22 + $0x8] sm:$0x3f]  }
 0x832   : > { %v4680_v62 = vadd.f32 %v4679_v59, %v10250_v25  ;;  %v4681_v58 = vpop.f32.mrb[245].mxu0  ;;  %v5905_v59 = vsel %vm5903_vm4, %v5904_v51, 0 }
 0x833   : > { %v4682_v1 = vadd.f32 %v4681_v58, %v10253_v26  ;;  %v4683_v63 = vpop.f32.mrb[246].mxu0  ;;  %5160 = vmatprep.mubr.bf16.mxu0 %v4797_v57  ;;  %v5907_v4 = vand.u32 %v8581_v55, %v5905_v59 }
 0x834   : > { %v4684_v0 = vadd.f32 %v4683_v63, %v10250_v25  ;;  %v4685_v2 = vpop.f32.mrb[247].mxu0  ;;  %5161 = vmatmul.mubr.bf16.gmra.mrb[48].mxu0 %v4796_v56  ;;  %v4760_v5 = vmax.f32 %v4680_v62, 0.0 }
 0x835   : > { %v4686_v3 = vadd.f32 %v4685_v2, %v10253_v26  ;;  %v4761_v41 = vmax.f32 %v4682_v1, 0.0 }
 0x836   : > { %v4762_v9 = vmax.f32 %v4684_v0, 0.0 }
 0x837   : > { %v4763_v43 = vmax.f32 %v4686_v3, 0.0 }
 0x838   : > { %v4798_v10 = vpack.c.bf16 %v4762_v9, %v4760_v5 }
 0x839   : > { %v4799_v42 = vpack.c.bf16 %v4763_v43, %v4761_v41  ;;  %v4689_v15 = vpop.f32.mrb[248].mxu0 }
 0x83a   : > { %v4690_v16 = vadd.f32 %v4689_v15, %v10250_v25  ;;  %v4691_v17 = vpop.f32.mrb[249].mxu0 }
 0x83b   : > { %v4692_v18 = vadd.f32 %v4691_v17, %v10253_v26  ;;  %v4693_v20 = vpop.f32.mrb[250].mxu0  ;;  %5170 = vmatprep.mubr.bf16.mxu0 %v4799_v42  ;;  %v8592_v42 = vld [vmem:[%s11136_s24 + $0x40] sm:$0xff]  }
 0x83c   : > { %v4694_v21 = vadd.f32 %v4693_v20, %v10250_v25  ;;  %v4695_v22 = vpop.f32.mrb[251].mxu0  ;;  %5171 = vmatmul.mubr.bf16.gmra.mrb[52].mxu0 %v4798_v10  ;;  %v4764_v40 = vmax.f32 %v4690_v16, 0.0 }
 0x83d   : > { %v4696_v19 = vadd.f32 %v4695_v22, %v10253_v26  ;;  %v4765_v23 = vmax.f32 %v4692_v18, 0.0 }
 0x83e   : > { %v4766_v7 = vmax.f32 %v4694_v21, 0.0 }
 0x83f   : > { %v4767_v60 = vmax.f32 %v4696_v19, 0.0 }
 0x840   : > { %v4800_v61 = vpack.c.bf16 %v4766_v7, %v4764_v40 }
 0x841   : > { %v4801_v24 = vpack.c.bf16 %v4767_v60, %v4765_v23  ;;  %v4699_v28 = vpop.f32.mrb[252].mxu0 }
 0x842   : > { %v4700_v30 = vadd.f32 %v4699_v28, %v10250_v25  ;;  %v4701_v29 = vpop.f32.mrb[253].mxu0 }
 0x843   : > { %v4702_v32 = vadd.f32 %v4701_v29, %v10253_v26  ;;  %v4703_v31 = vpop.f32.mrb[254].mxu0  ;;  %5180 = vmatprep.mubr.bf16.mxu0 %v4801_v24 }
 0x844   : > { %v4704_v33 = vadd.f32 %v4703_v31, %v10250_v25  ;;  %v4705_v34 = vpop.f32.mrb[255].mxu0  ;;  %5181 = vmatmul.mubr.bf16.gmra.mrb[56].mxu0 %v4800_v61  ;;  %v4768_v35 = vmax.f32 %v4700_v30, 0.0  ;;  %v4836_v25 = vld [vmem:[%s11130_s18] sm:$0x3] }
 0x845   : > { %v4706_v36 = vadd.f32 %v4705_v34, %v10253_v26  ;;  %v4769_v13 = vmax.f32 %v4702_v32, 0.0  ;;  %v10419_v26 = vrot.slane %v4836_v25, %v9578_v6  ;;  %v10422_v38 = vrot.slane %v4836_v25, %v9580_v8  ;;  %v8582_v31 = vld [vmem:[%s10413_s1] sm:$0xff]  }
 0x846   : > { %v4770_v12 = vmax.f32 %v4704_v33, 0.0 }
 0x847   : > { %v4771_v37 = vmax.f32 %v4706_v36, 0.0 }
 0x848   : > { %v4802_v11 = vpack.c.bf16 %v4770_v12, %v4768_v35 }
 0x849   : > { %v4803_v14 = vpack.c.bf16 %v4771_v37, %v4769_v13 }
 0x84b   : > { %5190 = vmatprep.mubr.bf16.mxu0 %v4803_v14 }
 0x84c   : > { %5191 = vmatmul.mubr.bf16.gmra.mrb[60].mxu0 %v4802_v11 }
 0x8a7   : > { %v5042_v44 = vpop.f32.mrb[0].mxu0 }
 0x8a8   : > { %v5043_v45 = vadd.f32 %v5042_v44, %v10419_v26  ;;  %v5044_v46 = vpop.f32.mrb[1].mxu0 }
 0x8a9   : > { %v5045_v47 = vadd.f32 %v5044_v46, %v10422_v38  ;;  %v5046_v48 = vpop.f32.mrb[2].mxu0 }
 0x8aa   : > { %v5047_v50 = vadd.f32 %v5046_v48, %v10419_v26  ;;  %v5048_v49 = vpop.f32.mrb[3].mxu0  ;;  %v5201_v53 = vmax.f32 %v5043_v45, 0.0  ;;  %v8583_v45 = vld [vmem:[%s10413_s1 + $0x8] sm:$0xff]   ;;  %v8584_v48 = vld [vmem:[%s10413_s1 + $0x10] sm:$0xff]  }
 0x8ab   : > { %v5049_v52 = vadd.f32 %v5048_v49, %v10422_v38  ;;  %v5202_v56 = vmax.f32 %v5045_v47, 0.0 }
 0x8ac   : > { %v5203_v54 = vmax.f32 %v5047_v50, 0.0  ;;  %v8593_v50 = vld [vmem:[%s11136_s24] sm:$0xff]  }
 0x8ad   : > { %v5204_v57 = vmax.f32 %v5049_v52, 0.0  ;;  %v8594_v52 = vld [vmem:[%s11136_s24 + $0x48] sm:$0xff]  }
 0x8ae   : > { %v10432_v62 = vpack.c.bf16 %v5203_v54, %v5201_v53  ;;  %v8615_v53 = vld [vmem:[#allocation16] sm:$0xff]  }
 0x8af   : > { %v10434_v58 = vpack.c.bf16 %v5204_v57, %v5202_v56  ;;  %v5052_v1 = vpop.f32.mrb[4].mxu0  ;;  %v8616_v56 = vld [vmem:[#allocation16 + $0x48] sm:$0xff]  }
 0x8b0   : > { %v5053_v63 = vadd.f32 %v5052_v1, %v10419_v26  ;;  %v5054_v0 = vpop.f32.mrb[5].mxu0 }
 0x8b1   : > { %v5055_v2 = vadd.f32 %v5054_v0, %v10422_v38  ;;  %v5056_v3 = vpop.f32.mrb[6].mxu0  ;;  %5533 = vmatprep.mubr.bf16.mxu0 %v10434_v58 }
 0x8b2   : > { %v5057_v5 = vadd.f32 %v5056_v3, %v10419_v26  ;;  %v5058_v9 = vpop.f32.mrb[7].mxu0  ;;  %5534 = vmatmul.mubr.bf16.vlgmr.msra.gmra.mrb[64].mxu0 %v10432_v62  ;;  %v5205_v43 = vmax.f32 %v5053_v63, 0.0  ;;  %v8595_v63 = vld [vmem:[%s11136_s24 + $0x8] sm:$0xff]  }
 0x8b3   : > { %v5059_v41 = vadd.f32 %v5058_v9, %v10422_v38  ;;  %7862 = vmatpush3.bf16.msra.mxu0 %v8580_v27  ;;  %v5206_v15 = vmax.f32 %v5055_v2, 0.0  ;;  %v8598_v2 = vld [vmem:[%s11136_s24 + $0x50] sm:$0xff]  }
 0x8b4   : > { %v5207_v10 = vmax.f32 %v5057_v5, 0.0  ;;  %7863 = vmatprep.subr.bf16.mxu0 %v5907_v4  ;;  %v8617_v3 = vld [vmem:[#allocation16 + $0x8] sm:$0xff]  }
 0x8b5   : > { %v5208_v16 = vmax.f32 %v5059_v41, 0.0  ;;  %v8618_v41 = vld [vmem:[#allocation16 + $0x50] sm:$0xff]  }
 0x8b6   : > { %v10445_v17 = vpack.c.bf16 %v5207_v10, %v5205_v43  ;;  %v8585_v10 = vld [vmem:[%s10413_s1 + $0x18] sm:$0xff]  }
 0x8b7   : > { %v10447_v18 = vpack.c.bf16 %v5208_v16, %v5206_v15  ;;  %v5062_v20 = vpop.f32.mrb[8].mxu0  ;;  %7864 = vmatpush3.bf16.msra.mxu0 %v5907_v4  ;;  %v8586_v16 = vld [vmem:[%s10413_s1 + $0x20] sm:$0xff]  }
 0x8b8   : > { %v5063_v21 = vadd.f32 %v5062_v20, %v10419_v26  ;;  %v5064_v22 = vpop.f32.mrb[9].mxu0  ;;  %7725 = vmatprep.subr.bf16.mxu0 %v8592_v42  ;;  %v8599_v20 = vld [vmem:[%s11136_s24 + $0x10] sm:$0xff]  }
 0x8b9   : > { %v5065_v19 = vadd.f32 %v5064_v22, %v10422_v38  ;;  %v5066_v40 = vpop.f32.mrb[10].mxu0  ;;  %5543 = vmatprep.mubr.bf16.mxu0 %v10447_v18 }
 0x8ba   : > { %v5067_v7 = vadd.f32 %v5066_v40, %v10419_v26  ;;  %v5068_v23 = vpop.f32.mrb[11].mxu0  ;;  %5544 = vmatmul.mubr.bf16.gmra.mrb[68].mxu0 %v10445_v17  ;;  %v5209_v61 = vmax.f32 %v5063_v21, 0.0  ;;  %v8619_v40 = vld [vmem:[#allocation16 + $0x10] sm:$0xff]  }
 0x8bb   : > { %v5069_v60 = vadd.f32 %v5068_v23, %v10422_v38  ;;  %v5210_v24 = vmax.f32 %v5065_v19, 0.0  ;;  %v8600_v19 = vld [vmem:[%s11136_s24 + $0x58] sm:$0xff]  }
 0x8bc   : > { %v5211_v27 = vmax.f32 %v5067_v7, 0.0 }
 0x8bd   : > { %v5212_v28 = vmax.f32 %v5069_v60, 0.0  ;;  %v8620_v60 = vld [vmem:[#allocation16 + $0x58] sm:$0xff]  }
 0x8be   : > { %v10455_v30 = vpack.c.bf16 %v5211_v27, %v5209_v61 }
 0x8bf   : > { %v10457_v29 = vpack.c.bf16 %v5212_v28, %v5210_v24  ;;  %v5072_v32 = vpop.f32.mrb[12].mxu0  ;;  %v8601_v28 = vld [vmem:[%s11136_s24 + $0x18] sm:$0xff]  }
 0x8c0   : > { %v5073_v33 = vadd.f32 %v5072_v32, %v10419_v26  ;;  %v5074_v34 = vpop.f32.mrb[13].mxu0 }
 0x8c1   : > { %v5075_v36 = vadd.f32 %v5074_v34, %v10422_v38  ;;  %v5076_v35 = vpop.f32.mrb[14].mxu0  ;;  %5553 = vmatprep.mubr.bf16.mxu0 %v10457_v29  ;;  %v8621_v34 = vld [vmem:[#allocation16 + $0x18] sm:$0xff]  }
 0x8c2   : > { %v5077_v12 = vadd.f32 %v5076_v35, %v10419_v26  ;;  %v5078_v13 = vpop.f32.mrb[15].mxu0  ;;  %5554 = vmatmul.mubr.bf16.gmra.mrb[72].mxu0 %v10455_v30  ;;  %v5213_v11 = vmax.f32 %v5073_v33, 0.0  ;;  %v8604_v33 = vld [vmem:[%s11136_s24 + $0x60] sm:$0xff]  }
 0x8c3   : > { %v5079_v37 = vadd.f32 %v5078_v13, %v10422_v38  ;;  %7865 = vmatprep.mubr.msk.bf16.mxu0 %vm5853_vm5, %v8582_v31  ;;  %v5214_v25 = vmax.f32 %v5075_v36, 0.0 }
 0x8c4   : > { %v5215_v14 = vmax.f32 %v5077_v12, 0.0  ;;  %v8622_v12 = vld [vmem:[#allocation16 + $0x60] sm:$0xff]  }
 0x8c5   : > { %v5216_v44 = vmax.f32 %v5079_v37, 0.0  ;;  %v8587_v37 = vld [vmem:[%s10413_s1 + $0x28] sm:$0xff]  }
 0x8c6   : > { %v10467_v39 = vpack.c.bf16 %v5215_v14, %v5213_v11 }
 0x8c7   : > { %v10470_v46 = vpack.c.bf16 %v5216_v44, %v5214_v25  ;;  %v5082_v47 = vpop.f32.mrb[16].mxu0  ;;  %v8588_v25 = vld [vmem:[%s10413_s1 + $0x30] sm:$0xff]   ;;  %v8605_v44 = vld [vmem:[%s11136_s24 + $0x20] sm:$0xff]  }
 0x8c8   : > { %v5083_v49 = vadd.f32 %v5082_v47, %v10419_v26  ;;  %v5084_v51 = vpop.f32.mrb[17].mxu0 }
 0x8c9   : > { %v5085_v54 = vadd.f32 %v5084_v51, %v10422_v38  ;;  %v5086_v55 = vpop.f32.mrb[18].mxu0  ;;  %5563 = vmatprep.mubr.bf16.mxu1 %v10470_v46 }
 0x8ca   : > { %v5087_v57 = vadd.f32 %v5086_v55, %v10419_v26  ;;  %v5088_v59 = vpop.f32.mrb[19].mxu0  ;;  %5564 = vmatmul.mubr.bf16.vlgmr.msra.gmra.mrb[192].mxu1 %v10467_v39  ;;  %7866 = vmatmul.mubr.msk.bf16.vlgmr.msra.gmra.mrb[76].mxu0 %vm5853_vm5, %v8583_v45  ;;  %v5217_v0 = vmax.f32 %v5083_v49, 0.0  ;;  %v8607_v55 = vld [vmem:[%s11136_s24 + $0x28] sm:$0xff]  }
 0x8cb   : > { %v5089_v1 = vadd.f32 %v5088_v59, %v10422_v38  ;;  %7869 = vmatprep.mubr.msk.bf16.mxu0 %vm5853_vm5, %v8584_v48  ;;  %7726 = vmatpush3.bf16.msra.mxu0 %v8593_v50  ;;  %v5218_v5 = vmax.f32 %v5085_v54, 0.0  ;;  %v8606_v48 = vld [vmem:[%s11136_s24 + $0x68] sm:$0xff]   ;;  %v8610_v59 = vld [vmem:[%s11136_s24 + $0x70] sm:$0xff]  }
 0x8cc   : > { %v5219_v4 = vmax.f32 %v5087_v57, 0.0  ;;  %7727 = vmatprep.subr.bf16.mxu0 %v8594_v52  ;;  %7614 = vmatpush3.bf16.msra.mxu1 %v8615_v53  ;;  %v8623_v50 = vld [vmem:[#allocation16 + $0x20] sm:$0xff]  }
 0x8cd   : > { %v5220_v9 = vmax.f32 %v5089_v1, 0.0  ;;  %7615 = vmatprep.subr.bf16.mxu1 %v8616_v56 }
 0x8ce   : > { %v10493_v43 = vpack.c.bf16 %v5219_v4, %v5217_v0  ;;  %v8589_v4 = vld [vmem:[%s10413_s1 + $0x38] sm:$0xff]  }
 0x8cf   : > { %v10496_v42 = vpack.c.bf16 %v5220_v9, %v5218_v5  ;;  %v5092_v15 = vpop.f32.mrb[20].mxu0  ;;  %7728 = vmatpush3.bf16.msra.mxu0 %v8595_v63  ;;  %v8590_v5 = vld [vmem:[%s10413_s1 + $0x40] sm:$0xff]   ;;  %v8611_v9 = vld [vmem:[%s11136_s24 + $0x30] sm:$0xff]  }
 0x8d0   : > { %v5093_v21 = vadd.f32 %v5092_v15, %v10419_v26  ;;  %v5094_v22 = vpop.f32.mrb[21].mxu0  ;;  %7729 = vmatprep.subr.bf16.mxu0 %v8598_v2  ;;  %7616 = vmatpush3.bf16.msra.mxu1 %v8617_v3  ;;  %v8612_v15 = vld [vmem:[%s11136_s24 + $0x78] sm:$0xff]  }
 0x8d1   : > { %v5095_v7 = vadd.f32 %v5094_v22, %v10422_v38  ;;  %v5096_v23 = vpop.f32.mrb[22].mxu0  ;;  %5573 = vmatprep.mubr.bf16.mxu1 %v10496_v42  ;;  %7617 = vmatprep.subr.bf16.mxu1 %v8618_v41 }
 0x8d2   : > { %v5097_v61 = vadd.f32 %v5096_v23, %v10419_v26  ;;  %v5098_v27 = vpop.f32.mrb[23].mxu0  ;;  %5574 = vmatmul.mubr.bf16.gmra.mrb[196].mxu1 %v10493_v43  ;;  %7870 = vmatmul.mubr.msk.bf16.gmra.mrb[80].mxu0 %vm5853_vm5, %v8585_v10  ;;  %v5221_v32 = vmax.f32 %v5093_v21, 0.0  ;;  %v8625_v23 = vld [vmem:[#allocation16 + $0x28] sm:$0xff]  }
 0x8d3   : > { %v5099_v24 = vadd.f32 %v5098_v27, %v10422_v38  ;;  %7873 = vmatprep.mubr.msk.bf16.mxu0 %vm5853_vm5, %v8586_v16  ;;  %7730 = vmatpush3.bf16.msra.mxu0 %v8599_v20  ;;  %v5222_v36 = vmax.f32 %v5095_v7, 0.0  ;;  %v8624_v7 = vld [vmem:[#allocation16 + $0x68] sm:$0xff]  }
 0x8d4   : > { %v5223_v31 = vmax.f32 %v5097_v61, 0.0  ;;  %7731 = vmatprep.subr.bf16.mxu0 %v8600_v19  ;;  %7618 = vmatpush3.bf16.msra.mxu1 %v8619_v40  ;;  %v8613_v40 = vld [vmem:[%s11136_s24 + $0x38] sm:$0xff]  }
 0x8d5   : > { %v5224_v35 = vmax.f32 %v5099_v24, 0.0  ;;  %7619 = vmatprep.subr.bf16.mxu1 %v8620_v60 }
 0x8d6   : > { %v10519_v13 = vpack.c.bf16 %v5223_v31, %v5221_v32  ;;  %v8591_v32 = vld [vmem:[%s10413_s1 + $0x48] sm:$0xff]  }
 0x8d7   : > { %v10522_v11 = vpack.c.bf16 %v5224_v35, %v5222_v36  ;;  %v5102_v14 = vpop.f32.mrb[24].mxu0  ;;  %7732 = vmatpush3.bf16.msra.mxu0 %v8601_v28 }
 0x8d8   : > { %v5103_v45 = vadd.f32 %v5102_v14, %v10419_v26  ;;  %v5104_v47 = vpop.f32.mrb[25].mxu0  ;;  %7733 = vmatprep.subr.bf16.mxu0 %v8604_v33  ;;  %7620 = vmatpush3.bf16.msra.mxu1 %v8621_v34  ;;  %v8596_v34 = vld [vmem:[%s10413_s1 + $0x50] sm:$0xff]  }
 0x8d9   : > { %v5105_v49 = vadd.f32 %v5104_v47, %v10422_v38  ;;  %v5106_v51 = vpop.f32.mrb[26].mxu0  ;;  %5583 = vmatprep.mubr.bf16.mxu1 %v10522_v11  ;;  %7621 = vmatprep.subr.bf16.mxu1 %v8622_v12 }
 0x8da   : > { %v5107_v52 = vadd.f32 %v5106_v51, %v10419_v26  ;;  %v5108_v53 = vpop.f32.mrb[27].mxu0  ;;  %5584 = vmatmul.mubr.bf16.gmra.mrb[200].mxu1 %v10519_v13  ;;  %7874 = vmatmul.mubr.msk.bf16.gmra.mrb[84].mxu0 %vm5853_vm5, %v8587_v37  ;;  %v5225_v56 = vmax.f32 %v5103_v45, 0.0  ;;  %v8597_v51 = vld [vmem:[%s10413_s1 + $0x58] sm:$0xff]  }
 0x8db   : > { %v5109_v54 = vadd.f32 %v5108_v53, %v10422_v38  ;;  %7877 = vmatprep.mubr.msk.bf16.mxu0 %vm5853_vm5, %v8588_v25  ;;  %7734 = vmatpush3.bf16.msra.mxu0 %v8605_v44  ;;  %v5226_v1 = vmax.f32 %v5105_v49, 0.0 }
 0x8dc   : > { %v5227_v57 = vmax.f32 %v5107_v52, 0.0  ;;  %7735 = vmatprep.subr.bf16.mxu0 %v8606_v48  ;;  %7622 = vmatpush3.bf16.msra.mxu1 %v8623_v50 }
 0x8dd   : > { %v5228_v63 = vmax.f32 %v5109_v54, 0.0  ;;  %7623 = vmatprep.subr.bf16.mxu1 %v8624_v7  ;;  %v8602_v54 = vld [vmem:[%s10413_s1 + $0x60] sm:$0xff]  }
 0x8de   : > { %v10545_v0 = vpack.c.bf16 %v5227_v57, %v5225_v56 }
 0x8df   : > { %v10548_v2 = vpack.c.bf16 %v5228_v63, %v5226_v1  ;;  %v5112_v3 = vpop.f32.mrb[28].mxu0  ;;  %7736 = vmatpush3.bf16.msra.mxu0 %v8607_v55 }
 0x8e0   : > { %v5113_v41 = vadd.f32 %v5112_v3, %v10419_v26  ;;  %v5114_v10 = vpop.f32.mrb[29].mxu0  ;;  %7737 = vmatprep.subr.bf16.mxu0 %v8610_v59  ;;  %7624 = vmatpush3.bf16.msra.mxu1 %v8625_v23 }
 0x8e1   : > { %v5115_v16 = vadd.f32 %v5114_v10, %v10422_v38  ;;  %v5116_v20 = vpop.f32.mrb[30].mxu0  ;;  %5593 = vmatprep.mubr.bf16.mxu1 %v10548_v2 }
 0x8e2   : > { %v5117_v21 = vadd.f32 %v5116_v20, %v10419_v26  ;;  %v5118_v22 = vpop.f32.mrb[31].mxu0  ;;  %5594 = vmatmul.mubr.bf16.gmra.mrb[204].mxu1 %v10545_v0  ;;  %7878 = vmatmul.mubr.msk.bf16.gmra.mrb[88].mxu0 %vm5853_vm5, %v8589_v4  ;;  %v5229_v60 = vmax.f32 %v5113_v41, 0.0  ;;  %v8626_v4 = vld [vmem:[#allocation16 + $0x70] sm:$0xff]   ;;  %v8603_v20 = vld [vmem:[%s10413_s1 + $0x68] sm:$0xff]  }
 0x8e3   : > { %v5119_v19 = vadd.f32 %v5118_v22, %v10422_v38  ;;  %7881 = vmatprep.mubr.msk.bf16.mxu0 %vm5853_vm5, %v8590_v5  ;;  %7738 = vmatpush3.bf16.msra.mxu0 %v8611_v9  ;;  %v5230_v27 = vmax.f32 %v5115_v16, 0.0  ;;  %v8627_v5 = vld [vmem:[#allocation16 + $0x30] sm:$0xff]  }
 0x8e4   : > { %v5231_v61 = vmax.f32 %v5117_v21, 0.0  ;;  %7739 = vmatprep.subr.bf16.mxu0 %v8612_v15  ;;  %7625 = vmatprep.subr.bf16.mxu1 %v8626_v4 }
 0x8e5   : > { %v5232_v24 = vmax.f32 %v5119_v19, 0.0  ;;  %7626 = vmatpush3.bf16.msra.mxu1 %v8627_v5  ;;  %v8608_v19 = vld [vmem:[%s10413_s1 + $0x70] sm:$0xff]  }
 0x8e6   : > { %v10568_v28 = vpack.c.bf16 %v5231_v61, %v5229_v60 }
 0x8e7   : > { %v10571_v31 = vpack.c.bf16 %v5232_v24, %v5230_v27  ;;  %v5122_v33 = vpop.f32.mrb[32].mxu0  ;;  %7740 = vmatpush3.bf16.msra.mxu0 %v8613_v40 }
 0x8e8   : > { %v5123_v36 = vadd.f32 %v5122_v33, %v10419_v26  ;;  %v5124_v35 = vpop.f32.mrb[33].mxu0  ;;  %v8629_v33 = vld [vmem:[#allocation16 + $0x38] sm:$0xff]  }
 0x8e9   : > { %v5125_v12 = vadd.f32 %v5124_v35, %v10422_v38  ;;  %v5126_v37 = vpop.f32.mrb[34].mxu0  ;;  %5603 = vmatprep.mubr.bf16.mxu1 %v10571_v31 }
 0x8ea   : > { %v5127_v14 = vadd.f32 %v5126_v37, %v10419_v26  ;;  %v5128_v25 = vpop.f32.mrb[35].mxu0  ;;  %5604 = vmatmul.mubr.bf16.gmra.mrb[208].mxu1 %v10568_v28  ;;  %7882 = vmatmul.mubr.msk.bf16.gmra.mrb[92].mxu0 %vm5853_vm5, %v8591_v32  ;;  %v5233_v45 = vmax.f32 %v5123_v36, 0.0  ;;  %v8628_v32 = vld [vmem:[#allocation16 + $0x78] sm:$0xff]  }
 0x8eb   : > { %v5129_v44 = vadd.f32 %v5128_v25, %v10422_v38  ;;  %7885 = vmatprep.mubr.msk.bf16.mxu0 %vm5853_vm5, %v8596_v34  ;;  %v5234_v48 = vmax.f32 %v5125_v12, 0.0  ;;  %7627 = vmatprep.subr.bf16.mxu1 %v8628_v32 }
 0x8ec   : > { %v5235_v47 = vmax.f32 %v5127_v14, 0.0  ;;  %v8609_v14 = vld [vmem:[%s10413_s1 + $0x78] sm:$0xff]   ;;  %7628 = vmatpush3.bf16.msra.mxu1 %v8629_v33  ;;  %s11219_s1 = sld [smem:[#allocation60_spill]] }
 0x8ed   : > { %v5236_v50 = vmax.f32 %v5129_v44, 0.0 }
 0x8ee   : > { %v10582_v49 = vpack.c.bf16 %v5235_v47, %v5233_v45 }
 0x8ef   : > { %v10585_v52 = vpack.c.bf16 %v5236_v50, %v5234_v48  ;;  %v5132_v53 = vpop.f32.mrb[36].mxu0 }
 0x8f0   : > { %v5133_v55 = vadd.f32 %v5132_v53, %v10419_v26  ;;  %v5134_v56 = vpop.f32.mrb[37].mxu0 }
 0x8f1   : > { %v5135_v57 = vadd.f32 %v5134_v56, %v10422_v38  ;;  %v5136_v59 = vpop.f32.mrb[38].mxu0  ;;  %5613 = vmatprep.mubr.bf16.mxu1 %v10585_v52 }
 0x8f2   : > { %v5137_v1 = vadd.f32 %v5136_v59, %v10419_v26  ;;  %v5138_v63 = vpop.f32.mrb[39].mxu0  ;;  %5614 = vmatmul.mubr.bf16.gmra.mrb[212].mxu1 %v10582_v49  ;;  %7886 = vmatmul.mubr.msk.bf16.gmra.mrb[96].mxu0 %vm5853_vm5, %v8597_v51  ;;  %v5237_v9 = vmax.f32 %v5133_v55, 0.0  ;;  %s10980_s28 = scalar_lea.vmem %s11219_s1, %s7196_s10 }
 0x8f3   : > { %v5139_v3 = vadd.f32 %v5138_v63, %v10422_v38  ;;  %7889 = vmatprep.mubr.msk.bf16.mxu0 %vm5853_vm5, %v8602_v54  ;;  %v5238_v10 = vmax.f32 %v5135_v57, 0.0 }
 0x8f4   : > { %v5239_v41 = vmax.f32 %v5137_v1, 0.0 }
 0x8f5   : > { %v5240_v15 = vmax.f32 %v5139_v3, 0.0 }
 0x8f6   : > { %v10596_v16 = vpack.c.bf16 %v5239_v41, %v5237_v9 }
 0x8f7   : > { %v10599_v21 = vpack.c.bf16 %v5240_v15, %v5238_v10  ;;  %v5142_v22 = vpop.f32.mrb[40].mxu0 }
 0x8f8   : > { %v5143_v40 = vadd.f32 %v5142_v22, %v10419_v26  ;;  %v5144_v7 = vpop.f32.mrb[41].mxu0 }
 0x8f9   : > { %v5145_v23 = vadd.f32 %v5144_v7, %v10422_v38  ;;  %v5146_v60 = vpop.f32.mrb[42].mxu0  ;;  %5623 = vmatprep.mubr.bf16.mxu1 %v10599_v21 }
 0x8fa   : > { %v5147_v61 = vadd.f32 %v5146_v60, %v10419_v26  ;;  %v5148_v27 = vpop.f32.mrb[43].mxu0  ;;  %5624 = vmatmul.mubr.bf16.gmra.mrb[216].mxu1 %v10596_v16  ;;  %7890 = vmatmul.mubr.msk.bf16.gmra.mrb[100].mxu0 %vm5853_vm5, %v8603_v20  ;;  %v5241_v34 = vmax.f32 %v5143_v40, 0.0 }
 0x8fb   : > { %v5149_v24 = vadd.f32 %v5148_v27, %v10422_v38  ;;  %7893 = vmatprep.mubr.msk.bf16.mxu0 %vm5853_vm5, %v8608_v19  ;;  %v5242_v35 = vmax.f32 %v5145_v23, 0.0 }
 0x8fc   : > { %v5243_v36 = vmax.f32 %v5147_v61, 0.0 }
 0x8fd   : > { %v5244_v12 = vmax.f32 %v5149_v24, 0.0 }
 0x8fe   : > { %v10610_v37 = vpack.c.bf16 %v5243_v36, %v5241_v34 }
 0x8ff   : > { %v10613_v25 = vpack.c.bf16 %v5244_v12, %v5242_v35  ;;  %v5152_v44 = vpop.f32.mrb[44].mxu0 }
 0x900   : > { %v5153_v45 = vadd.f32 %v5152_v44, %v10419_v26  ;;  %v5154_v47 = vpop.f32.mrb[45].mxu0 }
 0x901   : > { %v5155_v48 = vadd.f32 %v5154_v47, %v10422_v38  ;;  %v5156_v50 = vpop.f32.mrb[46].mxu0  ;;  %5633 = vmatprep.mubr.bf16.mxu1 %v10613_v25 }
 0x902   : > { %v5157_v51 = vadd.f32 %v5156_v50, %v10419_v26  ;;  %v5158_v53 = vpop.f32.mrb[47].mxu0  ;;  %5634 = vmatmul.mubr.bf16.gmra.mrb[220].mxu1 %v10610_v37  ;;  %7894 = vmatmul.mubr.msk.bf16.gmra.mrb[104].mxu0 %vm5853_vm5, %v8609_v14  ;;  %v5245_v55 = vmax.f32 %v5153_v45, 0.0 }
 0x903   : > { %v5159_v54 = vadd.f32 %v5158_v53, %v10422_v38  ;;  %6590 = vmatprep.mubr.bf16.mxu0 %v10434_v58  ;;  %v5246_v57 = vmax.f32 %v5155_v48, 0.0 }
 0x904   : > { %v5247_v56 = vmax.f32 %v5157_v51, 0.0 }
 0x905   : > { %v5248_v59 = vmax.f32 %v5159_v54, 0.0 }
 0x906   : > { %v10623_v1 = vpack.c.bf16 %v5247_v56, %v5245_v55 }
 0x907   : > { %v10625_v63 = vpack.c.bf16 %v5248_v59, %v5246_v57  ;;  %v5162_v4 = vpop.f32.mrb[48].mxu0 }
 0x908   : > { %v5163_v3 = vadd.f32 %v5162_v4, %v10419_v26  ;;  %v5164_v5 = vpop.f32.mrb[49].mxu0 }
 0x909   : > { %v5165_v9 = vadd.f32 %v5164_v5, %v10422_v38  ;;  %v5166_v41 = vpop.f32.mrb[50].mxu0  ;;  %5643 = vmatprep.mubr.bf16.mxu1 %v10625_v63 }
 0x90a   : > { %v5167_v10 = vadd.f32 %v5166_v41, %v10419_v26  ;;  %v5168_v58 = vpop.f32.mrb[51].mxu0  ;;  %5644 = vmatmul.mubr.bf16.gmra.mrb[224].mxu1 %v10623_v1  ;;  %6591 = vmatmul.mubr.bf16.vlgmr.msra.gmra.mrb[108].mxu0 %v10432_v62  ;;  %v5249_v20 = vmax.f32 %v5163_v3, 0.0 }
 0x90b   : > { %v5169_v15 = vadd.f32 %v5168_v58, %v10422_v38  ;;  %6598 = vmatprep.mubr.bf16.mxu0 %v10447_v18  ;;  %v5250_v19 = vmax.f32 %v5165_v9, 0.0 }
 0x90c   : > { %v5251_v22 = vmax.f32 %v5167_v10, 0.0 }
 0x90d   : > { %v5252_v40 = vmax.f32 %v5169_v15, 0.0 }
 0x90e   : > { %v10635_v7 = vpack.c.bf16 %v5251_v22, %v5249_v20 }
 0x90f   : > { %v10637_v23 = vpack.c.bf16 %v5252_v40, %v5250_v19  ;;  %v5172_v60 = vpop.f32.mrb[52].mxu0 }
 0x910   : > { %v5173_v61 = vadd.f32 %v5172_v60, %v10419_v26  ;;  %v5174_v27 = vpop.f32.mrb[53].mxu0 }
 0x911   : > { %v5175_v24 = vadd.f32 %v5174_v27, %v10422_v38  ;;  %v5176_v32 = vpop.f32.mrb[54].mxu0  ;;  %5653 = vmatprep.mubr.bf16.mxu1 %v10637_v23 }
 0x912   : > { %v5177_v62 = vadd.f32 %v5176_v32, %v10419_v26  ;;  %v5178_v18 = vpop.f32.mrb[55].mxu0  ;;  %5654 = vmatmul.mubr.bf16.gmra.mrb[228].mxu1 %v10635_v7  ;;  %6599 = vmatmul.mubr.bf16.gmra.mrb[112].mxu0 %v10445_v17  ;;  %v5253_v34 = vmax.f32 %v5173_v61, 0.0 }
 0x913   : > { %v5179_v33 = vadd.f32 %v5178_v18, %v10422_v38  ;;  %6606 = vmatprep.mubr.bf16.mxu0 %v10457_v29  ;;  %v5254_v35 = vmax.f32 %v5175_v24, 0.0 }
 0x914   : > { %v5255_v36 = vmax.f32 %v5177_v62, 0.0 }
 0x915   : > { %v5256_v12 = vmax.f32 %v5179_v33, 0.0 }
 0x916   : > { %v5291_v14 = vpack.c.bf16 %v5255_v36, %v5253_v34 }
 0x917   : > { %v5292_v44 = vpack.c.bf16 %v5256_v12, %v5254_v35  ;;  %v5182_v45 = vpop.f32.mrb[56].mxu0 }
 0x918   : > { %v5183_v47 = vadd.f32 %v5182_v45, %v10419_v26  ;;  %v5184_v48 = vpop.f32.mrb[57].mxu0 }
 0x919   : > { %v5185_v50 = vadd.f32 %v5184_v48, %v10422_v38  ;;  %v5186_v51 = vpop.f32.mrb[58].mxu0  ;;  %5663 = vmatprep.mubr.bf16.mxu1 %v5292_v44 }
 0x91a   : > { %v5187_v17 = vadd.f32 %v5186_v51, %v10419_v26  ;;  %v5188_v53 = vpop.f32.mrb[59].mxu0  ;;  %5664 = vmatmul.mubr.bf16.gmra.mrb[232].mxu1 %v5291_v14  ;;  %6607 = vmatmul.mubr.bf16.gmra.mrb[116].mxu0 %v10455_v30  ;;  %v5257_v54 = vmax.f32 %v5183_v47, 0.0 }
 0x91b   : > { %v5189_v29 = vadd.f32 %v5188_v53, %v10422_v38  ;;  %6614 = vmatprep.mubr.bf16.mxu0 %v10470_v46  ;;  %v5258_v56 = vmax.f32 %v5185_v50, 0.0 }
 0x91c   : > { %v5259_v55 = vmax.f32 %v5187_v17, 0.0 }
 0x91d   : > { %v5260_v57 = vmax.f32 %v5189_v29, 0.0 }
 0x91e   : > { %v5293_v59 = vpack.c.bf16 %v5259_v55, %v5257_v54 }
 0x91f   : > { %v5294_v4 = vpack.c.bf16 %v5260_v57, %v5258_v56  ;;  %v5192_v3 = vpop.f32.mrb[60].mxu0 }
 0x920   : > { %v5193_v5 = vadd.f32 %v5192_v3, %v10419_v26  ;;  %v5194_v9 = vpop.f32.mrb[61].mxu0 }
 0x921   : > { %v5195_v41 = vadd.f32 %v5194_v9, %v10422_v38  ;;  %v5196_v10 = vpop.f32.mrb[62].mxu0  ;;  %5673 = vmatprep.mubr.bf16.mxu1 %v5294_v4 }
 0x922   : > { %v5197_v30 = vadd.f32 %v5196_v10, %v10419_v26  ;;  %v5198_v58 = vpop.f32.mrb[63].mxu0  ;;  %5674 = vmatmul.mubr.bf16.gmra.mrb[236].mxu1 %v5293_v59  ;;  %6615 = vmatmul.mubr.bf16.gmra.mrb[120].mxu0 %v10467_v39  ;;  %v5261_v15 = vmax.f32 %v5193_v5, 0.0  ;;  %v5329_v26 = vld [vmem:[%s11196_s26] sm:$0x3] }
 0x923   : > { %v5199_v46 = vadd.f32 %v5198_v58, %v10422_v38  ;;  %6622 = vmatprep.mubr.bf16.mxu0 %v10496_v42  ;;  %v5262_v22 = vmax.f32 %v5195_v41, 0.0  ;;  %v10680_v38 = vrot.slane %v5329_v26, %v9578_v6 }
 0x924   : > { %v5263_v20 = vmax.f32 %v5197_v30, 0.0 }
 0x925   : > { %v5264_v19 = vmax.f32 %v5199_v46, 0.0 }
 0x926   : > { %v5295_v40 = vpack.c.bf16 %v5263_v20, %v5261_v15 }
 0x927   : > { %v5296_v60 = vpack.c.bf16 %v5264_v19, %v5262_v22 }
 0x929   : > { %5683 = vmatprep.mubr.bf16.mxu1 %v5296_v60 }
 0x92a   : > { %5684 = vmatmul.mubr.bf16.gmra.mrb[240].mxu1 %v5295_v40  ;;  %6623 = vmatmul.mubr.bf16.gmra.mrb[124].mxu0 %v10493_v43  ;;  %v10683_v43 = vrot.slane %v5329_v26, %v9580_v8 }
 0x92b   : > { %6630 = vmatprep.mubr.bf16.mxu0 %v10522_v11 }
 0x932   : > { %6631 = vmatmul.mubr.bf16.gmra.mrb[128].mxu0 %v10519_v13 }
 0x933   : > { %6638 = vmatprep.mubr.bf16.mxu0 %v10548_v2 }
 0x93a   : > { %6639 = vmatmul.mubr.bf16.gmra.mrb[132].mxu0 %v10545_v0 }
 0x93b   : > { %6646 = vmatprep.mubr.bf16.mxu0 %v10571_v31 }
 0x942   : > { %6647 = vmatmul.mubr.bf16.gmra.mrb[136].mxu0 %v10568_v28 }
 0x943   : > { %6654 = vmatprep.mubr.bf16.mxu0 %v10585_v52 }
 0x94a   : > { %6655 = vmatmul.mubr.bf16.gmra.mrb[140].mxu0 %v10582_v49 }
 0x94b   : > { %6662 = vmatprep.mubr.bf16.mxu0 %v10599_v21 }
 0x952   : > { %6663 = vmatmul.mubr.bf16.gmra.mrb[144].mxu0 %v10596_v16 }
 0x953   : > { %6670 = vmatprep.mubr.bf16.mxu0 %v10613_v25 }
 0x95a   : > { %6671 = vmatmul.mubr.bf16.gmra.mrb[148].mxu0 %v10610_v37 }
 0x95b   : > { %6678 = vmatprep.mubr.bf16.mxu0 %v10625_v63 }
 0x962   : > { %6679 = vmatmul.mubr.bf16.gmra.mrb[152].mxu0 %v10623_v1 }
 0x963   : > { %6686 = vmatprep.mubr.bf16.mxu0 %v10637_v23 }
 0x96a   : > { %6687 = vmatmul.mubr.bf16.gmra.mrb[156].mxu0 %v10635_v7 }
 0x96b   : > { %6694 = vmatprep.mubr.bf16.mxu0 %v5292_v44 }
 0x972   : > { %6695 = vmatmul.mubr.bf16.gmra.mrb[160].mxu0 %v5291_v14 }
 0x973   : > { %6702 = vmatprep.mubr.bf16.mxu0 %v5294_v4 }
 0x97a   : > { %6703 = vmatmul.mubr.bf16.gmra.mrb[164].mxu0 %v5293_v59 }
 0x97b   : > { %6710 = vmatprep.mubr.bf16.mxu0 %v5296_v60 }
 0x982   : > { %6711 = vmatmul.mubr.bf16.gmra.mrb[168].mxu0 %v5295_v40 }
 0x985   : > { %v5535_v39 = vpop.f32.mrb[64].mxu0 }
 0x986   : > { %v5537_v42 = vpop.f32.mrb[65].mxu0  ;;  %v5536_v11 = vadd.f32 %v5535_v39, %v10680_v38 }
 0x987   : > { %v5539_v13 = vpop.f32.mrb[66].mxu0  ;;  %v5538_v28 = vadd.f32 %v5537_v42, %v10683_v43 }
 0x988   : > { %v5540_v0 = vadd.f32 %v5539_v13, %v10680_v38  ;;  %v5541_v2 = vpop.f32.mrb[67].mxu0  ;;  %v8630_v13 = vld [vmem:[%s11197_s2] sm:$0xff]  }
 0x989   : > { %v5542_v31 = vadd.f32 %v5541_v2, %v10683_v43  ;;  %7897 = vmatprep.subr.bf16.mxu1 %v8630_v13 }
 0x98a   : > { %v5694_v49 = vpack.c.bf16 %v5540_v0, %v5536_v11 }
 0x98b   : > { %v5695_v52 = vpack.c.bf16 %v5542_v31, %v5538_v28 }
 0x98d   : > { %v5545_v16 = vpop.f32.mrb[68].mxu0  ;;  %6198 = vmatprep.mubr.bf16.mxu1 %v5695_v52 }
 0x98e   : > { %v5547_v6 = vpop.f32.mrb[69].mxu0  ;;  %6199 = vmatmul.mubr.bf16.vlgmr.msra.gmra.mrb[244].mxu1 %v5694_v49  ;;  %v5546_v8 = vadd.f32 %v5545_v16, %v10680_v38 }
 0x98f   : > { %v5549_v21 = vpop.f32.mrb[70].mxu0  ;;  %v5548_v1 = vadd.f32 %v5547_v6, %v10683_v43  ;;  %7898 = vmatpush3.bf16.msra.mxu1 %v8630_v13 }
 0x990   : > { %v5550_v37 = vadd.f32 %v5549_v21, %v10680_v38  ;;  %v5551_v25 = vpop.f32.mrb[71].mxu0 }
 0x991   : > { %v5552_v63 = vadd.f32 %v5551_v25, %v10683_v43 }
 0x992   : > { %v5696_v7 = vpack.c.bf16 %v5550_v37, %v5546_v8 }
 0x993   : > { %v5697_v23 = vpack.c.bf16 %v5552_v63, %v5548_v1 }
 0x995   : > { %v5555_v61 = vpop.f32.mrb[72].mxu0  ;;  %6206 = vmatprep.mubr.bf16.mxu1 %v5697_v23 }
 0x996   : > { %v5557_v27 = vpop.f32.mrb[73].mxu0  ;;  %6207 = vmatmul.mubr.bf16.gmra.mrb[248].mxu1 %v5696_v7  ;;  %v5556_v32 = vadd.f32 %v5555_v61, %v10680_v38 }
 0x997   : > { %v5559_v24 = vpop.f32.mrb[74].mxu0  ;;  %v5558_v33 = vadd.f32 %v5557_v27, %v10683_v43 }
 0x998   : > { %v5560_v62 = vadd.f32 %v5559_v24, %v10680_v38  ;;  %v5561_v18 = vpop.f32.mrb[75].mxu0 }
 0x999   : > { %v5562_v34 = vadd.f32 %v5561_v18, %v10683_v43 }
 0x99a   : > { %v5698_v36 = vpack.c.bf16 %v5560_v62, %v5556_v32 }
 0x99b   : > { %v5699_v35 = vpack.c.bf16 %v5562_v34, %v5558_v33 }
 0x99d   : > { %v5565_v12 = vpop.f32.mrb[192].mxu1  ;;  %6214 = vmatprep.mubr.bf16.mxu1 %v5699_v35  ;;  %v10697_v14 = vpop.f32.mrb[76].mxu0 }
 0x99e   : > { %v5567_v44 = vpop.f32.mrb[193].mxu1  ;;  %6215 = vmatmul.mubr.bf16.gmra.mrb[252].mxu1 %v5698_v36  ;;  %v10699_v45 = vpop.f32.mrb[77].mxu0  ;;  %v5566_v50 = vadd.f32 %v5565_v12, %v10680_v38 }
 0x99f   : > { %v5569_v47 = vpop.f32.mrb[194].mxu1  ;;  %v10701_v48 = vpop.f32.mrb[78].mxu0  ;;  %v5568_v29 = vadd.f32 %v5567_v44, %v10683_v43  ;;  %v8631_v44 = vld [vmem:[%s11197_s2 + $0x8] sm:$0xff]  }
 0x9a0   : > { %v5570_v51 = vadd.f32 %v5569_v47, %v10680_v38  ;;  %v5571_v17 = vpop.f32.mrb[195].mxu1  ;;  %v10705_v53 = vpop.f32.mrb[79].mxu0  ;;  %7899 = vmatprep.subr.bf16.mxu1 %v8631_v44 }
 0x9a1   : > { %v5572_v54 = vadd.f32 %v5571_v17, %v10683_v43  ;;  %7900 = vmatpush3.bf16.msra.mxu1 %v8631_v44 }
 0x9a2   : > { %v5700_v55 = vpack.c.bf16 %v5570_v51, %v5566_v50 }
 0x9a3   : > { %v5701_v56 = vpack.c.bf16 %v5572_v54, %v5568_v29 }
 0x9a5   : > { %v5575_v57 = vpop.f32.mrb[196].mxu1  ;;  %6222 = vmatprep.mubr.bf16.mxu1 %v5701_v56  ;;  %v10709_v59 = vpop.f32.mrb[80].mxu0 }
 0x9a6   : > { %v5577_v4 = vpop.f32.mrb[197].mxu1  ;;  %6223 = vmatmul.mubr.bf16.gmra.mrb[0].mxu1 %v5700_v55  ;;  %v10711_v3 = vpop.f32.mrb[81].mxu0  ;;  %v5576_v41 = vadd.f32 %v5575_v57, %v10680_v38 }
 0x9a7   : > { %v5579_v5 = vpop.f32.mrb[198].mxu1  ;;  %v10713_v9 = vpop.f32.mrb[82].mxu0  ;;  %v5578_v46 = vadd.f32 %v5577_v4, %v10683_v43 }
 0x9a8   : > { %v5580_v10 = vadd.f32 %v5579_v5, %v10680_v38  ;;  %v5581_v30 = vpop.f32.mrb[199].mxu1  ;;  %v10717_v58 = vpop.f32.mrb[83].mxu0 }
 0x9a9   : > { %v5582_v15 = vadd.f32 %v5581_v30, %v10683_v43 }
 0x9aa   : > { %v5702_v20 = vpack.c.bf16 %v5580_v10, %v5576_v41 }
 0x9ab   : > { %v5703_v22 = vpack.c.bf16 %v5582_v15, %v5578_v46 }
 0x9ad   : > { %v5585_v19 = vpop.f32.mrb[200].mxu1  ;;  %6230 = vmatprep.mubr.bf16.mxu1 %v5703_v22  ;;  %v10721_v40 = vpop.f32.mrb[84].mxu0 }
 0x9ae   : > { %v5587_v60 = vpop.f32.mrb[201].mxu1  ;;  %6231 = vmatmul.mubr.bf16.gmra.mrb[4].mxu1 %v5702_v20  ;;  %v10723_v26 = vpop.f32.mrb[85].mxu0  ;;  %v5586_v11 = vadd.f32 %v5585_v19, %v10680_v38 }
 0x9af   : > { %v5589_v39 = vpop.f32.mrb[202].mxu1  ;;  %v10725_v42 = vpop.f32.mrb[86].mxu0  ;;  %v5588_v31 = vadd.f32 %v5587_v60, %v10683_v43 }
 0x9b0   : > { %v5590_v0 = vadd.f32 %v5589_v39, %v10680_v38  ;;  %v5591_v2 = vpop.f32.mrb[203].mxu1  ;;  %v10732_v28 = vpop.f32.mrb[87].mxu0 }
 0x9b1   : > { %v5592_v49 = vadd.f32 %v5591_v2, %v10683_v43 }
 0x9b2   : > { %v5704_v52 = vpack.c.bf16 %v5590_v0, %v5586_v11 }
 0x9b3   : > { %v5705_v16 = vpack.c.bf16 %v5592_v49, %v5588_v31 }
 0x9b5   : > { %v5595_v6 = vpop.f32.mrb[204].mxu1  ;;  %6238 = vmatprep.mubr.bf16.mxu1 %v5705_v16  ;;  %v10736_v21 = vpop.f32.mrb[88].mxu0  ;;  %v8632_v16 = vld [vmem:[%s11197_s2 + $0x10] sm:$0xff]  }
 0x9b6   : > { %v5597_v8 = vpop.f32.mrb[205].mxu1  ;;  %6239 = vmatmul.mubr.bf16.gmra.mrb[8].mxu1 %v5704_v52  ;;  %v10738_v37 = vpop.f32.mrb[89].mxu0  ;;  %v5596_v63 = vadd.f32 %v5595_v6, %v10680_v38  ;;  %7901 = vmatprep.subr.bf16.mxu1 %v8632_v16 }
 0x9b7   : > { %v5599_v25 = vpop.f32.mrb[206].mxu1  ;;  %v10740_v1 = vpop.f32.mrb[90].mxu0  ;;  %v5598_v27 = vadd.f32 %v5597_v8, %v10683_v43  ;;  %7902 = vmatpush3.bf16.msra.mxu1 %v8632_v16 }
 0x9b8   : > { %v5600_v7 = vadd.f32 %v5599_v25, %v10680_v38  ;;  %v5601_v23 = vpop.f32.mrb[207].mxu1  ;;  %v10744_v61 = vpop.f32.mrb[91].mxu0 }
 0x9b9   : > { %v5602_v24 = vadd.f32 %v5601_v23, %v10683_v43 }
 0x9ba   : > { %v5706_v32 = vpack.c.bf16 %v5600_v7, %v5596_v63 }
 0x9bb   : > { %v5707_v62 = vpack.c.bf16 %v5602_v24, %v5598_v27 }
 0x9bd   : > { %v5605_v18 = vpop.f32.mrb[208].mxu1  ;;  %6246 = vmatprep.mubr.bf16.mxu1 %v5707_v62  ;;  %v10748_v33 = vpop.f32.mrb[92].mxu0 }
 0x9be   : > { %v5607_v34 = vpop.f32.mrb[209].mxu1  ;;  %6247 = vmatmul.mubr.bf16.gmra.mrb[12].mxu1 %v5706_v32  ;;  %v10750_v36 = vpop.f32.mrb[93].mxu0  ;;  %v5606_v47 = vadd.f32 %v5605_v18, %v10680_v38 }
 0x9bf   : > { %v5609_v35 = vpop.f32.mrb[210].mxu1  ;;  %v10752_v12 = vpop.f32.mrb[94].mxu0  ;;  %v5608_v29 = vadd.f32 %v5607_v34, %v10683_v43 }
 0x9c0   : > { %v5610_v50 = vadd.f32 %v5609_v35, %v10680_v38  ;;  %v5611_v51 = vpop.f32.mrb[211].mxu1  ;;  %v10759_v17 = vpop.f32.mrb[95].mxu0 }
 0x9c1   : > { %v5612_v54 = vadd.f32 %v5611_v51, %v10683_v43 }
 0x9c2   : > { %v5708_v55 = vpack.c.bf16 %v5610_v50, %v5606_v47 }
 0x9c3   : > { %v5709_v56 = vpack.c.bf16 %v5612_v54, %v5608_v29 }
 0x9c5   : > { %v5615_v57 = vpop.f32.mrb[212].mxu1  ;;  %6254 = vmatprep.mubr.bf16.mxu1 %v5709_v56  ;;  %v10763_v4 = vpop.f32.mrb[96].mxu0  ;;  %v8633_v56 = vld [vmem:[%s11197_s2 + $0x18] sm:$0xff]  }
 0x9c6   : > { %v5617_v5 = vpop.f32.mrb[213].mxu1  ;;  %6255 = vmatmul.mubr.bf16.gmra.mrb[16].mxu1 %v5708_v55  ;;  %v10765_v41 = vpop.f32.mrb[97].mxu0  ;;  %v5616_v46 = vadd.f32 %v5615_v57, %v10680_v38  ;;  %7903 = vmatprep.subr.bf16.mxu1 %v8633_v56 }
 0x9c7   : > { %v5619_v10 = vpop.f32.mrb[214].mxu1  ;;  %v10767_v30 = vpop.f32.mrb[98].mxu0  ;;  %v5618_v19 = vadd.f32 %v5617_v5, %v10683_v43  ;;  %7904 = vmatpush3.bf16.msra.mxu1 %v8633_v56 }
 0x9c8   : > { %v5620_v15 = vadd.f32 %v5619_v10, %v10680_v38  ;;  %v5621_v20 = vpop.f32.mrb[215].mxu1  ;;  %v10771_v22 = vpop.f32.mrb[99].mxu0 }
 0x9c9   : > { %v5622_v60 = vadd.f32 %v5621_v20, %v10683_v43 }
 0x9ca   : > { %v5710_v39 = vpack.c.bf16 %v5620_v15, %v5616_v46 }
 0x9cb   : > { %v5711_v13 = vpack.c.bf16 %v5622_v60, %v5618_v19 }
 0x9cd   : > { %v5625_v11 = vpop.f32.mrb[216].mxu1  ;;  %6262 = vmatprep.mubr.bf16.mxu1 %v5711_v13  ;;  %v10775_v0 = vpop.f32.mrb[100].mxu0 }
 0x9ce   : > { %v5627_v2 = vpop.f32.mrb[217].mxu1  ;;  %6263 = vmatmul.mubr.bf16.gmra.mrb[20].mxu1 %v5710_v39  ;;  %v10777_v31 = vpop.f32.mrb[101].mxu0  ;;  %v5626_v6 = vadd.f32 %v5625_v11, %v10680_v38 }
 0x9cf   : > { %v5629_v49 = vpop.f32.mrb[218].mxu1  ;;  %v10779_v52 = vpop.f32.mrb[102].mxu0  ;;  %v5628_v7 = vadd.f32 %v5627_v2, %v10683_v43 }
 0x9d0   : > { %v5630_v8 = vadd.f32 %v5629_v49, %v10680_v38  ;;  %v5631_v25 = vpop.f32.mrb[219].mxu1  ;;  %v10786_v63 = vpop.f32.mrb[103].mxu0 }
 0x9d1   : > { %v5632_v23 = vadd.f32 %v5631_v25, %v10683_v43 }
 0x9d2   : > { %v5712_v27 = vpack.c.bf16 %v5630_v8, %v5626_v6 }
 0x9d3   : > { %v5713_v24 = vpack.c.bf16 %v5632_v23, %v5628_v7 }
 0x9d5   : > { %v5635_v32 = vpop.f32.mrb[220].mxu1  ;;  %6270 = vmatprep.mubr.bf16.mxu1 %v5713_v24  ;;  %v10790_v62 = vpop.f32.mrb[104].mxu0  ;;  %v8634_v24 = vld [vmem:[%s11197_s2 + $0x20] sm:$0xff]  }
 0x9d6   : > { %v5637_v18 = vpop.f32.mrb[221].mxu1  ;;  %6271 = vmatmul.mubr.bf16.gmra.mrb[24].mxu1 %v5712_v27  ;;  %v10792_v34 = vpop.f32.mrb[105].mxu0  ;;  %v5636_v47 = vadd.f32 %v5635_v32, %v10680_v38  ;;  %7905 = vmatprep.subr.bf16.mxu1 %v8634_v24 }
 0x9d7   : > { %v5639_v35 = vpop.f32.mrb[222].mxu1  ;;  %v10794_v44 = vpop.f32.mrb[106].mxu0  ;;  %v5638_v54 = vadd.f32 %v5637_v18, %v10683_v43  ;;  %7906 = vmatpush3.bf16.msra.mxu1 %v8634_v24 }
 0x9d8   : > { %v5640_v50 = vadd.f32 %v5639_v35, %v10680_v38  ;;  %v5641_v51 = vpop.f32.mrb[223].mxu1  ;;  %v10798_v29 = vpop.f32.mrb[107].mxu0 }
 0x9d9   : > { %v5642_v55 = vadd.f32 %v5641_v51, %v10683_v43 }
 0x9da   : > { %v5714_v57 = vpack.c.bf16 %v5640_v50, %v5636_v47 }
 0x9db   : > { %v5715_v5 = vpack.c.bf16 %v5642_v55, %v5638_v54 }
 0x9dd   : > { %v5645_v10 = vpop.f32.mrb[224].mxu1  ;;  %6278 = vmatprep.mubr.bf16.mxu1 %v5715_v5  ;;  %v7741_v46 = vpop.f32.mrb[108].mxu0 }
 0x9de   : > { %v5647_v15 = vpop.f32.mrb[225].mxu1  ;;  %6279 = vmatmul.mubr.bf16.gmra.mrb[28].mxu1 %v5714_v57  ;;  %v7742_v20 = vpop.f32.mrb[109].mxu0  ;;  %v5646_v13 = vadd.f32 %v5645_v10, %v10680_v38 }
 0x9df   : > { %v10805_v19 = vadd.f32 %v7742_v20, %v7741_v46  ;;  %v5649_v60 = vpop.f32.mrb[226].mxu1  ;;  %v7744_v39 = vpop.f32.mrb[110].mxu0  ;;  %v5648_v16 = vadd.f32 %v5647_v15, %v10683_v43  ;;  %v8635_v46 = vld [vmem:[%s11197_s2 + $0x28] sm:$0xff]  }
 0x9e0   : > { %v5650_v11 = vadd.f32 %v5649_v60, %v10680_v38  ;;  %v5651_v2 = vpop.f32.mrb[227].mxu1  ;;  %v7745_v49 = vpop.f32.mrb[111].mxu0  ;;  %7907 = vmatprep.subr.bf16.mxu1 %v8635_v46 }
 0x9e1   : > { %v5652_v6 = vadd.f32 %v5651_v2, %v10683_v43  ;;  %v10811_v8 = vadd.f32 %v7745_v49, %v7744_v39  ;;  %7908 = vmatpush3.bf16.msra.mxu1 %v8635_v46 }
 0x9e2   : > { %v5716_v25 = vpack.c.bf16 %v5650_v11, %v5646_v13  ;;  %v8636_v13 = vld [vmem:[%s11197_s2 + $0x30] sm:$0xff]  }
 0x9e3   : > { %v5717_v7 = vpack.c.bf16 %v5652_v6, %v5648_v16  ;;  %7909 = vmatprep.subr.bf16.mxu1 %v8636_v13 }
 0x9e5   : > { %v5655_v23 = vpop.f32.mrb[228].mxu1  ;;  %6286 = vmatprep.mubr.bf16.mxu1 %v5717_v7  ;;  %v7747_v27 = vpop.f32.mrb[112].mxu0  ;;  %7910 = vmatpush3.bf16.msra.mxu1 %v8636_v13 }
 0x9e6   : > { %v5657_v32 = vpop.f32.mrb[229].mxu1  ;;  %6287 = vmatmul.mubr.bf16.gmra.mrb[32].mxu1 %v5716_v25  ;;  %v7748_v18 = vpop.f32.mrb[113].mxu0  ;;  %v5656_v51 = vadd.f32 %v5655_v23, %v10680_v38 }
 0x9e7   : > { %v10816_v35 = vadd.f32 %v7748_v18, %v7747_v27  ;;  %v5659_v47 = vpop.f32.mrb[230].mxu1  ;;  %v7750_v50 = vpop.f32.mrb[114].mxu0  ;;  %v5658_v57 = vadd.f32 %v5657_v32, %v10683_v43 }
 0x9e8   : > { %v5660_v54 = vadd.f32 %v5659_v47, %v10680_v38  ;;  %v5661_v55 = vpop.f32.mrb[231].mxu1  ;;  %v7751_v56 = vpop.f32.mrb[115].mxu0  ;;  %v8637_v47 = vld [vmem:[%s11197_s2 + $0x38] sm:$0xff]  }
 0x9e9   : > { %v5662_v5 = vadd.f32 %v5661_v55, %v10683_v43  ;;  %v10822_v10 = vadd.f32 %v7751_v56, %v7750_v50  ;;  %7911 = vmatprep.subr.bf16.mxu1 %v8637_v47 }
 0x9ea   : > { %v5718_v15 = vpack.c.bf16 %v5660_v54, %v5656_v51  ;;  %7912 = vmatpush3.bf16.msra.mxu1 %v8637_v47 }
 0x9eb   : > { %v5719_v20 = vpack.c.bf16 %v5662_v5, %v5658_v57 }
 0x9ed   : > { %v5665_v60 = vpop.f32.mrb[232].mxu1  ;;  %6294 = vmatprep.mubr.bf16.mxu1 %v5719_v20  ;;  %v7753_v39 = vpop.f32.mrb[116].mxu0 }
 0x9ee   : > { %v5667_v11 = vpop.f32.mrb[233].mxu1  ;;  %6295 = vmatmul.mubr.bf16.gmra.mrb[36].mxu1 %v5718_v15  ;;  %v7754_v2 = vpop.f32.mrb[117].mxu0  ;;  %v5666_v25 = vadd.f32 %v5665_v60, %v10680_v38 }
 0x9ef   : > { %v10830_v49 = vadd.f32 %v7754_v2, %v7753_v39  ;;  %v5669_v16 = vpop.f32.mrb[234].mxu1  ;;  %v7756_v6 = vpop.f32.mrb[118].mxu0  ;;  %v5668_v24 = vadd.f32 %v5667_v11, %v10683_v43 }
 0x9f0   : > { %v5670_v7 = vadd.f32 %v5669_v16, %v10680_v38  ;;  %v5671_v23 = vpop.f32.mrb[235].mxu1  ;;  %v7757_v27 = vpop.f32.mrb[119].mxu0 }
 0x9f1   : > { %v5672_v32 = vadd.f32 %v5671_v23, %v10683_v43  ;;  %v10836_v18 = vadd.f32 %v7757_v27, %v7756_v6 }
 0x9f2   : > { %v5720_v50 = vpack.c.bf16 %v5670_v7, %v5666_v25 }
 0x9f3   : > { %v5721_v51 = vpack.c.bf16 %v5672_v32, %v5668_v24 }
 0x9f5   : > { %v5675_v54 = vpop.f32.mrb[236].mxu1  ;;  %6302 = vmatprep.mubr.bf16.mxu1 %v5721_v51  ;;  %v7759_v55 = vpop.f32.mrb[120].mxu0 }
 0x9f6   : > { %v5677_v56 = vpop.f32.mrb[237].mxu1  ;;  %6303 = vmatmul.mubr.bf16.gmra.mrb[40].mxu1 %v5720_v50  ;;  %v7760_v57 = vpop.f32.mrb[121].mxu0  ;;  %v5676_v20 = vadd.f32 %v5675_v54, %v10680_v38 }
 0x9f7   : > { %v10841_v5 = vadd.f32 %v7760_v57, %v7759_v55  ;;  %v5679_v46 = vpop.f32.mrb[238].mxu1  ;;  %v7762_v15 = vpop.f32.mrb[122].mxu0  ;;  %v5678_v11 = vadd.f32 %v5677_v56, %v10683_v43 }
 0x9f8   : > { %v5680_v60 = vadd.f32 %v5679_v46, %v10680_v38  ;;  %v5681_v39 = vpop.f32.mrb[239].mxu1  ;;  %v7763_v13 = vpop.f32.mrb[123].mxu0 }
 0x9f9   : > { %v5682_v2 = vadd.f32 %v5681_v39, %v10683_v43  ;;  %v10847_v16 = vadd.f32 %v7763_v13, %v7762_v15 }
 0x9fa   : > { %v5722_v6 = vpack.c.bf16 %v5680_v60, %v5676_v20 }
 0x9fb   : > { %v5723_v25 = vpack.c.bf16 %v5682_v2, %v5678_v11 }
 0x9fd   : > { %v5685_v7 = vpop.f32.mrb[240].mxu1  ;;  %6310 = vmatprep.mubr.bf16.mxu1 %v5723_v25  ;;  %v7765_v23 = vpop.f32.mrb[124].mxu0 }
 0x9fe   : > { %v5687_v27 = vpop.f32.mrb[241].mxu1  ;;  %6311 = vmatmul.mubr.bf16.gmra.mrb[44].mxu1 %v5722_v6  ;;  %v7766_v24 = vpop.f32.mrb[125].mxu0  ;;  %v5686_v51 = vadd.f32 %v5685_v7, %v10680_v38 }
 0x9ff   : > { %v10849_v32 = vadd.f32 %v7766_v24, %v7765_v23  ;;  %v5689_v47 = vpop.f32.mrb[242].mxu1  ;;  %v7768_v50 = vpop.f32.mrb[126].mxu0  ;;  %v5688_v57 = vadd.f32 %v5687_v27, %v10683_v43 }
 0xa00   : > { %v5690_v54 = vadd.f32 %v5689_v47, %v10680_v38  ;;  %v5691_v55 = vpop.f32.mrb[243].mxu1  ;;  %v7769_v56 = vpop.f32.mrb[127].mxu0 }
 0xa01   : > { %v5692_v46 = vadd.f32 %v5691_v55, %v10683_v43  ;;  %v10855_v15 = vadd.f32 %v7769_v56, %v7768_v50 }
 0xa02   : > { %v5724_v20 = vpack.c.bf16 %v5690_v54, %v5686_v51 }
 0xa03   : > { %v5725_v60 = vpack.c.bf16 %v5692_v46, %v5688_v57 }
 0xa05   : > { %6318 = vmatprep.mubr.bf16.mxu1 %v5725_v60  ;;  %v7771_v39 = vpop.f32.mrb[128].mxu0 }
 0xa06   : > { %6319 = vmatmul.mubr.bf16.gmra.mrb[48].mxu1 %v5724_v20  ;;  %v7772_v13 = vpop.f32.mrb[129].mxu0 }
 0xa07   : > { %v10857_v11 = vadd.f32 %v7772_v13, %v7771_v39  ;;  %v7774_v2 = vpop.f32.mrb[130].mxu0 }
 0xa08   : > { %v7775_v6 = vpop.f32.mrb[131].mxu0 }
 0xa09   : > { %v10859_v25 = vadd.f32 %v7775_v6, %v7774_v2 }
 0xa0d   : > { %v7777_v38 = vpop.f32.mrb[132].mxu0 }
 0xa0e   : > { %v7778_v7 = vpop.f32.mrb[133].mxu0 }
 0xa0f   : > { %v10861_v23 = vadd.f32 %v7778_v7, %v7777_v38  ;;  %v7780_v27 = vpop.f32.mrb[134].mxu0 }
 0xa10   : > { %v7781_v43 = vpop.f32.mrb[135].mxu0 }
 0xa11   : > { %11198 = vst [vmem:[#allocation24_spill] sm:$0xff] %v10861_v23  ;;  %v10863_v24 = vadd.f32 %v7781_v43, %v7780_v27 }
 0xa13   : > { %11199 = vst [vmem:[#allocation25_spill] sm:$0xff] %v10863_v24 }
 0xa15   : > { %v7783_v47 = vpop.f32.mrb[136].mxu0 }
 0xa16   : > { %v7784_v50 = vpop.f32.mrb[137].mxu0 }
 0xa17   : > { %v10865_v51 = vadd.f32 %v7784_v50, %v7783_v47  ;;  %v7786_v54 = vpop.f32.mrb[138].mxu0 }
 0xa18   : > { %v7787_v55 = vpop.f32.mrb[139].mxu0 }
 0xa19   : > { %v10867_v56 = vadd.f32 %v7787_v55, %v7786_v54 }
 0xa1b   : > { %11200 = vst [vmem:[#allocation26_spill] sm:$0xff] %v10867_v56 }
 0xa1d   : > { %v7789_v57 = vpop.f32.mrb[140].mxu0 }
 0xa1e   : > { %v7790_v46 = vpop.f32.mrb[141].mxu0 }
 0xa1f   : > { %v10869_v20 = vadd.f32 %v7790_v46, %v7789_v57  ;;  %v7792_v60 = vpop.f32.mrb[142].mxu0 }
 0xa20   : > { %v7793_v39 = vpop.f32.mrb[143].mxu0 }
 0xa21   : > { %11201 = vst [vmem:[#allocation27_spill] sm:$0xff] %v10869_v20  ;;  %v10871_v13 = vadd.f32 %v7793_v39, %v7792_v60 }
 0xa23   : > { %11202 = vst [vmem:[#allocation28_spill] sm:$0xff] %v10871_v13 }
 0xa25   : > { %v7795_v2 = vpop.f32.mrb[144].mxu0 }
 0xa26   : > { %v7796_v6 = vpop.f32.mrb[145].mxu0 }
 0xa27   : > { %v10873_v38 = vadd.f32 %v7796_v6, %v7795_v2  ;;  %v7798_v7 = vpop.f32.mrb[146].mxu0 }
 0xa28   : > { %v7799_v27 = vpop.f32.mrb[147].mxu0 }
 0xa29   : > { %11203 = vst [vmem:[#allocation29_spill] sm:$0xff] %v10873_v38  ;;  %v10875_v43 = vadd.f32 %v7799_v27, %v7798_v7 }
 0xa2b   : > { %11204 = vst [vmem:[#allocation30_spill] sm:$0xff] %v10875_v43 }
 0xa2d   : > { %v7801_v47 = vpop.f32.mrb[148].mxu0 }
 0xa2e   : > { %v7802_v50 = vpop.f32.mrb[149].mxu0 }
 0xa2f   : > { %v10877_v54 = vadd.f32 %v7802_v50, %v7801_v47  ;;  %v7804_v55 = vpop.f32.mrb[150].mxu0 }
 0xa30   : > { %v7805_v24 = vpop.f32.mrb[151].mxu0 }
 0xa31   : > { %11205 = vst [vmem:[#allocation31_spill] sm:$0xff] %v10877_v54  ;;  %v10879_v57 = vadd.f32 %v7805_v24, %v7804_v55 }
 0xa33   : > { %11206 = vst [vmem:[#allocation32_spill] sm:$0xff] %v10879_v57 }
 0xa35   : > { %v7807_v46 = vpop.f32.mrb[152].mxu0 }
 0xa36   : > { %v7808_v20 = vpop.f32.mrb[153].mxu0 }
 0xa37   : > { %v10881_v60 = vadd.f32 %v7808_v20, %v7807_v46  ;;  %v7810_v39 = vpop.f32.mrb[154].mxu0 }
 0xa38   : > { %v7811_v13 = vpop.f32.mrb[155].mxu0 }
 0xa39   : > { %11207 = vst [vmem:[#allocation33_spill] sm:$0xff] %v10881_v60  ;;  %v10883_v2 = vadd.f32 %v7811_v13, %v7810_v39 }
 0xa3b   : > { %11208 = vst [vmem:[#allocation34_spill] sm:$0xff] %v10883_v2 }
 0xa3d   : > { %v7813_v6 = vpop.f32.mrb[156].mxu0 }
 0xa3e   : > { %v7814_v38 = vpop.f32.mrb[157].mxu0 }
 0xa3f   : > { %v10885_v7 = vadd.f32 %v7814_v38, %v7813_v6  ;;  %v7816_v27 = vpop.f32.mrb[158].mxu0 }
 0xa40   : > { %v7817_v43 = vpop.f32.mrb[159].mxu0 }
 0xa41   : > { %11209 = vst [vmem:[#allocation35_spill] sm:$0xff] %v10885_v7  ;;  %v10887_v47 = vadd.f32 %v7817_v43, %v7816_v27 }
 0xa43   : > { %11210 = vst [vmem:[#allocation36_spill] sm:$0xff] %v10887_v47 }
 0xa45   : > { %v7819_v50 = vpop.f32.mrb[160].mxu0 }
 0xa46   : > { %v7820_v54 = vpop.f32.mrb[161].mxu0 }
 0xa47   : > { %v10889_v24 = vadd.f32 %v7820_v54, %v7819_v50  ;;  %v7822_v55 = vpop.f32.mrb[162].mxu0 }
 0xa48   : > { %v7823_v57 = vpop.f32.mrb[163].mxu0 }
 0xa49   : > { %11211 = vst [vmem:[#allocation37_spill] sm:$0xff] %v10889_v24  ;;  %v10891_v20 = vadd.f32 %v7823_v57, %v7822_v55 }
 0xa4b   : > { %11212 = vst [vmem:[#allocation38_spill] sm:$0xff] %v10891_v20 }
 0xa4d   : > { %v7825_v46 = vpop.f32.mrb[164].mxu0 }
 0xa4e   : > { %v7826_v60 = vpop.f32.mrb[165].mxu0 }
 0xa4f   : > { %v10893_v13 = vadd.f32 %v7826_v60, %v7825_v46  ;;  %v7828_v39 = vpop.f32.mrb[166].mxu0  ;;  %v10904_v60 = vld [vmem:[%s11217_s30] ss:$0 sm:$0xff] }
 0xa50   : > { %v7829_v2 = vpop.f32.mrb[167].mxu0 }
 0xa51   : > { %11213 = vst [vmem:[#allocation39_spill] sm:$0xff] %v10893_v13  ;;  %v10895_v38 = vadd.f32 %v7829_v2, %v7828_v39 }
 0xa53   : > { %11214 = vst [vmem:[#allocation40_spill] sm:$0xff] %v10895_v38 }
 0xa55   : > { %v7831_v6 = vpop.f32.mrb[168].mxu0 }
 0xa56   : > { %v7832_v7 = vpop.f32.mrb[169].mxu0 }
 0xa57   : > { %v10897_v43 = vadd.f32 %v7832_v7, %v7831_v6  ;;  %v7834_v27 = vpop.f32.mrb[170].mxu0 }
 0xa58   : > { %v7835_v47 = vpop.f32.mrb[171].mxu0 }
 0xa59   : > { %11215 = vst [vmem:[#allocation41_spill] sm:$0xff] %v10897_v43  ;;  %v10899_v54 = vadd.f32 %v7835_v47, %v7834_v27 }
 0xa5b   : > { %11216 = vst [vmem:[#allocation42_spill] sm:$0xff] %v10899_v54 }
 0xa61   : > { %v7629_v50 = vpop.f32.mrb[244].mxu1 }
 0xa62   : > { %v7630_v24 = vpop.f32.mrb[245].mxu1 }
 0xa63   : > { %v7631_v57 = vadd.f32 %v7630_v24, %v7629_v50  ;;  %v7632_v55 = vpop.f32.mrb[246].mxu1 }
 0xa64   : > { %v7633_v46 = vpop.f32.mrb[247].mxu1 }
 0xa65   : > { %v6201_v2 = vadd.f32 %v7631_v57, %v10699_v45  ;;  %v7634_v39 = vadd.f32 %v7633_v46, %v7632_v55 }
 0xa67   : > { %v6334_v7 = vadd.f32 %v10904_v60, %v6201_v2  ;;  %v6204_v6 = vadd.f32 %v7634_v39, %v10705_v53 }
 0xa69   : > { %v6335_v47 = vadd.f32 %v10904_v60, %v6204_v6  ;;  %v7635_v27 = vpop.f32.mrb[248].mxu1  ;;  %v6366_v54 = vmax.f32 %v6334_v7, 0.0 }
 0xa6a   : > { %v7636_v38 = vpop.f32.mrb[249].mxu1 }
 0xa6b   : > { %v6367_v24 = vmax.f32 %v6335_v47, 0.0  ;;  %v7637_v50 = vadd.f32 %v7636_v38, %v7635_v27  ;;  %v7638_v13 = vpop.f32.mrb[250].mxu1 }
 0xa6c   : > { %v7639_v43 = vpop.f32.mrb[251].mxu1 }
 0xa6d   : > { %v6209_v20 = vadd.f32 %v10697_v14, %v7637_v50  ;;  %v7640_v56 = vadd.f32 %v7639_v43, %v7638_v13  ;;  %v6398_v23 = vpack.c.bf16 %v6367_v24, %v6366_v54 }
 0xa6f   : > { %v6336_v45 = vadd.f32 %v10904_v60, %v6209_v20  ;;  %v6212_v57 = vadd.f32 %v10701_v48, %v7640_v56  ;;  %7913 = vmatprep.mubr.bf16.mxu1 %v6398_v23 }
 0xa71   : > { %v6337_v53 = vadd.f32 %v10904_v60, %v6212_v57  ;;  %v7641_v55 = vpop.f32.mrb[252].mxu1  ;;  %v6368_v2 = vmax.f32 %v6336_v45, 0.0 }
 0xa72   : > { %v7642_v46 = vpop.f32.mrb[253].mxu1 }
 0xa73   : > { %v6369_v39 = vmax.f32 %v6337_v53, 0.0  ;;  %v7643_v7 = vadd.f32 %v7642_v46, %v7641_v55  ;;  %v7644_v6 = vpop.f32.mrb[254].mxu1 }
 0xa74   : > { %v7645_v38 = vpop.f32.mrb[255].mxu1 }
 0xa75   : > { %v6399_v47 = vpack.c.bf16 %v6369_v39, %v6368_v2  ;;  %v6217_v27 = vadd.f32 %v7643_v7, %v10711_v3  ;;  %v7646_v14 = vadd.f32 %v7645_v38, %v7644_v6 }
 0xa77   : > { %v6338_v13 = vadd.f32 %v10904_v60, %v6217_v27  ;;  %v6220_v20 = vadd.f32 %v7646_v14, %v10717_v58  ;;  %7914 = vmatmul.mubr.bf16.vlgmr.msra.gmra.mrb[52].mxu1 %v6399_v47 }
 0xa79   : > { %v6339_v48 = vadd.f32 %v10904_v60, %v6220_v20  ;;  %v7647_v23 = vpop.f32.mrb[0].mxu1  ;;  %v6370_v43 = vmax.f32 %v6338_v13, 0.0 }
 0xa7a   : > { %v7648_v56 = vpop.f32.mrb[1].mxu1 }
 0xa7b   : > { %v6371_v54 = vmax.f32 %v6339_v48, 0.0  ;;  %v7649_v24 = vadd.f32 %v7648_v56, %v7647_v23  ;;  %v7650_v50 = vpop.f32.mrb[2].mxu1 }
 0xa7c   : > { %v7651_v45 = vpop.f32.mrb[3].mxu1 }
 0xa7d   : > { %v6225_v57 = vadd.f32 %v10709_v59, %v7649_v24  ;;  %v7652_v53 = vadd.f32 %v7651_v45, %v7650_v50  ;;  %v6400_v55 = vpack.c.bf16 %v6371_v54, %v6370_v43 }
 0xa7f   : > { %v6340_v3 = vadd.f32 %v10904_v60, %v6225_v57  ;;  %v6228_v46 = vadd.f32 %v10713_v9, %v7652_v53  ;;  %7917 = vmatprep.mubr.bf16.mxu1 %v6400_v55 }
 0xa81   : > { %v6341_v58 = vadd.f32 %v10904_v60, %v6228_v46  ;;  %v7653_v2 = vpop.f32.mrb[4].mxu1  ;;  %v6372_v7 = vmax.f32 %v6340_v3, 0.0 }
 0xa82   : > { %v7654_v39 = vpop.f32.mrb[5].mxu1 }
 0xa83   : > { %v6373_v6 = vmax.f32 %v6341_v58, 0.0  ;;  %v7655_v38 = vadd.f32 %v7654_v39, %v7653_v2  ;;  %v7656_v47 = vpop.f32.mrb[6].mxu1 }
 0xa84   : > { %v7657_v27 = vpop.f32.mrb[7].mxu1 }
 0xa85   : > { %v6401_v14 = vpack.c.bf16 %v6373_v6, %v6372_v7  ;;  %v6233_v13 = vadd.f32 %v7655_v38, %v10723_v26  ;;  %v7658_v59 = vadd.f32 %v7657_v27, %v7656_v47 }
 0xa87   : > { %v6342_v20 = vadd.f32 %v10904_v60, %v6233_v13  ;;  %v6236_v48 = vadd.f32 %v7658_v59, %v10732_v28  ;;  %7918 = vmatmul.mubr.bf16.gmra.mrb[56].mxu1 %v6401_v14 }
 0xa89   : > { %v6343_v9 = vadd.f32 %v10904_v60, %v6236_v48  ;;  %v7659_v23 = vpop.f32.mrb[8].mxu1  ;;  %v6374_v43 = vmax.f32 %v6342_v20, 0.0 }
 0xa8a   : > { %v7660_v56 = vpop.f32.mrb[9].mxu1 }
 0xa8b   : > { %v6375_v54 = vmax.f32 %v6343_v9, 0.0  ;;  %v7661_v24 = vadd.f32 %v7660_v56, %v7659_v23  ;;  %v7662_v50 = vpop.f32.mrb[10].mxu1 }
 0xa8c   : > { %v7663_v45 = vpop.f32.mrb[11].mxu1 }
 0xa8d   : > { %v6241_v57 = vadd.f32 %v10721_v40, %v7661_v24  ;;  %v7664_v53 = vadd.f32 %v7663_v45, %v7662_v50  ;;  %v6402_v55 = vpack.c.bf16 %v6375_v54, %v6374_v43 }
 0xa8f   : > { %v6344_v26 = vadd.f32 %v10904_v60, %v6241_v57  ;;  %v6244_v3 = vadd.f32 %v10725_v42, %v7664_v53  ;;  %7921 = vmatprep.mubr.bf16.mxu1 %v6402_v55 }
 0xa91   : > { %v6345_v28 = vadd.f32 %v10904_v60, %v6244_v3  ;;  %v7665_v46 = vpop.f32.mrb[12].mxu1  ;;  %v6376_v2 = vmax.f32 %v6344_v26, 0.0 }
 0xa92   : > { %v7666_v58 = vpop.f32.mrb[13].mxu1 }
 0xa93   : > { %v6377_v39 = vmax.f32 %v6345_v28, 0.0  ;;  %v7667_v7 = vadd.f32 %v7666_v58, %v7665_v46  ;;  %v7668_v6 = vpop.f32.mrb[14].mxu1 }
 0xa94   : > { %v7669_v38 = vpop.f32.mrb[15].mxu1 }
 0xa95   : > { %v6403_v47 = vpack.c.bf16 %v6377_v39, %v6376_v2  ;;  %v6249_v27 = vadd.f32 %v7667_v7, %v10738_v37  ;;  %v7670_v40 = vadd.f32 %v7669_v38, %v7668_v6 }
 0xa97   : > { %v6346_v14 = vadd.f32 %v10904_v60, %v6249_v27  ;;  %v6252_v13 = vadd.f32 %v7670_v40, %v10744_v61  ;;  %7922 = vmatmul.mubr.bf16.gmra.mrb[60].mxu1 %v6403_v47 }
 0xa99   : > { %v6347_v42 = vadd.f32 %v10904_v60, %v6252_v13  ;;  %v7671_v59 = vpop.f32.mrb[16].mxu1  ;;  %v6378_v48 = vmax.f32 %v6346_v14, 0.0 }
 0xa9a   : > { %v7672_v20 = vpop.f32.mrb[17].mxu1 }
 0xa9b   : > { %v6379_v9 = vmax.f32 %v6347_v42, 0.0  ;;  %v7673_v23 = vadd.f32 %v7672_v20, %v7671_v59  ;;  %v7674_v56 = vpop.f32.mrb[18].mxu1 }
 0xa9c   : > { %v7675_v43 = vpop.f32.mrb[19].mxu1 }
 0xa9d   : > { %v6257_v54 = vadd.f32 %v10736_v21, %v7673_v23  ;;  %v7676_v24 = vadd.f32 %v7675_v43, %v7674_v56  ;;  %v6404_v50 = vpack.c.bf16 %v6379_v9, %v6378_v48 }
 0xa9f   : > { %v6348_v37 = vadd.f32 %v10904_v60, %v6257_v54  ;;  %v6260_v45 = vadd.f32 %v10740_v1, %v7676_v24  ;;  %7925 = vmatprep.mubr.bf16.mxu1 %v6404_v50 }
 0xaa1   : > { %v6349_v61 = vadd.f32 %v10904_v60, %v6260_v45  ;;  %v7677_v57 = vpop.f32.mrb[20].mxu1  ;;  %v6380_v55 = vmax.f32 %v6348_v37, 0.0 }
 0xaa2   : > { %v7678_v53 = vpop.f32.mrb[21].mxu1 }
 0xaa3   : > { %v6381_v26 = vmax.f32 %v6349_v61, 0.0  ;;  %v7679_v3 = vadd.f32 %v7678_v53, %v7677_v57  ;;  %v7680_v28 = vpop.f32.mrb[22].mxu1 }
 0xaa4   : > { %v7681_v46 = vpop.f32.mrb[23].mxu1 }
 0xaa5   : > { %v6405_v58 = vpack.c.bf16 %v6381_v26, %v6380_v55  ;;  %v6265_v2 = vadd.f32 %v7679_v3, %v10750_v36  ;;  %v7682_v21 = vadd.f32 %v7681_v46, %v7680_v28 }
 0xaa7   : > { %v6350_v39 = vadd.f32 %v10904_v60, %v6265_v2  ;;  %v6268_v7 = vadd.f32 %v7682_v21, %v10759_v17  ;;  %7926 = vmatmul.mubr.bf16.gmra.mrb[64].mxu1 %v6405_v58 }
 0xaa9   : > { %v6351_v1 = vadd.f32 %v10904_v60, %v6268_v7  ;;  %v7683_v6 = vpop.f32.mrb[24].mxu1  ;;  %v6382_v47 = vmax.f32 %v6350_v39, 0.0 }
 0xaaa   : > { %v7684_v38 = vpop.f32.mrb[25].mxu1 }
 0xaab   : > { %v6383_v27 = vmax.f32 %v6351_v1, 0.0  ;;  %v7685_v40 = vadd.f32 %v7684_v38, %v7683_v6  ;;  %v7686_v14 = vpop.f32.mrb[26].mxu1 }
 0xaac   : > { %v7687_v13 = vpop.f32.mrb[27].mxu1 }
 0xaad   : > { %v6273_v42 = vadd.f32 %v10748_v33, %v7685_v40  ;;  %v7688_v59 = vadd.f32 %v7687_v13, %v7686_v14  ;;  %v6406_v20 = vpack.c.bf16 %v6383_v27, %v6382_v47 }
 0xaaf   : > { %v6352_v36 = vadd.f32 %v10904_v60, %v6273_v42  ;;  %v6276_v48 = vadd.f32 %v10752_v12, %v7688_v59  ;;  %7929 = vmatprep.mubr.bf16.mxu1 %v6406_v20 }
 0xab1   : > { %v6353_v17 = vadd.f32 %v10904_v60, %v6276_v48  ;;  %v7689_v9 = vpop.f32.mrb[28].mxu1  ;;  %v6384_v56 = vmax.f32 %v6352_v36, 0.0 }
 0xab2   : > { %v7690_v23 = vpop.f32.mrb[29].mxu1 }
 0xab3   : > { %v6385_v43 = vmax.f32 %v6353_v17, 0.0  ;;  %v7691_v54 = vadd.f32 %v7690_v23, %v7689_v9  ;;  %v7692_v24 = vpop.f32.mrb[30].mxu1 }
 0xab4   : > { %v7693_v50 = vpop.f32.mrb[31].mxu1 }
 0xab5   : > { %v6407_v37 = vpack.c.bf16 %v6385_v43, %v6384_v56  ;;  %v6281_v45 = vadd.f32 %v7691_v54, %v10765_v41  ;;  %v7694_v33 = vadd.f32 %v7693_v50, %v7692_v24 }
 0xab7   : > { %v6354_v61 = vadd.f32 %v10904_v60, %v6281_v45  ;;  %v6284_v57 = vadd.f32 %v7694_v33, %v10771_v22  ;;  %7930 = vmatmul.mubr.bf16.gmra.mrb[68].mxu1 %v6407_v37 }
 0xab9   : > { %v6355_v12 = vadd.f32 %v10904_v60, %v6284_v57  ;;  %v7695_v53 = vpop.f32.mrb[32].mxu1  ;;  %v6386_v26 = vmax.f32 %v6354_v61, 0.0 }
 0xaba   : > { %v7696_v55 = vpop.f32.mrb[33].mxu1 }
 0xabb   : > { %v6387_v3 = vmax.f32 %v6355_v12, 0.0  ;;  %v7697_v28 = vadd.f32 %v7696_v55, %v7695_v53  ;;  %v7698_v46 = vpop.f32.mrb[34].mxu1 }
 0xabc   : > { %v7699_v58 = vpop.f32.mrb[35].mxu1 }
 0xabd   : > { %v6289_v2 = vadd.f32 %v10763_v4, %v7697_v28  ;;  %v7700_v21 = vadd.f32 %v7699_v58, %v7698_v46  ;;  %v6408_v39 = vpack.c.bf16 %v6387_v3, %v6386_v26 }
 0xabf   : > { %v6356_v41 = vadd.f32 %v10904_v60, %v6289_v2  ;;  %v6292_v7 = vadd.f32 %v10767_v30, %v7700_v21  ;;  %7933 = vmatprep.mubr.bf16.mxu1 %v6408_v39 }
 0xac1   : > { %v6357_v22 = vadd.f32 %v10904_v60, %v6292_v7  ;;  %v7701_v1 = vpop.f32.mrb[36].mxu1  ;;  %v6388_v38 = vmax.f32 %v6356_v41, 0.0 }
 0xac2   : > { %v7702_v6 = vpop.f32.mrb[37].mxu1 }
 0xac3   : > { %v6389_v47 = vmax.f32 %v6357_v22, 0.0  ;;  %v7703_v27 = vadd.f32 %v7702_v6, %v7701_v1  ;;  %v7704_v40 = vpop.f32.mrb[38].mxu1 }
 0xac4   : > { %v7705_v14 = vpop.f32.mrb[39].mxu1 }
 0xac5   : > { %v6409_v13 = vpack.c.bf16 %v6389_v47, %v6388_v38  ;;  %v6297_v42 = vadd.f32 %v7703_v27, %v10777_v31  ;;  %v7706_v4 = vadd.f32 %v7705_v14, %v7704_v40 }
 0xac7   : > { %v6358_v59 = vadd.f32 %v10904_v60, %v6297_v42  ;;  %v6300_v20 = vadd.f32 %v7706_v4, %v10786_v63  ;;  %7934 = vmatmul.mubr.bf16.gmra.mrb[72].mxu1 %v6409_v13  ;;  %v10974_v42 = vld [vmem:[%s11218_s13] ss:$0 sm:$0xff] }
 0xac9   : > { %v6359_v30 = vadd.f32 %v10904_v60, %v6300_v20  ;;  %v7707_v36 = vpop.f32.mrb[40].mxu1  ;;  %v6390_v17 = vmax.f32 %v6358_v59, 0.0 }
 0xaca   : > { %v7708_v48 = vpop.f32.mrb[41].mxu1 }
 0xacb   : > { %v6391_v9 = vmax.f32 %v6359_v30, 0.0  ;;  %v7709_v23 = vadd.f32 %v7708_v48, %v7707_v36  ;;  %v7710_v56 = vpop.f32.mrb[42].mxu1 }
 0xacc   : > { %v7711_v43 = vpop.f32.mrb[43].mxu1 }
 0xacd   : > { %v6305_v54 = vadd.f32 %v10775_v0, %v7709_v23  ;;  %v7712_v24 = vadd.f32 %v7711_v43, %v7710_v56  ;;  %v6410_v50 = vpack.c.bf16 %v6391_v9, %v6390_v17 }
 0xacf   : > { %v6360_v31 = vadd.f32 %v10904_v60, %v6305_v54  ;;  %v6308_v37 = vadd.f32 %v10779_v52, %v7712_v24  ;;  %7937 = vmatprep.mubr.bf16.mxu1 %v6410_v50 }
 0xad1   : > { %v6361_v63 = vadd.f32 %v10904_v60, %v6308_v37  ;;  %v7713_v45 = vpop.f32.mrb[44].mxu1  ;;  %v6392_v61 = vmax.f32 %v6360_v31, 0.0 }
 0xad2   : > { %v7714_v33 = vpop.f32.mrb[45].mxu1 }
 0xad3   : > { %v6393_v57 = vmax.f32 %v6361_v63, 0.0  ;;  %v7715_v12 = vadd.f32 %v7714_v33, %v7713_v45  ;;  %v7716_v53 = vpop.f32.mrb[46].mxu1 }
 0xad4   : > { %v7717_v55 = vpop.f32.mrb[47].mxu1 }
 0xad5   : > { %v6411_v26 = vpack.c.bf16 %v6393_v57, %v6392_v61  ;;  %v6313_v3 = vadd.f32 %v7715_v12, %v10792_v34  ;;  %v7718_v0 = vadd.f32 %v7717_v55, %v7716_v53  ;;  %v11220_v55 = vld [vmem:[#allocation24_spill] sm:$0xff] }
 0xad7   : > { %v6362_v28 = vadd.f32 %v10904_v60, %v6313_v3  ;;  %v6316_v46 = vadd.f32 %v7718_v0, %v10798_v29  ;;  %7938 = vmatmul.mubr.bf16.gmra.mrb[76].mxu1 %v6411_v26 }
 0xad9   : > { %v6363_v52 = vadd.f32 %v10904_v60, %v6316_v46  ;;  %v7719_v58 = vpop.f32.mrb[48].mxu1  ;;  %v6394_v21 = vmax.f32 %v6362_v28, 0.0  ;;  %v11221_v28 = vld [vmem:[#allocation26_spill] sm:$0xff] }
 0xada   : > { %v7720_v2 = vpop.f32.mrb[49].mxu1 }
 0xadb   : > { %v6395_v39 = vmax.f32 %v6363_v52, 0.0  ;;  %v7721_v41 = vadd.f32 %v7720_v2, %v7719_v58  ;;  %v7722_v7 = vpop.f32.mrb[50].mxu1  ;;  %v11222_v2 = vld [vmem:[#allocation25_spill] sm:$0xff] }
 0xadc   : > { %v7723_v22 = vpop.f32.mrb[51].mxu1 }
 0xadd   : > { %v6321_v1 = vadd.f32 %v10790_v62, %v7721_v41  ;;  %v7724_v6 = vadd.f32 %v7723_v22, %v7722_v7  ;;  %v6412_v34 = vpack.c.bf16 %v6395_v39, %v6394_v21  ;;  %v11223_v7 = vld [vmem:[#allocation29_spill] sm:$0xff] }
 0xadf   : > { %v6364_v38 = vadd.f32 %v10904_v60, %v6321_v1  ;;  %v6324_v47 = vadd.f32 %v10794_v44, %v7724_v6  ;;  %7941 = vmatprep.mubr.bf16.mxu1 %v6412_v34  ;;  %v11224_v6 = vld [vmem:[#allocation27_spill] sm:$0xff] }
 0xae1   : > { %v6365_v29 = vadd.f32 %v10904_v60, %v6324_v47  ;;  %v6396_v27 = vmax.f32 %v6364_v38, 0.0 }
 0xae3   : > { %v6397_v40 = vmax.f32 %v6365_v29, 0.0  ;;  %v11225_v29 = vld [vmem:[#allocation30_spill] sm:$0xff] }
 0xae5   : > { %v6413_v14 = vpack.c.bf16 %v6397_v40, %v6396_v27 }
 0xae7   : > { %7942 = vmatmul.mubr.bf16.gmra.mrb[80].mxu1 %v6413_v14 }
 0xb4a   : > { %v7915_v13 = vpop.f32.mrb[52].mxu1 }
 0xb4b   : > { %v6810_v62 = vadd.f32 %v7915_v13, %v10816_v35  ;;  %v6801_v4 = vpop.f32.mrb[53].mxu1  ;;  %v11226_v13 = vld [vmem:[#allocation28_spill] sm:$0xff] }
 0xb4c   : > { %v6802_v44 = vadd.f32 %v10805_v19, %v6801_v4  ;;  %v7916_v60 = vpop.f32.mrb[54].mxu1 }
 0xb4d   : > { %v6937_v59 = vadd.f32 %v10974_v42, %v6810_v62  ;;  %v6813_v20 = vadd.f32 %v7916_v60, %v10822_v10  ;;  %v6804_v30 = vpop.f32.mrb[55].mxu1 }
 0xb4e   : > { %v6935_v35 = vadd.f32 %v10974_v42, %v6802_v44  ;;  %v6805_v36 = vadd.f32 %v10811_v8, %v6804_v30 }
 0xb4f   : > { %6970 = vst.msk [vmem:[%s10980_s28 + $0x10] sm:$0xff] %vm6967_vm6, %v6937_v59  ;;  %v6938_v48 = vadd.f32 %v10974_v42, %v6813_v20  ;;  %v11227_v59 = vld [vmem:[#allocation33_spill] sm:$0xff] }
 0xb50   : > { %6968 = vst.msk [vmem:[%s10980_s28] sm:$0xff] %vm6967_vm6, %v6935_v35  ;;  %v6936_v19 = vadd.f32 %v10974_v42, %v6805_v36  ;;  %v11228_v35 = vld [vmem:[#allocation31_spill] sm:$0xff] }
 0xb51   : > { %6971 = vst.msk [vmem:[%s10980_s28 + $0x18] sm:$0xff] %vm6967_vm6, %v6938_v48 }
 0xb52   : > { %6969 = vst.msk [vmem:[%s10980_s28 + $0x8] sm:$0xff] %vm6967_vm6, %v6936_v19 }
 0xb5a   : > { %v7919_v10 = vpop.f32.mrb[56].mxu1 }
 0xb5b   : > { %v6826_v17 = vadd.f32 %v7919_v10, %v10841_v5  ;;  %v6817_v8 = vpop.f32.mrb[57].mxu1  ;;  %v11229_v10 = vld [vmem:[#allocation34_spill] sm:$0xff] }
 0xb5c   : > { %v6818_v9 = vadd.f32 %v10830_v49, %v6817_v8  ;;  %v7920_v23 = vpop.f32.mrb[58].mxu1 }
 0xb5d   : > { %v6941_v56 = vadd.f32 %v10974_v42, %v6826_v17  ;;  %v6829_v43 = vadd.f32 %v7920_v23, %v10847_v16  ;;  %v6820_v54 = vpop.f32.mrb[59].mxu1  ;;  %v11230_v23 = vld [vmem:[#allocation32_spill] sm:$0xff] }
 0xb5e   : > { %v6939_v24 = vadd.f32 %v10974_v42, %v6818_v9  ;;  %v6821_v50 = vadd.f32 %v10836_v18, %v6820_v54 }
 0xb5f   : > { %6974 = vst.msk [vmem:[%s10980_s28 + $0x30] sm:$0xff] %vm6967_vm6, %v6941_v56  ;;  %v6942_v31 = vadd.f32 %v10974_v42, %v6829_v43 }
 0xb60   : > { %6972 = vst.msk [vmem:[%s10980_s28 + $0x20] sm:$0xff] %vm6967_vm6, %v6939_v24  ;;  %v6940_v49 = vadd.f32 %v10974_v42, %v6821_v50  ;;  %v11231_v50 = vld [vmem:[#allocation37_spill] sm:$0xff] }
 0xb61   : > { %6975 = vst.msk [vmem:[%s10980_s28 + $0x38] sm:$0xff] %vm6967_vm6, %v6942_v31 }
 0xb62   : > { %6973 = vst.msk [vmem:[%s10980_s28 + $0x28] sm:$0xff] %vm6967_vm6, %v6940_v49 }
 0xb6a   : > { %v7923_v5 = vpop.f32.mrb[60].mxu1 }
 0xb6b   : > { %v6842_v16 = vadd.f32 %v7923_v5, %v10857_v11  ;;  %v6833_v18 = vpop.f32.mrb[61].mxu1  ;;  %v11232_v5 = vld [vmem:[#allocation35_spill] sm:$0xff] }
 0xb6c   : > { %v6834_v37 = vadd.f32 %v10849_v32, %v6833_v18  ;;  %v7924_v63 = vpop.f32.mrb[62].mxu1 }
 0xb6d   : > { %v6945_v45 = vadd.f32 %v10974_v42, %v6842_v16  ;;  %v6845_v33 = vadd.f32 %v7924_v63, %v10859_v25  ;;  %v6836_v61 = vpop.f32.mrb[63].mxu1  ;;  %v11233_v63 = vld [vmem:[#allocation38_spill] sm:$0xff] }
 0xb6e   : > { %v6943_v57 = vadd.f32 %v10974_v42, %v6834_v37  ;;  %v6837_v12 = vadd.f32 %v10855_v15, %v6836_v61 }
 0xb6f   : > { %6978 = vst.msk [vmem:[%s10980_s28 + $0x50] sm:$0xff] %vm6967_vm6, %v6945_v45  ;;  %v6946_v53 = vadd.f32 %v10974_v42, %v6845_v33 }
 0xb70   : > { %6976 = vst.msk [vmem:[%s10980_s28 + $0x40] sm:$0xff] %vm6967_vm6, %v6943_v57  ;;  %v6944_v32 = vadd.f32 %v10974_v42, %v6837_v12  ;;  %v11234_v57 = vld [vmem:[#allocation36_spill] sm:$0xff] }
 0xb71   : > { %6979 = vst.msk [vmem:[%s10980_s28 + $0x58] sm:$0xff] %vm6967_vm6, %v6946_v53 }
 0xb72   : > { %6977 = vst.msk [vmem:[%s10980_s28 + $0x48] sm:$0xff] %vm6967_vm6, %v6944_v32 }
 0xb7a   : > { %v7927_v11 = vpop.f32.mrb[64].mxu1 }
 0xb7b   : > { %v6858_v25 = vadd.f32 %v7927_v11, %v10865_v51  ;;  %v6849_v15 = vpop.f32.mrb[65].mxu1 }
 0xb7c   : > { %v6850_v26 = vadd.f32 %v11220_v55, %v6849_v15  ;;  %v7928_v3 = vpop.f32.mrb[66].mxu1 }
 0xb7d   : > { %v6949_v0 = vadd.f32 %v10974_v42, %v6858_v25  ;;  %v6861_v46 = vadd.f32 %v7928_v3, %v11221_v28  ;;  %v6852_v52 = vpop.f32.mrb[67].mxu1  ;;  %v11235_v25 = vld [vmem:[#allocation41_spill] sm:$0xff] }
 0xb7e   : > { %v6947_v58 = vadd.f32 %v10974_v42, %v6850_v26  ;;  %v6853_v21 = vadd.f32 %v11222_v2, %v6852_v52  ;;  %v11236_v26 = vld [vmem:[#allocation39_spill] sm:$0xff] }
 0xb7f   : > { %6982 = vst.msk [vmem:[%s10980_s28 + $0x70] sm:$0xff] %vm6967_vm6, %v6949_v0  ;;  %v6950_v39 = vadd.f32 %v10974_v42, %v6861_v46  ;;  %v11237_v46 = vld [vmem:[#allocation42_spill] sm:$0xff] }
 0xb80   : > { %6980 = vst.msk [vmem:[%s10980_s28 + $0x60] sm:$0xff] %vm6967_vm6, %v6947_v58  ;;  %v6948_v51 = vadd.f32 %v10974_v42, %v6853_v21  ;;  %v11238_v21 = vld [vmem:[#allocation40_spill] sm:$0xff] }
 0xb81   : > { %6983 = vst.msk [vmem:[%s10980_s28 + $0x78] sm:$0xff] %vm6967_vm6, %v6950_v39 }
 0xb82   : > { %6981 = vst.msk [vmem:[%s10980_s28 + $0x68] sm:$0xff] %vm6967_vm6, %v6948_v51 }
 0xb8a   : > { %v7931_v41 = vpop.f32.mrb[68].mxu1 }
 0xb8b   : > { %v6874_v22 = vadd.f32 %v7931_v41, %v11223_v7  ;;  %v6865_v1 = vpop.f32.mrb[69].mxu1 }
 0xb8c   : > { %v6866_v34 = vadd.f32 %v11224_v6, %v6865_v1  ;;  %v7932_v38 = vpop.f32.mrb[70].mxu1 }
 0xb8d   : > { %v6953_v47 = vadd.f32 %v10974_v42, %v6874_v22  ;;  %v6877_v27 = vadd.f32 %v7932_v38, %v11225_v29  ;;  %v6868_v40 = vpop.f32.mrb[71].mxu1 }
 0xb8e   : > { %v6951_v14 = vadd.f32 %v10974_v42, %v6866_v34  ;;  %v6869_v62 = vadd.f32 %v11226_v13, %v6868_v40 }
 0xb8f   : > { %6986 = vst.msk [vmem:[%s10980_s28 + $0x90] sm:$0xff] %vm6967_vm6, %v6953_v47  ;;  %v6954_v4 = vadd.f32 %v10974_v42, %v6877_v27 }
 0xb90   : > { %6984 = vst.msk [vmem:[%s10980_s28 + $0x80] sm:$0xff] %vm6967_vm6, %v6951_v14  ;;  %v6952_v44 = vadd.f32 %v10974_v42, %v6869_v62 }
 0xb91   : > { %6987 = vst.msk [vmem:[%s10980_s28 + $0x98] sm:$0xff] %vm6967_vm6, %v6954_v4 }
 0xb92   : > { %6985 = vst.msk [vmem:[%s10980_s28 + $0x88] sm:$0xff] %vm6967_vm6, %v6952_v44 }
 0xb9a   : > { %v7935_v60 = vpop.f32.mrb[72].mxu1 }
 0xb9b   : > { %v6890_v20 = vadd.f32 %v7935_v60, %v11227_v59  ;;  %v6881_v30 = vpop.f32.mrb[73].mxu1 }
 0xb9c   : > { %v6882_v36 = vadd.f32 %v11228_v35, %v6881_v30  ;;  %v7936_v48 = vpop.f32.mrb[74].mxu1 }
 0xb9d   : > { %v6957_v19 = vadd.f32 %v10974_v42, %v6890_v20  ;;  %v6893_v17 = vadd.f32 %v7936_v48, %v11229_v10  ;;  %v6884_v8 = vpop.f32.mrb[75].mxu1 }
 0xb9e   : > { %v6955_v9 = vadd.f32 %v10974_v42, %v6882_v36  ;;  %v6885_v56 = vadd.f32 %v11230_v23, %v6884_v8 }
 0xb9f   : > { %6990 = vst.msk [vmem:[%s10980_s28 + $0xb0] sm:$0xff] %vm6967_vm6, %v6957_v19  ;;  %v6958_v43 = vadd.f32 %v10974_v42, %v6893_v17 }
 0xba0   : > { %6988 = vst.msk [vmem:[%s10980_s28 + $0xa0] sm:$0xff] %vm6967_vm6, %v6955_v9  ;;  %v6956_v54 = vadd.f32 %v10974_v42, %v6885_v56 }
 0xba1   : > { %6991 = vst.msk [vmem:[%s10980_s28 + $0xb8] sm:$0xff] %vm6967_vm6, %v6958_v43 }
 0xba2   : > { %6989 = vst.msk [vmem:[%s10980_s28 + $0xa8] sm:$0xff] %vm6967_vm6, %v6956_v54 }
 0xbaa   : > { %v7939_v24 = vpop.f32.mrb[76].mxu1 }
 0xbab   : > { %v6906_v31 = vadd.f32 %v7939_v24, %v11231_v50  ;;  %v6897_v49 = vpop.f32.mrb[77].mxu1 }
 0xbac   : > { %v6898_v16 = vadd.f32 %v11232_v5, %v6897_v49  ;;  %v7940_v18 = vpop.f32.mrb[78].mxu1 }
 0xbad   : > { %v6961_v37 = vadd.f32 %v10974_v42, %v6906_v31  ;;  %v6909_v45 = vadd.f32 %v7940_v18, %v11233_v63  ;;  %v6900_v33 = vpop.f32.mrb[79].mxu1 }
 0xbae   : > { %v6959_v61 = vadd.f32 %v10974_v42, %v6898_v16  ;;  %v6901_v12 = vadd.f32 %v11234_v57, %v6900_v33 }
 0xbaf   : > { %6994 = vst.msk [vmem:[%s10980_s28 + $0xd0] sm:$0xff] %vm6967_vm6, %v6961_v37  ;;  %v6962_v53 = vadd.f32 %v10974_v42, %v6909_v45 }
 0xbb0   : > { %6992 = vst.msk [vmem:[%s10980_s28 + $0xc0] sm:$0xff] %vm6967_vm6, %v6959_v61  ;;  %v6960_v32 = vadd.f32 %v10974_v42, %v6901_v12 }
 0xbb1   : > { %6995 = vst.msk [vmem:[%s10980_s28 + $0xd8] sm:$0xff] %vm6967_vm6, %v6962_v53 }
 0xbb2   : > { %6993 = vst.msk [vmem:[%s10980_s28 + $0xc8] sm:$0xff] %vm6967_vm6, %v6960_v32 }
 0xbba   : > { %v7943_v11 = vpop.f32.mrb[80].mxu1 }
 0xbbb   : > { %v6922_v15 = vadd.f32 %v7943_v11, %v11235_v25  ;;  %v6913_v55 = vpop.f32.mrb[81].mxu1 }
 0xbbc   : > { %v6914_v3 = vadd.f32 %v11236_v26, %v6913_v55  ;;  %v7944_v0 = vpop.f32.mrb[82].mxu1 }
 0xbbd   : > { %v6965_v28 = vadd.f32 %v10974_v42, %v6922_v15  ;;  %v6925_v52 = vadd.f32 %v7944_v0, %v11237_v46  ;;  %v6916_v58 = vpop.f32.mrb[83].mxu1 }
 0xbbe   : > { %v6963_v2 = vadd.f32 %v10974_v42, %v6914_v3  ;;  %v6917_v39 = vadd.f32 %v11238_v21, %v6916_v58 }
 0xbbf   : > { %6998 = vst.msk [vmem:[%s10980_s28 + $0xf0] sm:$0xff] %vm6967_vm6, %v6965_v28  ;;  %v6966_v51 = vadd.f32 %v10974_v42, %v6925_v52 }
 0xbc0   : > { %6996 = vst.msk [vmem:[%s10980_s28 + $0xe0] sm:$0xff] %vm6967_vm6, %v6963_v2  ;;  %v6964_v41 = vadd.f32 %v10974_v42, %v6917_v39 }
 0xbc1   : > { %6999 = vst.msk [vmem:[%s10980_s28 + $0xf8] sm:$0xff] %vm6967_vm6, %v6966_v51 }
 0xbc2   : > { %6997 = vst.msk [vmem:[%s10980_s28 + $0xe8] sm:$0xff] %vm6967_vm6, %v6964_v41 }
 0xbc3 PF: > { %s43_s7 = sadd.s32 1, %s8964_s7  }
 0xbc4   : > { %p40_p7 = scmp.ge.s32.totalorder %s43_s7, 4  }
 0xbc6   :  { %42 = sbr.rel (!%p40_p7) target bundleno = 25 (0x19), region = 202 }
 0xbcd   :  { %7022 = vsyncpa [#allocation3], 1 }
 0xbce   :  { %7024 = vsyncpa [#allocation3 + $0x1], 1 }
 0xbcf   :  { %7025 = vsyncpa [#allocation5], 1 }
 0xbd0   :  { %7026 = vsyncpa [#allocation8], 1 }
 0xbd1   :  { %7027 = vsyncpa [#allocation11], 1 }
 0xbd2   :  { %7028 = vsyncpa [#allocation14], 1 }
 0xbd3   :  { %7029 = vsyncpa [#allocation17], 1 }

</bundles_post_ra>
